<compile_context>
chip_gen: v6e
topology: v6e:2x2x1
jax: 0.10.0
libtpu: 0.0.40
codegen_flags: <defaults>
</compile_context>

<pallas_src>
import functools

import numpy as np
import jax
import jax.numpy as jnp
from jax.experimental import pallas as pl
from jax.experimental.pallas import tpu as pltpu

_BN_EPS = 1e-5


def _round8(v):
    return ((v + 7) // 8) * 8


# ----------------------------------------------------------------------------
# Parameters: PyTorch layout ([Cout, Cin, KH, KW]) + one-time packing to the
# kernel's per-tap layout ([KH*KW, Cin, Cout]).
# ----------------------------------------------------------------------------
def init_params(key, channels, latent_channels):
    ks = jax.random.split(key, 8)

    def w(k, cout, cin, kh, kw):
        return jax.random.normal(k, (cout, cin, kh, kw), jnp.float32) * 0.05

    p = {
        "w1": w(ks[0], channels, 3, 4, 4),
        "g1": jnp.ones((channels,), jnp.float32),
        "b1": jnp.zeros((channels,), jnp.float32),
        "w2": w(ks[1], channels, channels, 4, 4),
        "g2": jnp.ones((channels,), jnp.float32),
        "b2": jnp.zeros((channels,), jnp.float32),
        "res": [],
        "wf": w(ks[2], 2 * latent_channels, channels, 1, 1),
        "bf": jax.random.normal(ks[3], (2 * latent_channels,), jnp.float32) * 0.05,
    }
    for r in range(2):
        ka, kb = jax.random.split(ks[4 + r])
        p["res"].append({
            "w3": w(ka, channels, channels, 3, 3),
            "g3": jnp.ones((channels,), jnp.float32),
            "b3": jnp.zeros((channels,), jnp.float32),
            "w1x1": w(kb, channels, channels, 1, 1),
            "g1x1": jnp.ones((channels,), jnp.float32),
            "b1x1": jnp.zeros((channels,), jnp.float32),
        })
    return p


def pack_params(p):
    """PyTorch conv weights -> per-tap GEMM weights (bf16) + packed BN table."""
    c = p["w1"].shape[0]
    l2 = p["wf"].shape[0]

    def conv_taps(w):                       # [Cout,Cin,KH,KW] -> [KH*KW,Cin,Cout]
        kh, kw = w.shape[2], w.shape[3]
        return jnp.transpose(w, (2, 3, 1, 0)).reshape(kh * kw, w.shape[1], w.shape[0])

    # conv1: rewrite the 4x4/stride-2 conv as a 2x2/stride-1 conv over the
    # space-to-depth input (channel order (row_parity, col_parity, cin)).
    cin = p["w1"].shape[1]
    w1 = jnp.transpose(p["w1"], (2, 3, 1, 0))                  # [4,4,Cin,Cout]
    w1 = w1.reshape(2, 2, 2, 2, cin, c)                        # (ki',pa,kj',pb,ci,co)
    w1 = jnp.transpose(w1, (0, 2, 1, 3, 4, 5)).reshape(4, 4 * cin, c)

    w2 = conv_taps(p["w2"])                                    # [16, C, C]
    w3 = jnp.stack([conv_taps(p["res"][r]["w3"]) for r in range(2)])        # [2,9,C,C]
    w1x1 = jnp.stack([p["res"][r]["w1x1"][:, :, 0, 0].T for r in range(2)]) # [2,C,C]
    wf = p["wf"][:, :, 0, 0].T                                 # [C, 2L]

    bn = jnp.stack([p["g1"], p["b1"], p["g2"], p["b2"],
                    p["res"][0]["g3"], p["res"][0]["b3"],
                    p["res"][0]["g1x1"], p["res"][0]["b1x1"],
                    p["res"][1]["g3"], p["res"][1]["b3"],
                    p["res"][1]["g1x1"], p["res"][1]["b1x1"]])  # [12, C]

    return {"w1": w1.astype(jnp.bfloat16), "w2": w2.astype(jnp.bfloat16),
            "w3": w3.astype(jnp.bfloat16), "w1x1": w1x1.astype(jnp.bfloat16),
            "wf": wf.astype(jnp.bfloat16),
            "bf": p["bf"].reshape(1, l2).astype(jnp.float32),
            "bn": bn.astype(jnp.float32)}


# ----------------------------------------------------------------------------
# Forward pass: one pallas_call, everything VMEM-resident.
# ----------------------------------------------------------------------------
def fc_encoder_forward(x_nchw, kp, latent_channels):
    n, cin, hin, win = x_nchw.shape
    assert win == hin and hin % 4 == 0
    c = kp["w1x1"].shape[-1]                 # hidden channels
    l2 = 2 * latent_channels
    assert kp["wf"].shape[-1] == l2

    h1, h2 = hin // 2, hin // 4              # spatial after conv1 / conv2
    g1, gr = h1 + 2, h2 + 2                  # zero-padded grid sides
    m1, mr = g1 * g1, gr * gr
    nm1, nmr = n * m1, n * mr
    pad = gr + 1                             # guard rows around the residual grid
    x_rows = _round8(nm1 + g1 + 2)           # conv1 taps shift by up to g1+1
    y1_rows = _round8(nm1 + 3 * g1 + 4)      # conv2 taps shift by up to 3*g1+3
    cnt1 = float(n * h1 * h1)                # BN population, conv1
    cnt2 = float(n * h2 * h2)                # BN population, conv2 / residual layers

    # tap row-offset tables on the flattened padded grids
    d_c1 = [ki * g1 + kj for ki in range(2) for kj in range(2)]
    d_c2 = [ki * g1 + kj for ki in range(4) for kj in range(4)]
    d_rs = [(ki - 1) * gr + (kj - 1) for ki in range(3) for kj in range(3)]

    # ---- wrapper-side input prep: pad + space-to-depth of the raw image -----
    x = jnp.transpose(x_nchw, (0, 2, 3, 1)).astype(jnp.float32)       # NHWC
    xp = jnp.pad(x, ((0, 0), (1, 1), (1, 1), (0, 0)))
    hs = h1 + 1
    xs = xp.reshape(n, hs, 2, hs, 2, cin)
    xs = jnp.transpose(xs, (0, 1, 3, 2, 4, 5)).reshape(n, hs, hs, 4 * cin)
    xg = jnp.zeros((n, g1, g1, 4 * cin), jnp.float32)
    xg = xg.at[:, 1:, 1:, :].set(xs)                                  # data at grid >= 1
    xflat = xg.reshape(nm1, 4 * cin)
    xflat = jnp.pad(xflat, ((0, x_rows - nm1), (0, 0))).astype(jnp.bfloat16)

    # ---- masks marking the valid (non-halo) rows of each padded grid --------
    def interior_mask(num, g):
        idx = np.arange(num * g * g)
        hh, ww = (idx // g) % g, idx % g
        ok = (hh >= 1) & (hh <= g - 2) & (ww >= 1) & (ww <= g - 2)
        return jnp.asarray(ok.astype(np.float32)[:, None])

    mask1 = interior_mask(n, g1)             # [nm1, 1]
    maskr = interior_mask(n, gr)             # [nmr, 1]

    # ------------------------------ the kernel -------------------------------
    def kernel(x_ref, w1_ref, w2_ref, w3_ref, w1x1_ref, wf_ref, bf_ref,
               bn_ref, m1_ref, mr_ref, o_ref, y1_ref, f2_ref, res_ref, z_ref):

        def batchnorm(v, mask, count, row):
            # training-mode BN: batch mean / biased variance over the masked rows
            gamma = bn_ref[row:row + 1, :]
            beta = bn_ref[row + 1:row + 2, :]
            vm = v * mask
            mean = jnp.sum(vm, axis=0, keepdims=True) * (1.0 / count)
            ex2 = jnp.sum(vm * vm, axis=0, keepdims=True) * (1.0 / count)
            inv = jax.lax.rsqrt(ex2 - mean * mean + _BN_EPS)
            return (v - mean) * inv * gamma + beta

        msk1 = m1_ref[...]
        mskr = mr_ref[...]

        # -- conv1: 4x4/s2 == 2x2/s1 on the space-to-depth grid (shift trick) --
        acc = None
        for t, d in enumerate(d_c1):
            p = jnp.dot(x_ref[d:d + nm1, :], w1_ref[t],
                        preferred_element_type=jnp.float32)
            acc = p if acc is None else acc + p
        y1 = jnp.maximum(batchnorm(acc, msk1, cnt1, 0), 0.0) * msk1
        y1_ref[0:nm1, :] = y1                                   # zero halo = padding
        y1_ref[nm1:y1_rows, :] = jnp.zeros((y1_rows - nm1, c), jnp.float32)

        # -- conv2: stride-1 4x4 conv on the padded grid, then decimate --------
        acc = None
        for t, d in enumerate(d_c2):
            p = jnp.dot(y1_ref[d:d + nm1, :].astype(jnp.bfloat16), w2_ref[t],
                        preferred_element_type=jnp.float32)
            acc = p if acc is None else acc + p
        f2_ref[...] = acc

        res_ref[...] = jnp.zeros((nmr + 2 * pad, c), jnp.float32)
        for b in range(n):
            for ho in range(h2):
                for wo in range(h2):
                    src = b * m1 + (2 * ho) * g1 + 2 * wo
                    dst = pad + b * mr + (ho + 1) * gr + (wo + 1)
                    res_ref[dst:dst + 1, :] = f2_ref[src:src + 1, :]
        x2 = batchnorm(res_ref[pad:pad + nmr, :], mskr, cnt2, 2) * mskr
        res_ref[pad:pad + nmr, :] = x2

        # -- two residual blocks ------------------------------------------------
        for r in range(2):
            row = 4 + 4 * r
            # nn.ReLU(inplace=True) mutates the block input, so the PyTorch skip
            # connection carries relu(x); reproduce that exactly.
            rx = jnp.maximum(res_ref[pad:pad + nmr, :], 0.0)
            res_ref[pad:pad + nmr, :] = rx
            acc = None
            for t, d in enumerate(d_rs):
                p = jnp.dot(res_ref[pad + d:pad + d + nmr, :].astype(jnp.bfloat16),
                            w3_ref[r, t], preferred_element_type=jnp.float32)
                acc = p if acc is None else acc + p
            h = jnp.maximum(batchnorm(acc, mskr, cnt2, row), 0.0)
            h = jnp.dot(h.astype(jnp.bfloat16), w1x1_ref[r],
                        preferred_element_type=jnp.float32)
            blk = batchnorm(h, mskr, cnt2, row + 2) * mskr
            res_ref[pad:pad + nmr, :] = rx + blk

        # -- final 1x1 conv (+bias) and fused softplus on the sigma half -------
        for b in range(n):
            for ho in range(h2):
                src = pad + b * mr + (ho + 1) * gr + 1
                dst = (b * h2 + ho) * h2
                z_ref[dst:dst + h2, :] = res_ref[src:src + h2, :]
        z = jnp.dot(z_ref[...].astype(jnp.bfloat16), wf_ref[...],
                    preferred_element_type=jnp.float32) + bf_ref[...]
        col = jax.lax.broadcasted_iota(jnp.int32, z.shape, 1)
        sp = jnp.where(z > 20.0, z, jnp.log1p(jnp.exp(jnp.minimum(z, 20.0))))
        o_ref[...] = jnp.where(col < latent_channels, z, sp)

    vmem = lambda: pl.BlockSpec(memory_space=pltpu.MemorySpace.VMEM)
    zout = pl.pallas_call(
        kernel,
        out_shape=jax.ShapeDtypeStruct((n * h2 * h2, l2), jnp.float32),
        in_specs=[vmem() for _ in range(10)],
        out_specs=vmem(),
        scratch_shapes=[
            pltpu.VMEM((y1_rows, c), jnp.float32),        # conv1 output (padded grid + guards)
            pltpu.VMEM((nm1, c), jnp.float32),            # conv2 stride-1 full output
            pltpu.VMEM((nmr + 2 * pad, c), jnp.float32),  # residual-grid activation
            pltpu.VMEM((n * h2 * h2, c), jnp.float32),    # compact input of final 1x1
        ],
    )(xflat, kp["w1"], kp["w2"], kp["w3"], kp["w1x1"], kp["wf"], kp["bf"],
      kp["bn"], mask1, maskr)

    # Output layout plumbing only: rows are (n, h, w), columns are channels.
    # Reorder to PyTorch's NCHW flattening (c, h, w) per sample.
    z = zout.reshape(n, h2, h2, l2).transpose(0, 3, 1, 2)
    mu = z[:, :latent_channels].reshape(n, -1)
    sp = z[:, latent_channels:].reshape(n, -1)
    return mu, sp


# ----------------------------------------------------------------------------
if __name__ == "__main__":
    batch, in_ch, hw = 2, 3, 16
    channels, latent_channels = 32, 8

    key = jax.random.PRNGKey(0)
    k_x, k_p = jax.random.split(key)
    x = jax.random.normal(k_x, (batch, in_ch, hw, hw), jnp.float32)

    params = init_params(k_p, channels, latent_channels)
    kp = pack_params(params)                      # one-time layout conversion

    fwd = jax.jit(functools.partial(fc_encoder_forward,
                                    latent_channels=latent_channels))
    mu, sp = fwd(x, kp)
    jax.block_until_ready((mu, sp))

    expected = latent_channels * (hw // 4) * (hw // 4)
    assert mu.shape == (batch, expected), mu.shape
    assert sp.shape == (batch, expected), sp.shape
    assert bool(jnp.all(sp >= 0.0))
    print("KERNEL_OK")
</pallas_src>

<mosaic_0001>
module attributes {stable_mosaic.version = 11 : i64} {
  func.func @kernel(%arg0: memref<216x12xbf16, #tpu.memory_space<vmem>>, %arg1: memref<4x12x32xbf16, #tpu.memory_space<vmem>>, %arg2: memref<16x32x32xbf16, #tpu.memory_space<vmem>>, %arg3: memref<2x9x32x32xbf16, #tpu.memory_space<vmem>>, %arg4: memref<2x32x32xbf16, #tpu.memory_space<vmem>>, %arg5: memref<32x16xbf16, #tpu.memory_space<vmem>>, %arg6: memref<1x16xf32, #tpu.memory_space<vmem>>, %arg7: memref<12x32xf32, #tpu.memory_space<vmem>>, %arg8: memref<200x1xf32, #tpu.memory_space<vmem>>, %arg9: memref<72x1xf32, #tpu.memory_space<vmem>>, %arg10: memref<32x16xf32, #tpu.memory_space<vmem>>, %arg11: memref<240x32xf32, #tpu.memory_space<vmem>>, %arg12: memref<200x32xf32, #tpu.memory_space<vmem>>, %arg13: memref<86x32xf32, #tpu.memory_space<vmem>>, %arg14: memref<32x32xf32, #tpu.memory_space<vmem>>) attributes {dimension_semantics = [], scalar_prefetch = 0 : i64, scratch_operands = 4 : i64, tpu.core_type = #tpu.core_type<tc>} {
    %c0 = arith.constant 0 : index
    %c0_0 = arith.constant 0 : index
    %0 = vector.load %arg8[%c0, %c0_0] : memref<200x1xf32, #tpu.memory_space<vmem>>, vector<200x1xf32>
    %c0_1 = arith.constant 0 : index
    %c0_2 = arith.constant 0 : index
    %1 = vector.load %arg9[%c0_1, %c0_2] : memref<72x1xf32, #tpu.memory_space<vmem>>, vector<72x1xf32>
    %c0_3 = arith.constant 0 : index
    %c0_4 = arith.constant 0 : index
    %2 = vector.load %arg0[%c0_3, %c0_4] : memref<216x12xbf16, #tpu.memory_space<vmem>>, vector<200x12xbf16>
    %c0_5 = arith.constant 0 : index
    %c0_6 = arith.constant 0 : index
    %c0_7 = arith.constant 0 : index
    %3 = vector.load %arg1[%c0_5, %c0_6, %c0_7] : memref<4x12x32xbf16, #tpu.memory_space<vmem>>, vector<1x12x32xbf16>
    %4 = vector.shape_cast %3 : vector<1x12x32xbf16> to vector<12x32xbf16>
    %cst = arith.constant dense<0.000000e+00> : vector<200x32xf32>
    %5 = tpu.matmul %2, %4, %cst {dimension_numbers = #tpu.dot_dimension_numbers<[1], [0], [0], [1], [0, 0, 1, 1], [], []>} : vector<200x12xbf16>, vector<12x32xbf16>, vector<200x32xf32> -> vector<200x32xf32>
    %c1 = arith.constant 1 : index
    %c0_8 = arith.constant 0 : index
    %6 = vector.load %arg0[%c1, %c0_8] : memref<216x12xbf16, #tpu.memory_space<vmem>>, vector<200x12xbf16>
    %c1_9 = arith.constant 1 : index
    %c0_10 = arith.constant 0 : index
    %c0_11 = arith.constant 0 : index
    %7 = vector.load %arg1[%c1_9, %c0_10, %c0_11] : memref<4x12x32xbf16, #tpu.memory_space<vmem>>, vector<1x12x32xbf16>
    %8 = vector.shape_cast %7 : vector<1x12x32xbf16> to vector<12x32xbf16>
    %cst_12 = arith.constant dense<0.000000e+00> : vector<200x32xf32>
    %9 = tpu.matmul %6, %8, %cst_12 {dimension_numbers = #tpu.dot_dimension_numbers<[1], [0], [0], [1], [0, 0, 1, 1], [], []>} : vector<200x12xbf16>, vector<12x32xbf16>, vector<200x32xf32> -> vector<200x32xf32>
    %10 = arith.addf %5, %9 : vector<200x32xf32>
    %c10 = arith.constant 10 : index
    %c0_13 = arith.constant 0 : index
    %11 = vector.load %arg0[%c10, %c0_13] : memref<216x12xbf16, #tpu.memory_space<vmem>>, vector<200x12xbf16>
    %c2 = arith.constant 2 : index
    %c0_14 = arith.constant 0 : index
    %c0_15 = arith.constant 0 : index
    %12 = vector.load %arg1[%c2, %c0_14, %c0_15] : memref<4x12x32xbf16, #tpu.memory_space<vmem>>, vector<1x12x32xbf16>
    %13 = vector.shape_cast %12 : vector<1x12x32xbf16> to vector<12x32xbf16>
    %cst_16 = arith.constant dense<0.000000e+00> : vector<200x32xf32>
    %14 = tpu.matmul %11, %13, %cst_16 {dimension_numbers = #tpu.dot_dimension_numbers<[1], [0], [0], [1], [0, 0, 1, 1], [], []>} : vector<200x12xbf16>, vector<12x32xbf16>, vector<200x32xf32> -> vector<200x32xf32>
    %15 = arith.addf %10, %14 : vector<200x32xf32>
    %c11 = arith.constant 11 : index
    %c0_17 = arith.constant 0 : index
    %16 = vector.load %arg0[%c11, %c0_17] : memref<216x12xbf16, #tpu.memory_space<vmem>>, vector<200x12xbf16>
    %c3 = arith.constant 3 : index
    %c0_18 = arith.constant 0 : index
    %c0_19 = arith.constant 0 : index
    %17 = vector.load %arg1[%c3, %c0_18, %c0_19] : memref<4x12x32xbf16, #tpu.memory_space<vmem>>, vector<1x12x32xbf16>
    %18 = vector.shape_cast %17 : vector<1x12x32xbf16> to vector<12x32xbf16>
    %cst_20 = arith.constant dense<0.000000e+00> : vector<200x32xf32>
    %19 = tpu.matmul %16, %18, %cst_20 {dimension_numbers = #tpu.dot_dimension_numbers<[1], [0], [0], [1], [0, 0, 1, 1], [], []>} : vector<200x12xbf16>, vector<12x32xbf16>, vector<200x32xf32> -> vector<200x32xf32>
    %20 = arith.addf %15, %19 : vector<200x32xf32>
    %c0_21 = arith.constant 0 : index
    %c0_22 = arith.constant 0 : index
    %21 = vector.load %arg7[%c0_21, %c0_22] : memref<12x32xf32, #tpu.memory_space<vmem>>, vector<1x32xf32>
    %c1_23 = arith.constant 1 : index
    %c0_24 = arith.constant 0 : index
    %22 = vector.load %arg7[%c1_23, %c0_24] : memref<12x32xf32, #tpu.memory_space<vmem>>, vector<1x32xf32>
    %23 = vector.broadcast %0 : vector<200x1xf32> to vector<200x32xf32>
    %24 = arith.mulf %20, %23 : vector<200x32xf32>
    %cst_25 = arith.constant dense<0.000000e+00> : vector<32xf32>
    %25 = vector.multi_reduction <add>, %24, %cst_25 [0] : vector<200x32xf32> to vector<32xf32>
    %26 = vector.shape_cast %25 : vector<32xf32> to vector<1x32xf32>
    %cst_26 = arith.constant 7.812500e-03 : f32
    %27 = vector.broadcast %cst_26 : f32 to vector<1x32xf32>
    %28 = arith.mulf %26, %27 : vector<1x32xf32>
    %29 = arith.mulf %24, %24 : vector<200x32xf32>
    %cst_27 = arith.constant dense<0.000000e+00> : vector<32xf32>
    %30 = vector.multi_reduction <add>, %29, %cst_27 [0] : vector<200x32xf32> to vector<32xf32>
    %31 = vector.shape_cast %30 : vector<32xf32> to vector<1x32xf32>
    %cst_28 = arith.constant 7.812500e-03 : f32
    %32 = vector.broadcast %cst_28 : f32 to vector<1x32xf32>
    %33 = arith.mulf %31, %32 : vector<1x32xf32>
    %34 = arith.mulf %28, %28 : vector<1x32xf32>
    %35 = arith.subf %33, %34 : vector<1x32xf32>
    %cst_29 = arith.constant 9.99999974E-6 : f32
    %36 = vector.broadcast %cst_29 : f32 to vector<1x32xf32>
    %37 = arith.addf %35, %36 : vector<1x32xf32>
    %38 = math.rsqrt %37 : vector<1x32xf32>
    %39 = vector.broadcast %28 : vector<1x32xf32> to vector<200x32xf32>
    %40 = arith.subf %20, %39 : vector<200x32xf32>
    %41 = vector.broadcast %38 : vector<1x32xf32> to vector<200x32xf32>
    %42 = arith.mulf %40, %41 : vector<200x32xf32>
    %43 = vector.broadcast %21 : vector<1x32xf32> to vector<200x32xf32>
    %44 = arith.mulf %42, %43 : vector<200x32xf32>
    %45 = vector.broadcast %22 : vector<1x32xf32> to vector<200x32xf32>
    %46 = arith.addf %44, %45 : vector<200x32xf32>
    %cst_30 = arith.constant 0.000000e+00 : f32
    %47 = vector.broadcast %cst_30 : f32 to vector<200x32xf32>
    %48 = arith.maximumf %46, %47 : vector<200x32xf32>
    %49 = vector.broadcast %0 : vector<200x1xf32> to vector<200x32xf32>
    %50 = arith.mulf %48, %49 : vector<200x32xf32>
    %c0_31 = arith.constant 0 : index
    %c0_32 = arith.constant 0 : index
    %51 = vector.load %arg11[%c0_31, %c0_32] : memref<240x32xf32, #tpu.memory_space<vmem>>, vector<200x32xf32>
    tpu.vector_store %arg11[%c0_31, %c0_32], %50 {strides = array<i32>} : memref<240x32xf32, #tpu.memory_space<vmem>>, vector<200x32xf32>,
    %cst_33 = arith.constant 0.000000e+00 : f32
    %52 = vector.broadcast %cst_33 : f32 to vector<40x32xf32>
    %c200 = arith.constant 200 : index
    %c0_34 = arith.constant 0 : index
    %53 = vector.load %arg11[%c200, %c0_34] : memref<240x32xf32, #tpu.memory_space<vmem>>, vector<40x32xf32>
    tpu.vector_store %arg11[%c200, %c0_34], %52 {strides = array<i32>} : memref<240x32xf32, #tpu.memory_space<vmem>>, vector<40x32xf32>,
    %c0_35 = arith.constant 0 : index
    %c0_36 = arith.constant 0 : index
    %54 = vector.load %arg11[%c0_35, %c0_36] : memref<240x32xf32, #tpu.memory_space<vmem>>, vector<200x32xf32>
    %55 = arith.truncf %54 : vector<200x32xf32> to vector<200x32xbf16>
    %c0_37 = arith.constant 0 : index
    %c0_38 = arith.constant 0 : index
    %c0_39 = arith.constant 0 : index
    %56 = vector.load %arg2[%c0_37, %c0_38, %c0_39] : memref<16x32x32xbf16, #tpu.memory_space<vmem>>, vector<1x32x32xbf16>
    %57 = vector.shape_cast %56 : vector<1x32x32xbf16> to vector<32x32xbf16>
    %cst_40 = arith.constant dense<0.000000e+00> : vector<200x32xf32>
    %58 = tpu.matmul %55, %57, %cst_40 {dimension_numbers = #tpu.dot_dimension_numbers<[1], [0], [0], [1], [0, 0, 1, 1], [], []>} : vector<200x32xbf16>, vector<32x32xbf16>, vector<200x32xf32> -> vector<200x32xf32>
    %c1_41 = arith.constant 1 : index
    %c0_42 = arith.constant 0 : index
    %59 = vector.load %arg11[%c1_41, %c0_42] : memref<240x32xf32, #tpu.memory_space<vmem>>, vector<200x32xf32>
    %60 = arith.truncf %59 : vector<200x32xf32> to vector<200x32xbf16>
    %c1_43 = arith.constant 1 : index
    %c0_44 = arith.constant 0 : index
    %c0_45 = arith.constant 0 : index
    %61 = vector.load %arg2[%c1_43, %c0_44, %c0_45] : memref<16x32x32xbf16, #tpu.memory_space<vmem>>, vector<1x32x32xbf16>
    %62 = vector.shape_cast %61 : vector<1x32x32xbf16> to vector<32x32xbf16>
    %cst_46 = arith.constant dense<0.000000e+00> : vector<200x32xf32>
    %63 = tpu.matmul %60, %62, %cst_46 {dimension_numbers = #tpu.dot_dimension_numbers<[1], [0], [0], [1], [0, 0, 1, 1], [], []>} : vector<200x32xbf16>, vector<32x32xbf16>, vector<200x32xf32> -> vector<200x32xf32>
    %64 = arith.addf %58, %63 : vector<200x32xf32>
    %c2_47 = arith.constant 2 : index
    %c0_48 = arith.constant 0 : index
    %65 = vector.load %arg11[%c2_47, %c0_48] : memref<240x32xf32, #tpu.memory_space<vmem>>, vector<200x32xf32>
    %66 = arith.truncf %65 : vector<200x32xf32> to vector<200x32xbf16>
    %c2_49 = arith.constant 2 : index
    %c0_50 = arith.constant 0 : index
    %c0_51 = arith.constant 0 : index
    %67 = vector.load %arg2[%c2_49, %c0_50, %c0_51] : memref<16x32x32xbf16, #tpu.memory_space<vmem>>, vector<1x32x32xbf16>
    %68 = vector.shape_cast %67 : vector<1x32x32xbf16> to vector<32x32xbf16>
    %cst_52 = arith.constant dense<0.000000e+00> : vector<200x32xf32>
    %69 = tpu.matmul %66, %68, %cst_52 {dimension_numbers = #tpu.dot_dimension_numbers<[1], [0], [0], [1], [0, 0, 1, 1], [], []>} : vector<200x32xbf16>, vector<32x32xbf16>, vector<200x32xf32> -> vector<200x32xf32>
    %70 = arith.addf %64, %69 : vector<200x32xf32>
    %c3_53 = arith.constant 3 : index
    %c0_54 = arith.constant 0 : index
    %71 = vector.load %arg11[%c3_53, %c0_54] : memref<240x32xf32, #tpu.memory_space<vmem>>, vector<200x32xf32>
    %72 = arith.truncf %71 : vector<200x32xf32> to vector<200x32xbf16>
    %c3_55 = arith.constant 3 : index
    %c0_56 = arith.constant 0 : index
    %c0_57 = arith.constant 0 : index
    %73 = vector.load %arg2[%c3_55, %c0_56, %c0_57] : memref<16x32x32xbf16, #tpu.memory_space<vmem>>, vector<1x32x32xbf16>
    %74 = vector.shape_cast %73 : vector<1x32x32xbf16> to vector<32x32xbf16>
    %cst_58 = arith.constant dense<0.000000e+00> : vector<200x32xf32>
    %75 = tpu.matmul %72, %74, %cst_58 {dimension_numbers = #tpu.dot_dimension_numbers<[1], [0], [0], [1], [0, 0, 1, 1], [], []>} : vector<200x32xbf16>, vector<32x32xbf16>, vector<200x32xf32> -> vector<200x32xf32>
    %76 = arith.addf %70, %75 : vector<200x32xf32>
    %c10_59 = arith.constant 10 : index
    %c0_60 = arith.constant 0 : index
    %77 = vector.load %arg11[%c10_59, %c0_60] : memref<240x32xf32, #tpu.memory_space<vmem>>, vector<200x32xf32>
    %78 = arith.truncf %77 : vector<200x32xf32> to vector<200x32xbf16>
    %c4 = arith.constant 4 : index
    %c0_61 = arith.constant 0 : index
    %c0_62 = arith.constant 0 : index
    %79 = vector.load %arg2[%c4, %c0_61, %c0_62] : memref<16x32x32xbf16, #tpu.memory_space<vmem>>, vector<1x32x32xbf16>
    %80 = vector.shape_cast %79 : vector<1x32x32xbf16> to vector<32x32xbf16>
    %cst_63 = arith.constant dense<0.000000e+00> : vector<200x32xf32>
    %81 = tpu.matmul %78, %80, %cst_63 {dimension_numbers = #tpu.dot_dimension_numbers<[1], [0], [0], [1], [0, 0, 1, 1], [], []>} : vector<200x32xbf16>, vector<32x32xbf16>, vector<200x32xf32> -> vector<200x32xf32>
    %82 = arith.addf %76, %81 : vector<200x32xf32>
    %c11_64 = arith.constant 11 : index
    %c0_65 = arith.constant 0 : index
    %83 = vector.load %arg11[%c11_64, %c0_65] : memref<240x32xf32, #tpu.memory_space<vmem>>, vector<200x32xf32>
    %84 = arith.truncf %83 : vector<200x32xf32> to vector<200x32xbf16>
    %c5 = arith.constant 5 : index
    %c0_66 = arith.constant 0 : index
    %c0_67 = arith.constant 0 : index
    %85 = vector.load %arg2[%c5, %c0_66, %c0_67] : memref<16x32x32xbf16, #tpu.memory_space<vmem>>, vector<1x32x32xbf16>
    %86 = vector.shape_cast %85 : vector<1x32x32xbf16> to vector<32x32xbf16>
    %cst_68 = arith.constant dense<0.000000e+00> : vector<200x32xf32>
    %87 = tpu.matmul %84, %86, %cst_68 {dimension_numbers = #tpu.dot_dimension_numbers<[1], [0], [0], [1], [0, 0, 1, 1], [], []>} : vector<200x32xbf16>, vector<32x32xbf16>, vector<200x32xf32> -> vector<200x32xf32>
    %88 = arith.addf %82, %87 : vector<200x32xf32>
    %c12 = arith.constant 12 : index
    %c0_69 = arith.constant 0 : index
    %89 = vector.load %arg11[%c12, %c0_69] : memref<240x32xf32, #tpu.memory_space<vmem>>, vector<200x32xf32>
    %90 = arith.truncf %89 : vector<200x32xf32> to vector<200x32xbf16>
    %c6 = arith.constant 6 : index
    %c0_70 = arith.constant 0 : index
    %c0_71 = arith.constant 0 : index
    %91 = vector.load %arg2[%c6, %c0_70, %c0_71] : memref<16x32x32xbf16, #tpu.memory_space<vmem>>, vector<1x32x32xbf16>
    %92 = vector.shape_cast %91 : vector<1x32x32xbf16> to vector<32x32xbf16>
    %cst_72 = arith.constant dense<0.000000e+00> : vector<200x32xf32>
    %93 = tpu.matmul %90, %92, %cst_72 {dimension_numbers = #tpu.dot_dimension_numbers<[1], [0], [0], [1], [0, 0, 1, 1], [], []>} : vector<200x32xbf16>, vector<32x32xbf16>, vector<200x32xf32> -> vector<200x32xf32>
    %94 = arith.addf %88, %93 : vector<200x32xf32>
    %c13 = arith.constant 13 : index
    %c0_73 = arith.constant 0 : index
    %95 = vector.load %arg11[%c13, %c0_73] : memref<240x32xf32, #tpu.memory_space<vmem>>, vector<200x32xf32>
    %96 = arith.truncf %95 : vector<200x32xf32> to vector<200x32xbf16>
    %c7 = arith.constant 7 : index
    %c0_74 = arith.constant 0 : index
    %c0_75 = arith.constant 0 : index
    %97 = vector.load %arg2[%c7, %c0_74, %c0_75] : memref<16x32x32xbf16, #tpu.memory_space<vmem>>, vector<1x32x32xbf16>
    %98 = vector.shape_cast %97 : vector<1x32x32xbf16> to vector<32x32xbf16>
    %cst_76 = arith.constant dense<0.000000e+00> : vector<200x32xf32>
    %99 = tpu.matmul %96, %98, %cst_76 {dimension_numbers = #tpu.dot_dimension_numbers<[1], [0], [0], [1], [0, 0, 1, 1], [], []>} : vector<200x32xbf16>, vector<32x32xbf16>, vector<200x32xf32> -> vector<200x32xf32>
    %100 = arith.addf %94, %99 : vector<200x32xf32>
    %c20 = arith.constant 20 : index
    %c0_77 = arith.constant 0 : index
    %101 = vector.load %arg11[%c20, %c0_77] : memref<240x32xf32, #tpu.memory_space<vmem>>, vector<200x32xf32>
    %102 = arith.truncf %101 : vector<200x32xf32> to vector<200x32xbf16>
    %c8 = arith.constant 8 : index
    %c0_78 = arith.constant 0 : index
    %c0_79 = arith.constant 0 : index
    %103 = vector.load %arg2[%c8, %c0_78, %c0_79] : memref<16x32x32xbf16, #tpu.memory_space<vmem>>, vector<1x32x32xbf16>
    %104 = vector.shape_cast %103 : vector<1x32x32xbf16> to vector<32x32xbf16>
    %cst_80 = arith.constant dense<0.000000e+00> : vector<200x32xf32>
    %105 = tpu.matmul %102, %104, %cst_80 {dimension_numbers = #tpu.dot_dimension_numbers<[1], [0], [0], [1], [0, 0, 1, 1], [], []>} : vector<200x32xbf16>, vector<32x32xbf16>, vector<200x32xf32> -> vector<200x32xf32>
    %106 = arith.addf %100, %105 : vector<200x32xf32>
    %c21 = arith.constant 21 : index
    %c0_81 = arith.constant 0 : index
    %107 = vector.load %arg11[%c21, %c0_81] : memref<240x32xf32, #tpu.memory_space<vmem>>, vector<200x32xf32>
    %108 = arith.truncf %107 : vector<200x32xf32> to vector<200x32xbf16>
    %c9 = arith.constant 9 : index
    %c0_82 = arith.constant 0 : index
    %c0_83 = arith.constant 0 : index
    %109 = vector.load %arg2[%c9, %c0_82, %c0_83] : memref<16x32x32xbf16, #tpu.memory_space<vmem>>, vector<1x32x32xbf16>
    %110 = vector.shape_cast %109 : vector<1x32x32xbf16> to vector<32x32xbf16>
    %cst_84 = arith.constant dense<0.000000e+00> : vector<200x32xf32>
    %111 = tpu.matmul %108, %110, %cst_84 {dimension_numbers = #tpu.dot_dimension_numbers<[1], [0], [0], [1], [0, 0, 1, 1], [], []>} : vector<200x32xbf16>, vector<32x32xbf16>, vector<200x32xf32> -> vector<200x32xf32>
    %112 = arith.addf %106, %111 : vector<200x32xf32>
    %c22 = arith.constant 22 : index
    %c0_85 = arith.constant 0 : index
    %113 = vector.load %arg11[%c22, %c0_85] : memref<240x32xf32, #tpu.memory_space<vmem>>, vector<200x32xf32>
    %114 = arith.truncf %113 : vector<200x32xf32> to vector<200x32xbf16>
    %c10_86 = arith.constant 10 : index
    %c0_87 = arith.constant 0 : index
    %c0_88 = arith.constant 0 : index
    %115 = vector.load %arg2[%c10_86, %c0_87, %c0_88] : memref<16x32x32xbf16, #tpu.memory_space<vmem>>, vector<1x32x32xbf16>
    %116 = vector.shape_cast %115 : vector<1x32x32xbf16> to vector<32x32xbf16>
    %cst_89 = arith.constant dense<0.000000e+00> : vector<200x32xf32>
    %117 = tpu.matmul %114, %116, %cst_89 {dimension_numbers = #tpu.dot_dimension_numbers<[1], [0], [0], [1], [0, 0, 1, 1], [], []>} : vector<200x32xbf16>, vector<32x32xbf16>, vector<200x32xf32> -> vector<200x32xf32>
    %118 = arith.addf %112, %117 : vector<200x32xf32>
    %c23 = arith.constant 23 : index
    %c0_90 = arith.constant 0 : index
    %119 = vector.load %arg11[%c23, %c0_90] : memref<240x32xf32, #tpu.memory_space<vmem>>, vector<200x32xf32>
    %120 = arith.truncf %119 : vector<200x32xf32> to vector<200x32xbf16>
    %c11_91 = arith.constant 11 : index
    %c0_92 = arith.constant 0 : index
    %c0_93 = arith.constant 0 : index
    %121 = vector.load %arg2[%c11_91, %c0_92, %c0_93] : memref<16x32x32xbf16, #tpu.memory_space<vmem>>, vector<1x32x32xbf16>
    %122 = vector.shape_cast %121 : vector<1x32x32xbf16> to vector<32x32xbf16>
    %cst_94 = arith.constant dense<0.000000e+00> : vector<200x32xf32>
    %123 = tpu.matmul %120, %122, %cst_94 {dimension_numbers = #tpu.dot_dimension_numbers<[1], [0], [0], [1], [0, 0, 1, 1], [], []>} : vector<200x32xbf16>, vector<32x32xbf16>, vector<200x32xf32> -> vector<200x32xf32>
    %124 = arith.addf %118, %123 : vector<200x32xf32>
    %c30 = arith.constant 30 : index
    %c0_95 = arith.constant 0 : index
    %125 = vector.load %arg11[%c30, %c0_95] : memref<240x32xf32, #tpu.memory_space<vmem>>, vector<200x32xf32>
    %126 = arith.truncf %125 : vector<200x32xf32> to vector<200x32xbf16>
    %c12_96 = arith.constant 12 : index
    %c0_97 = arith.constant 0 : index
    %c0_98 = arith.constant 0 : index
    %127 = vector.load %arg2[%c12_96, %c0_97, %c0_98] : memref<16x32x32xbf16, #tpu.memory_space<vmem>>, vector<1x32x32xbf16>
    %128 = vector.shape_cast %127 : vector<1x32x32xbf16> to vector<32x32xbf16>
    %cst_99 = arith.constant dense<0.000000e+00> : vector<200x32xf32>
    %129 = tpu.matmul %126, %128, %cst_99 {dimension_numbers = #tpu.dot_dimension_numbers<[1], [0], [0], [1], [0, 0, 1, 1], [], []>} : vector<200x32xbf16>, vector<32x32xbf16>, vector<200x32xf32> -> vector<200x32xf32>
    %130 = arith.addf %124, %129 : vector<200x32xf32>
    %c31 = arith.constant 31 : index
    %c0_100 = arith.constant 0 : index
    %131 = vector.load %arg11[%c31, %c0_100] : memref<240x32xf32, #tpu.memory_space<vmem>>, vector<200x32xf32>
    %132 = arith.truncf %131 : vector<200x32xf32> to vector<200x32xbf16>
    %c13_101 = arith.constant 13 : index
    %c0_102 = arith.constant 0 : index
    %c0_103 = arith.constant 0 : index
    %133 = vector.load %arg2[%c13_101, %c0_102, %c0_103] : memref<16x32x32xbf16, #tpu.memory_space<vmem>>, vector<1x32x32xbf16>
    %134 = vector.shape_cast %133 : vector<1x32x32xbf16> to vector<32x32xbf16>
    %cst_104 = arith.constant dense<0.000000e+00> : vector<200x32xf32>
    %135 = tpu.matmul %132, %134, %cst_104 {dimension_numbers = #tpu.dot_dimension_numbers<[1], [0], [0], [1], [0, 0, 1, 1], [], []>} : vector<200x32xbf16>, vector<32x32xbf16>, vector<200x32xf32> -> vector<200x32xf32>
    %136 = arith.addf %130, %135 : vector<200x32xf32>
    %c32 = arith.constant 32 : index
    %c0_105 = arith.constant 0 : index
    %137 = vector.load %arg11[%c32, %c0_105] : memref<240x32xf32, #tpu.memory_space<vmem>>, vector<200x32xf32>
    %138 = arith.truncf %137 : vector<200x32xf32> to vector<200x32xbf16>
    %c14 = arith.constant 14 : index
    %c0_106 = arith.constant 0 : index
    %c0_107 = arith.constant 0 : index
    %139 = vector.load %arg2[%c14, %c0_106, %c0_107] : memref<16x32x32xbf16, #tpu.memory_space<vmem>>, vector<1x32x32xbf16>
    %140 = vector.shape_cast %139 : vector<1x32x32xbf16> to vector<32x32xbf16>
    %cst_108 = arith.constant dense<0.000000e+00> : vector<200x32xf32>
    %141 = tpu.matmul %138, %140, %cst_108 {dimension_numbers = #tpu.dot_dimension_numbers<[1], [0], [0], [1], [0, 0, 1, 1], [], []>} : vector<200x32xbf16>, vector<32x32xbf16>, vector<200x32xf32> -> vector<200x32xf32>
    %142 = arith.addf %136, %141 : vector<200x32xf32>
    %c33 = arith.constant 33 : index
    %c0_109 = arith.constant 0 : index
    %143 = vector.load %arg11[%c33, %c0_109] : memref<240x32xf32, #tpu.memory_space<vmem>>, vector<200x32xf32>
    %144 = arith.truncf %143 : vector<200x32xf32> to vector<200x32xbf16>
    %c15 = arith.constant 15 : index
    %c0_110 = arith.constant 0 : index
    %c0_111 = arith.constant 0 : index
    %145 = vector.load %arg2[%c15, %c0_110, %c0_111] : memref<16x32x32xbf16, #tpu.memory_space<vmem>>, vector<1x32x32xbf16>
    %146 = vector.shape_cast %145 : vector<1x32x32xbf16> to vector<32x32xbf16>
    %cst_112 = arith.constant dense<0.000000e+00> : vector<200x32xf32>
    %147 = tpu.matmul %144, %146, %cst_112 {dimension_numbers = #tpu.dot_dimension_numbers<[1], [0], [0], [1], [0, 0, 1, 1], [], []>} : vector<200x32xbf16>, vector<32x32xbf16>, vector<200x32xf32> -> vector<200x32xf32>
    %148 = arith.addf %142, %147 : vector<200x32xf32>
    %c0_113 = arith.constant 0 : index
    %c0_114 = arith.constant 0 : index
    %149 = vector.load %arg12[%c0_113, %c0_114] : memref<200x32xf32, #tpu.memory_space<vmem>>, vector<200x32xf32>
    tpu.vector_store %arg12[%c0_113, %c0_114], %148 {strides = array<i32>} : memref<200x32xf32, #tpu.memory_space<vmem>>, vector<200x32xf32>,
    %cst_115 = arith.constant 0.000000e+00 : f32
    %150 = vector.broadcast %cst_115 : f32 to vector<86x32xf32>
    %c0_116 = arith.constant 0 : index
    %c0_117 = arith.constant 0 : index
    %151 = vector.load %arg13[%c0_116, %c0_117] : memref<86x32xf32, #tpu.memory_space<vmem>>, vector<86x32xf32>
    tpu.vector_store %arg13[%c0_116, %c0_117], %150 {strides = array<i32>} : memref<86x32xf32, #tpu.memory_space<vmem>>, vector<86x32xf32>,
    %c0_118 = arith.constant 0 : index
    %c0_119 = arith.constant 0 : index
    %152 = vector.load %arg12[%c0_118, %c0_119] : memref<200x32xf32, #tpu.memory_space<vmem>>, vector<1x32xf32>
    %c14_120 = arith.constant 14 : index
    %c0_121 = arith.constant 0 : index
    %153 = vector.load %arg13[%c14_120, %c0_121] : memref<86x32xf32, #tpu.memory_space<vmem>>, vector<1x32xf32>
    tpu.vector_store %arg13[%c14_120, %c0_121], %152 {strides = array<i32>} : memref<86x32xf32, #tpu.memory_space<vmem>>, vector<1x32xf32>,
    %c2_122 = arith.constant 2 : index
    %c0_123 = arith.constant 0 : index
    %154 = vector.load %arg12[%c2_122, %c0_123] : memref<200x32xf32, #tpu.memory_space<vmem>>, vector<1x32xf32>
    %c15_124 = arith.constant 15 : index
    %c0_125 = arith.constant 0 : index
    %155 = vector.load %arg13[%c15_124, %c0_125] : memref<86x32xf32, #tpu.memory_space<vmem>>, vector<1x32xf32>
    tpu.vector_store %arg13[%c15_124, %c0_125], %154 {strides = array<i32>} : memref<86x32xf32, #tpu.memory_space<vmem>>, vector<1x32xf32>,
    %c4_126 = arith.constant 4 : index
    %c0_127 = arith.constant 0 : index
    %156 = vector.load %arg12[%c4_126, %c0_127] : memref<200x32xf32, #tpu.memory_space<vmem>>, vector<1x32xf32>
    %c16 = arith.constant 16 : index
    %c0_128 = arith.constant 0 : index
    %157 = vector.load %arg13[%c16, %c0_128] : memref<86x32xf32, #tpu.memory_space<vmem>>, vector<1x32xf32>
    tpu.vector_store %arg13[%c16, %c0_128], %156 {strides = array<i32>} : memref<86x32xf32, #tpu.memory_space<vmem>>, vector<1x32xf32>,
    %c6_129 = arith.constant 6 : index
    %c0_130 = arith.constant 0 : index
    %158 = vector.load %arg12[%c6_129, %c0_130] : memref<200x32xf32, #tpu.memory_space<vmem>>, vector<1x32xf32>
    %c17 = arith.constant 17 : index
    %c0_131 = arith.constant 0 : index
    %159 = vector.load %arg13[%c17, %c0_131] : memref<86x32xf32, #tpu.memory_space<vmem>>, vector<1x32xf32>
    tpu.vector_store %arg13[%c17, %c0_131], %158 {strides = array<i32>} : memref<86x32xf32, #tpu.memory_space<vmem>>, vector<1x32xf32>,
    %c20_132 = arith.constant 20 : index
    %c0_133 = arith.constant 0 : index
    %160 = vector.load %arg12[%c20_132, %c0_133] : memref<200x32xf32, #tpu.memory_space<vmem>>, vector<1x32xf32>
    %c20_134 = arith.constant 20 : index
    %c0_135 = arith.constant 0 : index
    %161 = vector.load %arg13[%c20_134, %c0_135] : memref<86x32xf32, #tpu.memory_space<vmem>>, vector<1x32xf32>
    tpu.vector_store %arg13[%c20_134, %c0_135], %160 {strides = array<i32>} : memref<86x32xf32, #tpu.memory_space<vmem>>, vector<1x32xf32>,
    %c22_136 = arith.constant 22 : index
    %c0_137 = arith.constant 0 : index
    %162 = vector.load %arg12[%c22_136, %c0_137] : memref<200x32xf32, #tpu.memory_space<vmem>>, vector<1x32xf32>
    %c21_138 = arith.constant 21 : index
    %c0_139 = arith.constant 0 : index
    %163 = vector.load %arg13[%c21_138, %c0_139] : memref<86x32xf32, #tpu.memory_space<vmem>>, vector<1x32xf32>
    tpu.vector_store %arg13[%c21_138, %c0_139], %162 {strides = array<i32>} : memref<86x32xf32, #tpu.memory_space<vmem>>, vector<1x32xf32>,
    %c24 = arith.constant 24 : index
    %c0_140 = arith.constant 0 : index
    %164 = vector.load %arg12[%c24, %c0_140] : memref<200x32xf32, #tpu.memory_space<vmem>>, vector<1x32xf32>
    %c22_141 = arith.constant 22 : index
    %c0_142 = arith.constant 0 : index
    %165 = vector.load %arg13[%c22_141, %c0_142] : memref<86x32xf32, #tpu.memory_space<vmem>>, vector<1x32xf32>
    tpu.vector_store %arg13[%c22_141, %c0_142], %164 {strides = array<i32>} : memref<86x32xf32, #tpu.memory_space<vmem>>, vector<1x32xf32>,
    %c26 = arith.constant 26 : index
    %c0_143 = arith.constant 0 : index
    %166 = vector.load %arg12[%c26, %c0_143] : memref<200x32xf32, #tpu.memory_space<vmem>>, vector<1x32xf32>
    %c23_144 = arith.constant 23 : index
    %c0_145 = arith.constant 0 : index
    %167 = vector.load %arg13[%c23_144, %c0_145] : memref<86x32xf32, #tpu.memory_space<vmem>>, vector<1x32xf32>
    tpu.vector_store %arg13[%c23_144, %c0_145], %166 {strides = array<i32>} : memref<86x32xf32, #tpu.memory_space<vmem>>, vector<1x32xf32>,
    %c40 = arith.constant 40 : index
    %c0_146 = arith.constant 0 : index
    %168 = vector.load %arg12[%c40, %c0_146] : memref<200x32xf32, #tpu.memory_space<vmem>>, vector<1x32xf32>
    %c26_147 = arith.constant 26 : index
    %c0_148 = arith.constant 0 : index
    %169 = vector.load %arg13[%c26_147, %c0_148] : memref<86x32xf32, #tpu.memory_space<vmem>>, vector<1x32xf32>
    tpu.vector_store %arg13[%c26_147, %c0_148], %168 {strides = array<i32>} : memref<86x32xf32, #tpu.memory_space<vmem>>, vector<1x32xf32>,
    %c42 = arith.constant 42 : index
    %c0_149 = arith.constant 0 : index
    %170 = vector.load %arg12[%c42, %c0_149] : memref<200x32xf32, #tpu.memory_space<vmem>>, vector<1x32xf32>
    %c27 = arith.constant 27 : index
    %c0_150 = arith.constant 0 : index
    %171 = vector.load %arg13[%c27, %c0_150] : memref<86x32xf32, #tpu.memory_space<vmem>>, vector<1x32xf32>
    tpu.vector_store %arg13[%c27, %c0_150], %170 {strides = array<i32>} : memref<86x32xf32, #tpu.memory_space<vmem>>, vector<1x32xf32>,
    %c44 = arith.constant 44 : index
    %c0_151 = arith.constant 0 : index
    %172 = vector.load %arg12[%c44, %c0_151] : memref<200x32xf32, #tpu.memory_space<vmem>>, vector<1x32xf32>
    %c28 = arith.constant 28 : index
    %c0_152 = arith.constant 0 : index
    %173 = vector.load %arg13[%c28, %c0_152] : memref<86x32xf32, #tpu.memory_space<vmem>>, vector<1x32xf32>
    tpu.vector_store %arg13[%c28, %c0_152], %172 {strides = array<i32>} : memref<86x32xf32, #tpu.memory_space<vmem>>, vector<1x32xf32>,
    %c46 = arith.constant 46 : index
    %c0_153 = arith.constant 0 : index
    %174 = vector.load %arg12[%c46, %c0_153] : memref<200x32xf32, #tpu.memory_space<vmem>>, vector<1x32xf32>
    %c29 = arith.constant 29 : index
    %c0_154 = arith.constant 0 : index
    %175 = vector.load %arg13[%c29, %c0_154] : memref<86x32xf32, #tpu.memory_space<vmem>>, vector<1x32xf32>
    tpu.vector_store %arg13[%c29, %c0_154], %174 {strides = array<i32>} : memref<86x32xf32, #tpu.memory_space<vmem>>, vector<1x32xf32>,
    %c60 = arith.constant 60 : index
    %c0_155 = arith.constant 0 : index
    %176 = vector.load %arg12[%c60, %c0_155] : memref<200x32xf32, #tpu.memory_space<vmem>>, vector<1x32xf32>
    %c32_156 = arith.constant 32 : index
    %c0_157 = arith.constant 0 : index
    %177 = vector.load %arg13[%c32_156, %c0_157] : memref<86x32xf32, #tpu.memory_space<vmem>>, vector<1x32xf32>
    tpu.vector_store %arg13[%c32_156, %c0_157], %176 {strides = array<i32>} : memref<86x32xf32, #tpu.memory_space<vmem>>, vector<1x32xf32>,
    %c62 = arith.constant 62 : index
    %c0_158 = arith.constant 0 : index
    %178 = vector.load %arg12[%c62, %c0_158] : memref<200x32xf32, #tpu.memory_space<vmem>>, vector<1x32xf32>
    %c33_159 = arith.constant 33 : index
    %c0_160 = arith.constant 0 : index
    %179 = vector.load %arg13[%c33_159, %c0_160] : memref<86x32xf32, #tpu.memory_space<vmem>>, vector<1x32xf32>
    tpu.vector_store %arg13[%c33_159, %c0_160], %178 {strides = array<i32>} : memref<86x32xf32, #tpu.memory_space<vmem>>, vector<1x32xf32>,
    %c64 = arith.constant 64 : index
    %c0_161 = arith.constant 0 : index
    %180 = vector.load %arg12[%c64, %c0_161] : memref<200x32xf32, #tpu.memory_space<vmem>>, vector<1x32xf32>
    %c34 = arith.constant 34 : index
    %c0_162 = arith.constant 0 : index
    %181 = vector.load %arg13[%c34, %c0_162] : memref<86x32xf32, #tpu.memory_space<vmem>>, vector<1x32xf32>
    tpu.vector_store %arg13[%c34, %c0_162], %180 {strides = array<i32>} : memref<86x32xf32, #tpu.memory_space<vmem>>, vector<1x32xf32>,
    %c66 = arith.constant 66 : index
    %c0_163 = arith.constant 0 : index
    %182 = vector.load %arg12[%c66, %c0_163] : memref<200x32xf32, #tpu.memory_space<vmem>>, vector<1x32xf32>
    %c35 = arith.constant 35 : index
    %c0_164 = arith.constant 0 : index
    %183 = vector.load %arg13[%c35, %c0_164] : memref<86x32xf32, #tpu.memory_space<vmem>>, vector<1x32xf32>
    tpu.vector_store %arg13[%c35, %c0_164], %182 {strides = array<i32>} : memref<86x32xf32, #tpu.memory_space<vmem>>, vector<1x32xf32>,
    %c100 = arith.constant 100 : index
    %c0_165 = arith.constant 0 : index
    %184 = vector.load %arg12[%c100, %c0_165] : memref<200x32xf32, #tpu.memory_space<vmem>>, vector<1x32xf32>
    %c50 = arith.constant 50 : index
    %c0_166 = arith.constant 0 : index
    %185 = vector.load %arg13[%c50, %c0_166] : memref<86x32xf32, #tpu.memory_space<vmem>>, vector<1x32xf32>
    tpu.vector_store %arg13[%c50, %c0_166], %184 {strides = array<i32>} : memref<86x32xf32, #tpu.memory_space<vmem>>, vector<1x32xf32>,
    %c102 = arith.constant 102 : index
    %c0_167 = arith.constant 0 : index
    %186 = vector.load %arg12[%c102, %c0_167] : memref<200x32xf32, #tpu.memory_space<vmem>>, vector<1x32xf32>
    %c51 = arith.constant 51 : index
    %c0_168 = arith.constant 0 : index
    %187 = vector.load %arg13[%c51, %c0_168] : memref<86x32xf32, #tpu.memory_space<vmem>>, vector<1x32xf32>
    tpu.vector_store %arg13[%c51, %c0_168], %186 {strides = array<i32>} : memref<86x32xf32, #tpu.memory_space<vmem>>, vector<1x32xf32>,
    %c104 = arith.constant 104 : index
    %c0_169 = arith.constant 0 : index
    %188 = vector.load %arg12[%c104, %c0_169] : memref<200x32xf32, #tpu.memory_space<vmem>>, vector<1x32xf32>
    %c52 = arith.constant 52 : index
    %c0_170 = arith.constant 0 : index
    %189 = vector.load %arg13[%c52, %c0_170] : memref<86x32xf32, #tpu.memory_space<vmem>>, vector<1x32xf32>
    tpu.vector_store %arg13[%c52, %c0_170], %188 {strides = array<i32>} : memref<86x32xf32, #tpu.memory_space<vmem>>, vector<1x32xf32>,
    %c106 = arith.constant 106 : index
    %c0_171 = arith.constant 0 : index
    %190 = vector.load %arg12[%c106, %c0_171] : memref<200x32xf32, #tpu.memory_space<vmem>>, vector<1x32xf32>
    %c53 = arith.constant 53 : index
    %c0_172 = arith.constant 0 : index
    %191 = vector.load %arg13[%c53, %c0_172] : memref<86x32xf32, #tpu.memory_space<vmem>>, vector<1x32xf32>
    tpu.vector_store %arg13[%c53, %c0_172], %190 {strides = array<i32>} : memref<86x32xf32, #tpu.memory_space<vmem>>, vector<1x32xf32>,
    %c120 = arith.constant 120 : index
    %c0_173 = arith.constant 0 : index
    %192 = vector.load %arg12[%c120, %c0_173] : memref<200x32xf32, #tpu.memory_space<vmem>>, vector<1x32xf32>
    %c56 = arith.constant 56 : index
    %c0_174 = arith.constant 0 : index
    %193 = vector.load %arg13[%c56, %c0_174] : memref<86x32xf32, #tpu.memory_space<vmem>>, vector<1x32xf32>
    tpu.vector_store %arg13[%c56, %c0_174], %192 {strides = array<i32>} : memref<86x32xf32, #tpu.memory_space<vmem>>, vector<1x32xf32>,
    %c122 = arith.constant 122 : index
    %c0_175 = arith.constant 0 : index
    %194 = vector.load %arg12[%c122, %c0_175] : memref<200x32xf32, #tpu.memory_space<vmem>>, vector<1x32xf32>
    %c57 = arith.constant 57 : index
    %c0_176 = arith.constant 0 : index
    %195 = vector.load %arg13[%c57, %c0_176] : memref<86x32xf32, #tpu.memory_space<vmem>>, vector<1x32xf32>
    tpu.vector_store %arg13[%c57, %c0_176], %194 {strides = array<i32>} : memref<86x32xf32, #tpu.memory_space<vmem>>, vector<1x32xf32>,
    %c124 = arith.constant 124 : index
    %c0_177 = arith.constant 0 : index
    %196 = vector.load %arg12[%c124, %c0_177] : memref<200x32xf32, #tpu.memory_space<vmem>>, vector<1x32xf32>
    %c58 = arith.constant 58 : index
    %c0_178 = arith.constant 0 : index
    %197 = vector.load %arg13[%c58, %c0_178] : memref<86x32xf32, #tpu.memory_space<vmem>>, vector<1x32xf32>
    tpu.vector_store %arg13[%c58, %c0_178], %196 {strides = array<i32>} : memref<86x32xf32, #tpu.memory_space<vmem>>, vector<1x32xf32>,
    %c126 = arith.constant 126 : index
    %c0_179 = arith.constant 0 : index
    %198 = vector.load %arg12[%c126, %c0_179] : memref<200x32xf32, #tpu.memory_space<vmem>>, vector<1x32xf32>
    %c59 = arith.constant 59 : index
    %c0_180 = arith.constant 0 : index
    %199 = vector.load %arg13[%c59, %c0_180] : memref<86x32xf32, #tpu.memory_space<vmem>>, vector<1x32xf32>
    tpu.vector_store %arg13[%c59, %c0_180], %198 {strides = array<i32>} : memref<86x32xf32, #tpu.memory_space<vmem>>, vector<1x32xf32>,
    %c140 = arith.constant 140 : index
    %c0_181 = arith.constant 0 : index
    %200 = vector.load %arg12[%c140, %c0_181] : memref<200x32xf32, #tpu.memory_space<vmem>>, vector<1x32xf32>
    %c62_182 = arith.constant 62 : index
    %c0_183 = arith.constant 0 : index
    %201 = vector.load %arg13[%c62_182, %c0_183] : memref<86x32xf32, #tpu.memory_space<vmem>>, vector<1x32xf32>
    tpu.vector_store %arg13[%c62_182, %c0_183], %200 {strides = array<i32>} : memref<86x32xf32, #tpu.memory_space<vmem>>, vector<1x32xf32>,
    %c142 = arith.constant 142 : index
    %c0_184 = arith.constant 0 : index
    %202 = vector.load %arg12[%c142, %c0_184] : memref<200x32xf32, #tpu.memory_space<vmem>>, vector<1x32xf32>
    %c63 = arith.constant 63 : index
    %c0_185 = arith.constant 0 : index
    %203 = vector.load %arg13[%c63, %c0_185] : memref<86x32xf32, #tpu.memory_space<vmem>>, vector<1x32xf32>
    tpu.vector_store %arg13[%c63, %c0_185], %202 {strides = array<i32>} : memref<86x32xf32, #tpu.memory_space<vmem>>, vector<1x32xf32>,
    %c144 = arith.constant 144 : index
    %c0_186 = arith.constant 0 : index
    %204 = vector.load %arg12[%c144, %c0_186] : memref<200x32xf32, #tpu.memory_space<vmem>>, vector<1x32xf32>
    %c64_187 = arith.constant 64 : index
    %c0_188 = arith.constant 0 : index
    %205 = vector.load %arg13[%c64_187, %c0_188] : memref<86x32xf32, #tpu.memory_space<vmem>>, vector<1x32xf32>
    tpu.vector_store %arg13[%c64_187, %c0_188], %204 {strides = array<i32>} : memref<86x32xf32, #tpu.memory_space<vmem>>, vector<1x32xf32>,
    %c146 = arith.constant 146 : index
    %c0_189 = arith.constant 0 : index
    %206 = vector.load %arg12[%c146, %c0_189] : memref<200x32xf32, #tpu.memory_space<vmem>>, vector<1x32xf32>
    %c65 = arith.constant 65 : index
    %c0_190 = arith.constant 0 : index
    %207 = vector.load %arg13[%c65, %c0_190] : memref<86x32xf32, #tpu.memory_space<vmem>>, vector<1x32xf32>
    tpu.vector_store %arg13[%c65, %c0_190], %206 {strides = array<i32>} : memref<86x32xf32, #tpu.memory_space<vmem>>, vector<1x32xf32>,
    %c160 = arith.constant 160 : index
    %c0_191 = arith.constant 0 : index
    %208 = vector.load %arg12[%c160, %c0_191] : memref<200x32xf32, #tpu.memory_space<vmem>>, vector<1x32xf32>
    %c68 = arith.constant 68 : index
    %c0_192 = arith.constant 0 : index
    %209 = vector.load %arg13[%c68, %c0_192] : memref<86x32xf32, #tpu.memory_space<vmem>>, vector<1x32xf32>
    tpu.vector_store %arg13[%c68, %c0_192], %208 {strides = array<i32>} : memref<86x32xf32, #tpu.memory_space<vmem>>, vector<1x32xf32>,
    %c162 = arith.constant 162 : index
    %c0_193 = arith.constant 0 : index
    %210 = vector.load %arg12[%c162, %c0_193] : memref<200x32xf32, #tpu.memory_space<vmem>>, vector<1x32xf32>
    %c69 = arith.constant 69 : index
    %c0_194 = arith.constant 0 : index
    %211 = vector.load %arg13[%c69, %c0_194] : memref<86x32xf32, #tpu.memory_space<vmem>>, vector<1x32xf32>
    tpu.vector_store %arg13[%c69, %c0_194], %210 {strides = array<i32>} : memref<86x32xf32, #tpu.memory_space<vmem>>, vector<1x32xf32>,
    %c164 = arith.constant 164 : index
    %c0_195 = arith.constant 0 : index
    %212 = vector.load %arg12[%c164, %c0_195] : memref<200x32xf32, #tpu.memory_space<vmem>>, vector<1x32xf32>
    %c70 = arith.constant 70 : index
    %c0_196 = arith.constant 0 : index
    %213 = vector.load %arg13[%c70, %c0_196] : memref<86x32xf32, #tpu.memory_space<vmem>>, vector<1x32xf32>
    tpu.vector_store %arg13[%c70, %c0_196], %212 {strides = array<i32>} : memref<86x32xf32, #tpu.memory_space<vmem>>, vector<1x32xf32>,
    %c166 = arith.constant 166 : index
    %c0_197 = arith.constant 0 : index
    %214 = vector.load %arg12[%c166, %c0_197] : memref<200x32xf32, #tpu.memory_space<vmem>>, vector<1x32xf32>
    %c71 = arith.constant 71 : index
    %c0_198 = arith.constant 0 : index
    %215 = vector.load %arg13[%c71, %c0_198] : memref<86x32xf32, #tpu.memory_space<vmem>>, vector<1x32xf32>
    tpu.vector_store %arg13[%c71, %c0_198], %214 {strides = array<i32>} : memref<86x32xf32, #tpu.memory_space<vmem>>, vector<1x32xf32>,
    %c7_199 = arith.constant 7 : index
    %c0_200 = arith.constant 0 : index
    %216 = vector.load %arg13[%c7_199, %c0_200] : memref<86x32xf32, #tpu.memory_space<vmem>>, vector<72x32xf32>
    %c2_201 = arith.constant 2 : index
    %c0_202 = arith.constant 0 : index
    %217 = vector.load %arg7[%c2_201, %c0_202] : memref<12x32xf32, #tpu.memory_space<vmem>>, vector<1x32xf32>
    %c3_203 = arith.constant 3 : index
    %c0_204 = arith.constant 0 : index
    %218 = vector.load %arg7[%c3_203, %c0_204] : memref<12x32xf32, #tpu.memory_space<vmem>>, vector<1x32xf32>
    %219 = vector.broadcast %1 : vector<72x1xf32> to vector<72x32xf32>
    %220 = arith.mulf %216, %219 : vector<72x32xf32>
    %cst_205 = arith.constant dense<0.000000e+00> : vector<32xf32>
    %221 = vector.multi_reduction <add>, %220, %cst_205 [0] : vector<72x32xf32> to vector<32xf32>
    %222 = vector.shape_cast %221 : vector<32xf32> to vector<1x32xf32>
    %cst_206 = arith.constant 3.125000e-02 : f32
    %223 = vector.broadcast %cst_206 : f32 to vector<1x32xf32>
    %224 = arith.mulf %222, %223 : vector<1x32xf32>
    %225 = arith.mulf %220, %220 : vector<72x32xf32>
    %cst_207 = arith.constant dense<0.000000e+00> : vector<32xf32>
    %226 = vector.multi_reduction <add>, %225, %cst_207 [0] : vector<72x32xf32> to vector<32xf32>
    %227 = vector.shape_cast %226 : vector<32xf32> to vector<1x32xf32>
    %cst_208 = arith.constant 3.125000e-02 : f32
    %228 = vector.broadcast %cst_208 : f32 to vector<1x32xf32>
    %229 = arith.mulf %227, %228 : vector<1x32xf32>
    %230 = arith.mulf %224, %224 : vector<1x32xf32>
    %231 = arith.subf %229, %230 : vector<1x32xf32>
    %cst_209 = arith.constant 9.99999974E-6 : f32
    %232 = vector.broadcast %cst_209 : f32 to vector<1x32xf32>
    %233 = arith.addf %231, %232 : vector<1x32xf32>
    %234 = math.rsqrt %233 : vector<1x32xf32>
    %235 = vector.broadcast %224 : vector<1x32xf32> to vector<72x32xf32>
    %236 = arith.subf %216, %235 : vector<72x32xf32>
    %237 = vector.broadcast %234 : vector<1x32xf32> to vector<72x32xf32>
    %238 = arith.mulf %236, %237 : vector<72x32xf32>
    %239 = vector.broadcast %217 : vector<1x32xf32> to vector<72x32xf32>
    %240 = arith.mulf %238, %239 : vector<72x32xf32>
    %241 = vector.broadcast %218 : vector<1x32xf32> to vector<72x32xf32>
    %242 = arith.addf %240, %241 : vector<72x32xf32>
    %243 = vector.broadcast %1 : vector<72x1xf32> to vector<72x32xf32>
    %244 = arith.mulf %242, %243 : vector<72x32xf32>
    %c7_210 = arith.constant 7 : index
    %c0_211 = arith.constant 0 : index
    %245 = vector.load %arg13[%c7_210, %c0_211] : memref<86x32xf32, #tpu.memory_space<vmem>>, vector<72x32xf32>
    tpu.vector_store %arg13[%c7_210, %c0_211], %244 {strides = array<i32>} : memref<86x32xf32, #tpu.memory_space<vmem>>, vector<72x32xf32>,
    %c7_212 = arith.constant 7 : index
    %c0_213 = arith.constant 0 : index
    %246 = vector.load %arg13[%c7_212, %c0_213] : memref<86x32xf32, #tpu.memory_space<vmem>>, vector<72x32xf32>
    %cst_214 = arith.constant 0.000000e+00 : f32
    %247 = vector.broadcast %cst_214 : f32 to vector<72x32xf32>
    %248 = arith.maximumf %246, %247 : vector<72x32xf32>
    %c7_215 = arith.constant 7 : index
    %c0_216 = arith.constant 0 : index
    %249 = vector.load %arg13[%c7_215, %c0_216] : memref<86x32xf32, #tpu.memory_space<vmem>>, vector<72x32xf32>
    tpu.vector_store %arg13[%c7_215, %c0_216], %248 {strides = array<i32>} : memref<86x32xf32, #tpu.memory_space<vmem>>, vector<72x32xf32>,
    %c0_217 = arith.constant 0 : index
    %c0_218 = arith.constant 0 : index
    %250 = vector.load %arg13[%c0_217, %c0_218] : memref<86x32xf32, #tpu.memory_space<vmem>>, vector<72x32xf32>
    %251 = arith.truncf %250 : vector<72x32xf32> to vector<72x32xbf16>
    %c0_219 = arith.constant 0 : index
    %c0_220 = arith.constant 0 : index
    %c0_221 = arith.constant 0 : index
    %c0_222 = arith.constant 0 : index
    %252 = vector.load %arg3[%c0_219, %c0_220, %c0_221, %c0_222] : memref<2x9x32x32xbf16, #tpu.memory_space<vmem>>, vector<1x1x32x32xbf16>
    %253 = vector.shape_cast %252 : vector<1x1x32x32xbf16> to vector<32x32xbf16>
    %cst_223 = arith.constant dense<0.000000e+00> : vector<72x32xf32>
    %254 = tpu.matmul %251, %253, %cst_223 {dimension_numbers = #tpu.dot_dimension_numbers<[1], [0], [0], [1], [0, 0, 1, 1], [], []>} : vector<72x32xbf16>, vector<32x32xbf16>, vector<72x32xf32> -> vector<72x32xf32>
    %c1_224 = arith.constant 1 : index
    %c0_225 = arith.constant 0 : index
    %255 = vector.load %arg13[%c1_224, %c0_225] : memref<86x32xf32, #tpu.memory_space<vmem>>, vector<72x32xf32>
    %256 = arith.truncf %255 : vector<72x32xf32> to vector<72x32xbf16>
    %c0_226 = arith.constant 0 : index
    %c1_227 = arith.constant 1 : index
    %c0_228 = arith.constant 0 : index
    %c0_229 = arith.constant 0 : index
    %257 = vector.load %arg3[%c0_226, %c1_227, %c0_228, %c0_229] : memref<2x9x32x32xbf16, #tpu.memory_space<vmem>>, vector<1x1x32x32xbf16>
    %258 = vector.shape_cast %257 : vector<1x1x32x32xbf16> to vector<32x32xbf16>
    %cst_230 = arith.constant dense<0.000000e+00> : vector<72x32xf32>
    %259 = tpu.matmul %256, %258, %cst_230 {dimension_numbers = #tpu.dot_dimension_numbers<[1], [0], [0], [1], [0, 0, 1, 1], [], []>} : vector<72x32xbf16>, vector<32x32xbf16>, vector<72x32xf32> -> vector<72x32xf32>
    %260 = arith.addf %254, %259 : vector<72x32xf32>
    %c2_231 = arith.constant 2 : index
    %c0_232 = arith.constant 0 : index
    %261 = vector.load %arg13[%c2_231, %c0_232] : memref<86x32xf32, #tpu.memory_space<vmem>>, vector<72x32xf32>
    %262 = arith.truncf %261 : vector<72x32xf32> to vector<72x32xbf16>
    %c0_233 = arith.constant 0 : index
    %c2_234 = arith.constant 2 : index
    %c0_235 = arith.constant 0 : index
    %c0_236 = arith.constant 0 : index
    %263 = vector.load %arg3[%c0_233, %c2_234, %c0_235, %c0_236] : memref<2x9x32x32xbf16, #tpu.memory_space<vmem>>, vector<1x1x32x32xbf16>
    %264 = vector.shape_cast %263 : vector<1x1x32x32xbf16> to vector<32x32xbf16>
    %cst_237 = arith.constant dense<0.000000e+00> : vector<72x32xf32>
    %265 = tpu.matmul %262, %264, %cst_237 {dimension_numbers = #tpu.dot_dimension_numbers<[1], [0], [0], [1], [0, 0, 1, 1], [], []>} : vector<72x32xbf16>, vector<32x32xbf16>, vector<72x32xf32> -> vector<72x32xf32>
    %266 = arith.addf %260, %265 : vector<72x32xf32>
    %c6_238 = arith.constant 6 : index
    %c0_239 = arith.constant 0 : index
    %267 = vector.load %arg13[%c6_238, %c0_239] : memref<86x32xf32, #tpu.memory_space<vmem>>, vector<72x32xf32>
    %268 = arith.truncf %267 : vector<72x32xf32> to vector<72x32xbf16>
    %c0_240 = arith.constant 0 : index
    %c3_241 = arith.constant 3 : index
    %c0_242 = arith.constant 0 : index
    %c0_243 = arith.constant 0 : index
    %269 = vector.load %arg3[%c0_240, %c3_241, %c0_242, %c0_243] : memref<2x9x32x32xbf16, #tpu.memory_space<vmem>>, vector<1x1x32x32xbf16>
    %270 = vector.shape_cast %269 : vector<1x1x32x32xbf16> to vector<32x32xbf16>
    %cst_244 = arith.constant dense<0.000000e+00> : vector<72x32xf32>
    %271 = tpu.matmul %268, %270, %cst_244 {dimension_numbers = #tpu.dot_dimension_numbers<[1], [0], [0], [1], [0, 0, 1, 1], [], []>} : vector<72x32xbf16>, vector<32x32xbf16>, vector<72x32xf32> -> vector<72x32xf32>
    %272 = arith.addf %266, %271 : vector<72x32xf32>
    %c7_245 = arith.constant 7 : index
    %c0_246 = arith.constant 0 : index
    %273 = vector.load %arg13[%c7_245, %c0_246] : memref<86x32xf32, #tpu.memory_space<vmem>>, vector<72x32xf32>
    %274 = arith.truncf %273 : vector<72x32xf32> to vector<72x32xbf16>
    %c0_247 = arith.constant 0 : index
    %c4_248 = arith.constant 4 : index
    %c0_249 = arith.constant 0 : index
    %c0_250 = arith.constant 0 : index
    %275 = vector.load %arg3[%c0_247, %c4_248, %c0_249, %c0_250] : memref<2x9x32x32xbf16, #tpu.memory_space<vmem>>, vector<1x1x32x32xbf16>
    %276 = vector.shape_cast %275 : vector<1x1x32x32xbf16> to vector<32x32xbf16>
    %cst_251 = arith.constant dense<0.000000e+00> : vector<72x32xf32>
    %277 = tpu.matmul %274, %276, %cst_251 {dimension_numbers = #tpu.dot_dimension_numbers<[1], [0], [0], [1], [0, 0, 1, 1], [], []>} : vector<72x32xbf16>, vector<32x32xbf16>, vector<72x32xf32> -> vector<72x32xf32>
    %278 = arith.addf %272, %277 : vector<72x32xf32>
    %c8_252 = arith.constant 8 : index
    %c0_253 = arith.constant 0 : index
    %279 = vector.load %arg13[%c8_252, %c0_253] : memref<86x32xf32, #tpu.memory_space<vmem>>, vector<72x32xf32>
    %280 = arith.truncf %279 : vector<72x32xf32> to vector<72x32xbf16>
    %c0_254 = arith.constant 0 : index
    %c5_255 = arith.constant 5 : index
    %c0_256 = arith.constant 0 : index
    %c0_257 = arith.constant 0 : index
    %281 = vector.load %arg3[%c0_254, %c5_255, %c0_256, %c0_257] : memref<2x9x32x32xbf16, #tpu.memory_space<vmem>>, vector<1x1x32x32xbf16>
    %282 = vector.shape_cast %281 : vector<1x1x32x32xbf16> to vector<32x32xbf16>
    %cst_258 = arith.constant dense<0.000000e+00> : vector<72x32xf32>
    %283 = tpu.matmul %280, %282, %cst_258 {dimension_numbers = #tpu.dot_dimension_numbers<[1], [0], [0], [1], [0, 0, 1, 1], [], []>} : vector<72x32xbf16>, vector<32x32xbf16>, vector<72x32xf32> -> vector<72x32xf32>
    %284 = arith.addf %278, %283 : vector<72x32xf32>
    %c12_259 = arith.constant 12 : index
    %c0_260 = arith.constant 0 : index
    %285 = vector.load %arg13[%c12_259, %c0_260] : memref<86x32xf32, #tpu.memory_space<vmem>>, vector<72x32xf32>
    %286 = arith.truncf %285 : vector<72x32xf32> to vector<72x32xbf16>
    %c0_261 = arith.constant 0 : index
    %c6_262 = arith.constant 6 : index
    %c0_263 = arith.constant 0 : index
    %c0_264 = arith.constant 0 : index
    %287 = vector.load %arg3[%c0_261, %c6_262, %c0_263, %c0_264] : memref<2x9x32x32xbf16, #tpu.memory_space<vmem>>, vector<1x1x32x32xbf16>
    %288 = vector.shape_cast %287 : vector<1x1x32x32xbf16> to vector<32x32xbf16>
    %cst_265 = arith.constant dense<0.000000e+00> : vector<72x32xf32>
    %289 = tpu.matmul %286, %288, %cst_265 {dimension_numbers = #tpu.dot_dimension_numbers<[1], [0], [0], [1], [0, 0, 1, 1], [], []>} : vector<72x32xbf16>, vector<32x32xbf16>, vector<72x32xf32> -> vector<72x32xf32>
    %290 = arith.addf %284, %289 : vector<72x32xf32>
    %c13_266 = arith.constant 13 : index
    %c0_267 = arith.constant 0 : index
    %291 = vector.load %arg13[%c13_266, %c0_267] : memref<86x32xf32, #tpu.memory_space<vmem>>, vector<72x32xf32>
    %292 = arith.truncf %291 : vector<72x32xf32> to vector<72x32xbf16>
    %c0_268 = arith.constant 0 : index
    %c7_269 = arith.constant 7 : index
    %c0_270 = arith.constant 0 : index
    %c0_271 = arith.constant 0 : index
    %293 = vector.load %arg3[%c0_268, %c7_269, %c0_270, %c0_271] : memref<2x9x32x32xbf16, #tpu.memory_space<vmem>>, vector<1x1x32x32xbf16>
    %294 = vector.shape_cast %293 : vector<1x1x32x32xbf16> to vector<32x32xbf16>
    %cst_272 = arith.constant dense<0.000000e+00> : vector<72x32xf32>
    %295 = tpu.matmul %292, %294, %cst_272 {dimension_numbers = #tpu.dot_dimension_numbers<[1], [0], [0], [1], [0, 0, 1, 1], [], []>} : vector<72x32xbf16>, vector<32x32xbf16>, vector<72x32xf32> -> vector<72x32xf32>
    %296 = arith.addf %290, %295 : vector<72x32xf32>
    %c14_273 = arith.constant 14 : index
    %c0_274 = arith.constant 0 : index
    %297 = vector.load %arg13[%c14_273, %c0_274] : memref<86x32xf32, #tpu.memory_space<vmem>>, vector<72x32xf32>
    %298 = arith.truncf %297 : vector<72x32xf32> to vector<72x32xbf16>
    %c0_275 = arith.constant 0 : index
    %c8_276 = arith.constant 8 : index
    %c0_277 = arith.constant 0 : index
    %c0_278 = arith.constant 0 : index
    %299 = vector.load %arg3[%c0_275, %c8_276, %c0_277, %c0_278] : memref<2x9x32x32xbf16, #tpu.memory_space<vmem>>, vector<1x1x32x32xbf16>
    %300 = vector.shape_cast %299 : vector<1x1x32x32xbf16> to vector<32x32xbf16>
    %cst_279 = arith.constant dense<0.000000e+00> : vector<72x32xf32>
    %301 = tpu.matmul %298, %300, %cst_279 {dimension_numbers = #tpu.dot_dimension_numbers<[1], [0], [0], [1], [0, 0, 1, 1], [], []>} : vector<72x32xbf16>, vector<32x32xbf16>, vector<72x32xf32> -> vector<72x32xf32>
    %302 = arith.addf %296, %301 : vector<72x32xf32>
    %c4_280 = arith.constant 4 : index
    %c0_281 = arith.constant 0 : index
    %303 = vector.load %arg7[%c4_280, %c0_281] : memref<12x32xf32, #tpu.memory_space<vmem>>, vector<1x32xf32>
    %c5_282 = arith.constant 5 : index
    %c0_283 = arith.constant 0 : index
    %304 = vector.load %arg7[%c5_282, %c0_283] : memref<12x32xf32, #tpu.memory_space<vmem>>, vector<1x32xf32>
    %305 = vector.broadcast %1 : vector<72x1xf32> to vector<72x32xf32>
    %306 = arith.mulf %302, %305 : vector<72x32xf32>
    %cst_284 = arith.constant dense<0.000000e+00> : vector<32xf32>
    %307 = vector.multi_reduction <add>, %306, %cst_284 [0] : vector<72x32xf32> to vector<32xf32>
    %308 = vector.shape_cast %307 : vector<32xf32> to vector<1x32xf32>
    %cst_285 = arith.constant 3.125000e-02 : f32
    %309 = vector.broadcast %cst_285 : f32 to vector<1x32xf32>
    %310 = arith.mulf %308, %309 : vector<1x32xf32>
    %311 = arith.mulf %306, %306 : vector<72x32xf32>
    %cst_286 = arith.constant dense<0.000000e+00> : vector<32xf32>
    %312 = vector.multi_reduction <add>, %311, %cst_286 [0] : vector<72x32xf32> to vector<32xf32>
    %313 = vector.shape_cast %312 : vector<32xf32> to vector<1x32xf32>
    %cst_287 = arith.constant 3.125000e-02 : f32
    %314 = vector.broadcast %cst_287 : f32 to vector<1x32xf32>
    %315 = arith.mulf %313, %314 : vector<1x32xf32>
    %316 = arith.mulf %310, %310 : vector<1x32xf32>
    %317 = arith.subf %315, %316 : vector<1x32xf32>
    %cst_288 = arith.constant 9.99999974E-6 : f32
    %318 = vector.broadcast %cst_288 : f32 to vector<1x32xf32>
    %319 = arith.addf %317, %318 : vector<1x32xf32>
    %320 = math.rsqrt %319 : vector<1x32xf32>
    %321 = vector.broadcast %310 : vector<1x32xf32> to vector<72x32xf32>
    %322 = arith.subf %302, %321 : vector<72x32xf32>
    %323 = vector.broadcast %320 : vector<1x32xf32> to vector<72x32xf32>
    %324 = arith.mulf %322, %323 : vector<72x32xf32>
    %325 = vector.broadcast %303 : vector<1x32xf32> to vector<72x32xf32>
    %326 = arith.mulf %324, %325 : vector<72x32xf32>
    %327 = vector.broadcast %304 : vector<1x32xf32> to vector<72x32xf32>
    %328 = arith.addf %326, %327 : vector<72x32xf32>
    %cst_289 = arith.constant 0.000000e+00 : f32
    %329 = vector.broadcast %cst_289 : f32 to vector<72x32xf32>
    %330 = arith.maximumf %328, %329 : vector<72x32xf32>
    %331 = arith.truncf %330 : vector<72x32xf32> to vector<72x32xbf16>
    %c0_290 = arith.constant 0 : index
    %c0_291 = arith.constant 0 : index
    %c0_292 = arith.constant 0 : index
    %332 = vector.load %arg4[%c0_290, %c0_291, %c0_292] : memref<2x32x32xbf16, #tpu.memory_space<vmem>>, vector<1x32x32xbf16>
    %333 = vector.shape_cast %332 : vector<1x32x32xbf16> to vector<32x32xbf16>
    %cst_293 = arith.constant dense<0.000000e+00> : vector<72x32xf32>
    %334 = tpu.matmul %331, %333, %cst_293 {dimension_numbers = #tpu.dot_dimension_numbers<[1], [0], [0], [1], [0, 0, 1, 1], [], []>} : vector<72x32xbf16>, vector<32x32xbf16>, vector<72x32xf32> -> vector<72x32xf32>
    %c6_294 = arith.constant 6 : index
    %c0_295 = arith.constant 0 : index
    %335 = vector.load %arg7[%c6_294, %c0_295] : memref<12x32xf32, #tpu.memory_space<vmem>>, vector<1x32xf32>
    %c7_296 = arith.constant 7 : index
    %c0_297 = arith.constant 0 : index
    %336 = vector.load %arg7[%c7_296, %c0_297] : memref<12x32xf32, #tpu.memory_space<vmem>>, vector<1x32xf32>
    %337 = vector.broadcast %1 : vector<72x1xf32> to vector<72x32xf32>
    %338 = arith.mulf %334, %337 : vector<72x32xf32>
    %cst_298 = arith.constant dense<0.000000e+00> : vector<32xf32>
    %339 = vector.multi_reduction <add>, %338, %cst_298 [0] : vector<72x32xf32> to vector<32xf32>
    %340 = vector.shape_cast %339 : vector<32xf32> to vector<1x32xf32>
    %cst_299 = arith.constant 3.125000e-02 : f32
    %341 = vector.broadcast %cst_299 : f32 to vector<1x32xf32>
    %342 = arith.mulf %340, %341 : vector<1x32xf32>
    %343 = arith.mulf %338, %338 : vector<72x32xf32>
    %cst_300 = arith.constant dense<0.000000e+00> : vector<32xf32>
    %344 = vector.multi_reduction <add>, %343, %cst_300 [0] : vector<72x32xf32> to vector<32xf32>
    %345 = vector.shape_cast %344 : vector<32xf32> to vector<1x32xf32>
    %cst_301 = arith.constant 3.125000e-02 : f32
    %346 = vector.broadcast %cst_301 : f32 to vector<1x32xf32>
    %347 = arith.mulf %345, %346 : vector<1x32xf32>
    %348 = arith.mulf %342, %342 : vector<1x32xf32>
    %349 = arith.subf %347, %348 : vector<1x32xf32>
    %cst_302 = arith.constant 9.99999974E-6 : f32
    %350 = vector.broadcast %cst_302 : f32 to vector<1x32xf32>
    %351 = arith.addf %349, %350 : vector<1x32xf32>
    %352 = math.rsqrt %351 : vector<1x32xf32>
    %353 = vector.broadcast %342 : vector<1x32xf32> to vector<72x32xf32>
    %354 = arith.subf %334, %353 : vector<72x32xf32>
    %355 = vector.broadcast %352 : vector<1x32xf32> to vector<72x32xf32>
    %356 = arith.mulf %354, %355 : vector<72x32xf32>
    %357 = vector.broadcast %335 : vector<1x32xf32> to vector<72x32xf32>
    %358 = arith.mulf %356, %357 : vector<72x32xf32>
    %359 = vector.broadcast %336 : vector<1x32xf32> to vector<72x32xf32>
    %360 = arith.addf %358, %359 : vector<72x32xf32>
    %361 = vector.broadcast %1 : vector<72x1xf32> to vector<72x32xf32>
    %362 = arith.mulf %360, %361 : vector<72x32xf32>
    %363 = arith.addf %248, %362 : vector<72x32xf32>
    %c7_303 = arith.constant 7 : index
    %c0_304 = arith.constant 0 : index
    %364 = vector.load %arg13[%c7_303, %c0_304] : memref<86x32xf32, #tpu.memory_space<vmem>>, vector<72x32xf32>
    tpu.vector_store %arg13[%c7_303, %c0_304], %363 {strides = array<i32>} : memref<86x32xf32, #tpu.memory_space<vmem>>, vector<72x32xf32>,
    %c7_305 = arith.constant 7 : index
    %c0_306 = arith.constant 0 : index
    %365 = vector.load %arg13[%c7_305, %c0_306] : memref<86x32xf32, #tpu.memory_space<vmem>>, vector<72x32xf32>
    %cst_307 = arith.constant 0.000000e+00 : f32
    %366 = vector.broadcast %cst_307 : f32 to vector<72x32xf32>
    %367 = arith.maximumf %365, %366 : vector<72x32xf32>
    %c7_308 = arith.constant 7 : index
    %c0_309 = arith.constant 0 : index
    %368 = vector.load %arg13[%c7_308, %c0_309] : memref<86x32xf32, #tpu.memory_space<vmem>>, vector<72x32xf32>
    tpu.vector_store %arg13[%c7_308, %c0_309], %367 {strides = array<i32>} : memref<86x32xf32, #tpu.memory_space<vmem>>, vector<72x32xf32>,
    %c0_310 = arith.constant 0 : index
    %c0_311 = arith.constant 0 : index
    %369 = vector.load %arg13[%c0_310, %c0_311] : memref<86x32xf32, #tpu.memory_space<vmem>>, vector<72x32xf32>
    %370 = arith.truncf %369 : vector<72x32xf32> to vector<72x32xbf16>
    %c1_312 = arith.constant 1 : index
    %c0_313 = arith.constant 0 : index
    %c0_314 = arith.constant 0 : index
    %c0_315 = arith.constant 0 : index
    %371 = vector.load %arg3[%c1_312, %c0_313, %c0_314, %c0_315] : memref<2x9x32x32xbf16, #tpu.memory_space<vmem>>, vector<1x1x32x32xbf16>
    %372 = vector.shape_cast %371 : vector<1x1x32x32xbf16> to vector<32x32xbf16>
    %cst_316 = arith.constant dense<0.000000e+00> : vector<72x32xf32>
    %373 = tpu.matmul %370, %372, %cst_316 {dimension_numbers = #tpu.dot_dimension_numbers<[1], [0], [0], [1], [0, 0, 1, 1], [], []>} : vector<72x32xbf16>, vector<32x32xbf16>, vector<72x32xf32> -> vector<72x32xf32>
    %c1_317 = arith.constant 1 : index
    %c0_318 = arith.constant 0 : index
    %374 = vector.load %arg13[%c1_317, %c0_318] : memref<86x32xf32, #tpu.memory_space<vmem>>, vector<72x32xf32>
    %375 = arith.truncf %374 : vector<72x32xf32> to vector<72x32xbf16>
    %c1_319 = arith.constant 1 : index
    %c1_320 = arith.constant 1 : index
    %c0_321 = arith.constant 0 : index
    %c0_322 = arith.constant 0 : index
    %376 = vector.load %arg3[%c1_319, %c1_320, %c0_321, %c0_322] : memref<2x9x32x32xbf16, #tpu.memory_space<vmem>>, vector<1x1x32x32xbf16>
    %377 = vector.shape_cast %376 : vector<1x1x32x32xbf16> to vector<32x32xbf16>
    %cst_323 = arith.constant dense<0.000000e+00> : vector<72x32xf32>
    %378 = tpu.matmul %375, %377, %cst_323 {dimension_numbers = #tpu.dot_dimension_numbers<[1], [0], [0], [1], [0, 0, 1, 1], [], []>} : vector<72x32xbf16>, vector<32x32xbf16>, vector<72x32xf32> -> vector<72x32xf32>
    %379 = arith.addf %373, %378 : vector<72x32xf32>
    %c2_324 = arith.constant 2 : index
    %c0_325 = arith.constant 0 : index
    %380 = vector.load %arg13[%c2_324, %c0_325] : memref<86x32xf32, #tpu.memory_space<vmem>>, vector<72x32xf32>
    %381 = arith.truncf %380 : vector<72x32xf32> to vector<72x32xbf16>
    %c1_326 = arith.constant 1 : index
    %c2_327 = arith.constant 2 : index
    %c0_328 = arith.constant 0 : index
    %c0_329 = arith.constant 0 : index
    %382 = vector.load %arg3[%c1_326, %c2_327, %c0_328, %c0_329] : memref<2x9x32x32xbf16, #tpu.memory_space<vmem>>, vector<1x1x32x32xbf16>
    %383 = vector.shape_cast %382 : vector<1x1x32x32xbf16> to vector<32x32xbf16>
    %cst_330 = arith.constant dense<0.000000e+00> : vector<72x32xf32>
    %384 = tpu.matmul %381, %383, %cst_330 {dimension_numbers = #tpu.dot_dimension_numbers<[1], [0], [0], [1], [0, 0, 1, 1], [], []>} : vector<72x32xbf16>, vector<32x32xbf16>, vector<72x32xf32> -> vector<72x32xf32>
    %385 = arith.addf %379, %384 : vector<72x32xf32>
    %c6_331 = arith.constant 6 : index
    %c0_332 = arith.constant 0 : index
    %386 = vector.load %arg13[%c6_331, %c0_332] : memref<86x32xf32, #tpu.memory_space<vmem>>, vector<72x32xf32>
    %387 = arith.truncf %386 : vector<72x32xf32> to vector<72x32xbf16>
    %c1_333 = arith.constant 1 : index
    %c3_334 = arith.constant 3 : index
    %c0_335 = arith.constant 0 : index
    %c0_336 = arith.constant 0 : index
    %388 = vector.load %arg3[%c1_333, %c3_334, %c0_335, %c0_336] : memref<2x9x32x32xbf16, #tpu.memory_space<vmem>>, vector<1x1x32x32xbf16>
    %389 = vector.shape_cast %388 : vector<1x1x32x32xbf16> to vector<32x32xbf16>
    %cst_337 = arith.constant dense<0.000000e+00> : vector<72x32xf32>
    %390 = tpu.matmul %387, %389, %cst_337 {dimension_numbers = #tpu.dot_dimension_numbers<[1], [0], [0], [1], [0, 0, 1, 1], [], []>} : vector<72x32xbf16>, vector<32x32xbf16>, vector<72x32xf32> -> vector<72x32xf32>
    %391 = arith.addf %385, %390 : vector<72x32xf32>
    %c7_338 = arith.constant 7 : index
    %c0_339 = arith.constant 0 : index
    %392 = vector.load %arg13[%c7_338, %c0_339] : memref<86x32xf32, #tpu.memory_space<vmem>>, vector<72x32xf32>
    %393 = arith.truncf %392 : vector<72x32xf32> to vector<72x32xbf16>
    %c1_340 = arith.constant 1 : index
    %c4_341 = arith.constant 4 : index
    %c0_342 = arith.constant 0 : index
    %c0_343 = arith.constant 0 : index
    %394 = vector.load %arg3[%c1_340, %c4_341, %c0_342, %c0_343] : memref<2x9x32x32xbf16, #tpu.memory_space<vmem>>, vector<1x1x32x32xbf16>
    %395 = vector.shape_cast %394 : vector<1x1x32x32xbf16> to vector<32x32xbf16>
    %cst_344 = arith.constant dense<0.000000e+00> : vector<72x32xf32>
    %396 = tpu.matmul %393, %395, %cst_344 {dimension_numbers = #tpu.dot_dimension_numbers<[1], [0], [0], [1], [0, 0, 1, 1], [], []>} : vector<72x32xbf16>, vector<32x32xbf16>, vector<72x32xf32> -> vector<72x32xf32>
    %397 = arith.addf %391, %396 : vector<72x32xf32>
    %c8_345 = arith.constant 8 : index
    %c0_346 = arith.constant 0 : index
    %398 = vector.load %arg13[%c8_345, %c0_346] : memref<86x32xf32, #tpu.memory_space<vmem>>, vector<72x32xf32>
    %399 = arith.truncf %398 : vector<72x32xf32> to vector<72x32xbf16>
    %c1_347 = arith.constant 1 : index
    %c5_348 = arith.constant 5 : index
    %c0_349 = arith.constant 0 : index
    %c0_350 = arith.constant 0 : index
    %400 = vector.load %arg3[%c1_347, %c5_348, %c0_349, %c0_350] : memref<2x9x32x32xbf16, #tpu.memory_space<vmem>>, vector<1x1x32x32xbf16>
    %401 = vector.shape_cast %400 : vector<1x1x32x32xbf16> to vector<32x32xbf16>
    %cst_351 = arith.constant dense<0.000000e+00> : vector<72x32xf32>
    %402 = tpu.matmul %399, %401, %cst_351 {dimension_numbers = #tpu.dot_dimension_numbers<[1], [0], [0], [1], [0, 0, 1, 1], [], []>} : vector<72x32xbf16>, vector<32x32xbf16>, vector<72x32xf32> -> vector<72x32xf32>
    %403 = arith.addf %397, %402 : vector<72x32xf32>
    %c12_352 = arith.constant 12 : index
    %c0_353 = arith.constant 0 : index
    %404 = vector.load %arg13[%c12_352, %c0_353] : memref<86x32xf32, #tpu.memory_space<vmem>>, vector<72x32xf32>
    %405 = arith.truncf %404 : vector<72x32xf32> to vector<72x32xbf16>
    %c1_354 = arith.constant 1 : index
    %c6_355 = arith.constant 6 : index
    %c0_356 = arith.constant 0 : index
    %c0_357 = arith.constant 0 : index
    %406 = vector.load %arg3[%c1_354, %c6_355, %c0_356, %c0_357] : memref<2x9x32x32xbf16, #tpu.memory_space<vmem>>, vector<1x1x32x32xbf16>
    %407 = vector.shape_cast %406 : vector<1x1x32x32xbf16> to vector<32x32xbf16>
    %cst_358 = arith.constant dense<0.000000e+00> : vector<72x32xf32>
    %408 = tpu.matmul %405, %407, %cst_358 {dimension_numbers = #tpu.dot_dimension_numbers<[1], [0], [0], [1], [0, 0, 1, 1], [], []>} : vector<72x32xbf16>, vector<32x32xbf16>, vector<72x32xf32> -> vector<72x32xf32>
    %409 = arith.addf %403, %408 : vector<72x32xf32>
    %c13_359 = arith.constant 13 : index
    %c0_360 = arith.constant 0 : index
    %410 = vector.load %arg13[%c13_359, %c0_360] : memref<86x32xf32, #tpu.memory_space<vmem>>, vector<72x32xf32>
    %411 = arith.truncf %410 : vector<72x32xf32> to vector<72x32xbf16>
    %c1_361 = arith.constant 1 : index
    %c7_362 = arith.constant 7 : index
    %c0_363 = arith.constant 0 : index
    %c0_364 = arith.constant 0 : index
    %412 = vector.load %arg3[%c1_361, %c7_362, %c0_363, %c0_364] : memref<2x9x32x32xbf16, #tpu.memory_space<vmem>>, vector<1x1x32x32xbf16>
    %413 = vector.shape_cast %412 : vector<1x1x32x32xbf16> to vector<32x32xbf16>
    %cst_365 = arith.constant dense<0.000000e+00> : vector<72x32xf32>
    %414 = tpu.matmul %411, %413, %cst_365 {dimension_numbers = #tpu.dot_dimension_numbers<[1], [0], [0], [1], [0, 0, 1, 1], [], []>} : vector<72x32xbf16>, vector<32x32xbf16>, vector<72x32xf32> -> vector<72x32xf32>
    %415 = arith.addf %409, %414 : vector<72x32xf32>
    %c14_366 = arith.constant 14 : index
    %c0_367 = arith.constant 0 : index
    %416 = vector.load %arg13[%c14_366, %c0_367] : memref<86x32xf32, #tpu.memory_space<vmem>>, vector<72x32xf32>
    %417 = arith.truncf %416 : vector<72x32xf32> to vector<72x32xbf16>
    %c1_368 = arith.constant 1 : index
    %c8_369 = arith.constant 8 : index
    %c0_370 = arith.constant 0 : index
    %c0_371 = arith.constant 0 : index
    %418 = vector.load %arg3[%c1_368, %c8_369, %c0_370, %c0_371] : memref<2x9x32x32xbf16, #tpu.memory_space<vmem>>, vector<1x1x32x32xbf16>
    %419 = vector.shape_cast %418 : vector<1x1x32x32xbf16> to vector<32x32xbf16>
    %cst_372 = arith.constant dense<0.000000e+00> : vector<72x32xf32>
    %420 = tpu.matmul %417, %419, %cst_372 {dimension_numbers = #tpu.dot_dimension_numbers<[1], [0], [0], [1], [0, 0, 1, 1], [], []>} : vector<72x32xbf16>, vector<32x32xbf16>, vector<72x32xf32> -> vector<72x32xf32>
    %421 = arith.addf %415, %420 : vector<72x32xf32>
    %c8_373 = arith.constant 8 : index
    %c0_374 = arith.constant 0 : index
    %422 = vector.load %arg7[%c8_373, %c0_374] : memref<12x32xf32, #tpu.memory_space<vmem>>, vector<1x32xf32>
    %c9_375 = arith.constant 9 : index
    %c0_376 = arith.constant 0 : index
    %423 = vector.load %arg7[%c9_375, %c0_376] : memref<12x32xf32, #tpu.memory_space<vmem>>, vector<1x32xf32>
    %424 = vector.broadcast %1 : vector<72x1xf32> to vector<72x32xf32>
    %425 = arith.mulf %421, %424 : vector<72x32xf32>
    %cst_377 = arith.constant dense<0.000000e+00> : vector<32xf32>
    %426 = vector.multi_reduction <add>, %425, %cst_377 [0] : vector<72x32xf32> to vector<32xf32>
    %427 = vector.shape_cast %426 : vector<32xf32> to vector<1x32xf32>
    %cst_378 = arith.constant 3.125000e-02 : f32
    %428 = vector.broadcast %cst_378 : f32 to vector<1x32xf32>
    %429 = arith.mulf %427, %428 : vector<1x32xf32>
    %430 = arith.mulf %425, %425 : vector<72x32xf32>
    %cst_379 = arith.constant dense<0.000000e+00> : vector<32xf32>
    %431 = vector.multi_reduction <add>, %430, %cst_379 [0] : vector<72x32xf32> to vector<32xf32>
    %432 = vector.shape_cast %431 : vector<32xf32> to vector<1x32xf32>
    %cst_380 = arith.constant 3.125000e-02 : f32
    %433 = vector.broadcast %cst_380 : f32 to vector<1x32xf32>
    %434 = arith.mulf %432, %433 : vector<1x32xf32>
    %435 = arith.mulf %429, %429 : vector<1x32xf32>
    %436 = arith.subf %434, %435 : vector<1x32xf32>
    %cst_381 = arith.constant 9.99999974E-6 : f32
    %437 = vector.broadcast %cst_381 : f32 to vector<1x32xf32>
    %438 = arith.addf %436, %437 : vector<1x32xf32>
    %439 = math.rsqrt %438 : vector<1x32xf32>
    %440 = vector.broadcast %429 : vector<1x32xf32> to vector<72x32xf32>
    %441 = arith.subf %421, %440 : vector<72x32xf32>
    %442 = vector.broadcast %439 : vector<1x32xf32> to vector<72x32xf32>
    %443 = arith.mulf %441, %442 : vector<72x32xf32>
    %444 = vector.broadcast %422 : vector<1x32xf32> to vector<72x32xf32>
    %445 = arith.mulf %443, %444 : vector<72x32xf32>
    %446 = vector.broadcast %423 : vector<1x32xf32> to vector<72x32xf32>
    %447 = arith.addf %445, %446 : vector<72x32xf32>
    %cst_382 = arith.constant 0.000000e+00 : f32
    %448 = vector.broadcast %cst_382 : f32 to vector<72x32xf32>
    %449 = arith.maximumf %447, %448 : vector<72x32xf32>
    %450 = arith.truncf %449 : vector<72x32xf32> to vector<72x32xbf16>
    %c1_383 = arith.constant 1 : index
    %c0_384 = arith.constant 0 : index
    %c0_385 = arith.constant 0 : index
    %451 = vector.load %arg4[%c1_383, %c0_384, %c0_385] : memref<2x32x32xbf16, #tpu.memory_space<vmem>>, vector<1x32x32xbf16>
    %452 = vector.shape_cast %451 : vector<1x32x32xbf16> to vector<32x32xbf16>
    %cst_386 = arith.constant dense<0.000000e+00> : vector<72x32xf32>
    %453 = tpu.matmul %450, %452, %cst_386 {dimension_numbers = #tpu.dot_dimension_numbers<[1], [0], [0], [1], [0, 0, 1, 1], [], []>} : vector<72x32xbf16>, vector<32x32xbf16>, vector<72x32xf32> -> vector<72x32xf32>
    %c10_387 = arith.constant 10 : index
    %c0_388 = arith.constant 0 : index
    %454 = vector.load %arg7[%c10_387, %c0_388] : memref<12x32xf32, #tpu.memory_space<vmem>>, vector<1x32xf32>
    %c11_389 = arith.constant 11 : index
    %c0_390 = arith.constant 0 : index
    %455 = vector.load %arg7[%c11_389, %c0_390] : memref<12x32xf32, #tpu.memory_space<vmem>>, vector<1x32xf32>
    %456 = vector.broadcast %1 : vector<72x1xf32> to vector<72x32xf32>
    %457 = arith.mulf %453, %456 : vector<72x32xf32>
    %cst_391 = arith.constant dense<0.000000e+00> : vector<32xf32>
    %458 = vector.multi_reduction <add>, %457, %cst_391 [0] : vector<72x32xf32> to vector<32xf32>
    %459 = vector.shape_cast %458 : vector<32xf32> to vector<1x32xf32>
    %cst_392 = arith.constant 3.125000e-02 : f32
    %460 = vector.broadcast %cst_392 : f32 to vector<1x32xf32>
    %461 = arith.mulf %459, %460 : vector<1x32xf32>
    %462 = arith.mulf %457, %457 : vector<72x32xf32>
    %cst_393 = arith.constant dense<0.000000e+00> : vector<32xf32>
    %463 = vector.multi_reduction <add>, %462, %cst_393 [0] : vector<72x32xf32> to vector<32xf32>
    %464 = vector.shape_cast %463 : vector<32xf32> to vector<1x32xf32>
    %cst_394 = arith.constant 3.125000e-02 : f32
    %465 = vector.broadcast %cst_394 : f32 to vector<1x32xf32>
    %466 = arith.mulf %464, %465 : vector<1x32xf32>
    %467 = arith.mulf %461, %461 : vector<1x32xf32>
    %468 = arith.subf %466, %467 : vector<1x32xf32>
    %cst_395 = arith.constant 9.99999974E-6 : f32
    %469 = vector.broadcast %cst_395 : f32 to vector<1x32xf32>
    %470 = arith.addf %468, %469 : vector<1x32xf32>
    %471 = math.rsqrt %470 : vector<1x32xf32>
    %472 = vector.broadcast %461 : vector<1x32xf32> to vector<72x32xf32>
    %473 = arith.subf %453, %472 : vector<72x32xf32>
    %474 = vector.broadcast %471 : vector<1x32xf32> to vector<72x32xf32>
    %475 = arith.mulf %473, %474 : vector<72x32xf32>
    %476 = vector.broadcast %454 : vector<1x32xf32> to vector<72x32xf32>
    %477 = arith.mulf %475, %476 : vector<72x32xf32>
    %478 = vector.broadcast %455 : vector<1x32xf32> to vector<72x32xf32>
    %479 = arith.addf %477, %478 : vector<72x32xf32>
    %480 = vector.broadcast %1 : vector<72x1xf32> to vector<72x32xf32>
    %481 = arith.mulf %479, %480 : vector<72x32xf32>
    %482 = arith.addf %367, %481 : vector<72x32xf32>
    %c7_396 = arith.constant 7 : index
    %c0_397 = arith.constant 0 : index
    %483 = vector.load %arg13[%c7_396, %c0_397] : memref<86x32xf32, #tpu.memory_space<vmem>>, vector<72x32xf32>
    tpu.vector_store %arg13[%c7_396, %c0_397], %482 {strides = array<i32>} : memref<86x32xf32, #tpu.memory_space<vmem>>, vector<72x32xf32>,
    %c14_398 = arith.constant 14 : index
    %c0_399 = arith.constant 0 : index
    %484 = vector.load %arg13[%c14_398, %c0_399] : memref<86x32xf32, #tpu.memory_space<vmem>>, vector<4x32xf32>
    %c0_400 = arith.constant 0 : index
    %c0_401 = arith.constant 0 : index
    %485 = vector.load %arg14[%c0_400, %c0_401] : memref<32x32xf32, #tpu.memory_space<vmem>>, vector<4x32xf32>
    tpu.vector_store %arg14[%c0_400, %c0_401], %484 {strides = array<i32>} : memref<32x32xf32, #tpu.memory_space<vmem>>, vector<4x32xf32>,
    %c20_402 = arith.constant 20 : index
    %c0_403 = arith.constant 0 : index
    %486 = vector.load %arg13[%c20_402, %c0_403] : memref<86x32xf32, #tpu.memory_space<vmem>>, vector<4x32xf32>
    %c4_404 = arith.constant 4 : index
    %c0_405 = arith.constant 0 : index
    %487 = vector.load %arg14[%c4_404, %c0_405] : memref<32x32xf32, #tpu.memory_space<vmem>>, vector<4x32xf32>
    tpu.vector_store %arg14[%c4_404, %c0_405], %486 {strides = array<i32>} : memref<32x32xf32, #tpu.memory_space<vmem>>, vector<4x32xf32>,
    %c26_406 = arith.constant 26 : index
    %c0_407 = arith.constant 0 : index
    %488 = vector.load %arg13[%c26_406, %c0_407] : memref<86x32xf32, #tpu.memory_space<vmem>>, vector<4x32xf32>
    %c8_408 = arith.constant 8 : index
    %c0_409 = arith.constant 0 : index
    %489 = vector.load %arg14[%c8_408, %c0_409] : memref<32x32xf32, #tpu.memory_space<vmem>>, vector<4x32xf32>
    tpu.vector_store %arg14[%c8_408, %c0_409], %488 {strides = array<i32>} : memref<32x32xf32, #tpu.memory_space<vmem>>, vector<4x32xf32>,
    %c32_410 = arith.constant 32 : index
    %c0_411 = arith.constant 0 : index
    %490 = vector.load %arg13[%c32_410, %c0_411] : memref<86x32xf32, #tpu.memory_space<vmem>>, vector<4x32xf32>
    %c12_412 = arith.constant 12 : index
    %c0_413 = arith.constant 0 : index
    %491 = vector.load %arg14[%c12_412, %c0_413] : memref<32x32xf32, #tpu.memory_space<vmem>>, vector<4x32xf32>
    tpu.vector_store %arg14[%c12_412, %c0_413], %490 {strides = array<i32>} : memref<32x32xf32, #tpu.memory_space<vmem>>, vector<4x32xf32>,
    %c50_414 = arith.constant 50 : index
    %c0_415 = arith.constant 0 : index
    %492 = vector.load %arg13[%c50_414, %c0_415] : memref<86x32xf32, #tpu.memory_space<vmem>>, vector<4x32xf32>
    %c16_416 = arith.constant 16 : index
    %c0_417 = arith.constant 0 : index
    %493 = vector.load %arg14[%c16_416, %c0_417] : memref<32x32xf32, #tpu.memory_space<vmem>>, vector<4x32xf32>
    tpu.vector_store %arg14[%c16_416, %c0_417], %492 {strides = array<i32>} : memref<32x32xf32, #tpu.memory_space<vmem>>, vector<4x32xf32>,
    %c56_418 = arith.constant 56 : index
    %c0_419 = arith.constant 0 : index
    %494 = vector.load %arg13[%c56_418, %c0_419] : memref<86x32xf32, #tpu.memory_space<vmem>>, vector<4x32xf32>
    %c20_420 = arith.constant 20 : index
    %c0_421 = arith.constant 0 : index
    %495 = vector.load %arg14[%c20_420, %c0_421] : memref<32x32xf32, #tpu.memory_space<vmem>>, vector<4x32xf32>
    tpu.vector_store %arg14[%c20_420, %c0_421], %494 {strides = array<i32>} : memref<32x32xf32, #tpu.memory_space<vmem>>, vector<4x32xf32>,
    %c62_422 = arith.constant 62 : index
    %c0_423 = arith.constant 0 : index
    %496 = vector.load %arg13[%c62_422, %c0_423] : memref<86x32xf32, #tpu.memory_space<vmem>>, vector<4x32xf32>
    %c24_424 = arith.constant 24 : index
    %c0_425 = arith.constant 0 : index
    %497 = vector.load %arg14[%c24_424, %c0_425] : memref<32x32xf32, #tpu.memory_space<vmem>>, vector<4x32xf32>
    tpu.vector_store %arg14[%c24_424, %c0_425], %496 {strides = array<i32>} : memref<32x32xf32, #tpu.memory_space<vmem>>, vector<4x32xf32>,
    %c68_426 = arith.constant 68 : index
    %c0_427 = arith.constant 0 : index
    %498 = vector.load %arg13[%c68_426, %c0_427] : memref<86x32xf32, #tpu.memory_space<vmem>>, vector<4x32xf32>
    %c28_428 = arith.constant 28 : index
    %c0_429 = arith.constant 0 : index
    %499 = vector.load %arg14[%c28_428, %c0_429] : memref<32x32xf32, #tpu.memory_space<vmem>>, vector<4x32xf32>
    tpu.vector_store %arg14[%c28_428, %c0_429], %498 {strides = array<i32>} : memref<32x32xf32, #tpu.memory_space<vmem>>, vector<4x32xf32>,
    %c0_430 = arith.constant 0 : index
    %c0_431 = arith.constant 0 : index
    %500 = vector.load %arg14[%c0_430, %c0_431] : memref<32x32xf32, #tpu.memory_space<vmem>>, vector<32x32xf32>
    %501 = arith.truncf %500 : vector<32x32xf32> to vector<32x32xbf16>
    %c0_432 = arith.constant 0 : index
    %c0_433 = arith.constant 0 : index
    %502 = vector.load %arg5[%c0_432, %c0_433] : memref<32x16xbf16, #tpu.memory_space<vmem>>, vector<32x16xbf16>
    %cst_434 = arith.constant dense<0.000000e+00> : vector<32x16xf32>
    %503 = tpu.matmul %501, %502, %cst_434 {dimension_numbers = #tpu.dot_dimension_numbers<[1], [0], [0], [1], [0, 0, 1, 1], [], []>} : vector<32x32xbf16>, vector<32x16xbf16>, vector<32x16xf32> -> vector<32x16xf32>
    %c0_435 = arith.constant 0 : index
    %c0_436 = arith.constant 0 : index
    %504 = vector.load %arg6[%c0_435, %c0_436] : memref<1x16xf32, #tpu.memory_space<vmem>>, vector<1x16xf32>
    %505 = vector.broadcast %504 : vector<1x16xf32> to vector<32x16xf32>
    %506 = arith.addf %503, %505 : vector<32x16xf32>
    %507 = tpu.iota {dimensions = array<i32: 1>} : vector<32x16xi32>
    %cst_437 = arith.constant 2.000000e+01 : f32
    %508 = vector.broadcast %cst_437 : f32 to vector<32x16xf32>
    %509 = arith.cmpf ogt, %506, %508 : vector<32x16xf32>
    %cst_438 = arith.constant 2.000000e+01 : f32
    %510 = vector.broadcast %cst_438 : f32 to vector<32x16xf32>
    %511 = arith.minimumf %506, %510 : vector<32x16xf32>
    %512 = math.exp %511 : vector<32x16xf32>
    %513 = math.log1p %512 : vector<32x16xf32>
    %514 = arith.select %509, %506, %513 : vector<32x16xi1>, vector<32x16xf32>
    %c8_i32 = arith.constant 8 : i32
    %515 = vector.broadcast %c8_i32 : i32 to vector<32x16xi32>
    %516 = arith.cmpi slt, %507, %515 : vector<32x16xi32>
    %517 = arith.select %516, %506, %514 : vector<32x16xi1>, vector<32x16xf32>
    %c0_439 = arith.constant 0 : index
    %c0_440 = arith.constant 0 : index
    %518 = vector.load %arg10[%c0_439, %c0_440] : memref<32x16xf32, #tpu.memory_space<vmem>>, vector<32x16xf32>
    tpu.vector_store %arg10[%c0_439, %c0_440], %517 {strides = array<i32>} : memref<32x16xf32, #tpu.memory_space<vmem>>, vector<32x16xf32>,
    return
  }
}

</mosaic_0001>

<bundles_post_ra>
// kernel: fc_encoder_forward.1
= control target key start
LH: loop header
LB: loop body
LE: loop exit
PB: predicated region body
PF: predicated region fallthrough
CT: control target
= control target key end

     0   :  { %vm315_vm0 = vcmask 1045504   ;;  %vm275_vm1 = vcmask 97280   ;;  %v16248_v0 = vmov 0.0   ;;  %vm12204_vm2 = vmmov 0   ;;  %s16237_s1 = inlined_call_operand.vmem [shape: bf16[4,12,32], index: 1, kind: input, shape index: {}]   ;;  %s16238_s0 = inlined_call_operand.vmem [shape: bf16[216,12], index: 0, kind: input, shape index: {}]   ;;  %s16239_s8 = inlined_call_operand.vmem [shape: f32[200,1], index: 8, kind: input, shape index: {}]   ;;  %s16240_s9 = inlined_call_operand.vmem [shape: f32[72,1], index: 9, kind: input, shape index: {}]   ;;  %s16241_s2 = inlined_call_operand.vmem [shape: bf16[16,32,32], index: 2, kind: input, shape index: {}]   ;;  %s16242_s7 = inlined_call_operand.vmem [shape: f32[12,32], index: 7, kind: input, shape index: {}]   ;;  %s16243_s3 = inlined_call_operand.vmem [shape: bf16[2,9,32,32], index: 3, kind: input, shape index: {}]   ;;  %s16244_s4 = inlined_call_operand.vmem [shape: bf16[2,32,32], index: 4, kind: input, shape index: {}]   ;;  %s16245_s5 = inlined_call_operand.vmem [shape: bf16[32,16], index: 5, kind: input, shape index: {}]   ;;  %s16246_s6 = inlined_call_operand.vmem [shape: f32[1,16], index: 6, kind: input, shape index: {}]   ;;  %s16247_s10 = inlined_call_operand.vmem [shape: f32[32,16], index: 10, kind: output, shape index: {}]  }
   0x1   :  { %10430 = vmatprep.subr.bf16.mxu1 %v16248_v0  ;;  %v11981_v1 = vld [vmem:[%s16237_s1] sm:$0x3f]   ;;  %10376 = vmatprep.subr.bf16.mxu0 %v16248_v0  ;;  %v11982_v2 = vld [vmem:[%s16237_s1 + $0x8] sm:$0x3f]   ;;  %vm166_vm3 = vsmask.f32 7424 }
   0x2   :  { %10432 = vmatprep.mubr.msk.bf16.mxu1 %vm12204_vm2, %v16248_v0  ;;  %10378 = vmatprep.mubr.msk.bf16.mxu0 %vm12204_vm2, %v16248_v0  ;;  %v489_v3 = vsel %vm315_vm0, %v11981_v1, 0  ;;  %v11983_v4 = vld [vmem:[%s16238_s0] sm:$0xff]   ;;  %v317_v5 = vsel %vm315_vm0, %v11982_v2, 0  ;;  %v11984_v6 = vld [vmem:[%s16238_s0 + $0x8] sm:$0xff]   ;;  %v11985_v10 = vld [vmem:[%s16237_s1 + $0x10] sm:$0x3f]  }
   0x3   :  { %10431 = vmatpush3.bf16.msra.mxu1 %v489_v3  ;;  %10377 = vmatpush3.bf16.msra.mxu0 %v317_v5  ;;  %v168_v7 = vshrl.u32 %v11983_v4, 16  ;;  %v170_v8 = vshll.u32 %v11983_v4, 16  ;;  %v175_v9 = vshll.u32 %v11984_v6, 16  ;;  %v11987_v11 = vld [vmem:[%s16238_s0 + $0x10] sm:$0xff]   ;;  %v11986_v14 = vld [vmem:[%s16237_s1 + $0x18] sm:$0x3f]  }
   0x4   :  { %10538 = vmatprep.subr.bf16.mxu1 %v16248_v0  ;;  %10484 = vmatprep.subr.bf16.mxu0 %v16248_v0  ;;  %v179_v16 = vshrl.u32 %v11984_v6, 16  ;;  %v183_v17 = vshll.u32 %v11987_v11, 16  ;;  %v792_v18 = vsel %vm315_vm0, %v11985_v10, 0  ;;  %v1124_v19 = vsel %vm315_vm0, %v11986_v14, 0  ;;  %v11988_v23 = vld [vmem:[%s16238_s0 + $0x18] sm:$0xff]   ;;  %v11989_v29 = vld [vmem:[%s16238_s0 + $0x20] sm:$0xff]  }
   0x5   :  { %v172_v12 = vrot.slane %v170_v8, 1  ;;  %v177_v13 = vrot.slane %v175_v9, 1  ;;  %v187_v25 = vshrl.u32 %v11987_v11, 16  ;;  %v191_v26 = vshll.u32 %v11988_v23, 16  ;;  %v11990_v35 = vld [vmem:[%s16238_s0 + $0x28] sm:$0xff]   ;;  %v11991_v41 = vld [vmem:[%s16238_s0 + $0x30] sm:$0xff]  }
   0x6   :  { %10433 = vmatmul.mubr.msk.bf16.vlgmr.msra.gmra.mxu1 %vm275_vm1, %v11983_v4  ;;  %v185_v22 = vrot.slane %v183_v17, 1  ;;  %v195_v31 = vshrl.u32 %v11988_v23, 16  ;;  %v199_v32 = vshll.u32 %v11989_v29, 16  ;;  %v203_v37 = vshrl.u32 %v11989_v29, 16  ;;  %v36_v45 = vld [vmem:[%s16239_s8] sm:$0xff]  ;;  %v38_v47 = vld [vmem:[%s16239_s8 + $0x10] sm:$0xff] }
   0x7   :  { %10436 = vmatprep.mubr.msk.bf16.mxu1 %vm12204_vm2, %v16248_v0  ;;  %v173_v15 = vor.u32 %v172_v12, %v168_v7  ;;  %10539 = vmatpush3.bf16.msra.mxu1 %v1124_v19  ;;  %v181_v21 = vor.u32 %v179_v16, %v177_v13  ;;  %v193_v28 = vrot.slane %v191_v26, 1  ;;  %v207_v38 = vshll.u32 %v11990_v35, 16  ;;  %v11992_v50 = vld [vmem:[%s16238_s0 + $0x38] sm:$0xff]   ;;  %v37_v51 = vld [vmem:[%s16239_s8 + $0x8] sm:$0xff]  ;;  %v40_v56 = vld [vmem:[%s16239_s8 + $0x20] sm:$0xff] }
   0x8   :  { %10648 = vmatprep.subr.bf16.mxu1 %v16248_v0  ;;  %v189_v27 = vor.u32 %v187_v25, %v185_v22  ;;  %v201_v34 = vrot.slane %v199_v32, 1  ;;  %v211_v43 = vshrl.u32 %v11990_v35, 16  ;;  %v215_v44 = vshll.u32 %v11991_v41, 16  ;;  %v39_v52 = vld [vmem:[%s16239_s8 + $0x18] sm:$0xff]  ;;  %v41_v57 = vld [vmem:[%s16239_s8 + $0x28] sm:$0xff]  ;;  %v11993_v60 = vld [vmem:[%s16238_s0 + $0x40] sm:$0xff]  }
   0x9   :  { %v178_v20 = vsel %vm166_vm3, %v173_v15, %v177_v13  ;;  %v186_v24 = vsel %vm166_vm3, %v181_v21, %v185_v22  ;;  %v197_v33 = vor.u32 %v195_v31, %v193_v28  ;;  %v209_v40 = vrot.slane %v207_v38, 1  ;;  %v42_v61 = vld [vmem:[%s16239_s8 + $0x30] sm:$0xff]  ;;  %v43_v62 = vld [vmem:[%s16239_s8 + $0x38] sm:$0xff]  ;;  %v44_v3 = vld [vmem:[%s16239_s8 + $0x40] sm:$0xff] }
   0xa   :  { %10379 = vmatmul.mubr.msk.bf16.vlgmr.msra.gmra.mxu0 %vm275_vm1, %v178_v20  ;;  %v194_v30 = vsel %vm166_vm3, %v189_v27, %v193_v28  ;;  %v205_v39 = vor.u32 %v203_v37, %v201_v34  ;;  %v12205_v46 = vmov 0   ;;  %v217_v49 = vrot.slane %v215_v44, 1  ;;  %v45_v4 = vld [vmem:[%s16239_s8 + $0x48] sm:$0xff]  ;;  %v46_v8 = vld [vmem:[%s16239_s8 + $0x50] sm:$0xff]  ;;  %v47_v9 = vld [vmem:[%s16239_s8 + $0x58] sm:$0xff] }
   0xb   :  { %10485 = vmatpush3.bf16.msra.mxu0 %v792_v18  ;;  %10382 = vmatprep.mubr.msk.bf16.mxu0 %vm12204_vm2, %v16248_v0  ;;  %v202_v36 = vsel %vm166_vm3, %v197_v33, %v201_v34  ;;  %v213_v48 = vor.u32 %v211_v43, %v209_v40  ;;  %v219_v54 = vshrl.u32 %v11991_v41, 16  ;;  %v223_v55 = vshll.u32 %v11992_v50, 16  ;;  %v11994_v7 = vld [vmem:[%s16238_s0 + $0x48] sm:$0xff]   ;;  %v48_v13 = vld [vmem:[%s16239_s8 + $0x60] sm:$0xff]  ;;  %v11995_v17 = vld [vmem:[%s16238_s0 + $0x50] sm:$0xff]  }
   0xc   :  { %10592 = vmatprep.subr.bf16.mxu0 %v16248_v0  ;;  %v210_v42 = vsel %vm166_vm3, %v205_v39, %v209_v40  ;;  %11979 = vset.pattern.permute.xlu0 %v12205_v46  ;;  %v227_v1 = vshrl.u32 %v11992_v50, 16  ;;  %v231_v2 = vshll.u32 %v11993_v60, 16  ;;  %v239_v12 = vshll.u32 %v11994_v7, 16  ;;  %v49_v14 = vld [vmem:[%s16239_s8 + $0x68] sm:$0xff]  ;;  %v50_v18 = vld [vmem:[%s16239_s8 + $0x70] sm:$0xff]  ;;  %v51_v19 = vld [vmem:[%s16239_s8 + $0x78] sm:$0xff] }
   0xd   :  { %1291 = vperm.xlu0 %11979, %v36_v45   ;;  %11980 = vset.pattern.permute.xlu1 %v12205_v46  ;;  %v218_v53 = vsel %vm166_vm3, %v213_v48, %v217_v49  ;;  %v221_v58 = vor.u32 %v219_v54, %v217_v49  ;;  %v225_v59 = vrot.slane %v223_v55, 1  ;;  %v243_v21 = vshrl.u32 %v11994_v7, 16  ;;  %v11996_v26 = vld [vmem:[%s16238_s0 + $0x58] sm:$0xff]   ;;  %v53_v27 = vld [vmem:[%s16239_s8 + $0x88] sm:$0xff]  ;;  %v54_v28 = vld [vmem:[%s16239_s8 + $0x90] sm:$0xff] }
   0xe   :  { %10437 = vmatmul.mubr.msk.bf16.gmra.mxu1 %vm275_vm1, %v11984_v6  ;;  %1301 = vperm.xlu1 %11980, %v38_v47   ;;  %v233_v6 = vrot.slane %v231_v2, 1  ;;  %v241_v16 = vrot.slane %v239_v12, 1  ;;  %v247_v22 = vshll.u32 %v11995_v17, 16  ;;  %v255_v31 = vshll.u32 %v11996_v26, 16  ;;  %v94_v32 = vld [vmem:[%s16238_s0 + $0x60] sm:$0xf] }
   0xf   :  { %10440 = vmatprep.mubr.msk.bf16.mxu1 %vm12204_vm2, %v16248_v0  ;;  %v226_v63 = vsel %vm166_vm3, %v221_v58, %v225_v59  ;;  %v229_v5 = vor.u32 %v227_v1, %v225_v59  ;;  %v97_v33 = vld [vmem:[%s16238_s0 + $0x64] sm:$0x1]  ;;  %v55_v34 = vld [vmem:[%s16239_s8 + $0x98] sm:$0xff]  ;;  %v57_v39 = vld [vmem:[%s16239_s8 + $0xa8] sm:$0xff]  ;;  %v9346_v59 = vcombine.low %v94_v32, %v94_v32  ;;  %vm962_vm4 = vsmask.f32 6400 }
  0x10   :  { %v249_v25 = vrot.slane %v247_v22, 1  ;;  %v257_v37 = vrot.slane %v255_v31, 1  ;;  %v9331_v38 = vcombine.low %v94_v32, %v97_v33  ;;  %v58_v40 = vld [vmem:[%s16239_s8 + $0xb0] sm:$0xff]  ;;  %v59_v44 = vld [vmem:[%s16239_s8 + $0xb8] sm:$0xff]  ;;  %v60_v45 = vld [vmem:[%s16239_s8 + $0xc0] sm:$0xff]  ;;  %vm721_vm5 = vcmask 1046528  }
  0x11   :  { %1296 = vperm.xlu0 %11979, %v37_v51   ;;  %v234_v10 = vsel %vm166_vm3, %v229_v5, %v233_v6  ;;  %v12482_v46 = vld [vmem:[%s16238_s0 + $0x4] sm:$0xfe]   ;;  %v12487_v47 = vld [vmem:[%s16238_s0 + $0xc] sm:$0xff]   ;;  %v64_v58 = vld [vmem:[%s16240_s9 + $0x18] sm:$0xff]  ;;  %vm1439_vm6 = vcmask 261120   ;;  %vm5836_vm7 = vcmask 253952  }
  0x12   :  { %10383 = vmatmul.mubr.msk.bf16.gmra.mxu0 %vm275_vm1, %v186_v24  ;;  %1306 = vperm.xlu1 %11980, %v39_v52   ;;  %v245_v24 = vor.u32 %v243_v21, %v241_v16  ;;  %v263_v43 = vshll.u32 %v9331_v38, 16  ;;  %v62_v51 = vld [vmem:[%s16240_s9 + $0x8] sm:$0xff]  ;;  %v964_v52 = vshrl.u32 %v12482_v46, 16  ;;  %v972_v54 = vshrl.u32 %v12487_v47, 16  ;;  %v12515_v2 = vld [vmem:[%s16238_s0 + $0x14] sm:$0xff]   ;;  %1764 = vst.msk [vmem:[#allocation2 + $0xc8] sm:$0xff] %vm1439_vm6, %v16248_v0 }
  0x13   :  { %10386 = vmatprep.mubr.msk.bf16.mxu0 %vm12204_vm2, %v16248_v0  ;;  %v975_v55 = vshll.u32 %v12487_v47, 16  ;;  %1765 = vst.msk [vmem:[#allocation2 + $0xd0] sm:$0xff] %vm1439_vm6, %v16248_v0  ;;  %1766 = vst.msk [vmem:[#allocation2 + $0xd8] sm:$0xff] %vm1439_vm6, %v16248_v0  ;;  %vm5833_vm8 = vcmask 259072   ;;  %vm9145_vm9 = vcmask 257024   ;;  %vm9308_vm13 = vcmask 130048  }
  0x14   :  { %v265_v49 = vrot.slane %v263_v43, 1  ;;  %1767 = vst.msk [vmem:[#allocation2 + $0xe0] sm:$0xff] %vm1439_vm6, %v16248_v0  ;;  %1768 = vst.msk [vmem:[#allocation2 + $0xe8] sm:$0xff] %vm1439_vm6, %v16248_v0 }
  0x15   :  { %1311 = vperm.xlu0 %11979, %v40_v56   ;;  %v977_v1 = vrot.slane %v975_v55, 2  ;;  %5823 = vst.msk [vmem:[#allocation4] sm:$0xff] %vm1439_vm6, %v16248_v0  ;;  %5824 = vst.msk [vmem:[#allocation4 + $0x8] sm:$0xff] %vm1439_vm6, %v16248_v0 }
  0x16   :  { %10441 = vmatmul.mubr.msk.bf16.gmra.mxu1 %vm275_vm1, %v11987_v11  ;;  %1316 = vperm.xlu1 %11980, %v41_v57   ;;  %v235_v11 = vshrl.u32 %v11993_v60, 16  ;;  %v63_v57 = vld [vmem:[%s16240_s9 + $0x10] sm:$0xff]  ;;  %5825 = vst.msk [vmem:[#allocation4 + $0x10] sm:$0xff] %vm1439_vm6, %v16248_v0  ;;  %5826 = vst.msk [vmem:[#allocation4 + $0x18] sm:$0xff] %vm1439_vm6, %v16248_v0 }
  0x17   :  { %10444 = vmatprep.mubr.msk.bf16.mxu1 %vm12204_vm2, %v16248_v0  ;;  %5827 = vst.msk [vmem:[#allocation4 + $0x20] sm:$0xff] %vm1439_vm6, %v16248_v0  ;;  %5828 = vst.msk [vmem:[#allocation4 + $0x28] sm:$0xff] %vm1439_vm6, %v16248_v0 }
  0x18   :  { %v237_v15 = vor.u32 %v235_v11, %v233_v6  ;;  %v68_v11 = vld [vmem:[%s16240_s9 + $0x38] sm:$0xff]  ;;  %5829 = vst.msk [vmem:[#allocation4 + $0x30] sm:$0xff] %vm1439_vm6, %v16248_v0  ;;  %5830 = vst.msk [vmem:[#allocation4 + $0x38] sm:$0xff] %vm1439_vm6, %v16248_v0 }
  0x19   :  { %1321 = vperm.xlu0 %11979, %v42_v61   ;;  %v966_v61 = vrot.slane %v964_v52, 1  ;;  %5831 = vst.msk [vmem:[#allocation4 + $0x40] sm:$0xff] %vm1439_vm6, %v16248_v0  ;;  %5832 = vst.msk [vmem:[#allocation4 + $0x48] sm:$0xff] %vm1439_vm6, %v16248_v0 }
  0x1a   :  { %10387 = vmatmul.mubr.msk.bf16.gmra.mxu0 %vm275_vm1, %v194_v30  ;;  %1326 = vperm.xlu1 %11980, %v43_v62   ;;  %v242_v20 = vsel %vm166_vm3, %v237_v15, %v241_v16  ;;  %v251_v30 = vshrl.u32 %v11995_v17, 16  ;;  %v12002_v15 = vld [vmem:[%s16238_s0 + $0x1c] sm:$0xff]   ;;  %v722_v16 = vrot.slane %v12482_v46, 1 }
  0x1b   :  { %10390 = vmatprep.mubr.msk.bf16.mxu0 %vm12204_vm2, %v16248_v0  ;;  %v993_v21 = vshll.u32 %v12002_v15, 16 }
  0x1d   :  { %1331 = vperm.xlu0 %11979, %v44_v3   ;;  %v65_v3 = vld [vmem:[%s16240_s9 + $0x20] sm:$0xff] }
  0x1e   :  { %10445 = vmatmul.mubr.msk.bf16.gmra.mxu1 %vm275_vm1, %v11988_v23  ;;  %1336 = vperm.xlu1 %11980, %v45_v4   ;;  %v52_v23 = vld [vmem:[%s16239_s8 + $0x80] sm:$0xff]  ;;  %v66_v4 = vld [vmem:[%s16240_s9 + $0x28] sm:$0xff] }
  0x1f   :  { %10448 = vmatprep.mubr.msk.bf16.mxu1 %vm12204_vm2, %v16248_v0 }
  0x21   :  { %1341 = vperm.xlu0 %11979, %v46_v8   ;;  %v981_v8 = vshrl.u32 %v12515_v2, 16 }
  0x22   :  { %10391 = vmatmul.mubr.msk.bf16.gmra.mxu0 %vm275_vm1, %v202_v36  ;;  %1346 = vperm.xlu1 %11980, %v47_v9   ;;  %v253_v36 = vor.u32 %v251_v30, %v249_v25  ;;  %v984_v9 = vshll.u32 %v12515_v2, 16 }
  0x23   :  { %10394 = vmatprep.mubr.msk.bf16.mxu0 %vm12204_vm2, %v16248_v0 }
  0x25   :  { %1351 = vperm.xlu0 %11979, %v48_v13   ;;  %v983_v13 = vrot.slane %v981_v8, 1  ;;  %v12008_v8 = vld [vmem:[%s16238_s0 + $0x4c] sm:$0xff]  }
  0x26   :  { %10449 = vmatmul.mubr.msk.bf16.gmra.mxu1 %vm275_vm1, %v11989_v29  ;;  %1356 = vperm.xlu1 %11980, %v49_v14   ;;  %v250_v29 = vsel %vm166_vm3, %v245_v24, %v249_v25  ;;  %v986_v14 = vrot.slane %v984_v9, 2  ;;  %v995_v25 = vrot.slane %v993_v21, 2 }
  0x27   :  { %10452 = vmatprep.mubr.msk.bf16.mxu1 %vm12204_vm2, %v16248_v0 }
  0x29   :  { %1361 = vperm.xlu0 %11979, %v50_v18   ;;  %v69_v18 = vld [vmem:[%s16240_s9 + $0x40] sm:$0xff] }
  0x2a   :  { %10395 = vmatmul.mubr.msk.bf16.gmra.mxu0 %vm275_vm1, %v210_v42  ;;  %1366 = vperm.xlu1 %11980, %v51_v19   ;;  %v259_v42 = vshrl.u32 %v11996_v26, 16  ;;  %v987_v19 = vor.u32 %v986_v14, %v983_v13 }
  0x2b   :  { %10398 = vmatprep.mubr.msk.bf16.mxu0 %vm12204_vm2, %v16248_v0 }
  0x2c   :  { %v261_v48 = vor.u32 %v259_v42, %v257_v37 }
  0x2d   :  { %1371 = vperm.xlu0 %11979, %v52_v23  }
  0x2e   :  { %10453 = vmatmul.mubr.msk.bf16.gmra.mxu1 %vm275_vm1, %v11990_v35  ;;  %1376 = vperm.xlu1 %11980, %v53_v27   ;;  %v56_v35 = vld [vmem:[%s16239_s8 + $0xa0] sm:$0xff]  ;;  %v266_v56 = vsel %vm166_vm3, %v261_v48, %v265_v49  ;;  %v725_v27 = vrot.slane %v12515_v2, 1 }
  0x2f   :  { %10456 = vmatprep.mubr.msk.bf16.mxu1 %vm12204_vm2, %v16248_v0 }
  0x31   :  { %1381 = vperm.xlu0 %11979, %v54_v28  }
  0x32   :  { %10399 = vmatmul.mubr.msk.bf16.gmra.mxu0 %vm275_vm1, %v218_v53  ;;  %1386 = vperm.xlu1 %11980, %v55_v34   ;;  %v967_v53 = vshll.u32 %v12482_v46, 16 }
  0x33   :  { %10402 = vmatprep.mubr.msk.bf16.mxu0 %vm12204_vm2, %v16248_v0 }
  0x34   :  { %v969_v62 = vrot.slane %v967_v53, 2  ;;  %v12006_v53 = vld [vmem:[%s16238_s0 + $0x3c] sm:$0xff]  }
  0x35   :  { %1391 = vperm.xlu0 %11979, %v56_v35   ;;  %v12004_v35 = vld [vmem:[%s16238_s0 + $0x2c] sm:$0xff]   ;;  %v735_v9 = vrot.slane %v12006_v53, 1 }
  0x36   :  { %10457 = vmatmul.mubr.msk.bf16.gmra.mxu1 %vm275_vm1, %v11991_v41  ;;  %1396 = vperm.xlu1 %11980, %v57_v39   ;;  %v258_v41 = vsel %vm166_vm3, %v253_v36, %v257_v37  ;;  %v970_v6 = vor.u32 %v969_v62, %v966_v61  ;;  %v727_v36 = vrot.slane %v12002_v15, 1  ;;  %v1011_v39 = vshll.u32 %v12004_v35, 16  ;;  %v12007_v62 = vld [vmem:[%s16238_s0 + $0x44] sm:$0xff]  }
  0x37   :  { %10460 = vmatprep.mubr.msk.bf16.mxu1 %vm12204_vm2, %v16248_v0  ;;  %v1035_v2 = vshrl.u32 %v12007_v62, 16 }
  0x38   :  { %v1013_v43 = vrot.slane %v1011_v39, 2 }
  0x39   :  { %1401 = vperm.xlu0 %11979, %v58_v40   ;;  %v728_v40 = vsel %vm721_vm5, %v725_v27, %v727_v36 }
  0x3a   :  { %10403 = vmatmul.mubr.msk.bf16.gmra.mxu0 %vm275_vm1, %v226_v63  ;;  %1406 = vperm.xlu1 %11980, %v59_v44   ;;  %v974_v63 = vrot.slane %v972_v54, 1  ;;  %v12005_v44 = vld [vmem:[%s16238_s0 + $0x34] sm:$0xff]   ;;  %v731_v54 = vrot.slane %v12004_v35, 1 }
  0x3b   :  { %10406 = vmatprep.mubr.msk.bf16.mxu0 %vm12204_vm2, %v16248_v0  ;;  %v1020_v48 = vshll.u32 %v12005_v44, 16 }
  0x3d   :  { %1411 = vperm.xlu0 %11979, %v60_v45   ;;  %v1022_v52 = vrot.slane %v1020_v48, 2 }
  0x3e   :  { %10461 = vmatmul.mubr.msk.bf16.gmra.mxu1 %vm275_vm1, %v11992_v50  ;;  %v61_v50 = vld [vmem:[%s16240_s9] sm:$0xff] }
  0x3f   :  { %10464 = vmatprep.mubr.msk.bf16.mxu1 %vm12204_vm2, %v16248_v0  ;;  %5913 = vperm.xlu1 %11980, %v61_v50  }
  0x41   :  { %5918 = vperm.xlu0 %11979, %v62_v51  }
  0x42   :  { %10407 = vmatmul.mubr.msk.bf16.gmra.mxu0 %vm275_vm1, %v234_v10  ;;  %v67_v10 = vld [vmem:[%s16240_s9 + $0x30] sm:$0xff] }
  0x43   :  { %10410 = vmatprep.mubr.msk.bf16.mxu0 %vm12204_vm2, %v16248_v0  ;;  %5923 = vperm.xlu1 %11980, %v63_v57   ;;  %v1029_v57 = vshll.u32 %v12006_v53, 16 }
  0x45   :  { %5928 = vperm.xlu0 %11979, %v64_v58   ;;  %v1031_v61 = vrot.slane %v1029_v57, 2 }
  0x46   :  { %10465 = vmatmul.mubr.msk.bf16.gmra.mxu1 %vm275_vm1, %v11993_v60  ;;  %v267_v60 = vshrl.u32 %v9331_v38, 16  ;;  %v1008_v38 = vshrl.u32 %v12004_v35, 16 }
  0x47   :  { %10468 = vmatprep.mubr.msk.bf16.mxu1 %vm12204_vm2, %v16248_v0  ;;  %5933 = vperm.xlu1 %11980, %v65_v3   ;;  %v1038_v3 = vshll.u32 %v12007_v62, 16 }
  0x48   :  { %v269_v5 = vor.u32 %v267_v60, %v265_v49  ;;  %v1010_v42 = vrot.slane %v1008_v38, 1 }
  0x49   :  { %5938 = vperm.xlu0 %11979, %v66_v4  }
  0x4a   :  { %10411 = vmatmul.mubr.msk.bf16.gmra.mxu0 %vm275_vm1, %v242_v20  ;;  %v990_v20 = vshrl.u32 %v12002_v15, 16  ;;  %v1014_v46 = vor.u32 %v1013_v43, %v1010_v42 }
  0x4b   :  { %10414 = vmatprep.mubr.msk.bf16.mxu0 %vm12204_vm2, %v16248_v0  ;;  %5943 = vperm.xlu1 %11980, %v67_v10  }
  0x4c   :  { %v992_v24 = vrot.slane %v990_v20, 1 }
  0x4d   :  { %5948 = vperm.xlu0 %11979, %v68_v11   ;;  %v1044_v11 = vshrl.u32 %v12008_v8, 16 }
  0x4e   :  { %10469 = vmatmul.mubr.msk.bf16.gmra.mxu1 %vm275_vm1, %v11994_v7  ;;  %v978_v7 = vor.u32 %v977_v1, %v974_v63  ;;  %v996_v28 = vor.u32 %v995_v25, %v992_v24  ;;  %v733_v63 = vrot.slane %v12005_v44, 1 }
  0x4f   :  { %10472 = vmatprep.mubr.msk.bf16.mxu1 %vm12204_vm2, %v16248_v0  ;;  %5953 = vperm.xlu1 %11980, %v69_v18   ;;  %v1046_v15 = vrot.slane %v1044_v11, 1  ;;  %v737_v18 = vrot.slane %v12007_v62, 1 }
  0x50   :  { %v979_v12 = vsel %vm962_vm4, %v970_v6, %v978_v7  ;;  %v988_v23 = vsel %vm962_vm4, %v978_v7, %v987_v19  ;;  %v997_v32 = vsel %vm962_vm4, %v987_v19, %v996_v28  ;;  %v734_v4 = vsel %vm721_vm5, %v731_v54, %v733_v63 }
  0x51   :  { %v1037_v6 = vrot.slane %v1035_v2, 1  ;;  %v1040_v7 = vrot.slane %v1038_v3, 2  ;;  %v736_v13 = vsel %vm721_vm5, %v733_v63, %v735_v9 }
  0x52   :  { %10415 = vmatmul.mubr.msk.bf16.gmra.mxu0 %vm275_vm1, %v250_v29 }
  0x53   :  { %10418 = vmatprep.mubr.msk.bf16.mxu0 %vm12204_vm2, %v16248_v0  ;;  %v1041_v10 = vor.u32 %v1040_v7, %v1037_v6 }
  0x56   :  { %10473 = vmatmul.mubr.msk.bf16.gmra.mxu1 %vm275_vm1, %v11995_v17  ;;  %v723_v17 = vrot.slane %v12487_v47, 1  ;;  %v1017_v47 = vshrl.u32 %v12005_v44, 16 }
  0x57   :  { %10476 = vmatprep.mubr.msk.bf16.mxu1 %vm12204_vm2, %v16248_v0 }
  0x58   :  { %v724_v22 = vsel %vm721_vm5, %v722_v16, %v723_v17  ;;  %v726_v31 = vsel %vm721_vm5, %v723_v17, %v725_v27  ;;  %v1019_v51 = vrot.slane %v1017_v47, 1  ;;  %v12624_v17 = vld [vmem:[%s16238_s0 + $0x54] sm:$0xff]   ;;  %v739_v27 = vrot.slane %v12008_v8, 1  ;;  %v652_v47 = vld [vmem:[%s16238_s0 + $0x68] sm:$0x1] }
  0x59   :  { %v1053_v20 = vshrl.u32 %v12624_v17, 16  ;;  %v1056_v21 = vshll.u32 %v12624_v17, 16  ;;  %v741_v38 = vrot.slane %v12624_v17, 1 }
  0x5a   :  { %10419 = vmatmul.mubr.msk.bf16.gmra.mxu0 %vm275_vm1, %v258_v41  ;;  %v1023_v55 = vor.u32 %v1022_v52, %v1019_v51 }
  0x5b   :  { %10422 = vmatprep.mubr.msk.bf16.mxu0 %vm12204_vm2, %v16248_v0  ;;  %v1055_v24 = vrot.slane %v1053_v20, 1  ;;  %v1058_v25 = vrot.slane %v1056_v21, 2  ;;  %v742_v42 = vsel %vm721_vm5, %v739_v27, %v741_v38 }
  0x5e   :  { %10477 = vmatmul.mubr.msk.bf16.gmra.mxu1 %vm275_vm1, %v11996_v26  ;;  %v12003_v26 = vld [vmem:[%s16238_s0 + $0x24] sm:$0xff]  }
  0x5f   :  { %10480 = vmatprep.mubr.msk.bf16.mxu1 %vm12204_vm2, %v16248_v0  ;;  %v999_v29 = vshrl.u32 %v12003_v26, 16  ;;  %v1002_v30 = vshll.u32 %v12003_v26, 16  ;;  %v729_v45 = vrot.slane %v12003_v26, 1  ;;  %v12010_v26 = vld [vmem:[%s16238_s0 + $0x5c] sm:$0xff]  }
  0x61   :  { %v1001_v33 = vrot.slane %v999_v29, 1  ;;  %v1004_v34 = vrot.slane %v1002_v30, 2  ;;  %v730_v49 = vsel %vm721_vm5, %v727_v36, %v729_v45  ;;  %v732_v58 = vsel %vm721_vm5, %v729_v45, %v731_v54 }
  0x62   :  { %10423 = vmatmul.mubr.msk.bf16.gmra.mxu0 %vm275_vm1, %v266_v56  ;;  %v1026_v56 = vshrl.u32 %v12006_v53, 16  ;;  %v1062_v29 = vshrl.u32 %v12010_v26, 16  ;;  %v1065_v30 = vshll.u32 %v12010_v26, 16 }
  0x63   :  { %10426 = vmatprep.mubr.msk.bf16.mxu0 %vm12204_vm2, %v16248_v0  ;;  %v1005_v37 = vor.u32 %v1004_v34, %v1001_v33  ;;  %v955_v33 = vld [vmem:[%s16238_s0 + $0x68] sm:$0x3] }
  0x64   :  { %v1028_v60 = vrot.slane %v1026_v56, 1  ;;  %v1064_v35 = vrot.slane %v1062_v29, 1  ;;  %v1067_v36 = vrot.slane %v1065_v30, 2 }
  0x65   :  { %v1006_v41 = vsel %vm962_vm4, %v996_v28, %v1005_v37  ;;  %v1015_v50 = vsel %vm962_vm4, %v1005_v37, %v1014_v46  ;;  %v1059_v28 = vor.u32 %v1058_v25, %v1055_v24 }
  0x66   :  { %10481 = vmatmul.mubr.msk.bf16.gmra.mxu1 %vm275_vm1, %v9346_v59  ;;  %v1024_v59 = vsel %vm962_vm4, %v1014_v46, %v1023_v55  ;;  %v1032_v1 = vor.u32 %v1031_v61, %v1028_v60  ;;  %v1068_v39 = vor.u32 %v1067_v36, %v1064_v35  ;;  %v743_v46 = vrot.slane %v12010_v26, 1 }
  0x67   :  { %10540 = vmatprep.mubr.msk.bf16.mxu1 %vm12204_vm2, %v16248_v0 }
  0x68   :  { %v1042_v14 = vsel %vm962_vm4, %v1032_v1, %v1041_v10  ;;  %v1069_v43 = vsel %vm962_vm4, %v1059_v28, %v1068_v39 }
  0x6a   :  { %10427 = vmatmul.mubr.msk.bf16.gmra.mxu0 %vm275_vm1, %v269_v5  ;;  %v1033_v5 = vsel %vm962_vm4, %v1023_v55, %v1032_v1 }
  0x6b   :  { %10486 = vmatprep.mubr.msk.bf16.mxu0 %vm12204_vm2, %v16248_v0 }
  0x6e   :  { %10541 = vmatmul.mubr.msk.bf16.vlgmr.msra.gmra.mxu1 %vm275_vm1, %v979_v12  ;;  %v1047_v12 = vshll.u32 %v12008_v8, 16 }
  0x6f   :  { %10544 = vmatprep.mubr.msk.bf16.mxu1 %vm12204_vm2, %v16248_v0 }
  0x70   :  { %v1049_v16 = vrot.slane %v1047_v12, 2 }
  0x72   :  { %10487 = vmatmul.mubr.msk.bf16.vlgmr.msra.gmra.mxu0 %vm275_vm1, %v724_v22  ;;  %v1050_v19 = vor.u32 %v1049_v16, %v1046_v15  ;;  %v738_v22 = vsel %vm721_vm5, %v735_v9, %v737_v18 }
  0x73   :  { %10490 = vmatprep.mubr.msk.bf16.mxu0 %vm12204_vm2, %v16248_v0 }
  0x74   :  { %v1060_v34 = vsel %vm962_vm4, %v1050_v19, %v1059_v28 }
  0x76   :  { %10545 = vmatmul.mubr.msk.bf16.gmra.mxu1 %vm275_vm1, %v988_v23  ;;  %v1051_v23 = vsel %vm962_vm4, %v1041_v10, %v1050_v19 }
  0x77   :  { %10548 = vmatprep.mubr.msk.bf16.mxu1 %vm12204_vm2, %v16248_v0 }
  0x7a   :  { %10491 = vmatmul.mubr.msk.bf16.gmra.mxu0 %vm275_vm1, %v726_v31  ;;  %v740_v31 = vsel %vm721_vm5, %v737_v18, %v739_v27 }
  0x7b   :  { %10494 = vmatprep.mubr.msk.bf16.mxu0 %vm12204_vm2, %v16248_v0 }
  0x7e   :  { %10549 = vmatmul.mubr.msk.bf16.gmra.mxu1 %vm275_vm1, %v997_v32  ;;  %v651_v32 = vld [vmem:[%s16238_s0 + $0x64] sm:$0xf] }
  0x7f   :  { %10552 = vmatprep.mubr.msk.bf16.mxu1 %vm12204_vm2, %v16248_v0  ;;  %v9392_v37 = vcombine.low %v651_v32, %v955_v33 }
  0x82   :  { %10495 = vmatmul.mubr.msk.bf16.gmra.mxu0 %vm275_vm1, %v728_v40  ;;  %v1071_v40 = vshrl.u32 %v9392_v37, 16 }
  0x83   :  { %10498 = vmatprep.mubr.msk.bf16.mxu0 %vm12204_vm2, %v16248_v0 }
  0x84   :  { %v1073_v44 = vrot.slane %v1071_v40, 1 }
  0x86   :  { %10553 = vmatmul.mubr.msk.bf16.gmra.mxu1 %vm275_vm1, %v1006_v41  ;;  %v1074_v41 = vshll.u32 %v9392_v37, 16 }
  0x87   :  { %10556 = vmatprep.mubr.msk.bf16.mxu1 %vm12204_vm2, %v16248_v0 }
  0x88   :  { %v1076_v45 = vrot.slane %v1074_v41, 2 }
  0x8a   :  { %10499 = vmatmul.mubr.msk.bf16.gmra.mxu0 %vm275_vm1, %v730_v49  ;;  %v1077_v48 = vor.u32 %v1076_v45, %v1073_v44  ;;  %v744_v49 = vsel %vm721_vm5, %v741_v38, %v743_v46 }
  0x8b   :  { %10502 = vmatprep.mubr.msk.bf16.mxu0 %vm12204_vm2, %v16248_v0 }
  0x8c   :  { %v1078_v51 = vsel %vm962_vm4, %v1068_v39, %v1077_v48 }
  0x8e   :  { %10557 = vmatmul.mubr.msk.bf16.gmra.mxu1 %vm275_vm1, %v1015_v50  ;;  %v9375_v50 = vcombine.low %v651_v32, %v652_v47 }
  0x8f   :  { %10560 = vmatprep.mubr.msk.bf16.mxu1 %vm12204_vm2, %v16248_v0 }
  0x90   :  { %v745_v52 = vrot.slane %v9375_v50, 1 }
  0x92   :  { %10503 = vmatmul.mubr.msk.bf16.gmra.mxu0 %vm275_vm1, %v732_v58  ;;  %v746_v55 = vsel %vm721_vm5, %v743_v46, %v745_v52 }
  0x93   :  { %10506 = vmatprep.mubr.msk.bf16.mxu0 %vm12204_vm2, %v16248_v0 }
  0x96   :  { %10561 = vmatmul.mubr.msk.bf16.gmra.mxu1 %vm275_vm1, %v1024_v59 }
  0x97   :  { %10564 = vmatprep.mubr.msk.bf16.mxu1 %vm12204_vm2, %v16248_v0 }
  0x9a   :  { %10507 = vmatmul.mubr.msk.bf16.gmra.mxu0 %vm275_vm1, %v734_v4 }
  0x9b   :  { %10510 = vmatprep.mubr.msk.bf16.mxu0 %vm12204_vm2, %v16248_v0 }
  0x9e   :  { %10565 = vmatmul.mubr.msk.bf16.gmra.mxu1 %vm275_vm1, %v1033_v5 }
  0x9f   :  { %10568 = vmatprep.mubr.msk.bf16.mxu1 %vm12204_vm2, %v16248_v0 }
  0xa2   :  { %10511 = vmatmul.mubr.msk.bf16.gmra.mxu0 %vm275_vm1, %v736_v13 }
  0xa3   :  { %10514 = vmatprep.mubr.msk.bf16.mxu0 %vm12204_vm2, %v16248_v0 }
  0xa6   :  { %10569 = vmatmul.mubr.msk.bf16.gmra.mxu1 %vm275_vm1, %v1042_v14 }
  0xa7   :  { %10572 = vmatprep.mubr.msk.bf16.mxu1 %vm12204_vm2, %v16248_v0 }
  0xaa   :  { %10515 = vmatmul.mubr.msk.bf16.gmra.mxu0 %vm275_vm1, %v738_v22 }
  0xab   :  { %10518 = vmatprep.mubr.msk.bf16.mxu0 %vm12204_vm2, %v16248_v0 }
  0xae   :  { %10573 = vmatmul.mubr.msk.bf16.gmra.mxu1 %vm275_vm1, %v1051_v23 }
  0xaf   :  { %10576 = vmatprep.mubr.msk.bf16.mxu1 %vm12204_vm2, %v16248_v0 }
  0xb2   :  { %10519 = vmatmul.mubr.msk.bf16.gmra.mxu0 %vm275_vm1, %v740_v31 }
  0xb3   :  { %10522 = vmatprep.mubr.msk.bf16.mxu0 %vm12204_vm2, %v16248_v0 }
  0xb6   :  { %10577 = vmatmul.mubr.msk.bf16.gmra.mxu1 %vm275_vm1, %v1060_v34 }
  0xb7   :  { %10580 = vmatprep.mubr.msk.bf16.mxu1 %vm12204_vm2, %v16248_v0 }
  0xba   :  { %10523 = vmatmul.mubr.msk.bf16.gmra.mxu0 %vm275_vm1, %v742_v42 }
  0xbb   :  { %10526 = vmatprep.mubr.msk.bf16.mxu0 %vm12204_vm2, %v16248_v0 }
  0xbe   :  { %10581 = vmatmul.mubr.msk.bf16.gmra.mxu1 %vm275_vm1, %v1069_v43 }
  0xbf   :  { %10584 = vmatprep.mubr.msk.bf16.mxu1 %vm12204_vm2, %v16248_v0 }
  0xc2   :  { %10527 = vmatmul.mubr.msk.bf16.gmra.mxu0 %vm275_vm1, %v744_v49  ;;  %v12013_v49 = vld [vmem:[%s16241_s2 + $0x18] sm:$0xff]  }
  0xc3   :  { %10530 = vmatprep.mubr.msk.bf16.mxu0 %vm12204_vm2, %v16248_v0  ;;  %10593 = vmatpush3.bf16.msra.mxu0 %v12013_v49 }
  0xc4   :  { %10594 = vmatprep.subr.bf16.mxu0 %v16248_v0 }
  0xc6   :  { %v525_v53 = vpop.f32.mrf.mxu1  ;;  %10585 = vmatmul.mubr.msk.bf16.gmra.mxu1 %vm275_vm1, %v1078_v51  ;;  %v12014_v51 = vld [vmem:[%s16241_s2 + $0x8] sm:$0xff]  }
  0xc7   :  { %10588 = vmatprep.mubr.msk.bf16.mxu1 %vm12204_vm2, %v16248_v0  ;;  %10649 = vmatpush3.bf16.msra.mxu1 %v12014_v51 }
  0xc8   :  { %v10434_v54 = vpop.f32.mrf.mxu1  ;;  %10650 = vmatprep.subr.bf16.mxu1 %v16248_v0 }
  0xca   :  { %v528_v56 = vpop.f32.mrf.mxu1  ;;  %v353_v57 = vpop.f32.mrf.mxu0  ;;  %10531 = vmatmul.mubr.msk.bf16.gmra.mxu0 %vm275_vm1, %v746_v55 }
  0xcb   :  { %v12710_v58 = vadd.f32 %v525_v53, %v353_v57  ;;  %10534 = vmatprep.mubr.msk.bf16.mxu0 %vm12204_vm2, %v16248_v0 }
  0xcc   :  { %v10435_v59 = vpop.f32.mrf.mxu1  ;;  %v10380_v60 = vpop.f32.mrf.mxu0 }
  0xce   :  { %v533_v61 = vpop.f32.mrf.mxu1  ;;  %10589 = vmatmul.mubr.msk.bf16.gmra.mxu1 %vm275_vm1, %v1077_v48  ;;  %v356_v62 = vpop.f32.mrf.mxu0 }
  0xcf   :  { %10652 = vmatprep.mubr.msk.bf16.mxu1 %vm12204_vm2, %v16248_v0  ;;  %v12717_v63 = vadd.f32 %v528_v56, %v356_v62 }
  0xd0   :  { %v10438_v1 = vpop.f32.mrf.mxu1  ;;  %v10381_v2 = vpop.f32.mrf.mxu0 }
  0xd2   :  { %v536_v3 = vpop.f32.mrf.mxu1  ;;  %v361_v4 = vpop.f32.mrf.mxu0  ;;  %10535 = vmatmul.mubr.msk.bf16.gmra.mxu0 %vm275_vm1, %v745_v52 }
  0xd3   :  { %v12720_v5 = vadd.f32 %v533_v61, %v361_v4  ;;  %10596 = vmatprep.mubr.msk.bf16.mxu0 %vm12204_vm2, %v16248_v0 }
  0xd4   :  { %v10439_v6 = vpop.f32.mrf.mxu1  ;;  %v10384_v7 = vpop.f32.mrf.mxu0 }
  0xd6   :  { %v541_v8 = vpop.f32.mrf.mxu1  ;;  %v364_v9 = vpop.f32.mrf.mxu0 }
  0xd7   :  { %v12724_v10 = vadd.f32 %v536_v3, %v364_v9 }
  0xd8   :  { %v10442_v11 = vpop.f32.mrf.mxu1  ;;  %v10385_v12 = vpop.f32.mrf.mxu0 }
  0xda   :  { %v544_v13 = vpop.f32.mrf.mxu1  ;;  %v369_v14 = vpop.f32.mrf.mxu0 }
  0xdb   :  { %v12726_v15 = vadd.f32 %v541_v8, %v369_v14 }
  0xdc   :  { %v10443_v16 = vpop.f32.mrf.mxu1  ;;  %v10388_v17 = vpop.f32.mrf.mxu0 }
  0xde   :  { %v549_v18 = vpop.f32.mrf.mxu1  ;;  %v372_v19 = vpop.f32.mrf.mxu0 }
  0xdf   :  { %v12728_v20 = vadd.f32 %v544_v13, %v372_v19 }
  0xe0   :  { %v10446_v21 = vpop.f32.mrf.mxu1  ;;  %v10389_v22 = vpop.f32.mrf.mxu0 }
  0xe2   :  { %v552_v23 = vpop.f32.mrf.mxu1  ;;  %v377_v24 = vpop.f32.mrf.mxu0 }
  0xe3   :  { %v12730_v25 = vadd.f32 %v549_v18, %v377_v24 }
  0xe4   :  { %v10447_v26 = vpop.f32.mrf.mxu1  ;;  %v10392_v27 = vpop.f32.mrf.mxu0 }
  0xe6   :  { %v557_v28 = vpop.f32.mrf.mxu1  ;;  %v380_v29 = vpop.f32.mrf.mxu0 }
  0xe7   :  { %v12732_v30 = vadd.f32 %v552_v23, %v380_v29 }
  0xe8   :  { %v10450_v31 = vpop.f32.mrf.mxu1  ;;  %v10393_v32 = vpop.f32.mrf.mxu0 }
  0xea   :  { %v560_v33 = vpop.f32.mrf.mxu1  ;;  %v385_v34 = vpop.f32.mrf.mxu0 }
  0xeb   :  { %v12734_v35 = vadd.f32 %v557_v28, %v385_v34 }
  0xec   :  { %v10451_v36 = vpop.f32.mrf.mxu1  ;;  %v10396_v37 = vpop.f32.mrf.mxu0 }
  0xee   :  { %v565_v38 = vpop.f32.mrf.mxu1  ;;  %v388_v39 = vpop.f32.mrf.mxu0 }
  0xef   :  { %v12736_v40 = vadd.f32 %v560_v33, %v388_v39 }
  0xf0   :  { %v10454_v41 = vpop.f32.mrf.mxu1  ;;  %v10397_v42 = vpop.f32.mrf.mxu0 }
  0xf2   :  { %v568_v43 = vpop.f32.mrf.mxu1  ;;  %v393_v44 = vpop.f32.mrf.mxu0 }
  0xf3   :  { %v12738_v45 = vadd.f32 %v565_v38, %v393_v44 }
  0xf4   :  { %v10455_v46 = vpop.f32.mrf.mxu1  ;;  %v10400_v47 = vpop.f32.mrf.mxu0 }
  0xf6   :  { %v573_v48 = vpop.f32.mrf.mxu1  ;;  %v396_v50 = vpop.f32.mrf.mxu0 }
  0xf7   :  { %v12746_v52 = vadd.f32 %v568_v43, %v396_v50 }
  0xf8   :  { %v10458_v53 = vpop.f32.mrf.mxu1  ;;  %v10401_v54 = vpop.f32.mrf.mxu0 }
  0xfa   :  { %v576_v55 = vpop.f32.mrf.mxu1  ;;  %v401_v56 = vpop.f32.mrf.mxu0 }
  0xfb   :  { %v12750_v57 = vadd.f32 %v573_v48, %v401_v56 }
  0xfc   :  { %v10459_v59 = vpop.f32.mrf.mxu1  ;;  %v10404_v60 = vpop.f32.mrf.mxu0 }
  0xfe   :  { %v581_v61 = vpop.f32.mrf.mxu1  ;;  %v404_v62 = vpop.f32.mrf.mxu0 }
  0xff   :  { %v12752_v1 = vadd.f32 %v576_v55, %v404_v62 }
 0x100   :  { %v10462_v2 = vpop.f32.mrf.mxu1  ;;  %v10405_v3 = vpop.f32.mrf.mxu0 }
 0x102   :  { %v584_v4 = vpop.f32.mrf.mxu1  ;;  %v409_v6 = vpop.f32.mrf.mxu0 }
 0x103   :  { %v12754_v7 = vadd.f32 %v581_v61, %v409_v6 }
 0x104   :  { %v10463_v8 = vpop.f32.mrf.mxu1  ;;  %v10408_v9 = vpop.f32.mrf.mxu0 }
 0x106   :  { %v589_v11 = vpop.f32.mrf.mxu1  ;;  %v412_v12 = vpop.f32.mrf.mxu0 }
 0x107   :  { %v12756_v13 = vadd.f32 %v584_v4, %v412_v12 }
 0x108   :  { %v10466_v14 = vpop.f32.mrf.mxu1  ;;  %v10409_v16 = vpop.f32.mrf.mxu0 }
 0x10a   :  { %v592_v17 = vpop.f32.mrf.mxu1  ;;  %v417_v18 = vpop.f32.mrf.mxu0 }
 0x10b   :  { %v12758_v19 = vadd.f32 %v589_v11, %v417_v18 }
 0x10c   :  { %v10467_v21 = vpop.f32.mrf.mxu1  ;;  %v10412_v22 = vpop.f32.mrf.mxu0 }
 0x10e   :  { %v597_v23 = vpop.f32.mrf.mxu1  ;;  %v420_v24 = vpop.f32.mrf.mxu0 }
 0x10f   :  { %v12760_v26 = vadd.f32 %v592_v17, %v420_v24 }
 0x110   :  { %v10470_v27 = vpop.f32.mrf.mxu1  ;;  %v10413_v28 = vpop.f32.mrf.mxu0 }
 0x112   :  { %v600_v29 = vpop.f32.mrf.mxu1  ;;  %v425_v31 = vpop.f32.mrf.mxu0 }
 0x113   :  { %v12762_v32 = vadd.f32 %v597_v23, %v425_v31 }
 0x114   :  { %v10471_v33 = vpop.f32.mrf.mxu1  ;;  %v10416_v34 = vpop.f32.mrf.mxu0 }
 0x116   :  { %v605_v36 = vpop.f32.mrf.mxu1  ;;  %v428_v37 = vpop.f32.mrf.mxu0 }
 0x117   :  { %v12764_v38 = vadd.f32 %v600_v29, %v428_v37 }
 0x118   :  { %v10474_v39 = vpop.f32.mrf.mxu1  ;;  %v10417_v41 = vpop.f32.mrf.mxu0 }
 0x11a   :  { %v608_v42 = vpop.f32.mrf.mxu1  ;;  %v433_v43 = vpop.f32.mrf.mxu0 }
 0x11b   :  { %v12766_v44 = vadd.f32 %v605_v36, %v433_v43 }
 0x11c   :  { %v10475_v46 = vpop.f32.mrf.mxu1  ;;  %v10420_v47 = vpop.f32.mrf.mxu0 }
 0x11d   :  { %v12776_v47 = vpop.permute.xlu0 %1291 }
 0x11e   :  { %v613_v48 = vpop.f32.mrf.mxu1  ;;  %v436_v49 = vpop.f32.mrf.mxu0 }
 0x11f   :  { %v12768_v50 = vadd.f32 %v608_v42, %v436_v49 }
 0x120   :  { %v10478_v51 = vpop.f32.mrf.mxu1  ;;  %v10421_v53 = vpop.f32.mrf.mxu0 }
 0x122   :  { %v616_v54 = vpop.f32.mrf.mxu1  ;;  %v441_v55 = vpop.f32.mrf.mxu0 }
 0x123   :  { %v12770_v56 = vadd.f32 %v613_v48, %v441_v55 }
 0x124   :  { %v10479_v59 = vpop.f32.mrf.mxu1  ;;  %v10424_v60 = vpop.f32.mrf.mxu0 }
 0x125   :  { %v12780_v60 = vpop.permute.xlu0 %1296 }
 0x126   :  { %v621_v61 = vpop.f32.mrf.mxu1  ;;  %v444_v62 = vpop.f32.mrf.mxu0 }
 0x127   :  { %v12772_v2 = vadd.f32 %v616_v54, %v444_v62  ;;  %v12778_v54 = vpop.permute.xlu1 %1301 }
 0x128   :  { %v10482_v3 = vpop.f32.mrf.mxu1  ;;  %v10425_v4 = vpop.f32.mrf.mxu0 }
 0x129   :  { %v12015_v3 = vld [vmem:[%s16241_s2 + $0x10] sm:$0xff]   ;;  %v12016_v4 = vld [vmem:[%s16241_s2] sm:$0xff]  }
 0x12a   :  { %v624_v6 = vpop.f32.mrf.mxu1  ;;  %v449_v8 = vpop.f32.mrf.mxu0  ;;  %10595 = vmatpush3.bf16.msra.mxu0 %v12015_v3  ;;  %10651 = vmatpush3.bf16.msra.mxu1 %v12016_v4 }
 0x12b   :  { %v12774_v9 = vadd.f32 %v621_v61, %v449_v8  ;;  %10704 = vmatprep.subr.bf16.mxu0 %v16248_v0  ;;  %10760 = vmatprep.subr.bf16.mxu1 %v16248_v0 }
 0x12c   :  { %v10483_v11 = vpop.f32.mrf.mxu1  ;;  %v10428_v12 = vpop.f32.mrf.mxu0 }
 0x12e   :  { %v1160_v14 = vpop.f32.mrf.mxu1  ;;  %v452_v16 = vpop.f32.mrf.mxu0 }
 0x130   :  { %v10542_v17 = vpop.f32.mrf.mxu1  ;;  %v10429_v18 = vpop.f32.mrf.mxu0 }
 0x132   :  { %v1163_v21 = vpop.f32.mrf.mxu1  ;;  %v828_v22 = vpop.f32.mrf.mxu0 }
 0x133   :  { %v930_v8 = vadd.f32 %v828_v22, %v12710_v58 }
 0x134   :  { %v10543_v23 = vpop.f32.mrf.mxu1  ;;  %v10488_v24 = vpop.f32.mrf.mxu0 }
 0x135   :  { %v12800_v58 = vadd.f32 %v1160_v14, %v930_v8 }
 0x136   :  { %v1168_v27 = vpop.f32.mrf.mxu1  ;;  %v831_v28 = vpop.f32.mrf.mxu0 }
 0x137   :  { %v931_v61 = vadd.f32 %v831_v28, %v12717_v63  ;;  %v12793_v63 = vpop.permute.xlu1 %1306  ;;  %v12798_v28 = vpop.permute.xlu0 %1311  ;;  %v1414_v14 = vmul.f32 %v12776_v47, %v12800_v58 }
 0x138   :  { %v10546_v29 = vpop.f32.mrf.mxu1  ;;  %v10489_v31 = vpop.f32.mrf.mxu0 }
 0x139   :  { %v12795_v17 = vadd.f32 %v1163_v21, %v931_v61 }
 0x13a   :  { %v1171_v33 = vpop.f32.mrf.mxu1  ;;  %v836_v34 = vpop.f32.mrf.mxu0 }
 0x13b   :  { %v932_v11 = vadd.f32 %v836_v34, %v12720_v5  ;;  %v1415_v34 = vmul.f32 %v12780_v60, %v12795_v17 }
 0x13c   :  { %v10547_v36 = vpop.f32.mrf.mxu1  ;;  %v10492_v37 = vpop.f32.mrf.mxu0 }
 0x13d   :  { %v12802_v5 = vadd.f32 %v1168_v27, %v932_v11 }
 0x13e   :  { %v1176_v39 = vpop.f32.mrf.mxu1  ;;  %v839_v41 = vpop.f32.mrf.mxu0 }
 0x13f   :  { %v933_v23 = vadd.f32 %v839_v41, %v12724_v10  ;;  %v12810_v41 = vpop.permute.xlu1 %1316  ;;  %v1416_v27 = vmul.f32 %v12778_v54, %v12802_v5 }
 0x140   :  { %v10550_v42 = vpop.f32.mrf.mxu1  ;;  %v10493_v43 = vpop.f32.mrf.mxu0 }
 0x141   :  { %v12807_v21 = vadd.f32 %v1171_v33, %v933_v23  ;;  %v1497_v33 = vmul.f32 %v1415_v34, %v1415_v34  ;;  %v1498_v3 = vmul.f32 %v1416_v27, %v1416_v27 }
 0x142   :  { %v1179_v46 = vpop.f32.mrf.mxu1  ;;  %v844_v48 = vpop.f32.mrf.mxu0 }
 0x143   :  { %v934_v22 = vadd.f32 %v844_v48, %v12726_v15 }
 0x144   :  { %v10551_v49 = vpop.f32.mrf.mxu1  ;;  %v10496_v51 = vpop.f32.mrf.mxu0 }
 0x145   :  { %v12816_v15 = vadd.f32 %v1176_v39, %v934_v22  ;;  %v12819_v49 = vpop.permute.xlu0 %1321  ;;  %v1443_v22 = vsel %vm1439_vm6, %v1416_v27, 0.0 }
 0x146   :  { %v1184_v53 = vpop.f32.mrf.mxu1  ;;  %v847_v55 = vpop.f32.mrf.mxu0 }
 0x147   :  { %v935_v37 = vadd.f32 %v847_v55, %v12728_v20  ;;  %v1417_v55 = vmul.f32 %v12793_v63, %v12807_v21  ;;  %v1418_v39 = vmul.f32 %v12798_v28, %v12816_v15 }
 0x148   :  { %v10554_v59 = vpop.f32.mrf.mxu1  ;;  %v10497_v62 = vpop.f32.mrf.mxu0 }
 0x149   :  { %v12824_v59 = vadd.f32 %v1179_v46, %v935_v37  ;;  %v1496_v62 = vmul.f32 %v1414_v14, %v1414_v14  ;;  %v1522_v46 = vsel %vm1439_vm6, %v1497_v33, 0.0 }
 0x14a   :  { %v1187_v6 = vpop.f32.mrf.mxu1  ;;  %v852_v12 = vpop.f32.mrf.mxu0 }
 0x14b   :  { %v936_v43 = vadd.f32 %v852_v12, %v12730_v25  ;;  %v1441_v25 = vsel %vm1439_vm6, %v1415_v34, 0.0  ;;  %v1440_v12 = vsel %vm1439_vm6, %v1414_v14, 0.0  ;;  %v1524_v14 = vsel %vm1439_vm6, %v1498_v3, 0.0 }
 0x14c   :  { %v10555_v16 = vpop.f32.mrf.mxu1  ;;  %v10500_v18 = vpop.f32.mrf.mxu0  ;;  %v1442_v37 = vadd.f32 %v1441_v25, %v1440_v12  ;;  %v1447_v25 = vsel %vm1439_vm6, %v1418_v39, 0.0 }
 0x14d   :  { %v12829_v8 = vadd.f32 %v1184_v53, %v936_v43  ;;  %v12833_v16 = vpop.permute.xlu1 %1326  ;;  %v1445_v43 = vsel %vm1439_vm6, %v1417_v55, 0.0 }
 0x14e   :  { %v1192_v24 = vpop.f32.mrf.mxu1  ;;  %v855_v29 = vpop.f32.mrf.mxu0 }
 0x14f   :  { %v937_v20 = vadd.f32 %v855_v29, %v12732_v30  ;;  %v1499_v29 = vmul.f32 %v1417_v55, %v1417_v55  ;;  %v1420_v27 = vmul.f32 %v12819_v49, %v12829_v8 }
 0x150   :  { %v10558_v31 = vpop.f32.mrf.mxu1  ;;  %v10501_v36 = vpop.f32.mrf.mxu0 }
 0x151   :  { %v12836_v18 = vadd.f32 %v1187_v6, %v937_v20  ;;  %v1419_v31 = vmul.f32 %v12810_v41, %v12824_v59  ;;  %v12843_v36 = vpop.permute.xlu0 %1331  ;;  %v1526_v3 = vsel %vm1439_vm6, %v1499_v29, 0.0 }
 0x152   :  { %v1195_v10 = vpop.f32.mrf.mxu1  ;;  %v860_v42 = vpop.f32.mrf.mxu0 }
 0x153   :  { %v938_v11 = vadd.f32 %v860_v42, %v12734_v35  ;;  %v1521_v35 = vsel %vm1439_vm6, %v1496_v62, 0.0  ;;  %v1500_v42 = vmul.f32 %v1418_v39, %v1418_v39  ;;  %v1421_v62 = vmul.f32 %v12833_v16, %v12836_v18 }
 0x154   :  { %v10559_v48 = vpop.f32.mrf.mxu1  ;;  %v10504_v51 = vpop.f32.mrf.mxu0  ;;  %v1523_v20 = vadd.f32 %v1522_v46, %v1521_v35  ;;  %v1449_v35 = vsel %vm1439_vm6, %v1419_v31, 0.0 }
 0x155   :  { %v12849_v48 = vadd.f32 %v1192_v24, %v938_v11  ;;  %v1444_v51 = vadd.f32 %v1443_v22, %v1442_v37  ;;  %v1502_v37 = vmul.f32 %v1420_v27, %v1420_v27 }
 0x156   :  { %v1200_v61 = vpop.f32.mrf.mxu1  ;;  %v863_v4 = vpop.f32.mrf.mxu0  ;;  %v1525_v24 = vadd.f32 %v1524_v14, %v1523_v20  ;;  %v1503_v14 = vmul.f32 %v1421_v62, %v1421_v62 }
 0x157   :  { %v939_v53 = vadd.f32 %v863_v4, %v12736_v40  ;;  %v1446_v11 = vadd.f32 %v1445_v43, %v1444_v51  ;;  %v1422_v29 = vmul.f32 %v12843_v36, %v12849_v48 }
 0x158   :  { %v10562_v30 = vpop.f32.mrf.mxu1  ;;  %v10505_v23 = vpop.f32.mrf.mxu0 }
 0x159   :  { %v1501_v30 = vmul.f32 %v1419_v31, %v1419_v31  ;;  %v12856_v55 = vadd.f32 %v1195_v10, %v939_v53  ;;  %v12858_v23 = vpop.permute.xlu1 %1336  ;;  %v12867_v53 = vpop.permute.xlu0 %1341 }
 0x15a   :  { %v1203_v34 = vpop.f32.mrf.mxu1  ;;  %v868_v6 = vpop.f32.mrf.mxu0  ;;  %16372 = vst [vmem:[#allocation6_spill] sm:$0xff] %v12867_v53 }
 0x15b   :  { %v940_v33 = vadd.f32 %v868_v6, %v12738_v45  ;;  %v1528_v45 = vsel %vm1439_vm6, %v1500_v42, 0.0  ;;  %v1527_v6 = vadd.f32 %v1526_v3, %v1525_v24  ;;  %v1530_v42 = vsel %vm1439_vm6, %v1501_v30, 0.0 }
 0x15c   :  { %v10563_v40 = vpop.f32.mrf.mxu1  ;;  %v10508_v4 = vpop.f32.mrf.mxu0  ;;  %v1423_v31 = vmul.f32 %v12858_v23, %v12856_v55  ;;  %v1532_v3 = vsel %vm1439_vm6, %v1502_v37, 0.0  ;;  %v1504_v24 = vmul.f32 %v1422_v29, %v1422_v29 }
 0x15d   :  { %v12861_v46 = vadd.f32 %v1200_v61, %v940_v33  ;;  %v1448_v40 = vadd.f32 %v1447_v25, %v1446_v11  ;;  %v1451_v61 = vsel %vm1439_vm6, %v1420_v27, 0.0  ;;  %v1529_v51 = vadd.f32 %v1528_v45, %v1527_v6  ;;  %v12880_v11 = vpop.permute.xlu1 %1346 }
 0x15e   :  { %v1208_v12 = vpop.f32.mrf.mxu1  ;;  %v871_v22 = vpop.f32.mrf.mxu0  ;;  %v1453_v25 = vsel %vm1439_vm6, %v1421_v62, 0.0  ;;  %16373 = vst [vmem:[#allocation7_spill] sm:$0xff] %v12880_v11  ;;  %v1505_v6 = vmul.f32 %v1423_v31, %v1423_v31 }
 0x15f   :  { %v941_v39 = vadd.f32 %v871_v22, %v12746_v52  ;;  %v1450_v4 = vadd.f32 %v1449_v35, %v1448_v40  ;;  %v1424_v52 = vmul.f32 %v12867_v53, %v12861_v46  ;;  %v1455_v35 = vsel %vm1439_vm6, %v1422_v29, 0.0 }
 0x160   :  { %v10566_v10 = vpop.f32.mrf.mxu1  ;;  %v10509_v43 = vpop.f32.mrf.mxu0 }
 0x161   :  { %v12873_v33 = vadd.f32 %v1203_v34, %v941_v39  ;;  %v1531_v10 = vadd.f32 %v1530_v42, %v1529_v51  ;;  %v1452_v34 = vadd.f32 %v1451_v61, %v1450_v4  ;;  %v1534_v39 = vsel %vm1439_vm6, %v1503_v14, 0.0  ;;  %v12888_v43 = vpop.permute.xlu0 %1351 }
 0x162   :  { %v1211_v20 = vpop.f32.mrf.mxu1  ;;  %v876_v22 = vpop.f32.mrf.mxu0  ;;  %16374 = vst [vmem:[#allocation8_spill] sm:$0xff] %v12888_v43  ;;  %v1536_v42 = vsel %vm1439_vm6, %v1504_v24, 0.0  ;;  %v1457_v14 = vsel %vm1439_vm6, %v1423_v31, 0.0 }
 0x163   :  { %v942_v30 = vadd.f32 %v876_v22, %v12750_v57  ;;  %v1425_v40 = vmul.f32 %v12880_v11, %v12873_v33  ;;  %v1533_v57 = vadd.f32 %v1532_v3, %v1531_v10  ;;  %v1454_v22 = vadd.f32 %v1453_v25, %v1452_v34  ;;  %v12899_v24 = vpop.permute.xlu1 %1356 }
 0x164   :  { %v10567_v27 = vpop.f32.mrf.mxu1  ;;  %v10512_v45 = vpop.f32.mrf.mxu0  ;;  %v1459_v3 = vsel %vm1439_vm6, %v1424_v52, 0.0 }
 0x165   :  { %v12886_v37 = vadd.f32 %v1208_v12, %v942_v30  ;;  %v1506_v27 = vmul.f32 %v1424_v52, %v1424_v52  ;;  %v1535_v4 = vadd.f32 %v1534_v39, %v1533_v57  ;;  %v1456_v12 = vadd.f32 %v1455_v35, %v1454_v22 }
 0x166   :  { %v1216_v62 = vpop.f32.mrf.mxu1  ;;  %v879_v0 = vpop.f32.mrf.mxu0  ;;  %v1538_v45 = vsel %vm1439_vm6, %v1505_v6, 0.0  ;;  %v1507_v25 = vmul.f32 %v1425_v40, %v1425_v40 }
 0x167   :  { %v1426_v29 = vmul.f32 %v12888_v43, %v12886_v37  ;;  %v943_v61 = vadd.f32 %v879_v0, %v12752_v1  ;;  %v1537_v31 = vadd.f32 %v1536_v42, %v1535_v4  ;;  %v1458_v11 = vadd.f32 %v1457_v14, %v1456_v12 }
 0x168   :  { %v10570_v51 = vpop.f32.mrf.mxu1  ;;  %v10513_v30 = vpop.f32.mrf.mxu0  ;;  %v1540_v43 = vsel %vm1439_vm6, %v1506_v27, 0.0  ;;  %v1461_v0 = vsel %vm1439_vm6, %v1425_v40, 0.0  ;;  %v1542_v22 = vsel %vm1439_vm6, %v1507_v25, 0.0 }
 0x169   :  { %v12897_v10 = vadd.f32 %v1211_v20, %v943_v61  ;;  %v1508_v1 = vmul.f32 %v1426_v29, %v1426_v29  ;;  %v1539_v6 = vadd.f32 %v1538_v45, %v1537_v31  ;;  %v1460_v20 = vadd.f32 %v1459_v3, %v1458_v11  ;;  %v12910_v51 = vpop.permute.xlu0 %1361 }
 0x16a   :  { %v1219_v34 = vpop.f32.mrf.mxu1  ;;  %v884_v53 = vpop.f32.mrf.mxu0  ;;  %v1463_v42 = vsel %vm1439_vm6, %v1426_v29, 0.0 }
 0x16b   :  { %v1427_v39 = vmul.f32 %v12899_v24, %v12897_v10  ;;  %v944_v35 = vadd.f32 %v884_v53, %v12754_v7  ;;  %v1541_v40 = vadd.f32 %v1540_v43, %v1539_v6  ;;  %v1462_v4 = vadd.f32 %v1461_v0, %v1460_v20 }
 0x16c   :  { %v10571_v52 = vpop.f32.mrf.mxu1  ;;  %v10516_v57 = vpop.f32.mrf.mxu0  ;;  %v1544_v30 = vsel %vm1439_vm6, %v1508_v1, 0.0 }
 0x16d   :  { %v1509_v14 = vmul.f32 %v1427_v39, %v1427_v39  ;;  %v12908_v61 = vadd.f32 %v1216_v62, %v944_v35  ;;  %v1465_v7 = vsel %vm1439_vm6, %v1427_v39, 0.0  ;;  %v1543_v29 = vadd.f32 %v1542_v22, %v1541_v40  ;;  %v12921_v1 = vpop.permute.xlu1 %1366 }
 0x16e   :  { %v1224_v27 = vpop.f32.mrf.mxu1  ;;  %v887_v12 = vpop.f32.mrf.mxu0  ;;  %v1464_v3 = vadd.f32 %v1463_v42, %v1462_v4 }
 0x16f   :  { %v1428_v53 = vmul.f32 %v12910_v51, %v12908_v61  ;;  %v945_v11 = vadd.f32 %v887_v12, %v12756_v13  ;;  %v1546_v25 = vsel %vm1439_vm6, %v1509_v14, 0.0  ;;  %v1545_v39 = vadd.f32 %v1544_v30, %v1543_v29  ;;  %v12930_v30 = vpop.permute.xlu0 %1371 }
 0x170   :  { %v10574_v45 = vpop.f32.mrf.mxu1  ;;  %v10517_v62 = vpop.f32.mrf.mxu0  ;;  %v1466_v52 = vadd.f32 %v1465_v7, %v1464_v3 }
 0x171   :  { %v1467_v31 = vsel %vm1439_vm6, %v1428_v53, 0.0  ;;  %v1510_v43 = vmul.f32 %v1428_v53, %v1428_v53  ;;  %v12919_v0 = vadd.f32 %v1219_v34, %v945_v11  ;;  %v1547_v42 = vadd.f32 %v1546_v25, %v1545_v39 }
 0x172   :  { %v1227_v35 = vpop.f32.mrf.mxu1  ;;  %v892_v6 = vpop.f32.mrf.mxu0  ;;  %v1468_v14 = vadd.f32 %v1467_v31, %v1466_v52 }
 0x173   :  { %v1548_v20 = vsel %vm1439_vm6, %v1510_v43, 0.0  ;;  %v1429_v13 = vmul.f32 %v12921_v1, %v12919_v0  ;;  %v946_v57 = vadd.f32 %v892_v6, %v12758_v19  ;;  %v12939_v6 = vpop.permute.xlu1 %1376 }
 0x174   :  { %v10575_v22 = vpop.f32.mrf.mxu1  ;;  %v10520_v40 = vpop.f32.mrf.mxu0  ;;  %v1549_v7 = vadd.f32 %v1548_v20, %v1547_v42 }
 0x175   :  { %v1469_v34 = vsel %vm1439_vm6, %v1429_v13, 0.0  ;;  %v1511_v4 = vmul.f32 %v1429_v13, %v1429_v13  ;;  %v12928_v12 = vadd.f32 %v1224_v27, %v946_v57 }
 0x176   :  { %v1232_v53 = vpop.f32.mrf.mxu1  ;;  %v1470_v11 = vadd.f32 %v1469_v34, %v1468_v14  ;;  %v895_v45 = vpop.f32.mrf.mxu0 }
 0x177   :  { %v1550_v29 = vsel %vm1439_vm6, %v1511_v4, 0.0  ;;  %v1430_v19 = vmul.f32 %v12930_v30, %v12928_v12  ;;  %v947_v3 = vadd.f32 %v895_v45, %v12760_v26  ;;  %v12948_v45 = vpop.permute.xlu0 %1381 }
 0x178   :  { %v10578_v62 = vpop.f32.mrf.mxu1  ;;  %v1551_v25 = vadd.f32 %v1550_v29, %v1549_v7  ;;  %v10521_v31 = vpop.f32.mrf.mxu0 }
 0x179   :  { %v1471_v43 = vsel %vm1439_vm6, %v1430_v19, 0.0  ;;  %v1512_v27 = vmul.f32 %v1430_v19, %v1430_v19  ;;  %v12937_v39 = vadd.f32 %v1227_v35, %v947_v3 }
 0x17a   :  { %v1235_v52 = vpop.f32.mrf.mxu1  ;;  %v1472_v20 = vadd.f32 %v1471_v43, %v1470_v11  ;;  %v900_v13 = vpop.f32.mrf.mxu0 }
 0x17b   :  { %v1552_v57 = vsel %vm1439_vm6, %v1512_v27, 0.0  ;;  %v1431_v22 = vmul.f32 %v12939_v6, %v12937_v39  ;;  %v948_v26 = vadd.f32 %v900_v13, %v12762_v32 }
 0x17c   :  { %v10579_v42 = vpop.f32.mrf.mxu1  ;;  %v1553_v14 = vadd.f32 %v1552_v57, %v1551_v25  ;;  %v10524_v40 = vpop.f32.mrf.mxu0 }
 0x17d   :  { %v1473_v34 = vsel %vm1439_vm6, %v1431_v22, 0.0  ;;  %v1513_v4 = vmul.f32 %v1431_v22, %v1431_v22  ;;  %v12946_v35 = vadd.f32 %v1232_v53, %v948_v26  ;;  %v12957_v57 = vpop.permute.xlu1 %1386 }
 0x17e   :  { %v1240_v7 = vpop.f32.mrf.mxu1  ;;  %v1474_v11 = vadd.f32 %v1473_v34, %v1472_v20  ;;  %v903_v29 = vpop.f32.mrf.mxu0  ;;  %16375 = vst [vmem:[#allocation9_spill] sm:$0xff] %v12957_v57 }
 0x17f   :  { %v1554_v19 = vsel %vm1439_vm6, %v1513_v4, 0.0  ;;  %v1432_v3 = vmul.f32 %v12948_v45, %v12946_v35  ;;  %v949_v32 = vadd.f32 %v903_v29, %v12764_v38 }
 0x180   :  { %v10582_v62 = vpop.f32.mrf.mxu1  ;;  %v1555_v25 = vadd.f32 %v1554_v19, %v1553_v14  ;;  %v10525_v31 = vpop.f32.mrf.mxu0 }
 0x181   :  { %v1475_v43 = vsel %vm1439_vm6, %v1432_v3, 0.0  ;;  %v1514_v27 = vmul.f32 %v1432_v3, %v1432_v3  ;;  %v12955_v53 = vadd.f32 %v1235_v52, %v949_v32  ;;  %v12966_v3 = vpop.permute.xlu0 %1391 }
 0x182   :  { %v1243_v13 = vpop.f32.mrf.mxu1  ;;  %v1476_v20 = vadd.f32 %v1475_v43, %v1474_v11  ;;  %v908_v22 = vpop.f32.mrf.mxu0  ;;  %16376 = vst [vmem:[#allocation10_spill] sm:$0xff] %v12966_v3 }
 0x183   :  { %v1556_v26 = vsel %vm1439_vm6, %v1514_v27, 0.0  ;;  %v1433_v42 = vmul.f32 %v12957_v57, %v12955_v53  ;;  %v950_v38 = vadd.f32 %v908_v22, %v12766_v44 }
 0x184   :  { %v10583_v40 = vpop.f32.mrf.mxu1  ;;  %v1557_v14 = vadd.f32 %v1556_v26, %v1555_v25  ;;  %v10528_v34 = vpop.f32.mrf.mxu0 }
 0x185   :  { %v1477_v4 = vsel %vm1439_vm6, %v1433_v42, 0.0  ;;  %v1515_v29 = vmul.f32 %v1433_v42, %v1433_v42  ;;  %v12964_v52 = vadd.f32 %v1240_v7, %v950_v38  ;;  %v12975_v38 = vpop.permute.xlu1 %1396 }
 0x186   :  { %v1248_v19 = vpop.f32.mrf.mxu1  ;;  %v1478_v11 = vadd.f32 %v1477_v4, %v1476_v20  ;;  %v911_v32 = vpop.f32.mrf.mxu0  ;;  %16377 = vst [vmem:[#allocation11_spill] sm:$0xff] %v12975_v38 }
 0x187   :  { %v1558_v62 = vsel %vm1439_vm6, %v1515_v29, 0.0  ;;  %v1434_v31 = vmul.f32 %v12966_v3, %v12964_v52  ;;  %v951_v44 = vadd.f32 %v911_v32, %v12768_v50 }
 0x188   :  { %v10586_v43 = vpop.f32.mrf.mxu1  ;;  %v1559_v25 = vadd.f32 %v1558_v62, %v1557_v14  ;;  %v10529_v27 = vpop.f32.mrf.mxu0 }
 0x189   :  { %v1479_v22 = vsel %vm1439_vm6, %v1434_v31, 0.0  ;;  %v1516_v26 = vmul.f32 %v1434_v31, %v1434_v31  ;;  %v12973_v7 = vadd.f32 %v1243_v13, %v951_v44  ;;  %v12984_v43 = vpop.permute.xlu0 %1401 }
 0x18a   :  { %v1251_v42 = vpop.f32.mrf.mxu1  ;;  %v1480_v20 = vadd.f32 %v1479_v22, %v1478_v11  ;;  %v916_v40 = vpop.f32.mrf.mxu0  ;;  %16378 = vst [vmem:[#allocation12_spill] sm:$0xff] %v12984_v43 }
 0x18b   :  { %v1560_v34 = vsel %vm1439_vm6, %v1516_v26, 0.0  ;;  %v1435_v4 = vmul.f32 %v12975_v38, %v12973_v7  ;;  %v952_v50 = vadd.f32 %v916_v40, %v12770_v56 }
 0x18c   :  { %v10587_v29 = vpop.f32.mrf.mxu1  ;;  %v1561_v14 = vadd.f32 %v1560_v34, %v1559_v25  ;;  %v10532_v32 = vpop.f32.mrf.mxu0 }
 0x18d   :  { %v1481_v62 = vsel %vm1439_vm6, %v1435_v4, 0.0  ;;  %v1517_v31 = vmul.f32 %v1435_v4, %v1435_v4  ;;  %v12982_v13 = vadd.f32 %v1248_v19, %v952_v50  ;;  %v12993_v32 = vpop.permute.xlu1 %1406 }
 0x18e   :  { %v1256_v44 = vpop.f32.mrf.mxu1  ;;  %v1482_v11 = vadd.f32 %v1481_v62, %v1480_v20  ;;  %v919_v27 = vpop.f32.mrf.mxu0  ;;  %16379 = vst [vmem:[#allocation13_spill] sm:$0xff] %v12993_v32 }
 0x18f   :  { %v1562_v22 = vsel %vm1439_vm6, %v1517_v31, 0.0  ;;  %v1436_v26 = vmul.f32 %v12984_v43, %v12982_v13  ;;  %v953_v56 = vadd.f32 %v919_v27, %v12772_v2 }
 0x190   :  { %v10590_v40 = vpop.f32.mrf.mxu1  ;;  %v1563_v25 = vadd.f32 %v1562_v22, %v1561_v14  ;;  %v10533_v34 = vpop.f32.mrf.mxu0 }
 0x191   :  { %v1483_v29 = vsel %vm1439_vm6, %v1436_v26, 0.0  ;;  %v1518_v4 = vmul.f32 %v1436_v26, %v1436_v26  ;;  %v12991_v19 = vadd.f32 %v1251_v42, %v953_v56  ;;  %v13000_v56 = vpop.permute.xlu0 %1411 }
 0x192   :  { %v1259_v50 = vpop.f32.mrf.mxu1  ;;  %v1484_v20 = vadd.f32 %v1483_v29, %v1482_v11  ;;  %v924_v62 = vpop.f32.mrf.mxu0 }
 0x193   :  { %v1564_v31 = vsel %vm1439_vm6, %v1518_v4, 0.0  ;;  %v1437_v43 = vmul.f32 %v12993_v32, %v12991_v19  ;;  %v954_v2 = vadd.f32 %v924_v62, %v12774_v9 }
 0x194   :  { %v10591_v27 = vpop.f32.mrf.mxu1  ;;  %v1565_v14 = vadd.f32 %v1564_v31, %v1563_v25  ;;  %v10536_v22 = vpop.f32.mrf.mxu0 }
 0x195   :  { %v1485_v40 = vsel %vm1439_vm6, %v1437_v43, 0.0  ;;  %v1519_v26 = vmul.f32 %v1437_v43, %v1437_v43  ;;  %v1286_v42 = vadd.f32 %v1256_v44, %v954_v2 }
 0x196   :  { %v1486_v34 = vadd.f32 %v1485_v40, %v1484_v20  ;;  %v927_v50 = vpop.f32.mrf.mxu0 }
 0x197   :  { %v1566_v11 = vsel %vm1439_vm6, %v1519_v26, 0.0  ;;  %v1438_v29 = vmul.f32 %v13000_v56, %v1286_v42 }
 0x198   :  { %v1567_v4 = vadd.f32 %v1566_v11, %v1565_v14  ;;  %v10537_v38 = vpop.f32.mrf.mxu0 }
 0x199   :  { %v1487_v32 = vsel %vm1439_vm6, %v1438_v29, 0.0  ;;  %v1520_v9 = vmul.f32 %v1438_v29, %v1438_v29 }
 0x19a   :  { %v1488_v62 = vadd.f32 %v1487_v32, %v1486_v34 }
 0x19b   :  { %v1568_v25 = vsel %vm1439_vm6, %v1520_v9, 0.0 }
 0x19c   :  { %v1489_v31 = vrot.slane %v1488_v62, 4  ;;  %v1569_v27 = vadd.f32 %v1568_v25, %v1567_v4 }
 0x19e   :  { %v1490_v43 = vadd.f32 %v1489_v31, %v1488_v62  ;;  %v1570_v44 = vrot.slane %v1569_v27, 4 }
 0x1a0   :  { %v1491_v2 = vrot.slane %v1490_v43, 2  ;;  %v1571_v22 = vadd.f32 %v1570_v44, %v1569_v27 }
 0x1a2   :  { %v1492_v20 = vadd.f32 %v1491_v2, %v1490_v43  ;;  %v1572_v40 = vrot.slane %v1571_v22, 2 }
 0x1a4   :  { %v1493_v50 = vrot.slane %v1492_v20, 1  ;;  %v1573_v26 = vadd.f32 %v1572_v40, %v1571_v22 }
 0x1a6   :  { %v1494_v3 = vadd.f32 %v1493_v50, %v1492_v20  ;;  %v1574_v57 = vrot.slane %v1573_v26, 1 }
 0x1a8   :  { %v13006_v14 = vmul.f32 0.0078125, %v1494_v3  ;;  %v1575_v38 = vadd.f32 %v1574_v57, %v1573_v26 }
 0x1aa   :  { %v1576_v11 = vmul.f32 0.0078125, %v1575_v38  ;;  %v1577_v32 = vmul.f32 %v13006_v14, %v13006_v14  ;;  %v1605_v34 = vsub.f32 %v1286_v42, %v13006_v14  ;;  %v1595_v9 = vsub.f32 %v12908_v61, %v13006_v14 }
 0x1ab   :  { %v1596_v62 = vsub.f32 %v12919_v0, %v13006_v14  ;;  %v1597_v25 = vsub.f32 %v12928_v12, %v13006_v14  ;;  %v1598_v57 = vsub.f32 %v12937_v39, %v13006_v14  ;;  %v1581_v2 = vsub.f32 %v12800_v58, %v13006_v14  ;;  %v16382_v0 = vld [vmem:[#allocation8_spill] sm:$0xff] }
 0x1ac   :  { %v1578_v29 = vsub.f32 %v1576_v11, %v1577_v32  ;;  %v1582_v22 = vsub.f32 %v12795_v17, %v13006_v14  ;;  %v1583_v20 = vsub.f32 %v12802_v5, %v13006_v14  ;;  %v1584_v40 = vsub.f32 %v12807_v21, %v13006_v14  ;;  %v13056_v21 = vld [vmem:[%s16242_s7] ss:$0 sm:$0xff] }
 0x1ad   :  { %v1585_v50 = vsub.f32 %v12816_v15, %v13006_v14  ;;  %v1586_v26 = vsub.f32 %v12824_v59, %v13006_v14  ;;  %v1587_v38 = vsub.f32 %v12829_v8, %v13006_v14  ;;  %v1588_v58 = vsub.f32 %v12836_v18, %v13006_v14 }
 0x1ae   :  { %v1579_v4 = vadd.f32 1e-05, %v1578_v29  ;;  %v1589_v17 = vsub.f32 %v12849_v48, %v13006_v14  ;;  %v1590_v5 = vsub.f32 %v12856_v55, %v13006_v14  ;;  %v1591_v15 = vsub.f32 %v12861_v46, %v13006_v14  ;;  %v13073_v46 = vld [vmem:[%s16242_s7 + $0x1] ss:$0 sm:$0xff] }
 0x1af   :  { %v1592_v59 = vsub.f32 %v12873_v33, %v13006_v14  ;;  %v1593_v8 = vsub.f32 %v12886_v37, %v13006_v14  ;;  %v1594_v18 = vsub.f32 %v12897_v10, %v13006_v14 }
 0x1b0   :  { %12087 = vrsqrt.f32 %v1579_v4 }
 0x1bd   :  { %v13051_v11 = vpop.eup %12087 }
 0x1be   :  { %v1630_v48 = vmul.f32 %v13051_v11, %v1605_v34  ;;  %v1606_v55 = vmul.f32 %v13051_v11, %v1581_v2  ;;  %v1607_v32 = vmul.f32 %v13051_v11, %v1582_v22  ;;  %v1608_v29 = vmul.f32 %v13051_v11, %v1583_v20 }
 0x1bf   :  { %v1609_v33 = vmul.f32 %v13051_v11, %v1584_v40  ;;  %v1610_v37 = vmul.f32 %v13051_v11, %v1585_v50  ;;  %v1611_v4 = vmul.f32 %v13051_v11, %v1586_v26  ;;  %v1612_v10 = vmul.f32 %v13051_v11, %v1587_v38 }
 0x1c0   :  { %v1659_v34 = vmul.f32 %v13056_v21, %v1630_v48  ;;  %v1635_v2 = vmul.f32 %v13056_v21, %v1606_v55  ;;  %v1636_v22 = vmul.f32 %v13056_v21, %v1607_v32  ;;  %v1637_v20 = vmul.f32 %v13056_v21, %v1608_v29 }
 0x1c1   :  { %v1638_v44 = vmul.f32 %v13056_v21, %v1609_v33  ;;  %v1639_v43 = vmul.f32 %v13056_v21, %v1610_v37  ;;  %v1640_v40 = vmul.f32 %v13056_v21, %v1611_v4  ;;  %v1641_v50 = vmul.f32 %v13056_v21, %v1612_v10 }
 0x1c2   :  { %v1688_v26 = vadd.f32 %v13073_v46, %v1659_v34  ;;  %v1664_v38 = vadd.f32 %v13073_v46, %v1635_v2  ;;  %v1665_v48 = vadd.f32 %v13073_v46, %v1636_v22  ;;  %v1666_v55 = vadd.f32 %v13073_v46, %v1637_v20 }
 0x1c3   :  { %v1667_v32 = vadd.f32 %v13073_v46, %v1638_v44  ;;  %v1668_v29 = vadd.f32 %v13073_v46, %v1639_v43  ;;  %v1669_v33 = vadd.f32 %v13073_v46, %v1640_v40  ;;  %v1670_v37 = vadd.f32 %v13073_v46, %v1641_v50 }
 0x1c4   :  { %v1713_v27 = vmax.f32 %v1688_v26, 0.0  ;;  %v1689_v4 = vmax.f32 %v1664_v38, 0.0  ;;  %v1690_v31 = vmax.f32 %v1665_v48, 0.0  ;;  %v1691_v10 = vmax.f32 %v1666_v55, 0.0 }
 0x1c5   :  { %v1692_v42 = vmax.f32 %v1667_v32, 0.0  ;;  %v1693_v34 = vmax.f32 %v1668_v29, 0.0  ;;  %v1694_v3 = vmax.f32 %v1669_v33, 0.0  ;;  %v1695_v2 = vmax.f32 %v1670_v37, 0.0  ;;  %v12017_v29 = vld [vmem:[%s16241_s2 + $0x28] sm:$0xff]   ;;  %v12018_v33 = vld [vmem:[%s16241_s2 + $0x38] sm:$0xff]  }
 0x1c6   :  { %v1738_v22 = vmul.f32 %v1713_v27, %v13000_v56  ;;  %v1714_v20 = vmul.f32 %v1689_v4, %v12776_v47  ;;  %v1715_v44 = vmul.f32 %v1690_v31, %v12780_v60  ;;  %v1716_v43 = vmul.f32 %v1691_v10, %v12778_v54 }
 0x1c7   :  { %v1717_v40 = vmul.f32 %v1692_v42, %v12793_v63  ;;  %v1718_v50 = vmul.f32 %v1693_v34, %v12798_v28  ;;  %v1719_v26 = vmul.f32 %v1694_v3, %v12810_v41  ;;  %v1720_v38 = vmul.f32 %v1695_v2, %v12819_v49 }
 0x1c8   :  { %1763 = vst.msk [vmem:[#allocation2 + $0xc0] sm:$0xff] %vm1439_vm6, %v1738_v22  ;;  %1739 = vst.msk [vmem:[#allocation2] sm:$0xff] %vm1439_vm6, %v1714_v20  ;;  %v1613_v47 = vmul.f32 %v13051_v11, %v1588_v58  ;;  %v1614_v54 = vmul.f32 %v13051_v11, %v1589_v17  ;;  %v1615_v60 = vmul.f32 %v13051_v11, %v1590_v5 }
 0x1c9   :  { %1740 = vst.msk [vmem:[#allocation2 + $0x8] sm:$0xff] %vm1439_vm6, %v1715_v44  ;;  %1741 = vst.msk [vmem:[#allocation2 + $0x10] sm:$0xff] %vm1439_vm6, %v1716_v43  ;;  %v1616_v63 = vmul.f32 %v13051_v11, %v1591_v15  ;;  %v1617_v28 = vmul.f32 %v13051_v11, %v1592_v59  ;;  %v1618_v41 = vmul.f32 %v13051_v11, %v1593_v8 }
 0x1ca   :  { %1742 = vst.msk [vmem:[#allocation2 + $0x18] sm:$0xff] %vm1439_vm6, %v1717_v40  ;;  %1743 = vst.msk [vmem:[#allocation2 + $0x20] sm:$0xff] %vm1439_vm6, %v1718_v50  ;;  %v1619_v49 = vmul.f32 %v13051_v11, %v1594_v18  ;;  %v1620_v56 = vmul.f32 %v13051_v11, %v1595_v9  ;;  %v1642_v3 = vmul.f32 %v13056_v21, %v1613_v47 }
 0x1cb   :  { %1744 = vst.msk [vmem:[#allocation2 + $0x28] sm:$0xff] %vm1439_vm6, %v1719_v26  ;;  %1745 = vst.msk [vmem:[#allocation2 + $0x30] sm:$0xff] %vm1439_vm6, %v1720_v38  ;;  %v1643_v42 = vmul.f32 %v13056_v21, %v1614_v54  ;;  %v1644_v31 = vmul.f32 %v13056_v21, %v1615_v60  ;;  %v1645_v27 = vmul.f32 %v13056_v21, %v1616_v63 }
 0x1cc   :  { %v1646_v58 = vmul.f32 %v13056_v21, %v1617_v28  ;;  %v1647_v17 = vmul.f32 %v13056_v21, %v1618_v41  ;;  %v1648_v5 = vmul.f32 %v13056_v21, %v1619_v49  ;;  %v1649_v15 = vmul.f32 %v13056_v21, %v1620_v56  ;;  %v16380_v49 = vld [vmem:[#allocation6_spill] sm:$0xff] }
 0x1cd   :  { %v1671_v61 = vadd.f32 %v13073_v46, %v1642_v3  ;;  %v1672_v9 = vadd.f32 %v13073_v46, %v1643_v42  ;;  %v1673_v59 = vadd.f32 %v13073_v46, %v1644_v31  ;;  %v1674_v8 = vadd.f32 %v13073_v46, %v1645_v27  ;;  %v16381_v3 = vld [vmem:[#allocation7_spill] sm:$0xff]  ;;  %v12019_v31 = vld [vmem:[%s16241_s2 + $0x20] sm:$0xff]  }
 0x1ce   :  { %v1675_v18 = vadd.f32 %v13073_v46, %v1646_v58  ;;  %v1676_v48 = vadd.f32 %v13073_v46, %v1647_v17  ;;  %v1677_v55 = vadd.f32 %v13073_v46, %v1648_v5  ;;  %v1678_v32 = vadd.f32 %v13073_v46, %v1649_v15  ;;  %v12020_v17 = vld [vmem:[%s16241_s2 + $0x30] sm:$0xff]  }
 0x1cf   :  { %v1696_v37 = vmax.f32 %v1671_v61, 0.0  ;;  %v1697_v4 = vmax.f32 %v1672_v9, 0.0  ;;  %v1698_v10 = vmax.f32 %v1673_v59, 0.0  ;;  %v1699_v34 = vmax.f32 %v1674_v8, 0.0  ;;  %v1769_v20 = vld [vmem:[#allocation2] sm:$0xff] }
 0x1d0   :  { %v1811_v2 = vld [vmem:[#allocation2 + $0x1] sm:$0xff]  ;;  %v1812_v22 = vld [vmem:[#allocation2 + $0x9] sm:$0xff]  ;;  %v1700_v44 = vmax.f32 %v1675_v18, 0.0  ;;  %v1701_v43 = vmax.f32 %v1676_v48, 0.0  ;;  %v1702_v40 = vmax.f32 %v1677_v55, 0.0  ;;  %v1621_v50 = vmul.f32 %v13051_v11, %v1596_v62 }
 0x1d1   :  { %v1836_v26 = vpack.c.bf16 %v1812_v22, %v1811_v2  ;;  %v1770_v38 = vld [vmem:[#allocation2 + $0x8] sm:$0xff]  ;;  %v1813_v47 = vld [vmem:[#allocation2 + $0x11] sm:$0xff]  ;;  %v1814_v54 = vld [vmem:[#allocation2 + $0x19] sm:$0xff]  ;;  %v1721_v60 = vmul.f32 %v1696_v37, %v12833_v16  ;;  %v1722_v63 = vmul.f32 %v1697_v4, %v12843_v36  ;;  %v1723_v28 = vmul.f32 %v1698_v10, %v12858_v23 }
 0x1d2   :  { %v1794_v41 = vpack.c.bf16 %v1770_v38, %v1769_v20  ;;  %v1724_v56 = vmul.f32 %v1699_v34, %v16380_v49  ;;  %v1725_v42 = vmul.f32 %v1700_v44, %v16381_v3  ;;  %v1726_v62 = vmul.f32 %v1701_v43, %v16382_v0  ;;  %v1772_v15 = vld [vmem:[#allocation2 + $0x18] sm:$0xff]  ;;  %v16389_v49 = vld [vmem:[#allocation9_spill] sm:$0xff] }
 0x1d3   :  { %10597 = vmatmul.mubr.msk.bf16.vlgmr.msra.gmra.mxu0 %vm1439_vm6, %v1836_v26  ;;  %1746 = vst.msk [vmem:[#allocation2 + $0x38] sm:$0xff] %vm1439_vm6, %v1721_v60  ;;  %1747 = vst.msk [vmem:[#allocation2 + $0x40] sm:$0xff] %vm1439_vm6, %v1722_v63  ;;  %v1703_v16 = vmax.f32 %v1678_v32, 0.0  ;;  %v1727_v36 = vmul.f32 %v1702_v40, %v12899_v24  ;;  %v1837_v23 = vpack.c.bf16 %v1814_v54, %v1813_v47  ;;  %v16383_v58 = vmov 0.0   ;;  %v1815_v47 = vld [vmem:[#allocation2 + $0x21] sm:$0xff]  ;;  %v1816_v54 = vld [vmem:[#allocation2 + $0x29] sm:$0xff] }
 0x1d4   :  { %1748 = vst.msk [vmem:[#allocation2 + $0x48] sm:$0xff] %vm1439_vm6, %v1723_v28  ;;  %10653 = vmatmul.mubr.msk.bf16.vlgmr.msra.gmra.mxu1 %vm1439_vm6, %v1794_v41  ;;  %10705 = vmatpush3.bf16.msra.mxu0 %v12017_v29  ;;  %1749 = vst.msk [vmem:[#allocation2 + $0x50] sm:$0xff] %vm1439_vm6, %v1724_v56  ;;  %v1622_v27 = vmul.f32 %v13051_v11, %v1597_v25  ;;  %v1650_v5 = vmul.f32 %v13056_v21, %v1621_v50  ;;  %v1771_v25 = vld [vmem:[#allocation2 + $0x10] sm:$0xff]  ;;  %v1773_v28 = vld [vmem:[#allocation2 + $0x20] sm:$0xff] }
 0x1d5   :  { %1750 = vst.msk [vmem:[#allocation2 + $0x58] sm:$0xff] %vm1439_vm6, %v1725_v42  ;;  %10761 = vmatpush3.bf16.msra.mxu1 %v12018_v33  ;;  %10600 = vmatprep.mubr.msk.bf16.mxu0 %vm12204_vm2, %v16383_v58  ;;  %1751 = vst.msk [vmem:[#allocation2 + $0x60] sm:$0xff] %vm1439_vm6, %v1726_v62  ;;  %v1728_v24 = vmul.f32 %v1703_v16, %v12910_v51  ;;  %v1623_v12 = vmul.f32 %v13051_v11, %v1598_v57  ;;  %v1774_v41 = vld [vmem:[#allocation2 + $0x28] sm:$0xff] }
 0x1d6   :  { %1752 = vst.msk [vmem:[#allocation2 + $0x68] sm:$0xff] %vm1439_vm6, %v1727_v36  ;;  %10656 = vmatprep.mubr.msk.bf16.mxu1 %vm12204_vm2, %v16383_v58  ;;  %10706 = vmatprep.subr.bf16.mxu0 %v16383_v58  ;;  %v1651_v51 = vmul.f32 %v13056_v21, %v1622_v27  ;;  %v16384_v61 = vsub.f32 %v12946_v35, %v13006_v14 }
 0x1d7   :  { %v16385_v59 = vsub.f32 %v12955_v53, %v13006_v14  ;;  %1753 = vst.msk [vmem:[#allocation2 + $0x70] sm:$0xff] %vm1439_vm6, %v1728_v24  ;;  %10762 = vmatprep.subr.bf16.mxu1 %v16383_v58  ;;  %v1679_v57 = vadd.f32 %v13073_v46, %v1650_v5  ;;  %v1652_v8 = vmul.f32 %v13056_v21, %v1623_v12  ;;  %v16393_v5 = vld [vmem:[#allocation12_spill] sm:$0xff] }
 0x1d8   :  { %v1624_v9 = vmul.f32 %v13051_v11, %v16384_v61  ;;  %v16386_v18 = vsub.f32 %v12964_v52, %v13006_v14  ;;  %v16387_v48 = vsub.f32 %v12973_v7, %v13006_v14  ;;  %10707 = vmatpush3.bf16.msra.mxu0 %v12019_v31  ;;  %v1680_v55 = vadd.f32 %v13073_v46, %v1651_v51  ;;  %v16392_v31 = vld [vmem:[#allocation11_spill] sm:$0xff] }
 0x1d9   :  { %v1625_v39 = vmul.f32 %v13051_v11, %v16385_v59  ;;  %v16388_v33 = vsub.f32 %v12982_v13, %v13006_v14  ;;  %v1795_v52 = vpack.c.bf16 %v1772_v15, %v1771_v25  ;;  %10763 = vmatpush3.bf16.msra.mxu1 %v12020_v17  ;;  %v1704_v4 = vmax.f32 %v1679_v57, 0.0  ;;  %10816 = vmatprep.subr.bf16.mxu0 %v16383_v58  ;;  %v13248_v17 = vld [vmem:[#allocation2 + $0xa] sm:$0xff]  ;;  %v13263_v51 = vld [vmem:[#allocation2 + $0x1a] sm:$0xff] }
 0x1da   :  { %v1626_v35 = vmul.f32 %v13051_v11, %v16386_v18  ;;  %v1627_v53 = vmul.f32 %v13051_v11, %v16387_v48  ;;  %v1653_v32 = vmul.f32 %v13056_v21, %v1624_v9  ;;  %v1681_v10 = vadd.f32 %v13073_v46, %v1652_v8  ;;  %10872 = vmatprep.subr.bf16.mxu1 %v16383_v58  ;;  %v1817_v25 = vld [vmem:[#allocation2 + $0x31] sm:$0xff]  ;;  %v1818_v15 = vld [vmem:[#allocation2 + $0x39] sm:$0xff]  ;;  %v13267_v9 = vld [vmem:[#allocation2 + $0x22] sm:$0xff] }
 0x1db   :  { %v1654_v29 = vmul.f32 %v13056_v21, %v1625_v39  ;;  %v1628_v37 = vmul.f32 %v13051_v11, %v16388_v33  ;;  %v1705_v34 = vmax.f32 %v1680_v55, 0.0  ;;  %10601 = vmatmul.mubr.msk.bf16.gmra.mxu0 %vm1439_vm6, %v1837_v23  ;;  %v1729_v13 = vmul.f32 %v1704_v4, %v12921_v1  ;;  %v13265_v61 = vld [vmem:[#allocation2 + $0x1b] sm:$0xff]  ;;  %v13269_v59 = vld [vmem:[#allocation2 + $0x2a] sm:$0xff]  ;;  %v13273_v57 = vld [vmem:[#allocation2 + $0x32] sm:$0xff]  ;;  %5834 = vst.msk [vmem:[#allocation4 + $0x50] sm:$0x3f] %vm5833_vm8, %v16383_v58 }
 0x1dc   :  { %v1655_v7 = vmul.f32 %v13056_v21, %v1626_v35  ;;  %v1682_v2 = vadd.f32 %v13073_v46, %v1653_v32  ;;  %v1656_v20 = vmul.f32 %v13056_v21, %v1627_v53  ;;  %v1706_v44 = vmax.f32 %v1681_v10, 0.0  ;;  %10657 = vmatmul.mubr.msk.bf16.gmra.mxu1 %vm1439_vm6, %v1795_v52  ;;  %10604 = vmatprep.mubr.msk.bf16.mxu0 %vm12204_vm2, %v16383_v58  ;;  %v13271_v39 = vld [vmem:[#allocation2 + $0x23] sm:$0xff]  ;;  %v1775_v8 = vld [vmem:[#allocation2 + $0x30] sm:$0xff]  ;;  %v1776_v18 = vld [vmem:[#allocation2 + $0x38] sm:$0xff] }
 0x1dd   :  { %v1683_v22 = vadd.f32 %v13073_v46, %v1654_v29  ;;  %v1657_v43 = vmul.f32 %v13056_v21, %v1628_v37  ;;  %v1730_v40 = vmul.f32 %v1705_v34, %v12930_v30  ;;  %10660 = vmatprep.mubr.msk.bf16.mxu1 %vm12204_vm2, %v16383_v58  ;;  %1754 = vst.msk [vmem:[#allocation2 + $0x78] sm:$0xff] %vm1439_vm6, %v1729_v13  ;;  %v13280_v35 = vld [vmem:[#allocation2 + $0x3a] sm:$0xff]  ;;  %v13284_v53 = vld [vmem:[#allocation2 + $0x42] sm:$0xff]  ;;  %v13288_v29 = vld [vmem:[#allocation2 + $0x4a] sm:$0xff] }
 0x1de   :  { %v1707_v50 = vmax.f32 %v1682_v2, 0.0  ;;  %v1684_v26 = vadd.f32 %v13073_v46, %v1655_v7  ;;  %v1731_v1 = vmul.f32 %v1706_v44, %v12939_v6  ;;  %v1685_v30 = vadd.f32 %v13073_v46, %v1656_v20  ;;  %v16390_v6 = vld [vmem:[#allocation10_spill] sm:$0xff]  ;;  %v13286_v32 = vld [vmem:[#allocation2 + $0x3b] sm:$0xff]  ;;  %v13290_v33 = vld [vmem:[#allocation2 + $0x43] sm:$0xff] }
 0x1df   :  { %v1708_v38 = vmax.f32 %v1683_v22, 0.0  ;;  %1755 = vst.msk [vmem:[#allocation2 + $0x80] sm:$0xff] %vm1439_vm6, %v1730_v40  ;;  %v1686_v3 = vadd.f32 %v13073_v46, %v1657_v43  ;;  %v16391_v62 = vsub.f32 %v12991_v19, %v13006_v14  ;;  %v1838_v16 = vpack.c.bf16 %v1816_v54, %v1815_v47  ;;  %v13252_v19 = vld [vmem:[#allocation2 + $0xb] sm:$0xff]  ;;  %v13282_v48 = vld [vmem:[#allocation2 + $0x33] sm:$0xff]  ;;  %v13303_v22 = vld [vmem:[#allocation2 + $0x5b] sm:$0xff] }
 0x1e0   :  { %v1732_v60 = vmul.f32 %v1707_v50, %v12948_v45  ;;  %v1709_v63 = vmax.f32 %v1684_v26, 0.0  ;;  %1756 = vst.msk [vmem:[#allocation2 + $0x88] sm:$0xff] %vm1439_vm6, %v1731_v1  ;;  %v1710_v0 = vmax.f32 %v1685_v30, 0.0  ;;  %v1796_v23 = vpack.c.bf16 %v1774_v41, %v1773_v28  ;;  %v13254_v14 = vld [vmem:[#allocation2 + $0x12] sm:$0xff]  ;;  %v13296_v4 = vld [vmem:[#allocation2 + $0x5a] sm:$0xff]  ;;  %v16394_v34 = vld [vmem:[#allocation13_spill] sm:$0xff] }
 0x1e1   :  { %v1733_v56 = vmul.f32 %v1708_v38, %v16389_v49  ;;  %v1629_v45 = vmul.f32 %v13051_v11, %v16391_v62  ;;  %v1711_v36 = vmax.f32 %v1686_v3, 0.0  ;;  %v13256_v11 = vld [vmem:[#allocation2 + $0x13] sm:$0xff]  ;;  %v13292_v37 = vld [vmem:[#allocation2 + $0x4b] sm:$0xff]  ;;  %v13305_v20 = vld [vmem:[#allocation2 + $0x62] sm:$0xff]  ;;  %v1839_v43 = vpack.c.bf16 %v1818_v15, %v1817_v25 }
 0x1e2   :  { %1757 = vst.msk [vmem:[#allocation2 + $0x90] sm:$0xff] %vm1439_vm6, %v1732_v60  ;;  %v1734_v42 = vmul.f32 %v1709_v63, %v16390_v6  ;;  %v1735_v27 = vmul.f32 %v1710_v0, %v16392_v31  ;;  %v13294_v52 = vld [vmem:[#allocation2 + $0x52] sm:$0xff]  ;;  %v13307_v13 = vld [vmem:[#allocation2 + $0x6a] sm:$0xff]  ;;  %v1797_v54 = vpack.c.bf16 %v1776_v18, %v1775_v8  ;;  %v1819_v62 = vld [vmem:[#allocation2 + $0x41] sm:$0xff] }
 0x1e3   :  { %1758 = vst.msk [vmem:[#allocation2 + $0x98] sm:$0xff] %vm1439_vm6, %v1733_v56  ;;  %v1658_v24 = vmul.f32 %v13056_v21, %v1629_v45  ;;  %10605 = vmatmul.mubr.msk.bf16.gmra.mxu0 %vm1439_vm6, %v1838_v16  ;;  %v1736_v12 = vmul.f32 %v1711_v36, %v16393_v5  ;;  %v13298_v10 = vld [vmem:[#allocation2 + $0x53] sm:$0xff]  ;;  %v13311_v40 = vld [vmem:[#allocation2 + $0x63] sm:$0xff]  ;;  %v13313_v50 = vld [vmem:[#allocation2 + $0x6b] sm:$0xff] }
 0x1e4   :  { %1759 = vst.msk [vmem:[#allocation2 + $0xa0] sm:$0xff] %vm1439_vm6, %v1734_v42  ;;  %10661 = vmatmul.mubr.msk.bf16.gmra.mxu1 %vm1439_vm6, %v1796_v23  ;;  %10608 = vmatprep.mubr.msk.bf16.mxu0 %vm12204_vm2, %v16383_v58  ;;  %1760 = vst.msk [vmem:[#allocation2 + $0xa8] sm:$0xff] %vm1439_vm6, %v1735_v27  ;;  %v13315_v26 = vld [vmem:[#allocation2 + $0x72] sm:$0xff]  ;;  %v1820_v36 = vld [vmem:[#allocation2 + $0x49] sm:$0xff] }
 0x1e5   :  { %v1687_v21 = vadd.f32 %v13073_v46, %v1658_v24  ;;  %10664 = vmatprep.mubr.msk.bf16.mxu1 %vm12204_vm2, %v16383_v58  ;;  %1761 = vst.msk [vmem:[#allocation2 + $0xb0] sm:$0xff] %vm1439_vm6, %v1736_v12  ;;  %v13278_v46 = vld [vmem:[#allocation2 + $0x2b] sm:$0xff]  ;;  %v13326_v63 = vld [vmem:[#allocation2 + $0x73] sm:$0xff]  ;;  %v1840_v18 = vpack.c.bf16 %v1820_v36, %v1819_v62  ;;  %v13392_v27 = vld [vmem:[#allocation2 + $0xc3] sm:$0xff] }
 0x1e6   :  { %v13324_v60 = vld [vmem:[#allocation2 + $0x7a] sm:$0xff]  ;;  %16398 = vst [vmem:[#allocation9_spill] sm:$0xff] %v13392_v27  ;;  %v13424_v36 = vld [vmem:[#allocation2 + $0x25] sm:$0xff]  ;;  %v1779_v8 = vld [vmem:[#allocation2 + $0x50] sm:$0xff] }
 0x1e7   :  { %v1712_v55 = vmax.f32 %v1687_v21, 0.0  ;;  %v13328_v30 = vld [vmem:[#allocation2 + $0x7b] sm:$0xff]  ;;  %v13339_v3 = vld [vmem:[#allocation2 + $0x83] sm:$0xff]  ;;  %16407 = vst [vmem:[#allocation18_spill] sm:$0xff] %v13424_v36  ;;  %v13426_v38 = vld [vmem:[#allocation2 + $0x2c] sm:$0xff] }
 0x1e8   :  { %v13335_v49 = vld [vmem:[#allocation2 + $0x82] sm:$0xff]  ;;  %v13394_v16 = vld [vmem:[#allocation2 + $0x14] sm:$0xff]  ;;  %16408 = vst [vmem:[#allocation19_spill] sm:$0xff] %v13426_v38 }
 0x1e9   :  { %v1737_v2 = vmul.f32 %v1712_v55, %v16394_v34  ;;  %v13337_v56 = vld [vmem:[#allocation2 + $0x8a] sm:$0xff]  ;;  %v1777_v55 = vld [vmem:[#allocation2 + $0x40] sm:$0xff]  ;;  %16399 = vst [vmem:[#allocation10_spill] sm:$0xff] %v13394_v16  ;;  %v13396_v0 = vld [vmem:[#allocation2 + $0x15] sm:$0xff] }
 0x1ea   :  { %v13350_v45 = vld [vmem:[#allocation2 + $0x8b] sm:$0xff]  ;;  %v13366_v12 = vld [vmem:[#allocation2 + $0x93] sm:$0xff]  ;;  %v13388_v21 = vld [vmem:[#allocation2 + $0xc2] sm:$0xff]  ;;  %16400 = vst [vmem:[#allocation11_spill] sm:$0xff] %v13396_v0 }
 0x1eb   :  { %1762 = vst.msk [vmem:[#allocation2 + $0xb8] sm:$0xff] %vm1439_vm6, %v1737_v2  ;;  %10609 = vmatmul.mubr.msk.bf16.gmra.mxu0 %vm1439_vm6, %v1839_v43  ;;  %v13356_v23 = vld [vmem:[#allocation2 + $0x92] sm:$0xff]  ;;  %v13358_v31 = vld [vmem:[#allocation2 + $0x9a] sm:$0xff]  ;;  %v13370_v15 = vld [vmem:[#allocation2 + $0xa2] sm:$0xff] }
 0x1ec   :  { %10665 = vmatmul.mubr.msk.bf16.gmra.mxu1 %vm1439_vm6, %v1797_v54  ;;  %10612 = vmatprep.mubr.msk.bf16.mxu0 %vm12204_vm2, %v16383_v58  ;;  %v13368_v25 = vld [vmem:[#allocation2 + $0x9b] sm:$0xff]  ;;  %v1778_v34 = vld [vmem:[#allocation2 + $0x48] sm:$0xff]  ;;  %16397 = vst [vmem:[#allocation8_spill] sm:$0xff] %v13388_v21 }
 0x1ed   :  { %10668 = vmatprep.mubr.msk.bf16.mxu1 %vm12204_vm2, %v16383_v58  ;;  %v13378_v2 = vld [vmem:[#allocation2 + $0xa3] sm:$0xff]  ;;  %v13386_v24 = vld [vmem:[#allocation2 + $0xab] sm:$0xff]  ;;  %v1798_v43 = vpack.c.bf16 %v1778_v34, %v1777_v55  ;;  %v1822_v28 = vld [vmem:[#allocation2 + $0x59] sm:$0xff] }
 0x1ee   :  { %16395 = vst [vmem:[#allocation6_spill] sm:$0xff] %v13378_v2  ;;  %v13384_v5 = vld [vmem:[#allocation2 + $0xaa] sm:$0xff]  ;;  %16396 = vst [vmem:[#allocation7_spill] sm:$0xff] %v13386_v24  ;;  %v13413_v55 = vld [vmem:[#allocation2 + $0x1c] sm:$0xff] }
 0x1ef   :  { %v13415_v34 = vld [vmem:[#allocation2 + $0x24] sm:$0xff]  ;;  %v1780_v1 = vld [vmem:[#allocation2 + $0x58] sm:$0xff]  ;;  %v13432_v44 = vld [vmem:[#allocation2 + $0x2d] sm:$0xff] }
 0x1f0   :  { %16405 = vst [vmem:[#allocation16_spill] sm:$0xff] %v13415_v34  ;;  %v13422_v47 = vld [vmem:[#allocation2 + $0x1d] sm:$0xff]  ;;  %16410 = vst [vmem:[#allocation21_spill] sm:$0xff] %v13432_v44  ;;  %v13434_v7 = vld [vmem:[#allocation2 + $0x35] sm:$0xff] }
 0x1f1   :  { %16406 = vst [vmem:[#allocation17_spill] sm:$0xff] %v13422_v47  ;;  %16411 = vst [vmem:[#allocation22_spill] sm:$0xff] %v13434_v7  ;;  %v13450_v24 = vld [vmem:[#allocation2 + $0x45] sm:$0xff]  ;;  %v13454_v62 = vld [vmem:[#allocation2 + $0x54] sm:$0xff]  ;;  %v1799_v7 = vpack.c.bf16 %v1780_v1, %v1779_v8 }
 0x1f2   :  { %v13398_v42 = vld [vmem:[#allocation2 + $0xb2] sm:$0xff]  ;;  %v13400_v54 = vld [vmem:[#allocation2 + $0xba] sm:$0xff]  ;;  %16415 = vst [vmem:[#allocation26_spill] sm:$0xff] %v13450_v24  ;;  %16417 = vst [vmem:[#allocation28_spill] sm:$0xff] %v13454_v62 }
 0x1f3   :  { %16401 = vst [vmem:[#allocation12_spill] sm:$0xff] %v13398_v42  ;;  %16402 = vst [vmem:[#allocation13_spill] sm:$0xff] %v13400_v54  ;;  %v13402_v6 = vld [vmem:[#allocation2 + $0xb3] sm:$0xff]  ;;  %10613 = vmatmul.mubr.msk.bf16.gmra.mxu0 %vm1439_vm6, %v1840_v18  ;;  %v13405_v41 = vld [vmem:[#allocation2 + $0xbb] sm:$0xff] }
 0x1f4   :  { %16403 = vst [vmem:[#allocation14_spill] sm:$0xff] %v13402_v6  ;;  %16404 = vst [vmem:[#allocation15_spill] sm:$0xff] %v13405_v41  ;;  %10669 = vmatmul.mubr.msk.bf16.gmra.mxu1 %vm1439_vm6, %v1798_v43  ;;  %10616 = vmatprep.mubr.msk.bf16.mxu0 %vm12204_vm2, %v16383_v58  ;;  %v1821_v18 = vld [vmem:[#allocation2 + $0x51] sm:$0xff]  ;;  %v13442_v41 = vld [vmem:[#allocation2 + $0x3c] sm:$0xff] }
 0x1f5   :  { %10672 = vmatprep.mubr.msk.bf16.mxu1 %vm12204_vm2, %v16383_v58  ;;  %v13430_v43 = vld [vmem:[#allocation2 + $0x34] sm:$0xff]  ;;  %16412 = vst [vmem:[#allocation23_spill] sm:$0xff] %v13442_v41  ;;  %v13444_v6 = vld [vmem:[#allocation2 + $0x44] sm:$0xff]  ;;  %v13452_v2 = vld [vmem:[#allocation2 + $0x4c] sm:$0xff]  ;;  %v1841_v36 = vpack.c.bf16 %v1822_v28, %v1821_v18 }
 0x1f6   :  { %16409 = vst [vmem:[#allocation20_spill] sm:$0xff] %v13430_v43  ;;  %16413 = vst [vmem:[#allocation24_spill] sm:$0xff] %v13444_v6  ;;  %v13446_v54 = vld [vmem:[#allocation2 + $0x3d] sm:$0xff]  ;;  %v13460_v34 = vld [vmem:[#allocation2 + $0x4d] sm:$0xff] }
 0x1f7   :  { %16414 = vst [vmem:[#allocation25_spill] sm:$0xff] %v13446_v54  ;;  %16416 = vst [vmem:[#allocation27_spill] sm:$0xff] %v13452_v2  ;;  %v13462_v38 = vld [vmem:[#allocation2 + $0x55] sm:$0xff]  ;;  %v13468_v44 = vld [vmem:[#allocation2 + $0x64] sm:$0xff] }
 0x1f8   :  { %16418 = vst [vmem:[#allocation29_spill] sm:$0xff] %v13460_v34  ;;  %16419 = vst [vmem:[#allocation30_spill] sm:$0xff] %v13462_v38  ;;  %v13464_v0 = vld [vmem:[#allocation2 + $0x5c] sm:$0xff]  ;;  %v13472_v16 = vld [vmem:[#allocation2 + $0x65] sm:$0xff] }
 0x1f9   :  { %16420 = vst [vmem:[#allocation31_spill] sm:$0xff] %v13464_v0  ;;  %16421 = vst [vmem:[#allocation32_spill] sm:$0xff] %v13468_v44  ;;  %v13470_v47 = vld [vmem:[#allocation2 + $0x5d] sm:$0xff]  ;;  %v13478_v54 = vld [vmem:[#allocation2 + $0x6c] sm:$0xff] }
 0x1fa   :  { %16422 = vst [vmem:[#allocation33_spill] sm:$0xff] %v13470_v47  ;;  %16423 = vst [vmem:[#allocation34_spill] sm:$0xff] %v13472_v16  ;;  %v13480_v43 = vld [vmem:[#allocation2 + $0x74] sm:$0xff]  ;;  %v13489_v42 = vld [vmem:[#allocation2 + $0x7c] sm:$0xff] }
 0x1fb   :  { %16424 = vst [vmem:[#allocation35_spill] sm:$0xff] %v13478_v54  ;;  %16425 = vst [vmem:[#allocation36_spill] sm:$0xff] %v13480_v43  ;;  %v13482_v41 = vld [vmem:[#allocation2 + $0x6d] sm:$0xff]  ;;  %10617 = vmatmul.mubr.msk.bf16.gmra.mxu0 %vm1439_vm6, %v1841_v36  ;;  %v13487_v18 = vld [vmem:[#allocation2 + $0x75] sm:$0xff] }
 0x1fc   :  { %16426 = vst [vmem:[#allocation37_spill] sm:$0xff] %v13482_v41  ;;  %16427 = vst [vmem:[#allocation38_spill] sm:$0xff] %v13487_v18  ;;  %v13491_v27 = vld [vmem:[#allocation2 + $0x84] sm:$0xff]  ;;  %10673 = vmatmul.mubr.msk.bf16.gmra.mxu1 %vm1439_vm6, %v1799_v7  ;;  %10620 = vmatprep.mubr.msk.bf16.mxu0 %vm12204_vm2, %v16383_v58  ;;  %v13504_v47 = vld [vmem:[#allocation2 + $0x8c] sm:$0xff] }
 0x1fd   :  { %16428 = vst [vmem:[#allocation39_spill] sm:$0xff] %v13489_v42  ;;  %16429 = vst [vmem:[#allocation40_spill] sm:$0xff] %v13491_v27  ;;  %v1823_v28 = vld [vmem:[#allocation2 + $0x61] sm:$0xff]  ;;  %v1824_v21 = vld [vmem:[#allocation2 + $0x69] sm:$0xff]  ;;  %10676 = vmatprep.mubr.msk.bf16.mxu1 %vm12204_vm2, %v16383_v58 }
 0x1fe   :  { %v13500_v36 = vld [vmem:[#allocation2 + $0x7d] sm:$0xff]  ;;  %v13502_v38 = vld [vmem:[#allocation2 + $0x85] sm:$0xff]  ;;  %16432 = vst [vmem:[#allocation43_spill] sm:$0xff] %v13504_v47  ;;  %v13510_v7 = vld [vmem:[#allocation2 + $0x94] sm:$0xff] }
 0x1ff   :  { %16430 = vst [vmem:[#allocation41_spill] sm:$0xff] %v13500_v36  ;;  %16431 = vst [vmem:[#allocation42_spill] sm:$0xff] %v13502_v38  ;;  %v1781_v8 = vld [vmem:[#allocation2 + $0x60] sm:$0xff]  ;;  %v1782_v1 = vld [vmem:[#allocation2 + $0x68] sm:$0xff]  ;;  %v1842_v38 = vpack.c.bf16 %v1824_v21, %v1823_v28 }
 0x200   :  { %16433 = vst [vmem:[#allocation44_spill] sm:$0xff] %v13510_v7  ;;  %v13512_v16 = vld [vmem:[#allocation2 + $0x8d] sm:$0xff]  ;;  %v13514_v41 = vld [vmem:[#allocation2 + $0x95] sm:$0xff]  ;;  %v13522_v62 = vld [vmem:[#allocation2 + $0xa4] sm:$0xff]  ;;  %v1800_v7 = vpack.c.bf16 %v1782_v1, %v1781_v8 }
 0x201   :  { %16434 = vst [vmem:[#allocation45_spill] sm:$0xff] %v13512_v16  ;;  %16435 = vst [vmem:[#allocation46_spill] sm:$0xff] %v13514_v41  ;;  %v13520_v0 = vld [vmem:[#allocation2 + $0x9c] sm:$0xff]  ;;  %v13528_v24 = vld [vmem:[#allocation2 + $0xa5] sm:$0xff] }
 0x202   :  { %16436 = vst [vmem:[#allocation47_spill] sm:$0xff] %v13520_v0  ;;  %16437 = vst [vmem:[#allocation48_spill] sm:$0xff] %v13522_v62  ;;  %v13524_v43 = vld [vmem:[#allocation2 + $0x9d] sm:$0xff]  ;;  %v13530_v34 = vld [vmem:[#allocation2 + $0xac] sm:$0xff] }
 0x203   :  { %16438 = vst [vmem:[#allocation49_spill] sm:$0xff] %v13524_v43  ;;  %16439 = vst [vmem:[#allocation50_spill] sm:$0xff] %v13528_v24  ;;  %v13532_v6 = vld [vmem:[#allocation2 + $0xb4] sm:$0xff]  ;;  %v13542_v18 = vld [vmem:[#allocation2 + $0xbc] sm:$0xff]  ;;  %10621 = vmatmul.mubr.msk.bf16.gmra.mxu0 %vm1439_vm6, %v1842_v38 }
 0x204   :  { %16440 = vst [vmem:[#allocation51_spill] sm:$0xff] %v13530_v34  ;;  %16441 = vst [vmem:[#allocation52_spill] sm:$0xff] %v13532_v6  ;;  %v13538_v27 = vld [vmem:[#allocation2 + $0xad] sm:$0xff]  ;;  %v13540_v47 = vld [vmem:[#allocation2 + $0xb5] sm:$0xff]  ;;  %10677 = vmatmul.mubr.msk.bf16.gmra.mxu1 %vm1439_vm6, %v1800_v7  ;;  %10624 = vmatprep.mubr.msk.bf16.mxu0 %vm12204_vm2, %v16383_v58 }
 0x205   :  { %16442 = vst [vmem:[#allocation53_spill] sm:$0xff] %v13538_v27  ;;  %16443 = vst [vmem:[#allocation54_spill] sm:$0xff] %v13540_v47  ;;  %v13546_v16 = vld [vmem:[#allocation2 + $0xbd] sm:$0xff]  ;;  %v13559_v42 = vld [vmem:[#allocation2 + $0x26] sm:$0xff]  ;;  %10680 = vmatprep.mubr.msk.bf16.mxu1 %vm12204_vm2, %v16383_v58 }
 0x206   :  { %16444 = vst [vmem:[#allocation55_spill] sm:$0xff] %v13542_v18  ;;  %16445 = vst [vmem:[#allocation56_spill] sm:$0xff] %v13546_v16  ;;  %v13554_v41 = vld [vmem:[#allocation2 + $0x1e] sm:$0xff]  ;;  %v13561_v21 = vld [vmem:[#allocation2 + $0x2e] sm:$0xff] }
 0x207   :  { %16446 = vst [vmem:[#allocation57_spill] sm:$0xff] %v13554_v41  ;;  %v13557_v43 = vld [vmem:[#allocation2 + $0x1f] sm:$0xff]  ;;  %16448 = vst [vmem:[#allocation59_spill] sm:$0xff] %v13559_v42  ;;  %v1825_v28 = vld [vmem:[#allocation2 + $0x71] sm:$0xff] }
 0x208   :  { %16447 = vst [vmem:[#allocation58_spill] sm:$0xff] %v13557_v43  ;;  %16449 = vst [vmem:[#allocation60_spill] sm:$0xff] %v13561_v21  ;;  %v1826_v1 = vld [vmem:[#allocation2 + $0x79] sm:$0xff]  ;;  %v13566_v8 = vld [vmem:[#allocation2 + $0x27] sm:$0xff] }
 0x209   :  { %16450 = vst [vmem:[#allocation61_spill] sm:$0xff] %v13566_v8  ;;  %v13568_v54 = vld [vmem:[#allocation2 + $0x2f] sm:$0xff]  ;;  %v1784_v47 = vld [vmem:[#allocation2 + $0x78] sm:$0xff]  ;;  %v13586_v27 = vld [vmem:[#allocation2 + $0x46] sm:$0xff] }
 0x20a   :  { %16451 = vst [vmem:[#allocation62_spill] sm:$0xff] %v13568_v54  ;;  %v13570_v44 = vld [vmem:[#allocation2 + $0x36] sm:$0xff]  ;;  %v13576_v7 = vld [vmem:[#allocation2 + $0x3e] sm:$0xff]  ;;  %16456 = vst [vmem:[#allocation67_spill] sm:$0xff] %v13586_v27  ;;  %v1843_v54 = vpack.c.bf16 %v1826_v1, %v1825_v28 }
 0x20b   :  { %16452 = vst [vmem:[#allocation63_spill] sm:$0xff] %v13570_v44  ;;  %v1783_v36 = vld [vmem:[#allocation2 + $0x70] sm:$0xff]  ;;  %16453 = vst [vmem:[#allocation64_spill] sm:$0xff] %v13576_v7  ;;  %v13580_v6 = vld [vmem:[#allocation2 + $0x3f] sm:$0xff] }
 0x20c   :  { %v13578_v16 = vld [vmem:[#allocation2 + $0x37] sm:$0xff]  ;;  %16455 = vst [vmem:[#allocation66_spill] sm:$0xff] %v13580_v6  ;;  %v13588_v38 = vld [vmem:[#allocation2 + $0x4e] sm:$0xff]  ;;  %v13606_v44 = vld [vmem:[#allocation2 + $0x5f] sm:$0xff]  ;;  %v1801_v6 = vpack.c.bf16 %v1784_v47, %v1783_v36  ;;  %10625 = vmatmul.mubr.msk.bf16.gmra.mxu0 %vm1439_vm6, %v1843_v54 }
 0x20d   :  { %16454 = vst [vmem:[#allocation65_spill] sm:$0xff] %v13578_v16  ;;  %16457 = vst [vmem:[#allocation68_spill] sm:$0xff] %v13588_v38  ;;  %v13590_v41 = vld [vmem:[#allocation2 + $0x47] sm:$0xff]  ;;  %v13594_v62 = vld [vmem:[#allocation2 + $0x4f] sm:$0xff]  ;;  %10628 = vmatprep.mubr.msk.bf16.mxu0 %vm12204_vm2, %v16383_v58 }
 0x20e   :  { %16458 = vst [vmem:[#allocation69_spill] sm:$0xff] %v13590_v41  ;;  %16459 = vst [vmem:[#allocation70_spill] sm:$0xff] %v13594_v62  ;;  %v13596_v34 = vld [vmem:[#allocation2 + $0x56] sm:$0xff]  ;;  %v13598_v0 = vld [vmem:[#allocation2 + $0x5e] sm:$0xff]  ;;  %10681 = vmatmul.mubr.msk.bf16.gmra.mxu1 %vm1439_vm6, %v1801_v6 }
 0x20f   :  { %16460 = vst [vmem:[#allocation71_spill] sm:$0xff] %v13598_v0  ;;  %v13604_v21 = vld [vmem:[#allocation2 + $0x57] sm:$0xff]  ;;  %16462 = vst [vmem:[#allocation73_spill] sm:$0xff] %v13606_v44  ;;  %v13608_v43 = vld [vmem:[#allocation2 + $0x66] sm:$0xff]  ;;  %10684 = vmatprep.mubr.msk.bf16.mxu1 %vm12204_vm2, %v16383_v58 }
 0x210   :  { %16461 = vst [vmem:[#allocation72_spill] sm:$0xff] %v13604_v21  ;;  %16463 = vst [vmem:[#allocation74_spill] sm:$0xff] %v13608_v43  ;;  %v13612_v16 = vld [vmem:[#allocation2 + $0x6e] sm:$0xff]  ;;  %v13622_v41 = vld [vmem:[#allocation2 + $0x76] sm:$0xff] }
 0x211   :  { %16464 = vst [vmem:[#allocation75_spill] sm:$0xff] %v13612_v16  ;;  %v13614_v8 = vld [vmem:[#allocation2 + $0x67] sm:$0xff]  ;;  %v13616_v2 = vld [vmem:[#allocation2 + $0x6f] sm:$0xff]  ;;  %16467 = vst [vmem:[#allocation78_spill] sm:$0xff] %v13622_v41 }
 0x212   :  { %16465 = vst [vmem:[#allocation76_spill] sm:$0xff] %v13614_v8  ;;  %16466 = vst [vmem:[#allocation77_spill] sm:$0xff] %v13616_v2  ;;  %v13624_v7 = vld [vmem:[#allocation2 + $0x7e] sm:$0xff]  ;;  %v13633_v42 = vld [vmem:[#allocation2 + $0x86] sm:$0xff] }
 0x213   :  { %16468 = vst [vmem:[#allocation79_spill] sm:$0xff] %v13624_v7  ;;  %v13626_v27 = vld [vmem:[#allocation2 + $0x77] sm:$0xff]  ;;  %v13631_v1 = vld [vmem:[#allocation2 + $0x7f] sm:$0xff]  ;;  %16471 = vst [vmem:[#allocation82_spill] sm:$0xff] %v13633_v42 }
 0x214   :  { %16469 = vst [vmem:[#allocation80_spill] sm:$0xff] %v13626_v27  ;;  %16470 = vst [vmem:[#allocation81_spill] sm:$0xff] %v13631_v1  ;;  %v13635_v18 = vld [vmem:[#allocation2 + $0x8e] sm:$0xff]  ;;  %v1827_v28 = vld [vmem:[#allocation2 + $0x81] sm:$0xff] }
 0x215   :  { %16472 = vst [vmem:[#allocation83_spill] sm:$0xff] %v13635_v18  ;;  %v1828_v24 = vld [vmem:[#allocation2 + $0x89] sm:$0xff]  ;;  %v13648_v8 = vld [vmem:[#allocation2 + $0x96] sm:$0xff]  ;;  %v1785_v36 = vld [vmem:[#allocation2 + $0x80] sm:$0xff] }
 0x216   :  { %v13644_v54 = vld [vmem:[#allocation2 + $0x87] sm:$0xff]  ;;  %v13646_v44 = vld [vmem:[#allocation2 + $0x8f] sm:$0xff]  ;;  %16475 = vst [vmem:[#allocation86_spill] sm:$0xff] %v13648_v8  ;;  %v13654_v6 = vld [vmem:[#allocation2 + $0x9e] sm:$0xff] }
 0x217   :  { %16473 = vst [vmem:[#allocation84_spill] sm:$0xff] %v13644_v54  ;;  %16474 = vst [vmem:[#allocation85_spill] sm:$0xff] %v13646_v44  ;;  %v1786_v47 = vld [vmem:[#allocation2 + $0x88] sm:$0xff]  ;;  %v13656_v2 = vld [vmem:[#allocation2 + $0x97] sm:$0xff]  ;;  %v1844_v44 = vpack.c.bf16 %v1828_v24, %v1827_v28 }
 0x218   :  { %16476 = vst [vmem:[#allocation87_spill] sm:$0xff] %v13654_v6  ;;  %16477 = vst [vmem:[#allocation88_spill] sm:$0xff] %v13656_v2  ;;  %v13658_v27 = vld [vmem:[#allocation2 + $0x9f] sm:$0xff]  ;;  %v13666_v0 = vld [vmem:[#allocation2 + $0xae] sm:$0xff]  ;;  %v1802_v6 = vpack.c.bf16 %v1786_v47, %v1785_v36 }
 0x219   :  { %16478 = vst [vmem:[#allocation89_spill] sm:$0xff] %v13658_v27  ;;  %v13664_v43 = vld [vmem:[#allocation2 + $0xa6] sm:$0xff]  ;;  %16480 = vst [vmem:[#allocation91_spill] sm:$0xff] %v13666_v0  ;;  %v13672_v62 = vld [vmem:[#allocation2 + $0xaf] sm:$0xff]  ;;  %10629 = vmatmul.mubr.msk.bf16.gmra.mxu0 %vm1439_vm6, %v1844_v44 }
 0x21a   :  { %16479 = vst [vmem:[#allocation90_spill] sm:$0xff] %v13664_v43  ;;  %v13668_v7 = vld [vmem:[#allocation2 + $0xa7] sm:$0xff]  ;;  %16482 = vst [vmem:[#allocation93_spill] sm:$0xff] %v13672_v62  ;;  %v13674_v21 = vld [vmem:[#allocation2 + $0xb6] sm:$0xff]  ;;  %10685 = vmatmul.mubr.msk.bf16.gmra.mxu1 %vm1439_vm6, %v1802_v6  ;;  %10632 = vmatprep.mubr.msk.bf16.mxu0 %vm12204_vm2, %v16383_v58  ;;  %v16498_v43 = vpack.c.bf16 %v13256_v11, %v13252_v19 }
 0x21b   :  { %16481 = vst [vmem:[#allocation92_spill] sm:$0xff] %v13668_v7  ;;  %16483 = vst [vmem:[#allocation94_spill] sm:$0xff] %v13674_v21  ;;  %v13676_v38 = vld [vmem:[#allocation2 + $0xbe] sm:$0xff]  ;;  %v13686_v1 = vld [vmem:[#allocation2 + $0xc6] sm:$0xff]  ;;  %10688 = vmatprep.mubr.msk.bf16.mxu1 %vm12204_vm2, %v16383_v58 }
 0x21c   :  { %16484 = vst [vmem:[#allocation95_spill] sm:$0xff] %v13676_v38  ;;  %v13682_v18 = vld [vmem:[#allocation2 + $0xb7] sm:$0xff]  ;;  %v13684_v8 = vld [vmem:[#allocation2 + $0xbf] sm:$0xff]  ;;  %16487 = vst [vmem:[#allocation98_spill] sm:$0xff] %v13686_v1 }
 0x21d   :  { %16485 = vst [vmem:[#allocation96_spill] sm:$0xff] %v13682_v18  ;;  %16486 = vst [vmem:[#allocation97_spill] sm:$0xff] %v13684_v8  ;;  %v13690_v2 = vld [vmem:[#allocation2 + $0xc7] sm:$0xff]  ;;  %v1829_v24 = vld [vmem:[#allocation2 + $0x91] sm:$0xff] }
 0x21e   :  { %16488 = vst [vmem:[#allocation99_spill] sm:$0xff] %v13690_v2  ;;  %v1830_v28 = vld [vmem:[#allocation2 + $0x99] sm:$0xff]  ;;  %v1787_v54 = vld [vmem:[#allocation2 + $0x90] sm:$0xff]  ;;  %v1831_v44 = vld [vmem:[#allocation2 + $0xa1] sm:$0xff] }
 0x21f   :  { %v1788_v42 = vld [vmem:[#allocation2 + $0x98] sm:$0xff]  ;;  %v1845_v62 = vpack.c.bf16 %v1830_v28, %v1829_v24  ;;  %v1832_v47 = vld [vmem:[#allocation2 + $0xa9] sm:$0xff]  ;;  %v1789_v36 = vld [vmem:[#allocation2 + $0xa0] sm:$0xff] }
 0x220   :  { %v1803_v16 = vpack.c.bf16 %v1788_v42, %v1787_v54  ;;  %v1790_v6 = vld [vmem:[#allocation2 + $0xa8] sm:$0xff]  ;;  %v1846_v41 = vpack.c.bf16 %v1832_v47, %v1831_v44  ;;  %v1833_v42 = vld [vmem:[#allocation2 + $0xb1] sm:$0xff]  ;;  %v16495_v0 = vld [vmem:[#allocation8_spill] sm:$0xff] }
 0x221   :  { %10633 = vmatmul.mubr.msk.bf16.gmra.mxu0 %vm1439_vm6, %v1845_v62  ;;  %v1804_v8 = vpack.c.bf16 %v1790_v6, %v1789_v36  ;;  %v1791_v62 = vld [vmem:[#allocation2 + $0xb0] sm:$0xff]  ;;  %v1792_v54 = vld [vmem:[#allocation2 + $0xb8] sm:$0xff]  ;;  %v2228_v36 = vld [vmem:[#allocation2 + $0x2] sm:$0xff]  ;;  %v2265_v21 = vpack.c.bf16 %v16495_v0, %v16495_v0 }
 0x222   :  { %10689 = vmatmul.mubr.msk.bf16.gmra.mxu1 %vm1439_vm6, %v1803_v16  ;;  %10636 = vmatprep.mubr.msk.bf16.mxu0 %vm12204_vm2, %v16383_v58  ;;  %v1834_v16 = vld [vmem:[#allocation2 + $0xb9] sm:$0xff]  ;;  %v1805_v28 = vpack.c.bf16 %v1792_v54, %v1791_v62  ;;  %v2483_v6 = vld [vmem:[#allocation2 + $0x3] sm:$0xff] }
 0x223   :  { %10692 = vmatprep.mubr.msk.bf16.mxu1 %vm12204_vm2, %v16383_v58  ;;  %v1847_v24 = vpack.c.bf16 %v1834_v16, %v1833_v42  ;;  %v12021_v42 = vld [vmem:[%s16241_s2 + $0x48] sm:$0xff]   ;;  %v2253_v16 = vpack.c.bf16 %v13248_v17, %v2228_v36  ;;  %v12022_v62 = vld [vmem:[%s16241_s2 + $0x58] sm:$0xff]   ;;  %v2508_v54 = vpack.c.bf16 %v13252_v19, %v2483_v6  ;;  %v2256_v36 = vpack.c.bf16 %v13280_v35, %v13273_v57 }
 0x224   :  { %v2511_v6 = vpack.c.bf16 %v13286_v32, %v13282_v48  ;;  %v16496_v27 = vld [vmem:[#allocation9_spill] sm:$0xff] }
 0x229   :  { %10637 = vmatmul.mubr.msk.bf16.gmra.mxu0 %vm1439_vm6, %v1846_v41  ;;  %v1835_v41 = vld [vmem:[#allocation2 + $0xc1] sm:$0xff] }
 0x22a   :  { %10693 = vmatmul.mubr.msk.bf16.gmra.mxu1 %vm1439_vm6, %v1804_v8  ;;  %10640 = vmatprep.mubr.msk.bf16.mxu0 %vm12204_vm2, %v16383_v58  ;;  %v1793_v8 = vld [vmem:[#allocation2 + $0xc0] sm:$0xff]  ;;  %v1848_v44 = vpack.c.bf16 %v1835_v41, %v1835_v41  ;;  %v2254_v41 = vpack.c.bf16 %v13263_v51, %v13254_v14 }
 0x22b   :  { %10696 = vmatprep.mubr.msk.bf16.mxu1 %vm12204_vm2, %v16383_v58  ;;  %v1806_v47 = vpack.c.bf16 %v1793_v8, %v1793_v8  ;;  %v2509_v8 = vpack.c.bf16 %v13265_v61, %v13256_v11 }
 0x231   :  { %10641 = vmatmul.mubr.msk.bf16.gmra.mxu0 %vm1439_vm6, %v1847_v24  ;;  %v12023_v24 = vld [vmem:[%s16241_s2 + $0x40] sm:$0xff]  }
 0x232   :  { %10697 = vmatmul.mubr.msk.bf16.gmra.mxu1 %vm1439_vm6, %v1805_v28  ;;  %10644 = vmatprep.mubr.msk.bf16.mxu0 %vm12204_vm2, %v16383_v58  ;;  %v12024_v28 = vld [vmem:[%s16241_s2 + $0x50] sm:$0xff]  }
 0x233   :  { %10700 = vmatprep.mubr.msk.bf16.mxu1 %vm12204_vm2, %v16383_v58 }
 0x239   :  { %10645 = vmatmul.mubr.msk.bf16.gmra.mxu0 %vm1439_vm6, %v1848_v44  ;;  %v2255_v44 = vpack.c.bf16 %v13269_v59, %v13267_v9 }
 0x23a   :  { %10701 = vmatmul.mubr.msk.bf16.gmra.mxu1 %vm1439_vm6, %v1806_v47  ;;  %10708 = vmatprep.mubr.msk.bf16.mxu0 %vm12204_vm2, %v16383_v58  ;;  %v2510_v47 = vpack.c.bf16 %v13278_v46, %v13271_v39 }
 0x23b   :  { %10764 = vmatprep.mubr.msk.bf16.mxu1 %vm12204_vm2, %v16383_v58 }
 0x241   :  { %10709 = vmatmul.mubr.msk.bf16.vlgmr.msra.gmra.mxu0 %vm1439_vm6, %v2253_v16  ;;  %v2512_v16 = vpack.c.bf16 %v13292_v37, %v13290_v33 }
 0x242   :  { %10765 = vmatmul.mubr.msk.bf16.vlgmr.msra.gmra.mxu1 %vm1439_vm6, %v2508_v54  ;;  %10817 = vmatpush3.bf16.msra.mxu0 %v12021_v42  ;;  %v2257_v42 = vpack.c.bf16 %v13288_v29, %v13284_v53  ;;  %v2513_v54 = vpack.c.bf16 %v13303_v22, %v13298_v10 }
 0x243   :  { %10873 = vmatpush3.bf16.msra.mxu1 %v12022_v62  ;;  %10712 = vmatprep.mubr.msk.bf16.mxu0 %vm12204_vm2, %v16383_v58  ;;  %v2258_v62 = vpack.c.bf16 %v13296_v4, %v13294_v52 }
 0x244   :  { %10768 = vmatprep.mubr.msk.bf16.mxu1 %vm12204_vm2, %v16383_v58  ;;  %10818 = vmatprep.subr.bf16.mxu0 %v16383_v58 }
 0x245   :  { %10874 = vmatprep.subr.bf16.mxu1 %v16383_v58 }
 0x246   :  { %10819 = vmatpush3.bf16.msra.mxu0 %v12023_v24  ;;  %v2259_v24 = vpack.c.bf16 %v13307_v13, %v13305_v20 }
 0x247   :  { %10875 = vmatpush3.bf16.msra.mxu1 %v12024_v28  ;;  %10928 = vmatprep.subr.bf16.mxu0 %v16383_v58  ;;  %v2514_v28 = vpack.c.bf16 %v13313_v50, %v13311_v40 }
 0x248   :  { %10984 = vmatprep.subr.bf16.mxu1 %v16383_v58 }
 0x249   :  { %10713 = vmatmul.mubr.msk.bf16.gmra.mxu0 %vm1439_vm6, %v2254_v41  ;;  %v2260_v41 = vpack.c.bf16 %v13324_v60, %v13315_v26 }
 0x24a   :  { %10769 = vmatmul.mubr.msk.bf16.gmra.mxu1 %vm1439_vm6, %v2509_v8  ;;  %10716 = vmatprep.mubr.msk.bf16.mxu0 %vm12204_vm2, %v16383_v58  ;;  %v2515_v8 = vpack.c.bf16 %v13328_v30, %v13326_v63 }
 0x24b   :  { %10772 = vmatprep.mubr.msk.bf16.mxu1 %vm12204_vm2, %v16383_v58 }
 0x251   :  { %10717 = vmatmul.mubr.msk.bf16.gmra.mxu0 %vm1439_vm6, %v2255_v44  ;;  %v2261_v44 = vpack.c.bf16 %v13337_v56, %v13335_v49 }
 0x252   :  { %10773 = vmatmul.mubr.msk.bf16.gmra.mxu1 %vm1439_vm6, %v2510_v47  ;;  %10720 = vmatprep.mubr.msk.bf16.mxu0 %vm12204_vm2, %v16383_v58  ;;  %v2516_v47 = vpack.c.bf16 %v13350_v45, %v13339_v3 }
 0x253   :  { %10776 = vmatprep.mubr.msk.bf16.mxu1 %vm12204_vm2, %v16383_v58 }
 0x259   :  { %10721 = vmatmul.mubr.msk.bf16.gmra.mxu0 %vm1439_vm6, %v2256_v36  ;;  %v2262_v36 = vpack.c.bf16 %v13358_v31, %v13356_v23 }
 0x25a   :  { %10777 = vmatmul.mubr.msk.bf16.gmra.mxu1 %vm1439_vm6, %v2511_v6  ;;  %10724 = vmatprep.mubr.msk.bf16.mxu0 %vm12204_vm2, %v16383_v58  ;;  %v2517_v6 = vpack.c.bf16 %v13368_v25, %v13366_v12 }
 0x25b   :  { %10780 = vmatprep.mubr.msk.bf16.mxu1 %vm12204_vm2, %v16383_v58 }
 0x261   :  { %10725 = vmatmul.mubr.msk.bf16.gmra.mxu0 %vm1439_vm6, %v2257_v42  ;;  %v2263_v42 = vpack.c.bf16 %v13384_v5, %v13370_v15 }
 0x262   :  { %10781 = vmatmul.mubr.msk.bf16.gmra.mxu1 %vm1439_vm6, %v2512_v16  ;;  %10728 = vmatprep.mubr.msk.bf16.mxu0 %vm12204_vm2, %v16383_v58  ;;  %v16489_v16 = vld [vmem:[#allocation6_spill] sm:$0xff] }
 0x263   :  { %10784 = vmatprep.mubr.msk.bf16.mxu1 %vm12204_vm2, %v16383_v58 }
 0x269   :  { %10729 = vmatmul.mubr.msk.bf16.gmra.mxu0 %vm1439_vm6, %v2258_v62  ;;  %v16490_v62 = vld [vmem:[#allocation7_spill] sm:$0xff] }
 0x26a   :  { %10785 = vmatmul.mubr.msk.bf16.gmra.mxu1 %vm1439_vm6, %v2513_v54  ;;  %10732 = vmatprep.mubr.msk.bf16.mxu0 %vm12204_vm2, %v16383_v58  ;;  %v2518_v54 = vpack.c.bf16 %v16490_v62, %v16489_v16 }
 0x26b   :  { %10788 = vmatprep.mubr.msk.bf16.mxu1 %vm12204_vm2, %v16383_v58 }
 0x271   :  { %10733 = vmatmul.mubr.msk.bf16.gmra.mxu0 %vm1439_vm6, %v2259_v24  ;;  %v16491_v24 = vld [vmem:[#allocation12_spill] sm:$0xff] }
 0x272   :  { %10789 = vmatmul.mubr.msk.bf16.gmra.mxu1 %vm1439_vm6, %v2514_v28  ;;  %10736 = vmatprep.mubr.msk.bf16.mxu0 %vm12204_vm2, %v16383_v58  ;;  %v16492_v28 = vld [vmem:[#allocation13_spill] sm:$0xff] }
 0x273   :  { %10792 = vmatprep.mubr.msk.bf16.mxu1 %vm12204_vm2, %v16383_v58 }
 0x279   :  { %10737 = vmatmul.mubr.msk.bf16.gmra.mxu0 %vm1439_vm6, %v2260_v41  ;;  %v2264_v41 = vpack.c.bf16 %v16492_v28, %v16491_v24 }
 0x27a   :  { %10793 = vmatmul.mubr.msk.bf16.gmra.mxu1 %vm1439_vm6, %v2515_v8  ;;  %10740 = vmatprep.mubr.msk.bf16.mxu0 %vm12204_vm2, %v16383_v58  ;;  %v16493_v8 = vld [vmem:[#allocation14_spill] sm:$0xff] }
 0x27b   :  { %10796 = vmatprep.mubr.msk.bf16.mxu1 %vm12204_vm2, %v16383_v58 }
 0x281   :  { %10741 = vmatmul.mubr.msk.bf16.gmra.mxu0 %vm1439_vm6, %v2261_v44  ;;  %v16494_v44 = vld [vmem:[#allocation15_spill] sm:$0xff] }
 0x282   :  { %10797 = vmatmul.mubr.msk.bf16.gmra.mxu1 %vm1439_vm6, %v2516_v47  ;;  %10744 = vmatprep.mubr.msk.bf16.mxu0 %vm12204_vm2, %v16383_v58  ;;  %v2519_v47 = vpack.c.bf16 %v16494_v44, %v16493_v8 }
 0x283   :  { %10800 = vmatprep.mubr.msk.bf16.mxu1 %vm12204_vm2, %v16383_v58 }
 0x289   :  { %10745 = vmatmul.mubr.msk.bf16.gmra.mxu0 %vm1439_vm6, %v2262_v36 }
 0x28a   :  { %10801 = vmatmul.mubr.msk.bf16.gmra.mxu1 %vm1439_vm6, %v2517_v6  ;;  %10748 = vmatprep.mubr.msk.bf16.mxu0 %vm12204_vm2, %v16383_v58 }
 0x28b   :  { %10804 = vmatprep.mubr.msk.bf16.mxu1 %vm12204_vm2, %v16383_v58 }
 0x291   :  { %10749 = vmatmul.mubr.msk.bf16.gmra.mxu0 %vm1439_vm6, %v2263_v42 }
 0x292   :  { %10805 = vmatmul.mubr.msk.bf16.gmra.mxu1 %vm1439_vm6, %v2518_v54  ;;  %10752 = vmatprep.mubr.msk.bf16.mxu0 %vm12204_vm2, %v16383_v58 }
 0x293   :  { %10808 = vmatprep.mubr.msk.bf16.mxu1 %vm12204_vm2, %v16383_v58  ;;  %v1939_v36 = vpop.f32.mrf.mxu0 }
 0x294   :  { %v2126_v6 = vpop.f32.mrf.mxu1 }
 0x295   :  { %v13860_v42 = vadd.f32 %v2126_v6, %v1939_v36  ;;  %v10598_v54 = vpop.f32.mrf.mxu0 }
 0x296   :  { %v10654_v2 = vpop.f32.mrf.mxu1  ;;  %v12025_v54 = vld [vmem:[%s16241_s2 + $0x68] sm:$0xff]  }
 0x297   :  { %v1942_v38 = vpop.f32.mrf.mxu0 }
 0x298   :  { %v2129_v1 = vpop.f32.mrf.mxu1 }
 0x299   :  { %10753 = vmatmul.mubr.msk.bf16.gmra.mxu0 %vm1439_vm6, %v2264_v41  ;;  %v10599_v18 = vpop.f32.mrf.mxu0 }
 0x29a   :  { %10809 = vmatmul.mubr.msk.bf16.gmra.mxu1 %vm1439_vm6, %v2519_v47  ;;  %10756 = vmatprep.mubr.msk.bf16.mxu0 %vm12204_vm2, %v16383_v58  ;;  %v10655_v41 = vpop.f32.mrf.mxu1  ;;  %v2520_v47 = vpack.c.bf16 %v16496_v27, %v16496_v27 }
 0x29b   :  { %10812 = vmatprep.mubr.msk.bf16.mxu1 %vm12204_vm2, %v16383_v58  ;;  %v1947_v7 = vpop.f32.mrf.mxu0 }
 0x29c   :  { %v2134_v36 = vpop.f32.mrf.mxu1 }
 0x29d   :  { %v13872_v2 = vadd.f32 %v2134_v36, %v1947_v7  ;;  %v10602_v38 = vpop.f32.mrf.mxu0 }
 0x29e   :  { %v10658_v18 = vpop.f32.mrf.mxu1  ;;  %v16497_v38 = vpack.c.bf16 %v13254_v14, %v13248_v17  ;;  %v12028_v17 = vld [vmem:[%s16241_s2 + $0x70] sm:$0xff]  }
 0x29f   :  { %v1950_v1 = vpop.f32.mrf.mxu0 }
 0x2a0   :  { %v2137_v6 = vpop.f32.mrf.mxu1 }
 0x2a1   :  { %10757 = vmatmul.mubr.msk.bf16.gmra.mxu0 %vm1439_vm6, %v2265_v21  ;;  %v13879_v21 = vadd.f32 %v2137_v6, %v1950_v1  ;;  %v10603_v41 = vpop.f32.mrf.mxu0  ;;  %v12027_v1 = vld [vmem:[%s16241_s2 + $0x60] sm:$0xff]  }
 0x2a2   :  { %10813 = vmatmul.mubr.msk.bf16.gmra.mxu1 %vm1439_vm6, %v2520_v47  ;;  %10820 = vmatprep.mubr.msk.bf16.mxu0 %vm12204_vm2, %v16383_v58  ;;  %v12026_v47 = vld [vmem:[%s16241_s2 + $0x78] sm:$0xff]   ;;  %v10659_v7 = vpop.f32.mrf.mxu1 }
 0x2a3   :  { %10876 = vmatprep.mubr.msk.bf16.mxu1 %vm12204_vm2, %v16383_v58  ;;  %v1955_v36 = vpop.f32.mrf.mxu0  ;;  %v16499_v7 = vpack.c.bf16 %v13267_v9, %v13263_v51 }
 0x2a4   :  { %v2142_v18 = vpop.f32.mrf.mxu1 }
 0x2a5   :  { %v10606_v6 = vpop.f32.mrf.mxu0 }
 0x2a6   :  { %v10662_v14 = vpop.f32.mrf.mxu1 }
 0x2a7   :  { %v1958_v19 = vpop.f32.mrf.mxu0 }
 0x2a8   :  { %v2145_v11 = vpop.f32.mrf.mxu1 }
 0x2a9   :  { %10821 = vmatmul.mubr.msk.bf16.vlgmr.msra.gmra.mxu0 %vm1439_vm6, %v16497_v38  ;;  %v16500_v38 = vpack.c.bf16 %v13271_v39, %v13265_v61  ;;  %v16501_v61 = vpack.c.bf16 %v13273_v57, %v13269_v59 }
 0x2aa   :  { %10877 = vmatmul.mubr.msk.bf16.vlgmr.msra.gmra.mxu1 %vm1439_vm6, %v16498_v43  ;;  %10929 = vmatpush3.bf16.msra.mxu0 %v12025_v54  ;;  %v13904_v43 = vadd.f32 %v2145_v11, %v1958_v19  ;;  %v10607_v54 = vpop.f32.mrf.mxu0  ;;  %v10663_v41 = vpop.f32.mrf.mxu1  ;;  %v16502_v11 = vpack.c.bf16 %v13282_v48, %v13278_v46  ;;  %v16503_v46 = vpack.c.bf16 %v13284_v53, %v13280_v35 }
 0x2ab   :  { %10985 = vmatpush3.bf16.msra.mxu1 %v12026_v47  ;;  %10824 = vmatprep.mubr.msk.bf16.mxu0 %vm12204_vm2, %v16383_v58 }
 0x2ac   :  { %10880 = vmatprep.mubr.msk.bf16.mxu1 %vm12204_vm2, %v16383_v58  ;;  %10930 = vmatprep.subr.bf16.mxu0 %v16383_v58  ;;  %v1963_v47 = vpop.f32.mrf.mxu0  ;;  %v2150_v36 = vpop.f32.mrf.mxu1 }
 0x2ad   :  { %10986 = vmatprep.subr.bf16.mxu1 %v16383_v58 }
 0x2ae   :  { %10931 = vmatpush3.bf16.msra.mxu0 %v12027_v1  ;;  %v10610_v18 = vpop.f32.mrf.mxu0  ;;  %v10666_v1 = vpop.f32.mrf.mxu1 }
 0x2af   :  { %10987 = vmatpush3.bf16.msra.mxu1 %v12028_v17  ;;  %11040 = vmatprep.subr.bf16.mxu0 %v16383_v58  ;;  %v16504_v18 = vpack.c.bf16 %v13290_v33, %v13286_v32  ;;  %v16506_v33 = vpack.c.bf16 %v13298_v10, %v13292_v37  ;;  %v16507_v37 = vpack.c.bf16 %v13305_v20, %v13296_v4 }
 0x2b0   :  { %11096 = vmatprep.subr.bf16.mxu1 %v16383_v58  ;;  %v1966_v6 = vpop.f32.mrf.mxu0  ;;  %v2153_v17 = vpop.f32.mrf.mxu1 }
 0x2b1   :  { %10825 = vmatmul.mubr.msk.bf16.gmra.mxu0 %vm1439_vm6, %v16499_v7  ;;  %v13920_v14 = vadd.f32 %v2153_v17, %v1966_v6 }
 0x2b2   :  { %10881 = vmatmul.mubr.msk.bf16.gmra.mxu1 %vm1439_vm6, %v16500_v38  ;;  %10828 = vmatprep.mubr.msk.bf16.mxu0 %vm12204_vm2, %v16383_v58  ;;  %v10611_v51 = vpop.f32.mrf.mxu0  ;;  %v10667_v9 = vpop.f32.mrf.mxu1 }
 0x2b3   :  { %10884 = vmatprep.mubr.msk.bf16.mxu1 %vm12204_vm2, %v16383_v58 }
 0x2b4   :  { %v1971_v19 = vpop.f32.mrf.mxu0  ;;  %v2158_v39 = vpop.f32.mrf.mxu1 }
 0x2b5   :  { %v13932_v54 = vadd.f32 %v2158_v39, %v1971_v19  ;;  %v16505_v19 = vpack.c.bf16 %v13294_v52, %v13288_v29 }
 0x2b6   :  { %v10614_v41 = vpop.f32.mrf.mxu0  ;;  %v10670_v47 = vpop.f32.mrf.mxu1 }
 0x2b8   :  { %v1974_v7 = vpop.f32.mrf.mxu0  ;;  %v2161_v59 = vpop.f32.mrf.mxu1 }
 0x2b9   :  { %10829 = vmatmul.mubr.msk.bf16.gmra.mxu0 %vm1439_vm6, %v16501_v61 }
 0x2ba   :  { %10885 = vmatmul.mubr.msk.bf16.gmra.mxu1 %vm1439_vm6, %v16502_v11  ;;  %10832 = vmatprep.mubr.msk.bf16.mxu0 %vm12204_vm2, %v16383_v58  ;;  %v10615_v57 = vpop.f32.mrf.mxu0  ;;  %v10671_v36 = vpop.f32.mrf.mxu1 }
 0x2bb   :  { %10888 = vmatprep.mubr.msk.bf16.mxu1 %vm12204_vm2, %v16383_v58  ;;  %v16508_v57 = vpack.c.bf16 %v13311_v40, %v13303_v22  ;;  %v16509_v22 = vpack.c.bf16 %v13315_v26, %v13307_v13 }
 0x2bc   :  { %v1979_v38 = vpop.f32.mrf.mxu0  ;;  %v2166_v48 = vpop.f32.mrf.mxu1 }
 0x2be   :  { %v10618_v1 = vpop.f32.mrf.mxu0  ;;  %v10674_v6 = vpop.f32.mrf.mxu1 }
 0x2bf   :  { %v16510_v6 = vpack.c.bf16 %v13326_v63, %v13313_v50  ;;  %v16511_v50 = vpack.c.bf16 %v13335_v49, %v13324_v60 }
 0x2c0   :  { %v1982_v17 = vpop.f32.mrf.mxu0  ;;  %v2169_v51 = vpop.f32.mrf.mxu1 }
 0x2c1   :  { %10833 = vmatmul.mubr.msk.bf16.gmra.mxu0 %vm1439_vm6, %v16503_v46 }
 0x2c2   :  { %10889 = vmatmul.mubr.msk.bf16.gmra.mxu1 %vm1439_vm6, %v16504_v18  ;;  %10836 = vmatprep.mubr.msk.bf16.mxu0 %vm12204_vm2, %v16383_v58  ;;  %v10619_v9 = vpop.f32.mrf.mxu0  ;;  %v10675_v35 = vpop.f32.mrf.mxu1 }
 0x2c3   :  { %10892 = vmatprep.mubr.msk.bf16.mxu1 %vm12204_vm2, %v16383_v58 }
 0x2c4   :  { %v1987_v53 = vpop.f32.mrf.mxu0  ;;  %v2174_v32 = vpop.f32.mrf.mxu1 }
 0x2c5   :  { %v13958_v61 = vadd.f32 %v2174_v32, %v1987_v53  ;;  %v16512_v32 = vpack.c.bf16 %v13339_v3, %v13328_v30  ;;  %v16513_v30 = vpack.c.bf16 %v13356_v23, %v13337_v56 }
 0x2c6   :  { %v10622_v39 = vpop.f32.mrf.mxu0  ;;  %v10678_v11 = vpop.f32.mrf.mxu1 }
 0x2c8   :  { %v1990_v41 = vpop.f32.mrf.mxu0  ;;  %v2177_v29 = vpop.f32.mrf.mxu1 }
 0x2c9   :  { %10837 = vmatmul.mubr.msk.bf16.gmra.mxu0 %vm1439_vm6, %v16505_v19  ;;  %v13962_v52 = vadd.f32 %v2177_v29, %v1990_v41 }
 0x2ca   :  { %10893 = vmatmul.mubr.msk.bf16.gmra.mxu1 %vm1439_vm6, %v16506_v33  ;;  %10840 = vmatprep.mubr.msk.bf16.mxu0 %vm12204_vm2, %v16383_v58  ;;  %v10623_v47 = vpop.f32.mrf.mxu0  ;;  %v10679_v7 = vpop.f32.mrf.mxu1 }
 0x2cb   :  { %10896 = vmatprep.mubr.msk.bf16.mxu1 %vm12204_vm2, %v16383_v58  ;;  %v16514_v7 = vpack.c.bf16 %v13366_v12, %v13350_v45  ;;  %v16515_v45 = vpack.c.bf16 %v13370_v15, %v13358_v31 }
 0x2cc   :  { %v1995_v59 = vpop.f32.mrf.mxu0 }
 0x2ce   :  { %v2182_v10 = vpop.f32.mrf.mxu1  ;;  %v10626_v36 = vpop.f32.mrf.mxu0 }
 0x2d0   :  { %v10682_v38 = vpop.f32.mrf.mxu1  ;;  %v1998_v46 = vpop.f32.mrf.mxu0 }
 0x2d1   :  { %10841 = vmatmul.mubr.msk.bf16.gmra.mxu0 %vm1439_vm6, %v16507_v37 }
 0x2d2   :  { %10897 = vmatmul.mubr.msk.bf16.gmra.mxu1 %vm1439_vm6, %v16508_v57  ;;  %10844 = vmatprep.mubr.msk.bf16.mxu0 %vm12204_vm2, %v16383_v58  ;;  %v2185_v48 = vpop.f32.mrf.mxu1  ;;  %v10627_v4 = vpop.f32.mrf.mxu0 }
 0x2d3   :  { %10900 = vmatprep.mubr.msk.bf16.mxu1 %vm12204_vm2, %v16383_v58  ;;  %v13976_v18 = vadd.f32 %v2185_v48, %v1998_v46  ;;  %v16516_v46 = vpack.c.bf16 %v16489_v16, %v13368_v25  ;;  %v16518_v16 = vpack.c.bf16 %v16493_v8, %v16490_v62 }
 0x2d4   :  { %v10683_v20 = vpop.f32.mrf.mxu1 }
 0x2d9   :  { %v2003_v1 = vpop.f32.mrf.mxu0  ;;  %10845 = vmatmul.mubr.msk.bf16.gmra.mxu0 %vm1439_vm6, %v16509_v22 }
 0x2da   :  { %v2190_v40 = vpop.f32.mrf.mxu1  ;;  %10901 = vmatmul.mubr.msk.bf16.gmra.mxu1 %vm1439_vm6, %v16510_v6  ;;  %10848 = vmatprep.mubr.msk.bf16.mxu0 %vm12204_vm2, %v16383_v58 }
 0x2db   :  { %v10630_v17 = vpop.f32.mrf.mxu0  ;;  %10904 = vmatprep.mubr.msk.bf16.mxu1 %vm12204_vm2, %v16383_v58  ;;  %v16517_v40 = vpack.c.bf16 %v16491_v24, %v13384_v5 }
 0x2dc   :  { %v10686_v51 = vpop.f32.mrf.mxu1 }
 0x2dd   :  { %v2006_v9 = vpop.f32.mrf.mxu0 }
 0x2de   :  { %v2193_v35 = vpop.f32.mrf.mxu1 }
 0x2df   :  { %v13990_v53 = vadd.f32 %v2193_v35, %v2006_v9  ;;  %v10631_v13 = vpop.f32.mrf.mxu0 }
 0x2e0   :  { %v10687_v26 = vpop.f32.mrf.mxu1  ;;  %v16519_v13 = vpack.c.bf16 %v16495_v0, %v16492_v28 }
 0x2e1   :  { %v2011_v19 = vpop.f32.mrf.mxu0  ;;  %10849 = vmatmul.mubr.msk.bf16.gmra.mxu0 %vm1439_vm6, %v16511_v50  ;;  %v16520_v26 = vpack.c.bf16 %v16496_v27, %v16494_v44 }
 0x2e2   :  { %v2198_v63 = vpop.f32.mrf.mxu1  ;;  %10905 = vmatmul.mubr.msk.bf16.gmra.mxu1 %vm1439_vm6, %v16512_v32  ;;  %10852 = vmatprep.mubr.msk.bf16.mxu0 %vm12204_vm2, %v16383_v58 }
 0x2e3   :  { %v14002_v33 = vadd.f32 %v2198_v63, %v2011_v19  ;;  %v10634_v39 = vpop.f32.mrf.mxu0  ;;  %10908 = vmatprep.mubr.msk.bf16.mxu1 %vm12204_vm2, %v16383_v58  ;;  %v2762_v19 = vld [vmem:[#allocation2 + $0xca] sm:$0xff] }
 0x2e4   :  { %v10690_v11 = vpop.f32.mrf.mxu1  ;;  %v3017_v63 = vld [vmem:[#allocation2 + $0xcb] sm:$0xff] }
 0x2e5   :  { %v2014_v41 = vpop.f32.mrf.mxu0  ;;  %v3030_v11 = vpack.c.bf16 %v3017_v63, %v3017_v63 }
 0x2e6   :  { %v2201_v60 = vpop.f32.mrf.mxu1 }
 0x2e7   :  { %v10635_v49 = vpop.f32.mrf.mxu0 }
 0x2e8   :  { %v10691_v29 = vpop.f32.mrf.mxu1 }
 0x2e9   :  { %v2019_v47 = vpop.f32.mrf.mxu0  ;;  %10853 = vmatmul.mubr.msk.bf16.gmra.mxu0 %vm1439_vm6, %v16513_v30 }
 0x2ea   :  { %v2206_v3 = vpop.f32.mrf.mxu1  ;;  %10909 = vmatmul.mubr.msk.bf16.gmra.mxu1 %vm1439_vm6, %v16514_v7  ;;  %10856 = vmatprep.mubr.msk.bf16.mxu0 %vm12204_vm2, %v16383_v58 }
 0x2eb   :  { %v14016_v59 = vadd.f32 %v2206_v3, %v2019_v47  ;;  %v10638_v37 = vpop.f32.mrf.mxu0  ;;  %10912 = vmatprep.mubr.msk.bf16.mxu1 %vm12204_vm2, %v16383_v58  ;;  %v3248_v3 = vld [vmem:[#allocation2 + $0xc] sm:$0xff] }
 0x2ec   :  { %v10694_v10 = vpop.f32.mrf.mxu1  ;;  %v3503_v37 = vld [vmem:[#allocation2 + $0xd] sm:$0xff] }
 0x2ed   :  { %v2022_v57 = vpop.f32.mrf.mxu0 }
 0x2ee   :  { %v2209_v56 = vpop.f32.mrf.mxu1 }
 0x2ef   :  { %v10639_v23 = vpop.f32.mrf.mxu0 }
 0x2f0   :  { %v10695_v36 = vpop.f32.mrf.mxu1  ;;  %v12115_v23 = vld [vmem:[#allocation2 + $0x14] sm:$0xff] }
 0x2f1   :  { %v2027_v38 = vpop.f32.mrf.mxu0  ;;  %10857 = vmatmul.mubr.msk.bf16.gmra.mxu0 %vm1439_vm6, %v16515_v45  ;;  %v3273_v36 = vpack.c.bf16 %v12115_v23, %v3248_v3 }
 0x2f2   :  { %v2214_v12 = vpop.f32.mrf.mxu1  ;;  %10913 = vmatmul.mubr.msk.bf16.gmra.mxu1 %vm1439_vm6, %v16516_v46  ;;  %10860 = vmatprep.mubr.msk.bf16.mxu0 %vm12204_vm2, %v16383_v58  ;;  %v12030_v38 = vld [vmem:[%s16241_s2 + $0x98] sm:$0xff]  }
 0x2f3   :  { %v10642_v48 = vpop.f32.mrf.mxu0  ;;  %10916 = vmatprep.mubr.msk.bf16.mxu1 %vm12204_vm2, %v16383_v58  ;;  %v12116_v46 = vld [vmem:[#allocation2 + $0x15] sm:$0xff] }
 0x2f4   :  { %v10698_v4 = vpop.f32.mrf.mxu1  ;;  %v3528_v48 = vpack.c.bf16 %v12116_v46, %v3503_v37 }
 0x2f5   :  { %v2030_v20 = vpop.f32.mrf.mxu0 }
 0x2f6   :  { %v2217_v1 = vpop.f32.mrf.mxu1  ;;  %v12031_v20 = vld [vmem:[%s16241_s2 + $0x80] sm:$0xff]  }
 0x2f7   :  { %v10643_v22 = vpop.f32.mrf.mxu0 }
 0x2f8   :  { %v10699_v31 = vpop.f32.mrf.mxu1  ;;  %v12032_v22 = vld [vmem:[%s16241_s2 + $0x90] sm:$0xff]  }
 0x2f9   :  { %v2035_v15 = vpop.f32.mrf.mxu0  ;;  %10861 = vmatmul.mubr.msk.bf16.gmra.mxu0 %vm1439_vm6, %v16517_v40 }
 0x2fa   :  { %v2222_v25 = vpop.f32.mrf.mxu1  ;;  %10917 = vmatmul.mubr.msk.bf16.gmra.mxu1 %vm1439_vm6, %v16518_v16  ;;  %10864 = vmatprep.mubr.msk.bf16.mxu0 %vm12204_vm2, %v16383_v58 }
 0x2fb   :  { %v10646_v6 = vpop.f32.mrf.mxu0  ;;  %10920 = vmatprep.mubr.msk.bf16.mxu1 %vm12204_vm2, %v16383_v58 }
 0x2fc   :  { %v10702_v17 = vpop.f32.mrf.mxu1  ;;  %v12117_v6 = vld [vmem:[#allocation2 + $0x1c] sm:$0xff] }
 0x2fd   :  { %v2038_v51 = vpop.f32.mrf.mxu0  ;;  %v12118_v17 = vld [vmem:[#allocation2 + $0x24] sm:$0xff] }
 0x2fe   :  { %v2225_v9 = vpop.f32.mrf.mxu1  ;;  %v3274_v51 = vpack.c.bf16 %v12118_v17, %v12117_v6  ;;  %v12132_v6 = vld [vmem:[#allocation2 + $0x55] sm:$0xff] }
 0x2ff   :  { %v10647_v35 = vpop.f32.mrf.mxu0 }
 0x300   :  { %v10703_v5 = vpop.f32.mrf.mxu1 }
 0x301   :  { %v2356_v24 = vpop.f32.mrf.mxu0  ;;  %10865 = vmatmul.mubr.msk.bf16.gmra.mxu0 %vm1439_vm6, %v16519_v13  ;;  %v12119_v5 = vld [vmem:[#allocation2 + $0x1d] sm:$0xff] }
 0x302   :  { %v2458_v62 = vadd.f32 %v2356_v24, %v13860_v42  ;;  %v2611_v8 = vpop.f32.mrf.mxu1  ;;  %10921 = vmatmul.mubr.msk.bf16.gmra.mxu1 %vm1439_vm6, %v16520_v26  ;;  %10868 = vmatprep.mubr.msk.bf16.mxu0 %vm12204_vm2, %v16383_v58  ;;  %v2775_v42 = vpack.c.bf16 %v2762_v19, %v2762_v19  ;;  %v12120_v24 = vld [vmem:[#allocation2 + $0x25] sm:$0xff] }
 0x303   :  { %v10710_v50 = vpop.f32.mrf.mxu0  ;;  %10924 = vmatprep.mubr.msk.bf16.mxu1 %vm12204_vm2, %v16383_v58  ;;  %v3529_v13 = vpack.c.bf16 %v12120_v24, %v12119_v5 }
 0x304   :  { %v14057_v0 = vadd.f32 %v2611_v8, %v2458_v62  ;;  %v10766_v28 = vpop.f32.mrf.mxu1 }
 0x305   :  { %v2359_v32 = vpop.f32.mrf.mxu0 }
 0x306   :  { %v2614_v39 = vpop.f32.mrf.mxu1  ;;  %v12121_v32 = vld [vmem:[#allocation2 + $0x2c] sm:$0xff] }
 0x307   :  { %v10711_v41 = vpop.f32.mrf.mxu0 }
 0x308   :  { %v10767_v27 = vpop.f32.mrf.mxu1 }
 0x309   :  { %v2364_v44 = vpop.f32.mrf.mxu0  ;;  %10869 = vmatmul.mubr.msk.bf16.gmra.mxu0 %vm1439_vm6, %v2775_v42  ;;  %v12122_v42 = vld [vmem:[#allocation2 + $0x34] sm:$0xff] }
 0x30a   :  { %v2460_v60 = vadd.f32 %v2364_v44, %v13872_v2  ;;  %v2619_v49 = vpop.f32.mrf.mxu1  ;;  %10925 = vmatmul.mubr.msk.bf16.gmra.mxu1 %vm1439_vm6, %v3030_v11  ;;  %10932 = vmatprep.mubr.msk.bf16.mxu0 %vm12204_vm2, %v16383_v58  ;;  %v12029_v2 = vld [vmem:[%s16241_s2 + $0x88] sm:$0xff]   ;;  %v3275_v39 = vpack.c.bf16 %v12122_v42, %v12121_v32  ;;  %v12124_v44 = vld [vmem:[#allocation2 + $0x35] sm:$0xff]  ;;  %v12135_v42 = vld [vmem:[#allocation2 + $0x5d] sm:$0xff] }
 0x30b   :  { %v10714_v29 = vpop.f32.mrf.mxu0  ;;  %10988 = vmatprep.mubr.msk.bf16.mxu1 %vm12204_vm2, %v16383_v58  ;;  %v12123_v27 = vld [vmem:[#allocation2 + $0x2d] sm:$0xff] }
 0x30c   :  { %v14066_v47 = vadd.f32 %v2619_v49, %v2460_v60  ;;  %v10770_v30 = vpop.f32.mrf.mxu1  ;;  %v3530_v60 = vpack.c.bf16 %v12124_v44, %v12123_v27 }
 0x30d   :  { %v2367_v7 = vpop.f32.mrf.mxu0 }
 0x30e   :  { %v2461_v10 = vadd.f32 %v2367_v7, %v13879_v21  ;;  %v2622_v57 = vpop.f32.mrf.mxu1 }
 0x30f   :  { %v10715_v56 = vpop.f32.mrf.mxu0 }
 0x310   :  { %v14075_v45 = vadd.f32 %v2622_v57, %v2461_v10  ;;  %v10771_v12 = vpop.f32.mrf.mxu1  ;;  %v12126_v56 = vld [vmem:[#allocation2 + $0x44] sm:$0xff] }
 0x311   :  { %v2372_v4 = vpop.f32.mrf.mxu0  ;;  %10933 = vmatmul.mubr.msk.bf16.vlgmr.msra.gmra.mxu0 %vm1439_vm6, %v3273_v36  ;;  %v12127_v36 = vld [vmem:[#allocation2 + $0x3d] sm:$0xff] }
 0x312   :  { %v2627_v21 = vpop.f32.mrf.mxu1  ;;  %10989 = vmatmul.mubr.msk.bf16.vlgmr.msra.gmra.mxu1 %vm1439_vm6, %v3528_v48  ;;  %11041 = vmatpush3.bf16.msra.mxu0 %v12029_v2  ;;  %v12125_v2 = vld [vmem:[#allocation2 + $0x3c] sm:$0xff] }
 0x313   :  { %v10718_v1 = vpop.f32.mrf.mxu0  ;;  %11097 = vmatpush3.bf16.msra.mxu1 %v12030_v38  ;;  %10936 = vmatprep.mubr.msk.bf16.mxu0 %vm12204_vm2, %v16383_v58  ;;  %v3276_v23 = vpack.c.bf16 %v12126_v56, %v12125_v2  ;;  %v12128_v38 = vld [vmem:[#allocation2 + $0x45] sm:$0xff]  ;;  %v12139_v56 = vld [vmem:[#allocation2 + $0x6d] sm:$0xff] }
 0x314   :  { %v10774_v31 = vpop.f32.mrf.mxu1  ;;  %10992 = vmatprep.mubr.msk.bf16.mxu1 %vm12204_vm2, %v16383_v58  ;;  %11042 = vmatprep.subr.bf16.mxu0 %v16383_v58  ;;  %v3531_v12 = vpack.c.bf16 %v12128_v38, %v12127_v36 }
 0x315   :  { %v2375_v15 = vpop.f32.mrf.mxu0  ;;  %11098 = vmatprep.subr.bf16.mxu1 %v16383_v58  ;;  %v12129_v31 = vld [vmem:[#allocation2 + $0x4c] sm:$0xff] }
 0x316   :  { %v2463_v40 = vadd.f32 %v2375_v15, %v13904_v43  ;;  %v2630_v25 = vpop.f32.mrf.mxu1  ;;  %11043 = vmatpush3.bf16.msra.mxu0 %v12031_v20  ;;  %v12130_v15 = vld [vmem:[#allocation2 + $0x54] sm:$0xff] }
 0x317   :  { %v10719_v16 = vpop.f32.mrf.mxu0  ;;  %11099 = vmatpush3.bf16.msra.mxu1 %v12032_v22  ;;  %11152 = vmatprep.subr.bf16.mxu0 %v16383_v58 }
 0x318   :  { %v14093_v9 = vadd.f32 %v2630_v25, %v2463_v40  ;;  %v10775_v35 = vpop.f32.mrf.mxu1  ;;  %11208 = vmatprep.subr.bf16.mxu1 %v16383_v58  ;;  %v3277_v40 = vpack.c.bf16 %v12130_v15, %v12129_v31  ;;  %v12131_v16 = vld [vmem:[#allocation2 + $0x4d] sm:$0xff] }
 0x319   :  { %v2380_v62 = vpop.f32.mrf.mxu0  ;;  %10937 = vmatmul.mubr.msk.bf16.gmra.mxu0 %vm1439_vm6, %v3274_v51  ;;  %v3532_v17 = vpack.c.bf16 %v12132_v6, %v12131_v16 }
 0x31a   :  { %v2635_v43 = vpop.f32.mrf.mxu1  ;;  %10993 = vmatmul.mubr.msk.bf16.gmra.mxu1 %vm1439_vm6, %v3529_v13  ;;  %10940 = vmatprep.mubr.msk.bf16.mxu0 %vm12204_vm2, %v16383_v58 }
 0x31b   :  { %v10722_v8 = vpop.f32.mrf.mxu0  ;;  %10996 = vmatprep.mubr.msk.bf16.mxu1 %vm12204_vm2, %v16383_v58 }
 0x31c   :  { %v10778_v26 = vpop.f32.mrf.mxu1 }
 0x31d   :  { %v2383_v19 = vpop.f32.mrf.mxu0 }
 0x31e   :  { %v2465_v50 = vadd.f32 %v2383_v19, %v13920_v14  ;;  %v2638_v63 = vpop.f32.mrf.mxu1 }
 0x31f   :  { %v10723_v28 = vpop.f32.mrf.mxu0 }
 0x320   :  { %v14103_v11 = vadd.f32 %v2638_v63, %v2465_v50  ;;  %v10779_v41 = vpop.f32.mrf.mxu1  ;;  %v12133_v50 = vld [vmem:[#allocation2 + $0x5c] sm:$0xff] }
 0x321   :  { %v2388_v49 = vpop.f32.mrf.mxu0  ;;  %10941 = vmatmul.mubr.msk.bf16.gmra.mxu0 %vm1439_vm6, %v3275_v39  ;;  %v12136_v39 = vld [vmem:[#allocation2 + $0x65] sm:$0xff] }
 0x322   :  { %v2466_v29 = vadd.f32 %v2388_v49, %v13932_v54  ;;  %v2643_v30 = vpop.f32.mrf.mxu1  ;;  %10997 = vmatmul.mubr.msk.bf16.gmra.mxu1 %vm1439_vm6, %v3530_v60  ;;  %10944 = vmatprep.mubr.msk.bf16.mxu0 %vm12204_vm2, %v16383_v58  ;;  %v3533_v41 = vpack.c.bf16 %v12136_v39, %v12135_v42 }
 0x323   :  { %v10726_v14 = vpop.f32.mrf.mxu0  ;;  %11000 = vmatprep.mubr.msk.bf16.mxu1 %vm12204_vm2, %v16383_v58 }
 0x324   :  { %v14112_v3 = vadd.f32 %v2643_v30, %v2466_v29  ;;  %v10782_v7 = vpop.f32.mrf.mxu1 }
 0x325   :  { %v2391_v37 = vpop.f32.mrf.mxu0  ;;  %v12137_v7 = vld [vmem:[#allocation2 + $0x6c] sm:$0xff] }
 0x326   :  { %v2646_v10 = vpop.f32.mrf.mxu1  ;;  %v12138_v37 = vld [vmem:[#allocation2 + $0x74] sm:$0xff] }
 0x327   :  { %v10727_v57 = vpop.f32.mrf.mxu0  ;;  %v3279_v10 = vpack.c.bf16 %v12138_v37, %v12137_v7  ;;  %v12151_v7 = vld [vmem:[#allocation2 + $0x9d] sm:$0xff]  ;;  %v12152_v37 = vld [vmem:[#allocation2 + $0xa5] sm:$0xff] }
 0x328   :  { %v10783_v54 = vpop.f32.mrf.mxu1 }
 0x329   :  { %v2396_v46 = vpop.f32.mrf.mxu0  ;;  %10945 = vmatmul.mubr.msk.bf16.gmra.mxu0 %vm1439_vm6, %v3276_v23  ;;  %v12140_v23 = vld [vmem:[#allocation2 + $0x75] sm:$0xff] }
 0x32a   :  { %v2651_v48 = vpop.f32.mrf.mxu1  ;;  %11001 = vmatmul.mubr.msk.bf16.gmra.mxu1 %vm1439_vm6, %v3531_v12  ;;  %10948 = vmatprep.mubr.msk.bf16.mxu0 %vm12204_vm2, %v16383_v58  ;;  %v3534_v54 = vpack.c.bf16 %v12140_v23, %v12139_v56 }
 0x32b   :  { %v10730_v4 = vpop.f32.mrf.mxu0  ;;  %11004 = vmatprep.mubr.msk.bf16.mxu1 %vm12204_vm2, %v16383_v58 }
 0x32c   :  { %v10786_v21 = vpop.f32.mrf.mxu1 }
 0x32d   :  { %v2399_v20 = vpop.f32.mrf.mxu0 }
 0x32e   :  { %v2654_v1 = vpop.f32.mrf.mxu1  ;;  %v12141_v20 = vld [vmem:[#allocation2 + $0x7c] sm:$0xff] }
 0x32f   :  { %v10731_v22 = vpop.f32.mrf.mxu0  ;;  %v12142_v1 = vld [vmem:[#allocation2 + $0x84] sm:$0xff] }
 0x330   :  { %v10787_v25 = vpop.f32.mrf.mxu1  ;;  %v3280_v22 = vpack.c.bf16 %v12142_v1, %v12141_v20  ;;  %v12156_v20 = vld [vmem:[#allocation2 + $0xb5] sm:$0xff] }
 0x331   :  { %v2404_v51 = vpop.f32.mrf.mxu0  ;;  %10949 = vmatmul.mubr.msk.bf16.gmra.mxu0 %vm1439_vm6, %v3277_v40  ;;  %v12143_v40 = vld [vmem:[#allocation2 + $0x7d] sm:$0xff]  ;;  %v12144_v25 = vld [vmem:[#allocation2 + $0x85] sm:$0xff] }
 0x332   :  { %v2470_v35 = vadd.f32 %v2404_v51, %v13958_v61  ;;  %v2659_v5 = vpop.f32.mrf.mxu1  ;;  %11005 = vmatmul.mubr.msk.bf16.gmra.mxu1 %vm1439_vm6, %v3532_v17  ;;  %10952 = vmatprep.mubr.msk.bf16.mxu0 %vm12204_vm2, %v16383_v58  ;;  %v12134_v61 = vld [vmem:[#allocation2 + $0x64] sm:$0xff]  ;;  %v3535_v16 = vpack.c.bf16 %v12144_v25, %v12143_v40 }
 0x333   :  { %v10734_v24 = vpop.f32.mrf.mxu0  ;;  %11008 = vmatprep.mubr.msk.bf16.mxu1 %vm12204_vm2, %v16383_v58  ;;  %v3278_v63 = vpack.c.bf16 %v12134_v61, %v12133_v50  ;;  %v12147_v50 = vld [vmem:[#allocation2 + $0x8d] sm:$0xff]  ;;  %v12148_v61 = vld [vmem:[#allocation2 + $0x95] sm:$0xff] }
 0x334   :  { %v14127_v13 = vadd.f32 %v2659_v5, %v2470_v35  ;;  %v10790_v62 = vpop.f32.mrf.mxu1 }
 0x335   :  { %v2407_v43 = vpop.f32.mrf.mxu0 }
 0x336   :  { %v2471_v8 = vadd.f32 %v2407_v43, %v13962_v52  ;;  %v2662_v26 = vpop.f32.mrf.mxu1 }
 0x337   :  { %v10735_v19 = vpop.f32.mrf.mxu0 }
 0x338   :  { %v14130_v28 = vadd.f32 %v2662_v26, %v2471_v8  ;;  %v10791_v32 = vpop.f32.mrf.mxu1  ;;  %v12145_v8 = vld [vmem:[#allocation2 + $0x8c] sm:$0xff]  ;;  %v12146_v26 = vld [vmem:[#allocation2 + $0x94] sm:$0xff] }
 0x339   :  { %v2412_v27 = vpop.f32.mrf.mxu0  ;;  %10953 = vmatmul.mubr.msk.bf16.gmra.mxu0 %vm1439_vm6, %v3278_v63  ;;  %v3281_v19 = vpack.c.bf16 %v12146_v26, %v12145_v8  ;;  %v3536_v63 = vpack.c.bf16 %v12148_v61, %v12147_v50 }
 0x33a   :  { %v2667_v44 = vpop.f32.mrf.mxu1  ;;  %11009 = vmatmul.mubr.msk.bf16.gmra.mxu1 %vm1439_vm6, %v3533_v41  ;;  %10956 = vmatprep.mubr.msk.bf16.mxu0 %vm12204_vm2, %v16383_v58 }
 0x33b   :  { %v10738_v52 = vpop.f32.mrf.mxu0  ;;  %11012 = vmatprep.mubr.msk.bf16.mxu1 %vm12204_vm2, %v16383_v58 }
 0x33c   :  { %v10794_v60 = vpop.f32.mrf.mxu1 }
 0x33d   :  { %v2415_v49 = vpop.f32.mrf.mxu0 }
 0x33e   :  { %v2473_v29 = vadd.f32 %v2415_v49, %v13976_v18  ;;  %v2670_v30 = vpop.f32.mrf.mxu1 }
 0x33f   :  { %v10739_v14 = vpop.f32.mrf.mxu0 }
 0x340   :  { %v14139_v57 = vadd.f32 %v2670_v30, %v2473_v29  ;;  %v10795_v2 = vpop.f32.mrf.mxu1  ;;  %v12149_v29 = vld [vmem:[#allocation2 + $0x9c] sm:$0xff]  ;;  %v12150_v30 = vld [vmem:[#allocation2 + $0xa4] sm:$0xff] }
 0x341   :  { %v2420_v36 = vpop.f32.mrf.mxu0  ;;  %10957 = vmatmul.mubr.msk.bf16.gmra.mxu0 %vm1439_vm6, %v3279_v10  ;;  %v3282_v14 = vpack.c.bf16 %v12150_v30, %v12149_v29  ;;  %v3537_v10 = vpack.c.bf16 %v12152_v37, %v12151_v7 }
 0x342   :  { %v2675_v38 = vpop.f32.mrf.mxu1  ;;  %11013 = vmatmul.mubr.msk.bf16.gmra.mxu1 %vm1439_vm6, %v3534_v54  ;;  %10960 = vmatprep.mubr.msk.bf16.mxu0 %vm12204_vm2, %v16383_v58 }
 0x343   :  { %v10742_v18 = vpop.f32.mrf.mxu0  ;;  %11016 = vmatprep.mubr.msk.bf16.mxu1 %vm12204_vm2, %v16383_v58 }
 0x344   :  { %v10798_v12 = vpop.f32.mrf.mxu1 }
 0x345   :  { %v2423_v46 = vpop.f32.mrf.mxu0  ;;  %v12153_v12 = vld [vmem:[#allocation2 + $0xac] sm:$0xff] }
 0x346   :  { %v2475_v48 = vadd.f32 %v2423_v46, %v13990_v53  ;;  %v2678_v4 = vpop.f32.mrf.mxu1  ;;  %v12154_v46 = vld [vmem:[#allocation2 + $0xb4] sm:$0xff] }
 0x347   :  { %v10743_v21 = vpop.f32.mrf.mxu0 }
 0x348   :  { %v14148_v31 = vadd.f32 %v2678_v4, %v2475_v48  ;;  %v10799_v15 = vpop.f32.mrf.mxu1  ;;  %v3283_v48 = vpack.c.bf16 %v12154_v46, %v12153_v12  ;;  %v12155_v21 = vld [vmem:[#allocation2 + $0xad] sm:$0xff] }
 0x349   :  { %v2428_v6 = vpop.f32.mrf.mxu0  ;;  %10961 = vmatmul.mubr.msk.bf16.gmra.mxu0 %vm1439_vm6, %v3280_v22  ;;  %v3538_v1 = vpack.c.bf16 %v12156_v20, %v12155_v21  ;;  %v16523_v46 = vld [vmem:[#allocation17_spill] sm:$0xff]  ;;  %v12035_v21 = vld [vmem:[%s16241_s2 + $0xa0] sm:$0xff]  }
 0x34a   :  { %v2476_v17 = vadd.f32 %v2428_v6, %v14002_v33  ;;  %v2683_v51 = vpop.f32.mrf.mxu1  ;;  %11017 = vmatmul.mubr.msk.bf16.gmra.mxu1 %vm1439_vm6, %v3535_v16  ;;  %10964 = vmatprep.mubr.msk.bf16.mxu0 %vm12204_vm2, %v16383_v58  ;;  %v14180_v16 = vld [vmem:[#allocation2 + $0xc4] sm:$0xff] }
 0x34b   :  { %v10746_v53 = vpop.f32.mrf.mxu0  ;;  %11020 = vmatprep.mubr.msk.bf16.mxu1 %vm12204_vm2, %v16383_v58 }
 0x34c   :  { %v14157_v35 = vadd.f32 %v2683_v51, %v2476_v17  ;;  %v10802_v5 = vpop.f32.mrf.mxu1  ;;  %v14182_v17 = vld [vmem:[#allocation2 + $0xc5] sm:$0xff] }
 0x34d   :  { %v2431_v24 = vpop.f32.mrf.mxu0  ;;  %v12157_v5 = vld [vmem:[#allocation2 + $0xbc] sm:$0xff] }
 0x34e   :  { %v2686_v62 = vpop.f32.mrf.mxu1  ;;  %v3284_v24 = vpack.c.bf16 %v14180_v16, %v12157_v5  ;;  %v16526_v5 = vld [vmem:[#allocation19_spill] sm:$0xff] }
 0x34f   :  { %v10747_v43 = vpop.f32.mrf.mxu0 }
 0x350   :  { %v10803_v33 = vpop.f32.mrf.mxu1  ;;  %v12158_v43 = vld [vmem:[#allocation2 + $0xbd] sm:$0xff] }
 0x351   :  { %v2436_v32 = vpop.f32.mrf.mxu0  ;;  %10965 = vmatmul.mubr.msk.bf16.gmra.mxu0 %vm1439_vm6, %v3281_v19  ;;  %v3539_v8 = vpack.c.bf16 %v14182_v17, %v12158_v43 }
 0x352   :  { %v2478_v42 = vadd.f32 %v2436_v32, %v14016_v59  ;;  %v2691_v39 = vpop.f32.mrf.mxu1  ;;  %11021 = vmatmul.mubr.msk.bf16.gmra.mxu1 %vm1439_vm6, %v3536_v63  ;;  %10968 = vmatprep.mubr.msk.bf16.mxu0 %vm12204_vm2, %v16383_v58  ;;  %v14195_v32 = vld [vmem:[#allocation2 + $0xcc] sm:$0xff] }
 0x353   :  { %v10750_v41 = vpop.f32.mrf.mxu0  ;;  %11024 = vmatprep.mubr.msk.bf16.mxu1 %vm12204_vm2, %v16383_v58 }
 0x354   :  { %v14166_v27 = vadd.f32 %v2691_v39, %v2478_v42  ;;  %v10806_v44 = vpop.f32.mrf.mxu1  ;;  %v3285_v39 = vpack.c.bf16 %v14195_v32, %v14195_v32 }
 0x355   :  { %v2439_v52 = vpop.f32.mrf.mxu0 }
 0x356   :  { %v2694_v60 = vpop.f32.mrf.mxu1 }
 0x357   :  { %v10751_v49 = vpop.f32.mrf.mxu0 }
 0x358   :  { %v10807_v59 = vpop.f32.mrf.mxu1 }
 0x359   :  { %v2444_v2 = vpop.f32.mrf.mxu0  ;;  %10969 = vmatmul.mubr.msk.bf16.gmra.mxu0 %vm1439_vm6, %v3282_v14 }
 0x35a   :  { %v2699_v56 = vpop.f32.mrf.mxu1  ;;  %11025 = vmatmul.mubr.msk.bf16.gmra.mxu1 %vm1439_vm6, %v3537_v10  ;;  %10972 = vmatprep.mubr.msk.bf16.mxu0 %vm12204_vm2, %v16383_v58 }
 0x35b   :  { %v10754_v23 = vpop.f32.mrf.mxu0  ;;  %11028 = vmatprep.mubr.msk.bf16.mxu1 %vm12204_vm2, %v16383_v58 }
 0x35c   :  { %v10810_v54 = vpop.f32.mrf.mxu1  ;;  %v12034_v23 = vld [vmem:[%s16241_s2 + $0xb8] sm:$0xff]  }
 0x35d   :  { %v2447_v36 = vpop.f32.mrf.mxu0 }
 0x35e   :  { %v2702_v38 = vpop.f32.mrf.mxu1 }
 0x35f   :  { %v10755_v18 = vpop.f32.mrf.mxu0 }
 0x360   :  { %v10811_v4 = vpop.f32.mrf.mxu1  ;;  %v16521_v18 = vld [vmem:[#allocation10_spill] sm:$0xff] }
 0x361   :  { %v2452_v22 = vpop.f32.mrf.mxu0  ;;  %10973 = vmatmul.mubr.msk.bf16.gmra.mxu0 %vm1439_vm6, %v3283_v48  ;;  %v16522_v12 = vpack.c.bf16 %v13413_v55, %v16521_v18  ;;  %v16524_v48 = vld [vmem:[#allocation11_spill] sm:$0xff]  ;;  %v12036_v55 = vld [vmem:[%s16241_s2 + $0xb0] sm:$0xff]  }
 0x362   :  { %v2707_v15 = vpop.f32.mrf.mxu1  ;;  %11029 = vmatmul.mubr.msk.bf16.gmra.mxu1 %vm1439_vm6, %v3538_v1  ;;  %10976 = vmatprep.mubr.msk.bf16.mxu0 %vm12204_vm2, %v16383_v58  ;;  %v16525_v4 = vpack.c.bf16 %v16523_v46, %v16524_v48  ;;  %v16538_v18 = vld [vmem:[#allocation27_spill] sm:$0xff]  ;;  %v16541_v48 = vld [vmem:[#allocation29_spill] sm:$0xff] }
 0x363   :  { %v10758_v40 = vpop.f32.mrf.mxu0  ;;  %11032 = vmatprep.mubr.msk.bf16.mxu1 %vm12204_vm2, %v16383_v58 }
 0x364   :  { %v10814_v25 = vpop.f32.mrf.mxu1 }
 0x365   :  { %v2455_v6 = vpop.f32.mrf.mxu0 }
 0x366   :  { %v2710_v51 = vpop.f32.mrf.mxu1 }
 0x367   :  { %v10759_v53 = vpop.f32.mrf.mxu0 }
 0x368   :  { %v10815_v62 = vpop.f32.mrf.mxu1 }
 0x369   :  { %v2866_v26 = vpop.f32.mrf.mxu0  ;;  %10977 = vmatmul.mubr.msk.bf16.gmra.mxu0 %vm1439_vm6, %v3284_v24  ;;  %v16527_v24 = vld [vmem:[#allocation16_spill] sm:$0xff] }
 0x36a   :  { %v2968_v19 = vadd.f32 %v2866_v26, %v14057_v0  ;;  %v3121_v33 = vpop.f32.mrf.mxu1  ;;  %11033 = vmatmul.mubr.msk.bf16.gmra.mxu1 %vm1439_vm6, %v3539_v8  ;;  %10980 = vmatprep.mubr.msk.bf16.mxu0 %vm12204_vm2, %v16383_v58  ;;  %v14199_v0 = vld [vmem:[#allocation2 + $0xcd] sm:$0xff]  ;;  %v16528_v62 = vpack.c.bf16 %v16526_v5, %v16527_v24 }
 0x36b   :  { %v10822_v50 = vpop.f32.mrf.mxu0  ;;  %11036 = vmatprep.mubr.msk.bf16.mxu1 %vm12204_vm2, %v16383_v58  ;;  %v3540_v44 = vpack.c.bf16 %v14199_v0, %v14199_v0  ;;  %v16529_v8 = vld [vmem:[#allocation21_spill] sm:$0xff] }
 0x36c   :  { %v14193_v61 = vadd.f32 %v3121_v33, %v2968_v19  ;;  %v10878_v63 = vpop.f32.mrf.mxu1 }
 0x36d   :  { %v2869_v42 = vpop.f32.mrf.mxu0 }
 0x36e   :  { %v3124_v41 = vpop.f32.mrf.mxu1 }
 0x36f   :  { %v10823_v52 = vpop.f32.mrf.mxu0 }
 0x370   :  { %v10879_v60 = vpop.f32.mrf.mxu1 }
 0x371   :  { %v2874_v49 = vpop.f32.mrf.mxu0  ;;  %10981 = vmatmul.mubr.msk.bf16.gmra.mxu0 %vm1439_vm6, %v3285_v39  ;;  %v16532_v60 = vld [vmem:[#allocation23_spill] sm:$0xff] }
 0x372   :  { %v2970_v29 = vadd.f32 %v2874_v49, %v14066_v47  ;;  %v3129_v30 = vpop.f32.mrf.mxu1  ;;  %11037 = vmatmul.mubr.msk.bf16.gmra.mxu1 %vm1439_vm6, %v3540_v44  ;;  %11044 = vmatprep.mubr.msk.bf16.mxu0 %vm12204_vm2, %v16383_v58  ;;  %v12033_v47 = vld [vmem:[%s16241_s2 + $0xa8] sm:$0xff]   ;;  %v16533_v49 = vld [vmem:[#allocation20_spill] sm:$0xff] }
 0x373   :  { %v10826_v14 = vpop.f32.mrf.mxu0  ;;  %11100 = vmatprep.mubr.msk.bf16.mxu1 %vm12204_vm2, %v16383_v58 }
 0x374   :  { %v14210_v59 = vadd.f32 %v3129_v30, %v2970_v29  ;;  %v10882_v7 = vpop.f32.mrf.mxu1  ;;  %v16534_v29 = vpack.c.bf16 %v16532_v60, %v16533_v49  ;;  %v16550_v60 = vld [vmem:[#allocation35_spill] sm:$0xff]  ;;  %v16551_v49 = vld [vmem:[#allocation32_spill] sm:$0xff] }
 0x375   :  { %v2877_v37 = vpop.f32.mrf.mxu0  ;;  %v16535_v7 = vld [vmem:[#allocation25_spill] sm:$0xff] }
 0x376   :  { %v2971_v10 = vadd.f32 %v2877_v37, %v14075_v45  ;;  %v3132_v2 = vpop.f32.mrf.mxu1  ;;  %v16536_v37 = vld [vmem:[#allocation22_spill] sm:$0xff] }
 0x377   :  { %v10827_v56 = vpop.f32.mrf.mxu0 }
 0x378   :  { %v14219_v54 = vadd.f32 %v3132_v2, %v2971_v10  ;;  %v10883_v36 = vpop.f32.mrf.mxu1  ;;  %v16537_v10 = vpack.c.bf16 %v16535_v7, %v16536_v37  ;;  %v16554_v7 = vld [vmem:[#allocation34_spill] sm:$0xff] }
 0x379   :  { %v2882_v38 = vpop.f32.mrf.mxu0  ;;  %11045 = vmatmul.mubr.msk.bf16.vlgmr.msra.gmra.mxu0 %vm1439_vm6, %v16522_v12  ;;  %v16539_v12 = vld [vmem:[#allocation24_spill] sm:$0xff] }
 0x37a   :  { %v3137_v45 = vpop.f32.mrf.mxu1  ;;  %11101 = vmatmul.mubr.msk.bf16.vlgmr.msra.gmra.mxu1 %vm1439_vm6, %v16525_v4  ;;  %11153 = vmatpush3.bf16.msra.mxu0 %v12033_v47  ;;  %v16542_v4 = vld [vmem:[#allocation26_spill] sm:$0xff] }
 0x37b   :  { %v10830_v20 = vpop.f32.mrf.mxu0  ;;  %11209 = vmatpush3.bf16.msra.mxu1 %v12034_v23  ;;  %11048 = vmatprep.mubr.msk.bf16.mxu0 %vm12204_vm2, %v16383_v58  ;;  %v16540_v45 = vpack.c.bf16 %v16538_v18, %v16539_v12  ;;  %v16556_v18 = vld [vmem:[#allocation39_spill] sm:$0xff]  ;;  %v16557_v12 = vld [vmem:[#allocation36_spill] sm:$0xff] }
 0x37c   :  { %v10886_v1 = vpop.f32.mrf.mxu1  ;;  %11104 = vmatprep.mubr.msk.bf16.mxu1 %vm12204_vm2, %v16383_v58  ;;  %11154 = vmatprep.subr.bf16.mxu0 %v16383_v58 }
 0x37d   :  { %v2885_v22 = vpop.f32.mrf.mxu0  ;;  %11210 = vmatprep.subr.bf16.mxu1 %v16383_v58 }
 0x37e   :  { %v2973_v15 = vadd.f32 %v2885_v22, %v14093_v9  ;;  %v3140_v40 = vpop.f32.mrf.mxu1  ;;  %11155 = vmatpush3.bf16.msra.mxu0 %v12035_v21  ;;  %v16530_v9 = vld [vmem:[#allocation18_spill] sm:$0xff]  ;;  %v16543_v21 = vpack.c.bf16 %v16541_v48, %v16542_v4  ;;  %v16559_v48 = vld [vmem:[#allocation41_spill] sm:$0xff] }
 0x37f   :  { %v10831_v25 = vpop.f32.mrf.mxu0  ;;  %11211 = vmatpush3.bf16.msra.mxu1 %v12036_v55  ;;  %11264 = vmatprep.subr.bf16.mxu0 %v16383_v58  ;;  %v16531_v26 = vpack.c.bf16 %v16529_v8, %v16530_v9  ;;  %v16548_v8 = vld [vmem:[#allocation30_spill] sm:$0xff] }
 0x380   :  { %v14243_v6 = vadd.f32 %v3140_v40, %v2973_v15  ;;  %v10887_v51 = vpop.f32.mrf.mxu1  ;;  %11320 = vmatprep.subr.bf16.mxu1 %v16383_v58  ;;  %v16560_v4 = vld [vmem:[#allocation38_spill] sm:$0xff] }
 0x381   :  { %v2890_v53 = vpop.f32.mrf.mxu0  ;;  %11049 = vmatmul.mubr.msk.bf16.gmra.mxu0 %vm1439_vm6, %v16528_v62  ;;  %v16544_v51 = vld [vmem:[#allocation31_spill] sm:$0xff] }
 0x382   :  { %v3145_v43 = vpop.f32.mrf.mxu1  ;;  %11105 = vmatmul.mubr.msk.bf16.gmra.mxu1 %vm1439_vm6, %v16531_v26  ;;  %11052 = vmatprep.mubr.msk.bf16.mxu0 %vm12204_vm2, %v16383_v58  ;;  %v16545_v53 = vld [vmem:[#allocation28_spill] sm:$0xff] }
 0x383   :  { %v10834_v19 = vpop.f32.mrf.mxu0  ;;  %11108 = vmatprep.mubr.msk.bf16.mxu1 %vm12204_vm2, %v16383_v58  ;;  %v16546_v5 = vpack.c.bf16 %v16544_v51, %v16545_v53  ;;  %v16547_v43 = vld [vmem:[#allocation33_spill] sm:$0xff]  ;;  %v16562_v53 = vld [vmem:[#allocation43_spill] sm:$0xff] }
 0x384   :  { %v10890_v33 = vpop.f32.mrf.mxu1  ;;  %v16549_v9 = vpack.c.bf16 %v16547_v43, %v16548_v8  ;;  %v16565_v8 = vld [vmem:[#allocation45_spill] sm:$0xff] }
 0x385   :  { %v2893_v50 = vpop.f32.mrf.mxu0 }
 0x386   :  { %v2975_v63 = vadd.f32 %v2893_v50, %v14103_v11  ;;  %v3148_v42 = vpop.f32.mrf.mxu1 }
 0x387   :  { %v10835_v39 = vpop.f32.mrf.mxu0 }
 0x388   :  { %v14259_v41 = vadd.f32 %v3148_v42, %v2975_v63  ;;  %v10891_v44 = vpop.f32.mrf.mxu1 }
 0x389   :  { %v2898_v52 = vpop.f32.mrf.mxu0  ;;  %11053 = vmatmul.mubr.msk.bf16.gmra.mxu0 %vm1439_vm6, %v16534_v29  ;;  %v16552_v29 = vpack.c.bf16 %v16550_v60, %v16551_v49  ;;  %v16569_v60 = vld [vmem:[#allocation44_spill] sm:$0xff] }
 0x38a   :  { %v2976_v30 = vadd.f32 %v2898_v52, %v14112_v3  ;;  %v3153_v14 = vpop.f32.mrf.mxu1  ;;  %11109 = vmatmul.mubr.msk.bf16.gmra.mxu1 %vm1439_vm6, %v16537_v10  ;;  %11056 = vmatprep.mubr.msk.bf16.mxu0 %vm12204_vm2, %v16383_v58 }
 0x38b   :  { %v10838_v11 = vpop.f32.mrf.mxu0  ;;  %11112 = vmatprep.mubr.msk.bf16.mxu1 %vm12204_vm2, %v16383_v58 }
 0x38c   :  { %v14274_v2 = vadd.f32 %v3153_v14, %v2976_v30  ;;  %v10894_v47 = vpop.f32.mrf.mxu1  ;;  %v16553_v14 = vld [vmem:[#allocation37_spill] sm:$0xff] }
 0x38d   :  { %v2901_v56 = vpop.f32.mrf.mxu0  ;;  %v16555_v37 = vpack.c.bf16 %v16553_v14, %v16554_v7  ;;  %v16571_v14 = vld [vmem:[#allocation49_spill] sm:$0xff]  ;;  %v16572_v7 = vld [vmem:[#allocation46_spill] sm:$0xff] }
 0x38e   :  { %v3156_v23 = vpop.f32.mrf.mxu1 }
 0x38f   :  { %v10839_v36 = vpop.f32.mrf.mxu0 }
 0x390   :  { %v10895_v3 = vpop.f32.mrf.mxu1 }
 0x391   :  { %v2906_v38 = vpop.f32.mrf.mxu0  ;;  %11057 = vmatmul.mubr.msk.bf16.gmra.mxu0 %vm1439_vm6, %v16540_v45  ;;  %v16558_v45 = vpack.c.bf16 %v16556_v18, %v16557_v12  ;;  %v16575_v18 = vld [vmem:[#allocation48_spill] sm:$0xff] }
 0x392   :  { %v3161_v46 = vpop.f32.mrf.mxu1  ;;  %11113 = vmatmul.mubr.msk.bf16.gmra.mxu1 %vm1439_vm6, %v16543_v21  ;;  %11060 = vmatprep.mubr.msk.bf16.mxu0 %vm12204_vm2, %v16383_v58  ;;  %v16561_v21 = vpack.c.bf16 %v16559_v48, %v16560_v4  ;;  %v16578_v48 = vld [vmem:[#allocation50_spill] sm:$0xff] }
 0x393   :  { %v10842_v20 = vpop.f32.mrf.mxu0  ;;  %11116 = vmatprep.mubr.msk.bf16.mxu1 %vm12204_vm2, %v16383_v58 }
 0x394   :  { %v10898_v55 = vpop.f32.mrf.mxu1 }
 0x395   :  { %v2909_v1 = vpop.f32.mrf.mxu0 }
 0x396   :  { %v3164_v22 = vpop.f32.mrf.mxu1 }
 0x397   :  { %v10843_v15 = vpop.f32.mrf.mxu0 }
 0x398   :  { %v10899_v40 = vpop.f32.mrf.mxu1 }
 0x399   :  { %v2914_v25 = vpop.f32.mrf.mxu0  ;;  %11061 = vmatmul.mubr.msk.bf16.gmra.mxu0 %vm1439_vm6, %v16546_v5  ;;  %v16563_v5 = vld [vmem:[#allocation40_spill] sm:$0xff] }
 0x39a   :  { %v2980_v24 = vadd.f32 %v2914_v25, %v14127_v13  ;;  %v3169_v62 = vpop.f32.mrf.mxu1  ;;  %11117 = vmatmul.mubr.msk.bf16.gmra.mxu1 %vm1439_vm6, %v16549_v9  ;;  %11064 = vmatprep.mubr.msk.bf16.mxu0 %vm12204_vm2, %v16383_v58  ;;  %v16566_v9 = vld [vmem:[#allocation42_spill] sm:$0xff] }
 0x39b   :  { %v10846_v26 = vpop.f32.mrf.mxu0  ;;  %11120 = vmatprep.mubr.msk.bf16.mxu1 %vm12204_vm2, %v16383_v58 }
 0x39c   :  { %v14301_v19 = vadd.f32 %v3169_v62, %v2980_v24  ;;  %v10902_v33 = vpop.f32.mrf.mxu1  ;;  %v16564_v24 = vpack.c.bf16 %v16562_v53, %v16563_v5  ;;  %v16567_v26 = vpack.c.bf16 %v16565_v8, %v16566_v9 }
 0x39d   :  { %v2917_v50 = vpop.f32.mrf.mxu0 }
 0x39e   :  { %v2981_v63 = vadd.f32 %v2917_v50, %v14130_v28  ;;  %v3172_v13 = vpop.f32.mrf.mxu1 }
 0x39f   :  { %v10847_v42 = vpop.f32.mrf.mxu0 }
 0x3a0   :  { %v14304_v39 = vadd.f32 %v3172_v13, %v2981_v63  ;;  %v10903_v44 = vpop.f32.mrf.mxu1 }
 0x3a1   :  { %v2922_v52 = vpop.f32.mrf.mxu0  ;;  %11065 = vmatmul.mubr.msk.bf16.gmra.mxu0 %vm1439_vm6, %v16552_v29 }
 0x3a2   :  { %v3177_v30 = vpop.f32.mrf.mxu1  ;;  %11121 = vmatmul.mubr.msk.bf16.gmra.mxu1 %vm1439_vm6, %v16555_v37  ;;  %11068 = vmatprep.mubr.msk.bf16.mxu0 %vm12204_vm2, %v16383_v58  ;;  %v16568_v52 = vld [vmem:[#allocation47_spill] sm:$0xff]  ;;  %v16573_v37 = vpack.c.bf16 %v16571_v14, %v16572_v7 }
 0x3a3   :  { %v10850_v28 = vpop.f32.mrf.mxu0  ;;  %11124 = vmatprep.mubr.msk.bf16.mxu1 %vm12204_vm2, %v16383_v58  ;;  %v16570_v49 = vpack.c.bf16 %v16568_v52, %v16569_v60  ;;  %v3782_v60 = vld [vmem:[#allocation2 + $0xd4] sm:$0xff] }
 0x3a4   :  { %v10906_v10 = vpop.f32.mrf.mxu1 }
 0x3a5   :  { %v2925_v11 = vpop.f32.mrf.mxu0 }
 0x3a6   :  { %v2983_v47 = vadd.f32 %v2925_v11, %v14139_v57  ;;  %v3180_v56 = vpop.f32.mrf.mxu1 }
 0x3a7   :  { %v10851_v23 = vpop.f32.mrf.mxu0 }
 0x3a8   :  { %v14319_v36 = vadd.f32 %v3180_v56, %v2983_v47  ;;  %v10907_v3 = vpop.f32.mrf.mxu1 }
 0x3a9   :  { %v2930_v38 = vpop.f32.mrf.mxu0  ;;  %11069 = vmatmul.mubr.msk.bf16.gmra.mxu0 %vm1439_vm6, %v16558_v45 }
 0x3aa   :  { %v3185_v46 = vpop.f32.mrf.mxu1  ;;  %11125 = vmatmul.mubr.msk.bf16.gmra.mxu1 %vm1439_vm6, %v16561_v21  ;;  %11072 = vmatprep.mubr.msk.bf16.mxu0 %vm12204_vm2, %v16383_v58  ;;  %v16574_v38 = vld [vmem:[#allocation51_spill] sm:$0xff] }
 0x3ab   :  { %v10854_v57 = vpop.f32.mrf.mxu0  ;;  %11128 = vmatprep.mubr.msk.bf16.mxu1 %vm12204_vm2, %v16383_v58  ;;  %v16576_v12 = vpack.c.bf16 %v16574_v38, %v16575_v18  ;;  %v16577_v46 = vld [vmem:[#allocation53_spill] sm:$0xff]  ;;  %v4523_v38 = vld [vmem:[#allocation2 + $0x17] sm:$0xff] }
 0x3ac   :  { %v10910_v20 = vpop.f32.mrf.mxu1  ;;  %v16579_v4 = vpack.c.bf16 %v16577_v46, %v16578_v48  ;;  %v12159_v46 = vld [vmem:[#allocation2 + $0x1e] sm:$0xff] }
 0x3ad   :  { %v2933_v55 = vpop.f32.mrf.mxu0 }
 0x3ae   :  { %v2985_v1 = vadd.f32 %v2933_v55, %v14148_v31  ;;  %v3188_v22 = vpop.f32.mrf.mxu1 }
 0x3af   :  { %v10855_v15 = vpop.f32.mrf.mxu0 }
 0x3b0   :  { %v14334_v40 = vadd.f32 %v3188_v22, %v2985_v1  ;;  %v10911_v25 = vpop.f32.mrf.mxu1 }
 0x3b1   :  { %v2938_v51 = vpop.f32.mrf.mxu0  ;;  %11073 = vmatmul.mubr.msk.bf16.gmra.mxu0 %vm1439_vm6, %v16564_v24  ;;  %v16580_v25 = vld [vmem:[#allocation55_spill] sm:$0xff]  ;;  %v16583_v24 = vld [vmem:[#allocation56_spill] sm:$0xff] }
 0x3b2   :  { %v2986_v62 = vadd.f32 %v2938_v51, %v14157_v35  ;;  %v3193_v43 = vpop.f32.mrf.mxu1  ;;  %11129 = vmatmul.mubr.msk.bf16.gmra.mxu1 %vm1439_vm6, %v16567_v26  ;;  %11076 = vmatprep.mubr.msk.bf16.mxu0 %vm12204_vm2, %v16383_v58  ;;  %v16581_v51 = vld [vmem:[#allocation52_spill] sm:$0xff] }
 0x3b3   :  { %v10858_v31 = vpop.f32.mrf.mxu0  ;;  %11132 = vmatprep.mubr.msk.bf16.mxu1 %vm12204_vm2, %v16383_v58  ;;  %v16582_v53 = vpack.c.bf16 %v16580_v25, %v16581_v51  ;;  %v12040_v25 = vld [vmem:[%s16241_s2 + $0xd0] sm:$0xff]  }
 0x3b4   :  { %v14349_v33 = vadd.f32 %v3193_v43, %v2986_v62  ;;  %v10914_v50 = vpop.f32.mrf.mxu1  ;;  %v16584_v62 = vld [vmem:[#allocation54_spill] sm:$0xff] }
 0x3b5   :  { %v2941_v63 = vpop.f32.mrf.mxu0  ;;  %v16585_v43 = vpack.c.bf16 %v16583_v24, %v16584_v62 }
 0x3b6   :  { %v3196_v13 = vpop.f32.mrf.mxu1  ;;  %v3794_v63 = vpack.c.bf16 %v14195_v32, %v14180_v16  ;;  %v4037_v16 = vld [vmem:[#allocation2 + $0xd5] sm:$0xff] }
 0x3b7   :  { %v10859_v42 = vpop.f32.mrf.mxu0  ;;  %v4050_v14 = vpack.c.bf16 %v4037_v16, %v4037_v16 }
 0x3b8   :  { %v10915_v35 = vpop.f32.mrf.mxu1  ;;  %v4049_v42 = vpack.c.bf16 %v14199_v0, %v14182_v17 }
 0x3b9   :  { %v2946_v44 = vpop.f32.mrf.mxu0  ;;  %11077 = vmatmul.mubr.msk.bf16.gmra.mxu0 %vm1439_vm6, %v16570_v49 }
 0x3ba   :  { %v2988_v29 = vadd.f32 %v2946_v44, %v14166_v27  ;;  %v3201_v30 = vpop.f32.mrf.mxu1  ;;  %11133 = vmatmul.mubr.msk.bf16.gmra.mxu1 %vm1439_vm6, %v16573_v37  ;;  %11080 = vmatprep.mubr.msk.bf16.mxu0 %vm12204_vm2, %v16383_v58 }
 0x3bb   :  { %v10862_v28 = vpop.f32.mrf.mxu0  ;;  %11136 = vmatprep.mubr.msk.bf16.mxu1 %vm12204_vm2, %v16383_v58 }
 0x3bc   :  { %v14364_v10 = vadd.f32 %v3201_v30, %v2988_v29  ;;  %v10918_v11 = vpop.f32.mrf.mxu1  ;;  %v3795_v29 = vpack.c.bf16 %v3782_v60, %v3782_v60 }
 0x3bd   :  { %v2949_v47 = vpop.f32.mrf.mxu0 }
 0x3be   :  { %v3204_v56 = vpop.f32.mrf.mxu1 }
 0x3bf   :  { %v10863_v23 = vpop.f32.mrf.mxu0 }
 0x3c0   :  { %v10919_v27 = vpop.f32.mrf.mxu1 }
 0x3c1   :  { %v2954_v3 = vpop.f32.mrf.mxu0  ;;  %11081 = vmatmul.mubr.msk.bf16.gmra.mxu0 %vm1439_vm6, %v16576_v12  ;;  %v4268_v27 = vld [vmem:[#allocation2 + $0x16] sm:$0xff] }
 0x3c2   :  { %v3209_v45 = vpop.f32.mrf.mxu1  ;;  %11137 = vmatmul.mubr.msk.bf16.gmra.mxu1 %vm1439_vm6, %v16579_v4  ;;  %11084 = vmatprep.mubr.msk.bf16.mxu0 %vm12204_vm2, %v16383_v58  ;;  %v4293_v48 = vpack.c.bf16 %v12159_v46, %v4268_v27  ;;  %v12038_v4 = vld [vmem:[%s16241_s2 + $0xd8] sm:$0xff]   ;;  %v12171_v46 = vld [vmem:[#allocation2 + $0x47] sm:$0xff] }
 0x3c3   :  { %v10866_v21 = vpop.f32.mrf.mxu0  ;;  %11140 = vmatprep.mubr.msk.bf16.mxu1 %vm12204_vm2, %v16383_v58 }
 0x3c4   :  { %v10922_v57 = vpop.f32.mrf.mxu1 }
 0x3c5   :  { %v2957_v20 = vpop.f32.mrf.mxu0 }
 0x3c6   :  { %v3212_v55 = vpop.f32.mrf.mxu1  ;;  %v12160_v20 = vld [vmem:[#allocation2 + $0x1f] sm:$0xff] }
 0x3c7   :  { %v10867_v1 = vpop.f32.mrf.mxu0  ;;  %v4548_v55 = vpack.c.bf16 %v12160_v20, %v4523_v38 }
 0x3c8   :  { %v10923_v22 = vpop.f32.mrf.mxu1 }
 0x3c9   :  { %v2962_v15 = vpop.f32.mrf.mxu0  ;;  %11085 = vmatmul.mubr.msk.bf16.gmra.mxu0 %vm1439_vm6, %v16582_v53  ;;  %v12039_v22 = vld [vmem:[%s16241_s2 + $0xc0] sm:$0xff]  }
 0x3ca   :  { %v3217_v5 = vpop.f32.mrf.mxu1  ;;  %11141 = vmatmul.mubr.msk.bf16.gmra.mxu1 %vm1439_vm6, %v16585_v43  ;;  %11088 = vmatprep.mubr.msk.bf16.mxu0 %vm12204_vm2, %v16383_v58  ;;  %v12161_v43 = vld [vmem:[#allocation2 + $0x26] sm:$0xff] }
 0x3cb   :  { %v10870_v8 = vpop.f32.mrf.mxu0  ;;  %11144 = vmatprep.mubr.msk.bf16.mxu1 %vm12204_vm2, %v16383_v58 }
 0x3cc   :  { %v10926_v9 = vpop.f32.mrf.mxu1  ;;  %v12162_v8 = vld [vmem:[#allocation2 + $0x2e] sm:$0xff] }
 0x3cd   :  { %v2965_v26 = vpop.f32.mrf.mxu0  ;;  %v4294_v9 = vpack.c.bf16 %v12162_v8, %v12161_v43 }
 0x3ce   :  { %v3220_v31 = vpop.f32.mrf.mxu1 }
 0x3cf   :  { %v10871_v50 = vpop.f32.mrf.mxu0 }
 0x3d0   :  { %v10927_v13 = vpop.f32.mrf.mxu1  ;;  %v12163_v50 = vld [vmem:[#allocation2 + $0x27] sm:$0xff] }
 0x3d1   :  { %v3376_v35 = vpop.f32.mrf.mxu0  ;;  %11089 = vmatmul.mubr.msk.bf16.gmra.mxu0 %vm1439_vm6, %v3794_v63  ;;  %v12164_v63 = vld [vmem:[#allocation2 + $0x2f] sm:$0xff] }
 0x3d2   :  { %v3478_v44 = vadd.f32 %v3376_v35, %v14193_v61  ;;  %v3631_v52 = vpop.f32.mrf.mxu1  ;;  %11145 = vmatmul.mubr.msk.bf16.gmra.mxu1 %vm1439_vm6, %v4049_v42  ;;  %11092 = vmatprep.mubr.msk.bf16.mxu0 %vm12204_vm2, %v16383_v58  ;;  %v4549_v13 = vpack.c.bf16 %v12164_v63, %v12163_v50 }
 0x3d3   :  { %v10934_v49 = vpop.f32.mrf.mxu0  ;;  %11148 = vmatprep.mubr.msk.bf16.mxu1 %vm12204_vm2, %v16383_v58 }
 0x3d4   :  { %v14401_v32 = vadd.f32 %v3631_v52, %v3478_v44  ;;  %v10990_v17 = vpop.f32.mrf.mxu1 }
 0x3d5   :  { %v3379_v0 = vpop.f32.mrf.mxu0  ;;  %v12165_v17 = vld [vmem:[#allocation2 + $0x36] sm:$0xff] }
 0x3d6   :  { %v3634_v30 = vpop.f32.mrf.mxu1  ;;  %v12166_v0 = vld [vmem:[#allocation2 + $0x3e] sm:$0xff] }
 0x3d7   :  { %v10935_v61 = vpop.f32.mrf.mxu0 }
 0x3d8   :  { %v10991_v7 = vpop.f32.mrf.mxu1  ;;  %v12167_v61 = vld [vmem:[#allocation2 + $0x37] sm:$0xff] }
 0x3d9   :  { %v3384_v37 = vpop.f32.mrf.mxu0  ;;  %11093 = vmatmul.mubr.msk.bf16.gmra.mxu0 %vm1439_vm6, %v3795_v29  ;;  %v4295_v29 = vpack.c.bf16 %v12166_v0, %v12165_v17  ;;  %v12168_v7 = vld [vmem:[#allocation2 + $0x3f] sm:$0xff]  ;;  %v12179_v17 = vld [vmem:[#allocation2 + $0x67] sm:$0xff]  ;;  %v12180_v0 = vld [vmem:[#allocation2 + $0x6f] sm:$0xff] }
 0x3da   :  { %v3480_v28 = vadd.f32 %v3384_v37, %v14210_v59  ;;  %v3639_v11 = vpop.f32.mrf.mxu1  ;;  %11149 = vmatmul.mubr.msk.bf16.gmra.mxu1 %vm1439_vm6, %v4050_v14  ;;  %11156 = vmatprep.mubr.msk.bf16.mxu0 %vm12204_vm2, %v16383_v58  ;;  %v12037_v59 = vld [vmem:[%s16241_s2 + $0xc8] sm:$0xff]   ;;  %v4550_v37 = vpack.c.bf16 %v12168_v7, %v12167_v61 }
 0x3db   :  { %v10938_v47 = vpop.f32.mrf.mxu0  ;;  %11212 = vmatprep.mubr.msk.bf16.mxu1 %vm12204_vm2, %v16383_v58 }
 0x3dc   :  { %v14410_v56 = vadd.f32 %v3639_v11, %v3480_v28  ;;  %v10994_v23 = vpop.f32.mrf.mxu1 }
 0x3dd   :  { %v3387_v3 = vpop.f32.mrf.mxu0 }
 0x3de   :  { %v3481_v18 = vadd.f32 %v3387_v3, %v14219_v54  ;;  %v3642_v12 = vpop.f32.mrf.mxu1 }
 0x3df   :  { %v10939_v45 = vpop.f32.mrf.mxu0 }
 0x3e0   :  { %v14419_v21 = vadd.f32 %v3642_v12, %v3481_v18  ;;  %v10995_v57 = vpop.f32.mrf.mxu1  ;;  %v12169_v12 = vld [vmem:[#allocation2 + $0x46] sm:$0xff] }
 0x3e1   :  { %v3392_v1 = vpop.f32.mrf.mxu0  ;;  %11157 = vmatmul.mubr.msk.bf16.vlgmr.msra.gmra.mxu0 %vm1439_vm6, %v4293_v48  ;;  %v12172_v48 = vld [vmem:[#allocation2 + $0x4f] sm:$0xff] }
 0x3e2   :  { %v3647_v54 = vpop.f32.mrf.mxu1  ;;  %11213 = vmatmul.mubr.msk.bf16.vlgmr.msra.gmra.mxu1 %vm1439_vm6, %v4548_v55  ;;  %11265 = vmatpush3.bf16.msra.mxu0 %v12037_v59  ;;  %v12170_v59 = vld [vmem:[#allocation2 + $0x4e] sm:$0xff] }
 0x3e3   :  { %v10942_v15 = vpop.f32.mrf.mxu0  ;;  %11321 = vmatpush3.bf16.msra.mxu1 %v12038_v4  ;;  %11160 = vmatprep.mubr.msk.bf16.mxu0 %vm12204_vm2, %v16383_v58  ;;  %v4296_v45 = vpack.c.bf16 %v12170_v59, %v12169_v12  ;;  %v4551_v4 = vpack.c.bf16 %v12172_v48, %v12171_v46  ;;  %v12183_v12 = vld [vmem:[#allocation2 + $0x77] sm:$0xff]  ;;  %v12184_v59 = vld [vmem:[#allocation2 + $0x7f] sm:$0xff] }
 0x3e4   :  { %v10998_v51 = vpop.f32.mrf.mxu1  ;;  %11216 = vmatprep.mubr.msk.bf16.mxu1 %vm12204_vm2, %v16383_v58  ;;  %11266 = vmatprep.subr.bf16.mxu0 %v16383_v58 }
 0x3e5   :  { %v3395_v53 = vpop.f32.mrf.mxu0  ;;  %11322 = vmatprep.subr.bf16.mxu1 %v16383_v58  ;;  %v12174_v51 = vld [vmem:[#allocation2 + $0x5e] sm:$0xff] }
 0x3e6   :  { %v3483_v5 = vadd.f32 %v3395_v53, %v14243_v6  ;;  %v3650_v24 = vpop.f32.mrf.mxu1  ;;  %11267 = vmatpush3.bf16.msra.mxu0 %v12039_v22 }
 0x3e7   :  { %v10943_v62 = vpop.f32.mrf.mxu0  ;;  %11323 = vmatpush3.bf16.msra.mxu1 %v12040_v25  ;;  %11376 = vmatprep.subr.bf16.mxu0 %v16383_v58  ;;  %v12173_v25 = vld [vmem:[#allocation2 + $0x56] sm:$0xff] }
 0x3e8   :  { %v14437_v26 = vadd.f32 %v3650_v24, %v3483_v5  ;;  %v10999_v31 = vpop.f32.mrf.mxu1  ;;  %11432 = vmatprep.subr.bf16.mxu1 %v16383_v58  ;;  %v4297_v53 = vpack.c.bf16 %v12174_v51, %v12173_v25  ;;  %v12175_v24 = vld [vmem:[#allocation2 + $0x57] sm:$0xff]  ;;  %v12176_v62 = vld [vmem:[#allocation2 + $0x5f] sm:$0xff]  ;;  %v12187_v51 = vld [vmem:[#allocation2 + $0x87] sm:$0xff] }
 0x3e9   :  { %v3400_v42 = vpop.f32.mrf.mxu0  ;;  %11161 = vmatmul.mubr.msk.bf16.gmra.mxu0 %vm1439_vm6, %v4294_v9  ;;  %v4552_v43 = vpack.c.bf16 %v12176_v62, %v12175_v24 }
 0x3ea   :  { %v3655_v6 = vpop.f32.mrf.mxu1  ;;  %11217 = vmatmul.mubr.msk.bf16.gmra.mxu1 %vm1439_vm6, %v4549_v13  ;;  %11164 = vmatprep.mubr.msk.bf16.mxu0 %vm12204_vm2, %v16383_v58 }
 0x3eb   :  { %v10946_v35 = vpop.f32.mrf.mxu0  ;;  %11220 = vmatprep.mubr.msk.bf16.mxu1 %vm12204_vm2, %v16383_v58 }
 0x3ec   :  { %v11002_v44 = vpop.f32.mrf.mxu1 }
 0x3ed   :  { %v3403_v52 = vpop.f32.mrf.mxu0 }
 0x3ee   :  { %v3485_v60 = vadd.f32 %v3403_v52, %v14259_v41  ;;  %v3658_v49 = vpop.f32.mrf.mxu1  ;;  %v12177_v52 = vld [vmem:[#allocation2 + $0x66] sm:$0xff] }
 0x3ef   :  { %v10947_v16 = vpop.f32.mrf.mxu0 }
 0x3f0   :  { %v14447_v30 = vadd.f32 %v3658_v49, %v3485_v60  ;;  %v11003_v14 = vpop.f32.mrf.mxu1 }
 0x3f1   :  { %v3408_v28 = vpop.f32.mrf.mxu0  ;;  %11165 = vmatmul.mubr.msk.bf16.gmra.mxu0 %vm1439_vm6, %v4295_v29  ;;  %v4553_v29 = vpack.c.bf16 %v12180_v0, %v12179_v17 }
 0x3f2   :  { %v3486_v11 = vadd.f32 %v3408_v28, %v14274_v2  ;;  %v3663_v47 = vpop.f32.mrf.mxu1  ;;  %11221 = vmatmul.mubr.msk.bf16.gmra.mxu1 %vm1439_vm6, %v4550_v37  ;;  %11168 = vmatprep.mubr.msk.bf16.mxu0 %vm12204_vm2, %v16383_v58 }
 0x3f3   :  { %v10950_v41 = vpop.f32.mrf.mxu0  ;;  %11224 = vmatprep.mubr.msk.bf16.mxu1 %vm12204_vm2, %v16383_v58 }
 0x3f4   :  { %v14456_v23 = vadd.f32 %v3663_v47, %v3486_v11  ;;  %v11006_v27 = vpop.f32.mrf.mxu1  ;;  %v12181_v41 = vld [vmem:[#allocation2 + $0x76] sm:$0xff] }
 0x3f5   :  { %v3411_v3 = vpop.f32.mrf.mxu0  ;;  %v12182_v27 = vld [vmem:[#allocation2 + $0x7e] sm:$0xff] }
 0x3f6   :  { %v3666_v38 = vpop.f32.mrf.mxu1  ;;  %v4299_v3 = vpack.c.bf16 %v12182_v27, %v12181_v41  ;;  %v12196_v41 = vld [vmem:[#allocation2 + $0xaf] sm:$0xff] }
 0x3f7   :  { %v10951_v18 = vpop.f32.mrf.mxu0 }
 0x3f8   :  { %v11007_v2 = vpop.f32.mrf.mxu1 }
 0x3f9   :  { %v3416_v57 = vpop.f32.mrf.mxu0  ;;  %11169 = vmatmul.mubr.msk.bf16.gmra.mxu0 %vm1439_vm6, %v4296_v45  ;;  %v4554_v45 = vpack.c.bf16 %v12184_v59, %v12183_v12 }
 0x3fa   :  { %v3671_v20 = vpop.f32.mrf.mxu1  ;;  %11225 = vmatmul.mubr.msk.bf16.gmra.mxu1 %vm1439_vm6, %v4551_v4  ;;  %11172 = vmatprep.mubr.msk.bf16.mxu0 %vm12204_vm2, %v16383_v58 }
 0x3fb   :  { %v10954_v55 = vpop.f32.mrf.mxu0  ;;  %11228 = vmatprep.mubr.msk.bf16.mxu1 %vm12204_vm2, %v16383_v58 }
 0x3fc   :  { %v11010_v1 = vpop.f32.mrf.mxu1 }
 0x3fd   :  { %v3419_v54 = vpop.f32.mrf.mxu0  ;;  %v12185_v1 = vld [vmem:[#allocation2 + $0x86] sm:$0xff] }
 0x3fe   :  { %v3674_v22 = vpop.f32.mrf.mxu1  ;;  %v12186_v54 = vld [vmem:[#allocation2 + $0x8e] sm:$0xff] }
 0x3ff   :  { %v10955_v15 = vpop.f32.mrf.mxu0  ;;  %v4300_v22 = vpack.c.bf16 %v12186_v54, %v12185_v1 }
 0x400   :  { %v11011_v5 = vpop.f32.mrf.mxu1 }
 0x401   :  { %v3424_v8 = vpop.f32.mrf.mxu0  ;;  %11173 = vmatmul.mubr.msk.bf16.gmra.mxu0 %vm1439_vm6, %v4297_v53  ;;  %v12188_v53 = vld [vmem:[#allocation2 + $0x8f] sm:$0xff] }
 0x402   :  { %v3490_v9 = vadd.f32 %v3424_v8, %v14301_v19  ;;  %v3679_v31 = vpop.f32.mrf.mxu1  ;;  %11229 = vmatmul.mubr.msk.bf16.gmra.mxu1 %vm1439_vm6, %v4552_v43  ;;  %11176 = vmatprep.mubr.msk.bf16.mxu0 %vm12204_vm2, %v16383_v58  ;;  %v12178_v19 = vld [vmem:[#allocation2 + $0x6e] sm:$0xff]  ;;  %v4555_v5 = vpack.c.bf16 %v12188_v53, %v12187_v51 }
 0x403   :  { %v10958_v50 = vpop.f32.mrf.mxu0  ;;  %11232 = vmatprep.mubr.msk.bf16.mxu1 %vm12204_vm2, %v16383_v58  ;;  %v4298_v60 = vpack.c.bf16 %v12178_v19, %v12177_v52  ;;  %v12192_v52 = vld [vmem:[#allocation2 + $0x9f] sm:$0xff]  ;;  %v14524_v53 = vld [vmem:[#allocation2 + $0xce] sm:$0xff] }
 0x404   :  { %v14471_v63 = vadd.f32 %v3679_v31, %v3490_v9  ;;  %v11014_v13 = vpop.f32.mrf.mxu1 }
 0x405   :  { %v3427_v42 = vpop.f32.mrf.mxu0 }
 0x406   :  { %v3491_v6 = vadd.f32 %v3427_v42, %v14304_v39  ;;  %v3682_v35 = vpop.f32.mrf.mxu1  ;;  %v12189_v42 = vld [vmem:[#allocation2 + $0x96] sm:$0xff] }
 0x407   :  { %v10959_v44 = vpop.f32.mrf.mxu0 }
 0x408   :  { %v14474_v49 = vadd.f32 %v3682_v35, %v3491_v6  ;;  %v11015_v16 = vpop.f32.mrf.mxu1  ;;  %v12190_v6 = vld [vmem:[#allocation2 + $0x9e] sm:$0xff] }
 0x409   :  { %v3432_v14 = vpop.f32.mrf.mxu0  ;;  %11177 = vmatmul.mubr.msk.bf16.gmra.mxu0 %vm1439_vm6, %v4298_v60  ;;  %v4301_v35 = vpack.c.bf16 %v12190_v6, %v12189_v42  ;;  %v12191_v44 = vld [vmem:[#allocation2 + $0x97] sm:$0xff] }
 0x40a   :  { %v3687_v61 = vpop.f32.mrf.mxu1  ;;  %11233 = vmatmul.mubr.msk.bf16.gmra.mxu1 %vm1439_vm6, %v4553_v29  ;;  %11180 = vmatprep.mubr.msk.bf16.mxu0 %vm12204_vm2, %v16383_v58  ;;  %v4556_v19 = vpack.c.bf16 %v12192_v52, %v12191_v44  ;;  %v14539_v52 = vld [vmem:[#allocation2 + $0xd7] sm:$0xff] }
 0x40b   :  { %v10962_v39 = vpop.f32.mrf.mxu0  ;;  %11236 = vmatprep.mubr.msk.bf16.mxu1 %vm12204_vm2, %v16383_v58 }
 0x40c   :  { %v11018_v7 = vpop.f32.mrf.mxu1 }
 0x40d   :  { %v3435_v37 = vpop.f32.mrf.mxu0 }
 0x40e   :  { %v3493_v28 = vadd.f32 %v3435_v37, %v14319_v36  ;;  %v3690_v11 = vpop.f32.mrf.mxu1  ;;  %v12193_v37 = vld [vmem:[#allocation2 + $0xa6] sm:$0xff] }
 0x40f   :  { %v10963_v47 = vpop.f32.mrf.mxu0 }
 0x410   :  { %v14483_v38 = vadd.f32 %v3690_v11, %v3493_v28  ;;  %v11019_v18 = vpop.f32.mrf.mxu1  ;;  %v12194_v28 = vld [vmem:[#allocation2 + $0xae] sm:$0xff] }
 0x411   :  { %v3440_v2 = vpop.f32.mrf.mxu0  ;;  %11181 = vmatmul.mubr.msk.bf16.gmra.mxu0 %vm1439_vm6, %v4299_v3  ;;  %v4302_v11 = vpack.c.bf16 %v12194_v28, %v12193_v37  ;;  %v12195_v47 = vld [vmem:[#allocation2 + $0xa7] sm:$0xff] }
 0x412   :  { %v3695_v46 = vpop.f32.mrf.mxu1  ;;  %11237 = vmatmul.mubr.msk.bf16.gmra.mxu1 %vm1439_vm6, %v4554_v45  ;;  %11184 = vmatprep.mubr.msk.bf16.mxu0 %vm12204_vm2, %v16383_v58  ;;  %v4557_v27 = vpack.c.bf16 %v12196_v41, %v12195_v47 }
 0x413   :  { %v10966_v36 = vpop.f32.mrf.mxu0  ;;  %11240 = vmatprep.mubr.msk.bf16.mxu1 %vm12204_vm2, %v16383_v58 }
 0x414   :  { %v11022_v48 = vpop.f32.mrf.mxu1  ;;  %v12197_v36 = vld [vmem:[#allocation2 + $0xb6] sm:$0xff] }
 0x415   :  { %v3443_v4 = vpop.f32.mrf.mxu0  ;;  %v12198_v48 = vld [vmem:[#allocation2 + $0xbe] sm:$0xff] }
 0x416   :  { %v3495_v57 = vadd.f32 %v3443_v4, %v14334_v40  ;;  %v3698_v20 = vpop.f32.mrf.mxu1  ;;  %v4303_v4 = vpack.c.bf16 %v12198_v48, %v12197_v36  ;;  %v16589_v48 = vld [vmem:[#allocation61_spill] sm:$0xff] }
 0x417   :  { %v10967_v55 = vpop.f32.mrf.mxu0 }
 0x418   :  { %v14492_v15 = vadd.f32 %v3698_v20, %v3495_v57  ;;  %v11023_v25 = vpop.f32.mrf.mxu1  ;;  %v12199_v20 = vld [vmem:[#allocation2 + $0xb7] sm:$0xff]  ;;  %v12200_v55 = vld [vmem:[#allocation2 + $0xbf] sm:$0xff] }
 0x419   :  { %v3448_v24 = vpop.f32.mrf.mxu0  ;;  %11185 = vmatmul.mubr.msk.bf16.gmra.mxu0 %vm1439_vm6, %v4300_v22  ;;  %v4558_v1 = vpack.c.bf16 %v12200_v55, %v12199_v20  ;;  %v12043_v20 = vld [vmem:[%s16241_s2 + $0xe0] sm:$0xff]  }
 0x41a   :  { %v3496_v62 = vadd.f32 %v3448_v24, %v14349_v33  ;;  %v3703_v43 = vpop.f32.mrf.mxu1  ;;  %11241 = vmatmul.mubr.msk.bf16.gmra.mxu1 %vm1439_vm6, %v4555_v5  ;;  %11188 = vmatprep.mubr.msk.bf16.mxu0 %vm12204_vm2, %v16383_v58  ;;  %v14526_v24 = vld [vmem:[#allocation2 + $0xcf] sm:$0xff] }
 0x41b   :  { %v10970_v40 = vpop.f32.mrf.mxu0  ;;  %11244 = vmatprep.mubr.msk.bf16.mxu1 %vm12204_vm2, %v16383_v58 }
 0x41c   :  { %v14501_v8 = vadd.f32 %v3703_v43, %v3496_v62  ;;  %v11026_v9 = vpop.f32.mrf.mxu1  ;;  %v12201_v40 = vld [vmem:[#allocation2 + $0xc6] sm:$0xff] }
 0x41d   :  { %v3451_v31 = vpop.f32.mrf.mxu0  ;;  %v4304_v9 = vpack.c.bf16 %v14524_v53, %v12201_v40 }
 0x41e   :  { %v3706_v50 = vpop.f32.mrf.mxu1 }
 0x41f   :  { %v10971_v13 = vpop.f32.mrf.mxu0  ;;  %v12202_v50 = vld [vmem:[#allocation2 + $0xc7] sm:$0xff] }
 0x420   :  { %v11027_v33 = vpop.f32.mrf.mxu1  ;;  %v4559_v13 = vpack.c.bf16 %v14526_v24, %v12202_v50 }
 0x421   :  { %v3456_v60 = vpop.f32.mrf.mxu0  ;;  %11189 = vmatmul.mubr.msk.bf16.gmra.mxu0 %vm1439_vm6, %v4301_v35  ;;  %v14535_v33 = vld [vmem:[#allocation2 + $0xd6] sm:$0xff] }
 0x422   :  { %v3498_v16 = vadd.f32 %v3456_v60, %v14364_v10  ;;  %v3711_v17 = vpop.f32.mrf.mxu1  ;;  %11245 = vmatmul.mubr.msk.bf16.gmra.mxu1 %vm1439_vm6, %v4556_v19  ;;  %11192 = vmatprep.mubr.msk.bf16.mxu0 %vm12204_vm2, %v16383_v58 }
 0x423   :  { %v10974_v0 = vpop.f32.mrf.mxu0  ;;  %11248 = vmatprep.mubr.msk.bf16.mxu1 %vm12204_vm2, %v16383_v58 }
 0x424   :  { %v14510_v29 = vadd.f32 %v3711_v17, %v3498_v16  ;;  %v11030_v14 = vpop.f32.mrf.mxu1  ;;  %v4560_v0 = vpack.c.bf16 %v14539_v52, %v14539_v52 }
 0x425   :  { %v3459_v61 = vpop.f32.mrf.mxu0 }
 0x426   :  { %v3714_v39 = vpop.f32.mrf.mxu1 }
 0x427   :  { %v10975_v7 = vpop.f32.mrf.mxu0 }
 0x428   :  { %v11031_v10 = vpop.f32.mrf.mxu1 }
 0x429   :  { %v3464_v3 = vpop.f32.mrf.mxu0  ;;  %11193 = vmatmul.mubr.msk.bf16.gmra.mxu0 %vm1439_vm6, %v4302_v11 }
 0x42a   :  { %v3719_v18 = vpop.f32.mrf.mxu1  ;;  %11249 = vmatmul.mubr.msk.bf16.gmra.mxu1 %vm1439_vm6, %v4557_v27  ;;  %11196 = vmatprep.mubr.msk.bf16.mxu0 %vm12204_vm2, %v16383_v58 }
 0x42b   :  { %v10978_v12 = vpop.f32.mrf.mxu0  ;;  %11252 = vmatprep.mubr.msk.bf16.mxu1 %vm12204_vm2, %v16383_v58  ;;  %v12042_v18 = vld [vmem:[%s16241_s2 + $0xf8] sm:$0xff]  }
 0x42c   :  { %v11034_v59 = vpop.f32.mrf.mxu1 }
 0x42d   :  { %v3467_v45 = vpop.f32.mrf.mxu0 }
 0x42e   :  { %v3722_v2 = vpop.f32.mrf.mxu1 }
 0x42f   :  { %v10979_v46 = vpop.f32.mrf.mxu0  ;;  %v16586_v2 = vld [vmem:[#allocation59_spill] sm:$0xff] }
 0x430   :  { %v11035_v57 = vpop.f32.mrf.mxu1  ;;  %v16587_v46 = vld [vmem:[#allocation57_spill] sm:$0xff] }
 0x431   :  { %v3472_v54 = vpop.f32.mrf.mxu0  ;;  %11197 = vmatmul.mubr.msk.bf16.gmra.mxu0 %vm1439_vm6, %v4303_v4  ;;  %v16588_v36 = vpack.c.bf16 %v16586_v2, %v16587_v46  ;;  %v16590_v4 = vld [vmem:[#allocation58_spill] sm:$0xff]  ;;  %v16604_v46 = vld [vmem:[#allocation68_spill] sm:$0xff] }
 0x432   :  { %v3727_v22 = vpop.f32.mrf.mxu1  ;;  %11253 = vmatmul.mubr.msk.bf16.gmra.mxu1 %vm1439_vm6, %v4558_v1  ;;  %11200 = vmatprep.mubr.msk.bf16.mxu0 %vm12204_vm2, %v16383_v58  ;;  %v16591_v57 = vpack.c.bf16 %v16589_v48, %v16590_v4  ;;  %v12044_v1 = vld [vmem:[%s16241_s2 + $0xf0] sm:$0xff]   ;;  %v16606_v48 = vld [vmem:[#allocation72_spill] sm:$0xff] }
 0x433   :  { %v10982_v25 = vpop.f32.mrf.mxu0  ;;  %11256 = vmatprep.mubr.msk.bf16.mxu1 %vm12204_vm2, %v16383_v58  ;;  %v16607_v4 = vld [vmem:[#allocation70_spill] sm:$0xff] }
 0x434   :  { %v11038_v51 = vpop.f32.mrf.mxu1 }
 0x435   :  { %v3475_v5 = vpop.f32.mrf.mxu0 }
 0x436   :  { %v3730_v62 = vpop.f32.mrf.mxu1 }
 0x437   :  { %v10983_v43 = vpop.f32.mrf.mxu0 }
 0x438   :  { %v11039_v31 = vpop.f32.mrf.mxu1 }
 0x439   :  { %v3886_v42 = vpop.f32.mrf.mxu0  ;;  %11201 = vmatmul.mubr.msk.bf16.gmra.mxu0 %vm1439_vm6, %v4304_v9  ;;  %v16592_v9 = vld [vmem:[#allocation63_spill] sm:$0xff]  ;;  %v16593_v31 = vld [vmem:[#allocation60_spill] sm:$0xff] }
 0x43a   :  { %v3988_v6 = vadd.f32 %v3886_v42, %v14401_v32  ;;  %v4141_v35 = vpop.f32.mrf.mxu1  ;;  %11257 = vmatmul.mubr.msk.bf16.gmra.mxu1 %vm1439_vm6, %v4559_v13  ;;  %11204 = vmatprep.mubr.msk.bf16.mxu0 %vm12204_vm2, %v16383_v58  ;;  %v4305_v32 = vpack.c.bf16 %v14535_v33, %v14535_v33  ;;  %v16594_v50 = vpack.c.bf16 %v16592_v9, %v16593_v31  ;;  %v16595_v42 = vld [vmem:[#allocation65_spill] sm:$0xff]  ;;  %v16612_v31 = vld [vmem:[#allocation76_spill] sm:$0xff] }
 0x43b   :  { %v11046_v44 = vpop.f32.mrf.mxu0  ;;  %11260 = vmatprep.mubr.msk.bf16.mxu1 %vm12204_vm2, %v16383_v58 }
 0x43c   :  { %v14541_v19 = vadd.f32 %v4141_v35, %v3988_v6  ;;  %v11102_v60 = vpop.f32.mrf.mxu1 }
 0x43d   :  { %v3889_v16 = vpop.f32.mrf.mxu0 }
 0x43e   :  { %v4144_v17 = vpop.f32.mrf.mxu1 }
 0x43f   :  { %v11047_v14 = vpop.f32.mrf.mxu0 }
 0x440   :  { %v11103_v61 = vpop.f32.mrf.mxu1 }
 0x441   :  { %v3894_v39 = vpop.f32.mrf.mxu0  ;;  %11205 = vmatmul.mubr.msk.bf16.gmra.mxu0 %vm1439_vm6, %v4305_v32 }
 0x442   :  { %v3990_v7 = vadd.f32 %v3894_v39, %v14410_v56  ;;  %v4149_v37 = vpop.f32.mrf.mxu1  ;;  %11261 = vmatmul.mubr.msk.bf16.gmra.mxu1 %vm1439_vm6, %v4560_v0  ;;  %11268 = vmatprep.mubr.msk.bf16.mxu0 %vm12204_vm2, %v16383_v58  ;;  %v12041_v56 = vld [vmem:[%s16241_s2 + $0xe8] sm:$0xff]   ;;  %v16598_v39 = vld [vmem:[#allocation67_spill] sm:$0xff] }
 0x443   :  { %v11050_v28 = vpop.f32.mrf.mxu0  ;;  %11324 = vmatprep.mubr.msk.bf16.mxu1 %vm12204_vm2, %v16383_v58 }
 0x444   :  { %v14554_v11 = vadd.f32 %v4149_v37, %v3990_v7  ;;  %v11106_v10 = vpop.f32.mrf.mxu1  ;;  %v16599_v7 = vld [vmem:[#allocation64_spill] sm:$0xff] }
 0x445   :  { %v3897_v47 = vpop.f32.mrf.mxu0  ;;  %v16600_v37 = vpack.c.bf16 %v16598_v39, %v16599_v7 }
 0x446   :  { %v3991_v41 = vadd.f32 %v3897_v47, %v14419_v21  ;;  %v4152_v27 = vpop.f32.mrf.mxu1  ;;  %v16601_v47 = vld [vmem:[#allocation69_spill] sm:$0xff] }
 0x447   :  { %v11051_v3 = vpop.f32.mrf.mxu0 }
 0x448   :  { %v14563_v12 = vadd.f32 %v4152_v27, %v3991_v41  ;;  %v11107_v59 = vpop.f32.mrf.mxu1  ;;  %v16602_v41 = vld [vmem:[#allocation66_spill] sm:$0xff] }
 0x449   :  { %v3902_v45 = vpop.f32.mrf.mxu0  ;;  %11269 = vmatmul.mubr.msk.bf16.vlgmr.msra.gmra.mxu0 %vm1439_vm6, %v16588_v36  ;;  %v16603_v27 = vpack.c.bf16 %v16601_v47, %v16602_v41  ;;  %v16605_v36 = vpack.c.bf16 %v13596_v34, %v16604_v46 }
 0x44a   :  { %v4157_v21 = vpop.f32.mrf.mxu1  ;;  %11325 = vmatmul.mubr.msk.bf16.vlgmr.msra.gmra.mxu1 %vm1439_vm6, %v16591_v57  ;;  %11377 = vmatpush3.bf16.msra.mxu0 %v12041_v56  ;;  %v16608_v57 = vpack.c.bf16 %v16606_v48, %v16607_v4  ;;  %v16625_v48 = vld [vmem:[#allocation81_spill] sm:$0xff] }
 0x44b   :  { %v11054_v55 = vpop.f32.mrf.mxu0  ;;  %11433 = vmatpush3.bf16.msra.mxu1 %v12042_v18  ;;  %11272 = vmatprep.mubr.msk.bf16.mxu0 %vm12204_vm2, %v16383_v58 }
 0x44c   :  { %v11110_v54 = vpop.f32.mrf.mxu1  ;;  %11328 = vmatprep.mubr.msk.bf16.mxu1 %vm12204_vm2, %v16383_v58  ;;  %11378 = vmatprep.subr.bf16.mxu0 %v16383_v58 }
 0x44d   :  { %v3905_v22 = vpop.f32.mrf.mxu0  ;;  %11434 = vmatprep.subr.bf16.mxu1 %v16383_v58 }
 0x44e   :  { %v3993_v25 = vadd.f32 %v3905_v22, %v14437_v26  ;;  %v4160_v51 = vpop.f32.mrf.mxu1  ;;  %11379 = vmatpush3.bf16.msra.mxu0 %v12043_v20  ;;  %v16596_v26 = vld [vmem:[#allocation62_spill] sm:$0xff] }
 0x44f   :  { %v11055_v5 = vpop.f32.mrf.mxu0  ;;  %11435 = vmatpush3.bf16.msra.mxu1 %v12044_v1  ;;  %11488 = vmatprep.subr.bf16.mxu0 %v16383_v58  ;;  %v16597_v6 = vpack.c.bf16 %v16595_v42, %v16596_v26 }
 0x450   :  { %v14587_v62 = vadd.f32 %v4160_v51, %v3993_v25  ;;  %v11111_v43 = vpop.f32.mrf.mxu1  ;;  %11512 = vmatprep.subr.bf16.mxu1 %v16383_v58  ;;  %v16609_v51 = vld [vmem:[#allocation74_spill] sm:$0xff]  ;;  %v16610_v5 = vld [vmem:[#allocation71_spill] sm:$0xff] }
 0x451   :  { %v3910_v40 = vpop.f32.mrf.mxu0  ;;  %11273 = vmatmul.mubr.msk.bf16.gmra.mxu0 %vm1439_vm6, %v16594_v50  ;;  %v16611_v43 = vpack.c.bf16 %v16609_v51, %v16610_v5  ;;  %v16613_v50 = vld [vmem:[#allocation73_spill] sm:$0xff]  ;;  %v16627_v51 = vld [vmem:[#allocation86_spill] sm:$0xff]  ;;  %v16628_v5 = vld [vmem:[#allocation83_spill] sm:$0xff] }
 0x452   :  { %v4165_v13 = vpop.f32.mrf.mxu1  ;;  %11329 = vmatmul.mubr.msk.bf16.gmra.mxu1 %vm1439_vm6, %v16597_v6  ;;  %11276 = vmatprep.mubr.msk.bf16.mxu0 %vm12204_vm2, %v16383_v58 }
 0x453   :  { %v11058_v35 = vpop.f32.mrf.mxu0  ;;  %11332 = vmatprep.mubr.msk.bf16.mxu1 %vm12204_vm2, %v16383_v58  ;;  %v16614_v13 = vpack.c.bf16 %v16612_v31, %v16613_v50  ;;  %v16630_v31 = vld [vmem:[#allocation88_spill] sm:$0xff]  ;;  %v16631_v50 = vld [vmem:[#allocation85_spill] sm:$0xff] }
 0x454   :  { %v11114_v44 = vpop.f32.mrf.mxu1 }
 0x455   :  { %v3913_v60 = vpop.f32.mrf.mxu0 }
 0x456   :  { %v3995_v16 = vadd.f32 %v3913_v60, %v14447_v30  ;;  %v4168_v32 = vpop.f32.mrf.mxu1 }
 0x457   :  { %v11059_v17 = vpop.f32.mrf.mxu0 }
 0x458   :  { %v14603_v0 = vadd.f32 %v4168_v32, %v3995_v16  ;;  %v11115_v14 = vpop.f32.mrf.mxu1 }
 0x459   :  { %v3918_v61 = vpop.f32.mrf.mxu0  ;;  %11277 = vmatmul.mubr.msk.bf16.gmra.mxu0 %vm1439_vm6, %v16600_v37  ;;  %v16615_v14 = vld [vmem:[#allocation78_spill] sm:$0xff]  ;;  %v16618_v37 = vld [vmem:[#allocation80_spill] sm:$0xff] }
 0x45a   :  { %v3996_v28 = vadd.f32 %v3918_v61, %v14456_v23  ;;  %v4173_v10 = vpop.f32.mrf.mxu1  ;;  %11333 = vmatmul.mubr.msk.bf16.gmra.mxu1 %vm1439_vm6, %v16603_v27  ;;  %11280 = vmatprep.mubr.msk.bf16.mxu0 %vm12204_vm2, %v16383_v58  ;;  %v16616_v61 = vld [vmem:[#allocation75_spill] sm:$0xff] }
 0x45b   :  { %v11062_v30 = vpop.f32.mrf.mxu0  ;;  %11336 = vmatprep.mubr.msk.bf16.mxu1 %vm12204_vm2, %v16383_v58  ;;  %v16617_v39 = vpack.c.bf16 %v16615_v14, %v16616_v61 }
 0x45c   :  { %v14618_v56 = vadd.f32 %v4173_v10, %v3996_v28  ;;  %v11118_v3 = vpop.f32.mrf.mxu1  ;;  %v16619_v28 = vld [vmem:[#allocation77_spill] sm:$0xff] }
 0x45d   :  { %v3921_v18 = vpop.f32.mrf.mxu0  ;;  %v16620_v10 = vpack.c.bf16 %v16618_v37, %v16619_v28  ;;  %v16637_v37 = vld [vmem:[#allocation89_spill] sm:$0xff] }
 0x45e   :  { %v4176_v59 = vpop.f32.mrf.mxu1 }
 0x45f   :  { %v11063_v45 = vpop.f32.mrf.mxu0 }
 0x460   :  { %v11119_v23 = vpop.f32.mrf.mxu1 }
 0x461   :  { %v3926_v2 = vpop.f32.mrf.mxu0  ;;  %11281 = vmatmul.mubr.msk.bf16.gmra.mxu0 %vm1439_vm6, %v16605_v36  ;;  %v16621_v23 = vld [vmem:[#allocation82_spill] sm:$0xff] }
 0x462   :  { %v4181_v21 = vpop.f32.mrf.mxu1  ;;  %11337 = vmatmul.mubr.msk.bf16.gmra.mxu1 %vm1439_vm6, %v16608_v57  ;;  %11284 = vmatprep.mubr.msk.bf16.mxu0 %vm12204_vm2, %v16383_v58  ;;  %v16622_v2 = vld [vmem:[#allocation79_spill] sm:$0xff] }
 0x463   :  { %v11066_v20 = vpop.f32.mrf.mxu0  ;;  %11340 = vmatprep.mubr.msk.bf16.mxu1 %vm12204_vm2, %v16383_v58  ;;  %v16623_v46 = vpack.c.bf16 %v16621_v23, %v16622_v2  ;;  %v16624_v21 = vld [vmem:[#allocation84_spill] sm:$0xff] }
 0x464   :  { %v11122_v55 = vpop.f32.mrf.mxu1  ;;  %v16626_v4 = vpack.c.bf16 %v16624_v21, %v16625_v48 }
 0x465   :  { %v3929_v1 = vpop.f32.mrf.mxu0 }
 0x466   :  { %v4184_v54 = vpop.f32.mrf.mxu1 }
 0x467   :  { %v11067_v22 = vpop.f32.mrf.mxu0 }
 0x468   :  { %v11123_v34 = vpop.f32.mrf.mxu1 }
 0x469   :  { %v3934_v25 = vpop.f32.mrf.mxu0  ;;  %11285 = vmatmul.mubr.msk.bf16.gmra.mxu0 %vm1439_vm6, %v16611_v43  ;;  %v16629_v43 = vpack.c.bf16 %v16627_v51, %v16628_v5  ;;  %v16648_v5 = vld [vmem:[#allocation99_spill] sm:$0xff] }
 0x46a   :  { %v4000_v40 = vadd.f32 %v3934_v25, %v14471_v63  ;;  %v4189_v9 = vpop.f32.mrf.mxu1  ;;  %11341 = vmatmul.mubr.msk.bf16.gmra.mxu1 %vm1439_vm6, %v16614_v13  ;;  %11288 = vmatprep.mubr.msk.bf16.mxu0 %vm12204_vm2, %v16383_v58  ;;  %v16632_v13 = vpack.c.bf16 %v16630_v31, %v16631_v50 }
 0x46b   :  { %v11070_v42 = vpop.f32.mrf.mxu0  ;;  %11344 = vmatprep.mubr.msk.bf16.mxu1 %vm12204_vm2, %v16383_v58 }
 0x46c   :  { %v14645_v26 = vadd.f32 %v4189_v9, %v4000_v40  ;;  %v11126_v6 = vpop.f32.mrf.mxu1 }
 0x46d   :  { %v3937_v35 = vpop.f32.mrf.mxu0 }
 0x46e   :  { %v4001_v44 = vadd.f32 %v3937_v35, %v14474_v49  ;;  %v4192_v63 = vpop.f32.mrf.mxu1 }
 0x46f   :  { %v11071_v60 = vpop.f32.mrf.mxu0 }
 0x470   :  { %v14648_v16 = vadd.f32 %v4192_v63, %v4001_v44  ;;  %v11127_v32 = vpop.f32.mrf.mxu1 }
 0x471   :  { %v3942_v17 = vpop.f32.mrf.mxu0  ;;  %11289 = vmatmul.mubr.msk.bf16.gmra.mxu0 %vm1439_vm6, %v16617_v39  ;;  %v16633_v32 = vld [vmem:[#allocation90_spill] sm:$0xff] }
 0x472   :  { %v4197_v7 = vpop.f32.mrf.mxu1  ;;  %11345 = vmatmul.mubr.msk.bf16.gmra.mxu1 %vm1439_vm6, %v16620_v10  ;;  %11292 = vmatprep.mubr.msk.bf16.mxu0 %vm12204_vm2, %v16383_v58  ;;  %v16634_v17 = vld [vmem:[#allocation87_spill] sm:$0xff] }
 0x473   :  { %v11074_v49 = vpop.f32.mrf.mxu0  ;;  %11348 = vmatprep.mubr.msk.bf16.mxu1 %vm12204_vm2, %v16383_v58  ;;  %v16635_v14 = vpack.c.bf16 %v16633_v32, %v16634_v17  ;;  %v16636_v7 = vld [vmem:[#allocation92_spill] sm:$0xff] }
 0x474   :  { %v11130_v47 = vpop.f32.mrf.mxu1  ;;  %v16638_v28 = vpack.c.bf16 %v16636_v7, %v16637_v37  ;;  %v4802_v32 = vld [vmem:[#allocation2 + $0xde] sm:$0xff] }
 0x475   :  { %v3945_v41 = vpop.f32.mrf.mxu0 }
 0x476   :  { %v4003_v27 = vadd.f32 %v3945_v41, %v14483_v38  ;;  %v4200_v30 = vpop.f32.mrf.mxu1 }
 0x477   :  { %v11075_v3 = vpop.f32.mrf.mxu0 }
 0x478   :  { %v14663_v18 = vadd.f32 %v4200_v30, %v4003_v27  ;;  %v11131_v59 = vpop.f32.mrf.mxu1 }
 0x479   :  { %v3950_v45 = vpop.f32.mrf.mxu0  ;;  %11293 = vmatmul.mubr.msk.bf16.gmra.mxu0 %vm1439_vm6, %v16623_v46  ;;  %v16639_v59 = vld [vmem:[#allocation94_spill] sm:$0xff]  ;;  %v16642_v46 = vld [vmem:[#allocation96_spill] sm:$0xff] }
 0x47a   :  { %v4205_v36 = vpop.f32.mrf.mxu1  ;;  %11349 = vmatmul.mubr.msk.bf16.gmra.mxu1 %vm1439_vm6, %v16626_v4  ;;  %11296 = vmatprep.mubr.msk.bf16.mxu0 %vm12204_vm2, %v16383_v58  ;;  %v16640_v45 = vld [vmem:[#allocation91_spill] sm:$0xff] }
 0x47b   :  { %v11078_v38 = vpop.f32.mrf.mxu0  ;;  %11352 = vmatprep.mubr.msk.bf16.mxu1 %vm12204_vm2, %v16383_v58  ;;  %v16641_v23 = vpack.c.bf16 %v16639_v59, %v16640_v45  ;;  %v16643_v36 = vld [vmem:[#allocation93_spill] sm:$0xff] }
 0x47c   :  { %v11134_v57 = vpop.f32.mrf.mxu1  ;;  %v16644_v21 = vpack.c.bf16 %v16642_v46, %v16643_v36  ;;  %v5543_v59 = vld [vmem:[#allocation2 + $0x21] sm:$0xff]  ;;  %v5544_v45 = vld [vmem:[#allocation2 + $0x29] sm:$0xff] }
 0x47d   :  { %v3953_v20 = vpop.f32.mrf.mxu0 }
 0x47e   :  { %v4005_v55 = vadd.f32 %v3953_v20, %v14492_v15  ;;  %v4208_v1 = vpop.f32.mrf.mxu1 }
 0x47f   :  { %v11079_v54 = vpop.f32.mrf.mxu0 }
 0x480   :  { %v14678_v22 = vadd.f32 %v4208_v1, %v4005_v55  ;;  %v11135_v34 = vpop.f32.mrf.mxu1  ;;  %v16645_v54 = vld [vmem:[#allocation98_spill] sm:$0xff] }
 0x481   :  { %v3958_v25 = vpop.f32.mrf.mxu0  ;;  %11297 = vmatmul.mubr.msk.bf16.gmra.mxu0 %vm1439_vm6, %v16629_v43  ;;  %v16646_v34 = vld [vmem:[#allocation95_spill] sm:$0xff]  ;;  %v16649_v43 = vld [vmem:[#allocation97_spill] sm:$0xff] }
 0x482   :  { %v4006_v40 = vadd.f32 %v3958_v25, %v14501_v8  ;;  %v4213_v9 = vpop.f32.mrf.mxu1  ;;  %11353 = vmatmul.mubr.msk.bf16.gmra.mxu1 %vm1439_vm6, %v16632_v13  ;;  %11300 = vmatprep.mubr.msk.bf16.mxu0 %vm12204_vm2, %v16383_v58  ;;  %v16647_v25 = vpack.c.bf16 %v16645_v54, %v16646_v34  ;;  %v4814_v13 = vpack.c.bf16 %v14535_v33, %v14524_v53  ;;  %v5057_v53 = vld [vmem:[#allocation2 + $0xdf] sm:$0xff]  ;;  %v5545_v54 = vld [vmem:[#allocation2 + $0x31] sm:$0xff] }
 0x483   :  { %v11082_v15 = vpop.f32.mrf.mxu0  ;;  %11356 = vmatprep.mubr.msk.bf16.mxu1 %vm12204_vm2, %v16383_v58  ;;  %v5546_v34 = vld [vmem:[#allocation2 + $0x39] sm:$0xff] }
 0x484   :  { %v14693_v42 = vadd.f32 %v4213_v9, %v4006_v40  ;;  %v11138_v6 = vpop.f32.mrf.mxu1  ;;  %v16650_v40 = vpack.c.bf16 %v16648_v5, %v16649_v43 }
 0x485   :  { %v3961_v35 = vpop.f32.mrf.mxu0  ;;  %v5069_v6 = vpack.c.bf16 %v14539_v52, %v14526_v24 }
 0x486   :  { %v4216_v44 = vpop.f32.mrf.mxu1 }
 0x487   :  { %v11083_v63 = vpop.f32.mrf.mxu0 }
 0x488   :  { %v11139_v8 = vpop.f32.mrf.mxu1 }
 0x489   :  { %v3966_v60 = vpop.f32.mrf.mxu0  ;;  %11301 = vmatmul.mubr.msk.bf16.gmra.mxu0 %vm1439_vm6, %v16635_v14  ;;  %v4815_v14 = vpack.c.bf16 %v4802_v32, %v4802_v32 }
 0x48a   :  { %v4008_v61 = vadd.f32 %v3966_v60, %v14510_v29  ;;  %v4221_v39 = vpop.f32.mrf.mxu1  ;;  %11357 = vmatmul.mubr.msk.bf16.gmra.mxu1 %vm1439_vm6, %v16638_v28  ;;  %11304 = vmatprep.mubr.msk.bf16.mxu0 %vm12204_vm2, %v16383_v58 }
 0x48b   :  { %v11086_v10 = vpop.f32.mrf.mxu0  ;;  %11360 = vmatprep.mubr.msk.bf16.mxu1 %vm12204_vm2, %v16383_v58 }
 0x48c   :  { %v14708_v49 = vadd.f32 %v4221_v39, %v4008_v61  ;;  %v11142_v47 = vpop.f32.mrf.mxu1  ;;  %v5070_v39 = vpack.c.bf16 %v5057_v53, %v5057_v53 }
 0x48d   :  { %v3969_v41 = vpop.f32.mrf.mxu0 }
 0x48e   :  { %v4224_v27 = vpop.f32.mrf.mxu1 }
 0x48f   :  { %v11087_v30 = vpop.f32.mrf.mxu0 }
 0x490   :  { %v11143_v29 = vpop.f32.mrf.mxu1  ;;  %v5288_v30 = vld [vmem:[#allocation2 + $0x20] sm:$0xff] }
 0x491   :  { %v3974_v3 = vpop.f32.mrf.mxu0  ;;  %11305 = vmatmul.mubr.msk.bf16.gmra.mxu0 %vm1439_vm6, %v16641_v23  ;;  %v5289_v29 = vld [vmem:[#allocation2 + $0x28] sm:$0xff] }
 0x492   :  { %v4229_v2 = vpop.f32.mrf.mxu1  ;;  %11361 = vmatmul.mubr.msk.bf16.gmra.mxu1 %vm1439_vm6, %v16644_v21  ;;  %11308 = vmatprep.mubr.msk.bf16.mxu0 %vm12204_vm2, %v16383_v58  ;;  %v5313_v46 = vpack.c.bf16 %v5289_v29, %v5288_v30  ;;  %v5550_v30 = vld [vmem:[#allocation2 + $0x59] sm:$0xff] }
 0x493   :  { %v11090_v48 = vpop.f32.mrf.mxu0  ;;  %11364 = vmatprep.mubr.msk.bf16.mxu1 %vm12204_vm2, %v16383_v58 }
 0x494   :  { %v11146_v4 = vpop.f32.mrf.mxu1  ;;  %v5568_v48 = vpack.c.bf16 %v5544_v45, %v5543_v59 }
 0x495   :  { %v3977_v38 = vpop.f32.mrf.mxu0 }
 0x496   :  { %v4232_v57 = vpop.f32.mrf.mxu1 }
 0x497   :  { %v11091_v20 = vpop.f32.mrf.mxu0 }
 0x498   :  { %v11147_v55 = vpop.f32.mrf.mxu1  ;;  %v5290_v20 = vld [vmem:[#allocation2 + $0x30] sm:$0xff] }
 0x499   :  { %v3982_v1 = vpop.f32.mrf.mxu0  ;;  %11309 = vmatmul.mubr.msk.bf16.gmra.mxu0 %vm1439_vm6, %v16647_v25  ;;  %v5291_v55 = vld [vmem:[#allocation2 + $0x38] sm:$0xff] }
 0x49a   :  { %v4237_v51 = vpop.f32.mrf.mxu1  ;;  %11365 = vmatmul.mubr.msk.bf16.gmra.mxu1 %vm1439_vm6, %v16650_v40  ;;  %11312 = vmatprep.mubr.msk.bf16.mxu0 %vm12204_vm2, %v16383_v58  ;;  %v5314_v43 = vpack.c.bf16 %v5291_v55, %v5290_v20 }
 0x49b   :  { %v11094_v9 = vpop.f32.mrf.mxu0  ;;  %11368 = vmatprep.mubr.msk.bf16.mxu1 %vm12204_vm2, %v16383_v58 }
 0x49c   :  { %v11150_v31 = vpop.f32.mrf.mxu1 }
 0x49d   :  { %v3985_v50 = vpop.f32.mrf.mxu0  ;;  %v5569_v31 = vpack.c.bf16 %v5546_v34, %v5545_v54 }
 0x49e   :  { %v4240_v15 = vpop.f32.mrf.mxu1 }
 0x49f   :  { %v11095_v35 = vpop.f32.mrf.mxu0 }
 0x4a0   :  { %v11151_v44 = vpop.f32.mrf.mxu1  ;;  %v5293_v35 = vld [vmem:[#allocation2 + $0x48] sm:$0xff] }
 0x4a1   :  { %v4396_v63 = vpop.f32.mrf.mxu0  ;;  %11313 = vmatmul.mubr.msk.bf16.gmra.mxu0 %vm1439_vm6, %v4814_v13 }
 0x4a2   :  { %v4498_v8 = vadd.f32 %v4396_v63, %v14541_v19  ;;  %v4651_v60 = vpop.f32.mrf.mxu1  ;;  %11369 = vmatmul.mubr.msk.bf16.gmra.mxu1 %vm1439_vm6, %v5069_v6  ;;  %11316 = vmatprep.mubr.msk.bf16.mxu0 %vm12204_vm2, %v16383_v58  ;;  %v5292_v6 = vld [vmem:[#allocation2 + $0x40] sm:$0xff] }
 0x4a3   :  { %v11158_v17 = vpop.f32.mrf.mxu0  ;;  %11372 = vmatprep.mubr.msk.bf16.mxu1 %vm12204_vm2, %v16383_v58  ;;  %v5547_v63 = vld [vmem:[#allocation2 + $0x41] sm:$0xff]  ;;  %v5315_v53 = vpack.c.bf16 %v5293_v35, %v5292_v6 }
 0x4a4   :  { %v14745_v24 = vadd.f32 %v4651_v60, %v4498_v8  ;;  %v11214_v33 = vpop.f32.mrf.mxu1  ;;  %v5548_v8 = vld [vmem:[#allocation2 + $0x49] sm:$0xff] }
 0x4a5   :  { %v4399_v52 = vpop.f32.mrf.mxu0 }
 0x4a6   :  { %v4654_v61 = vpop.f32.mrf.mxu1 }
 0x4a7   :  { %v11159_v19 = vpop.f32.mrf.mxu0 }
 0x4a8   :  { %v11215_v7 = vpop.f32.mrf.mxu1 }
 0x4a9   :  { %v4404_v37 = vpop.f32.mrf.mxu0  ;;  %11317 = vmatmul.mubr.msk.bf16.gmra.mxu0 %vm1439_vm6, %v4815_v14  ;;  %v5570_v14 = vpack.c.bf16 %v5548_v8, %v5547_v63 }
 0x4aa   :  { %v4500_v28 = vadd.f32 %v4404_v37, %v14554_v11  ;;  %v4659_v10 = vpop.f32.mrf.mxu1  ;;  %11373 = vmatmul.mubr.msk.bf16.gmra.mxu1 %vm1439_vm6, %v5070_v39  ;;  %11380 = vmatprep.mubr.msk.bf16.mxu0 %vm12204_vm2, %v16383_v58 }
 0x4ab   :  { %v11162_v47 = vpop.f32.mrf.mxu0  ;;  %11436 = vmatprep.mubr.msk.bf16.mxu1 %vm12204_vm2, %v16383_v58 }
 0x4ac   :  { %v14754_v41 = vadd.f32 %v4659_v10, %v4500_v28  ;;  %v11218_v27 = vpop.f32.mrf.mxu1  ;;  %v5294_v28 = vld [vmem:[#allocation2 + $0x50] sm:$0xff]  ;;  %v5295_v10 = vld [vmem:[#allocation2 + $0x58] sm:$0xff] }
 0x4ad   :  { %v4407_v3 = vpop.f32.mrf.mxu0  ;;  %v5549_v27 = vld [vmem:[#allocation2 + $0x51] sm:$0xff] }
 0x4ae   :  { %v4501_v11 = vadd.f32 %v4407_v3, %v14563_v12  ;;  %v4662_v23 = vpop.f32.mrf.mxu1  ;;  %v5316_v3 = vpack.c.bf16 %v5295_v10, %v5294_v28  ;;  %v5571_v45 = vpack.c.bf16 %v5550_v30, %v5549_v27 }
 0x4af   :  { %v11163_v2 = vpop.f32.mrf.mxu0 }
 0x4b0   :  { %v14757_v36 = vadd.f32 %v4662_v23, %v4501_v11  ;;  %v11219_v21 = vpop.f32.mrf.mxu1 }
 0x4b1   :  { %v4412_v4 = vpop.f32.mrf.mxu0  ;;  %11381 = vmatmul.mubr.msk.bf16.vlgmr.msra.gmra.mxu0 %vm1439_vm6, %v5313_v46  ;;  %v5296_v21 = vld [vmem:[#allocation2 + $0x60] sm:$0xff] }
 0x4b2   :  { %v4667_v38 = vpop.f32.mrf.mxu1  ;;  %11437 = vmatmul.mubr.msk.bf16.vlgmr.msra.gmra.mxu1 %vm1439_vm6, %v5568_v48  ;;  %11384 = vmatprep.mubr.msk.bf16.mxu0 %vm12204_vm2, %v16383_v58  ;;  %v5297_v48 = vld [vmem:[#allocation2 + $0x68] sm:$0xff] }
 0x4b3   :  { %v11166_v57 = vpop.f32.mrf.mxu0  ;;  %11440 = vmatprep.mubr.msk.bf16.mxu1 %vm12204_vm2, %v16383_v58  ;;  %v5551_v38 = vld [vmem:[#allocation2 + $0x61] sm:$0xff]  ;;  %v5317_v55 = vpack.c.bf16 %v5297_v48, %v5296_v21 }
 0x4b4   :  { %v11222_v12 = vpop.f32.mrf.mxu1  ;;  %v5552_v57 = vld [vmem:[#allocation2 + $0x69] sm:$0xff] }
 0x4b5   :  { %v4415_v1 = vpop.f32.mrf.mxu0  ;;  %v5572_v54 = vpack.c.bf16 %v5552_v57, %v5551_v38 }
 0x4b6   :  { %v4503_v25 = vadd.f32 %v4415_v1, %v14587_v62  ;;  %v4670_v51 = vpop.f32.mrf.mxu1 }
 0x4b7   :  { %v11167_v5 = vpop.f32.mrf.mxu0 }
 0x4b8   :  { %v14766_v40 = vadd.f32 %v4670_v51, %v4503_v25  ;;  %v11223_v9 = vpop.f32.mrf.mxu1 }
 0x4b9   :  { %v4420_v50 = vpop.f32.mrf.mxu0  ;;  %11385 = vmatmul.mubr.msk.bf16.gmra.mxu0 %vm1439_vm6, %v5314_v43 }
 0x4ba   :  { %v4675_v13 = vpop.f32.mrf.mxu1  ;;  %11441 = vmatmul.mubr.msk.bf16.gmra.mxu1 %vm1439_vm6, %v5569_v31  ;;  %11388 = vmatprep.mubr.msk.bf16.mxu0 %vm12204_vm2, %v16383_v58  ;;  %v5298_v31 = vld [vmem:[#allocation2 + $0x70] sm:$0xff]  ;;  %v5299_v50 = vld [vmem:[#allocation2 + $0x78] sm:$0xff] }
 0x4bb   :  { %v11170_v15 = vpop.f32.mrf.mxu0  ;;  %11444 = vmatprep.mubr.msk.bf16.mxu1 %vm12204_vm2, %v16383_v58 }
 0x4bc   :  { %v11226_v62 = vpop.f32.mrf.mxu1  ;;  %v5553_v15 = vld [vmem:[#allocation2 + $0x71] sm:$0xff] }
 0x4bd   :  { %v4423_v44 = vpop.f32.mrf.mxu0  ;;  %v5554_v62 = vld [vmem:[#allocation2 + $0x79] sm:$0xff] }
 0x4be   :  { %v4505_v60 = vadd.f32 %v4423_v44, %v14603_v0  ;;  %v4678_v32 = vpop.f32.mrf.mxu1  ;;  %v5318_v44 = vpack.c.bf16 %v5299_v50, %v5298_v31  ;;  %v5560_v31 = vld [vmem:[#allocation2 + $0xa9] sm:$0xff] }
 0x4bf   :  { %v11171_v17 = vpop.f32.mrf.mxu0 }
 0x4c0   :  { %v14775_v33 = vadd.f32 %v4678_v32, %v4505_v60  ;;  %v11227_v52 = vpop.f32.mrf.mxu1  ;;  %v5573_v60 = vpack.c.bf16 %v5554_v62, %v5553_v15 }
 0x4c1   :  { %v4428_v61 = vpop.f32.mrf.mxu0  ;;  %11389 = vmatmul.mubr.msk.bf16.gmra.mxu0 %vm1439_vm6, %v5315_v53  ;;  %v5300_v52 = vld [vmem:[#allocation2 + $0x80] sm:$0xff] }
 0x4c2   :  { %v4506_v39 = vadd.f32 %v4428_v61, %v14618_v56  ;;  %v4683_v19 = vpop.f32.mrf.mxu1  ;;  %11445 = vmatmul.mubr.msk.bf16.gmra.mxu1 %vm1439_vm6, %v5570_v14  ;;  %11392 = vmatprep.mubr.msk.bf16.mxu0 %vm12204_vm2, %v16383_v58  ;;  %v5301_v14 = vld [vmem:[#allocation2 + $0x88] sm:$0xff] }
 0x4c3   :  { %v11174_v7 = vpop.f32.mrf.mxu0  ;;  %11448 = vmatprep.mubr.msk.bf16.mxu1 %vm12204_vm2, %v16383_v58  ;;  %v5319_v10 = vpack.c.bf16 %v5301_v14, %v5300_v52  ;;  %v5562_v52 = vld [vmem:[#allocation2 + $0xb9] sm:$0xff] }
 0x4c4   :  { %v14784_v0 = vadd.f32 %v4683_v19, %v4506_v39  ;;  %v11230_v37 = vpop.f32.mrf.mxu1  ;;  %v5555_v39 = vld [vmem:[#allocation2 + $0x81] sm:$0xff]  ;;  %v5556_v19 = vld [vmem:[#allocation2 + $0x89] sm:$0xff] }
 0x4c5   :  { %v4431_v47 = vpop.f32.mrf.mxu0  ;;  %v5574_v30 = vpack.c.bf16 %v5556_v19, %v5555_v39 }
 0x4c6   :  { %v4686_v29 = vpop.f32.mrf.mxu1 }
 0x4c7   :  { %v11175_v56 = vpop.f32.mrf.mxu0 }
 0x4c8   :  { %v11231_v59 = vpop.f32.mrf.mxu1 }
 0x4c9   :  { %v4436_v11 = vpop.f32.mrf.mxu0  ;;  %11393 = vmatmul.mubr.msk.bf16.gmra.mxu0 %vm1439_vm6, %v5316_v3  ;;  %v5302_v59 = vld [vmem:[#allocation2 + $0x90] sm:$0xff] }
 0x4ca   :  { %v4691_v23 = vpop.f32.mrf.mxu1  ;;  %11449 = vmatmul.mubr.msk.bf16.gmra.mxu1 %vm1439_vm6, %v5571_v45  ;;  %11396 = vmatprep.mubr.msk.bf16.mxu0 %vm12204_vm2, %v16383_v58  ;;  %v5303_v45 = vld [vmem:[#allocation2 + $0x98] sm:$0xff] }
 0x4cb   :  { %v11178_v2 = vpop.f32.mrf.mxu0  ;;  %11452 = vmatprep.mubr.msk.bf16.mxu1 %vm12204_vm2, %v16383_v58  ;;  %v5557_v23 = vld [vmem:[#allocation2 + $0x91] sm:$0xff] }
 0x4cc   :  { %v11234_v46 = vpop.f32.mrf.mxu1  ;;  %v5558_v2 = vld [vmem:[#allocation2 + $0x99] sm:$0xff] }
 0x4cd   :  { %v4439_v4 = vpop.f32.mrf.mxu0 }
 0x4ce   :  { %v4694_v12 = vpop.f32.mrf.mxu1  ;;  %v5320_v4 = vpack.c.bf16 %v5303_v45, %v5302_v59 }
 0x4cf   :  { %v11179_v20 = vpop.f32.mrf.mxu0  ;;  %v5575_v12 = vpack.c.bf16 %v5558_v2, %v5557_v23 }
 0x4d0   :  { %v11235_v1 = vpop.f32.mrf.mxu1 }
 0x4d1   :  { %v4444_v34 = vpop.f32.mrf.mxu0  ;;  %11397 = vmatmul.mubr.msk.bf16.gmra.mxu0 %vm1439_vm6, %v5317_v55 }
 0x4d2   :  { %v4510_v25 = vadd.f32 %v4444_v34, %v14645_v26  ;;  %v4699_v51 = vpop.f32.mrf.mxu1  ;;  %11453 = vmatmul.mubr.msk.bf16.gmra.mxu1 %vm1439_vm6, %v5572_v54  ;;  %11400 = vmatprep.mubr.msk.bf16.mxu0 %vm12204_vm2, %v16383_v58 }
 0x4d3   :  { %v11182_v5 = vpop.f32.mrf.mxu0  ;;  %11456 = vmatprep.mubr.msk.bf16.mxu1 %vm12204_vm2, %v16383_v58 }
 0x4d4   :  { %v14799_v43 = vadd.f32 %v4699_v51, %v4510_v25  ;;  %v11238_v9 = vpop.f32.mrf.mxu1  ;;  %v5304_v25 = vld [vmem:[#allocation2 + $0xa0] sm:$0xff]  ;;  %v5305_v51 = vld [vmem:[#allocation2 + $0xa8] sm:$0xff] }
 0x4d5   :  { %v4447_v13 = vpop.f32.mrf.mxu0  ;;  %v5559_v9 = vld [vmem:[#allocation2 + $0xa1] sm:$0xff] }
 0x4d6   :  { %v4511_v26 = vadd.f32 %v4447_v13, %v14648_v16  ;;  %v4702_v6 = vpop.f32.mrf.mxu1  ;;  %v5321_v13 = vpack.c.bf16 %v5305_v51, %v5304_v25  ;;  %v5576_v62 = vpack.c.bf16 %v5560_v31, %v5559_v9 }
 0x4d7   :  { %v11183_v35 = vpop.f32.mrf.mxu0 }
 0x4d8   :  { %v14802_v63 = vadd.f32 %v4702_v6, %v4511_v26  ;;  %v11239_v8 = vpop.f32.mrf.mxu1 }
 0x4d9   :  { %v4452_v32 = vpop.f32.mrf.mxu0  ;;  %11401 = vmatmul.mubr.msk.bf16.gmra.mxu0 %vm1439_vm6, %v5318_v44 }
 0x4da   :  { %v4707_v17 = vpop.f32.mrf.mxu1  ;;  %11457 = vmatmul.mubr.msk.bf16.gmra.mxu1 %vm1439_vm6, %v5573_v60  ;;  %11404 = vmatprep.mubr.msk.bf16.mxu0 %vm12204_vm2, %v16383_v58  ;;  %v5306_v32 = vld [vmem:[#allocation2 + $0xb0] sm:$0xff] }
 0x4db   :  { %v11186_v53 = vpop.f32.mrf.mxu0  ;;  %11460 = vmatprep.mubr.msk.bf16.mxu1 %vm12204_vm2, %v16383_v58  ;;  %v5307_v17 = vld [vmem:[#allocation2 + $0xb8] sm:$0xff] }
 0x4dc   :  { %v11242_v16 = vpop.f32.mrf.mxu1 }
 0x4dd   :  { %v4455_v61 = vpop.f32.mrf.mxu0  ;;  %v5561_v16 = vld [vmem:[#allocation2 + $0xb1] sm:$0xff] }
 0x4de   :  { %v4513_v7 = vadd.f32 %v4455_v61, %v14663_v18  ;;  %v4710_v37 = vpop.f32.mrf.mxu1  ;;  %v5322_v61 = vpack.c.bf16 %v5307_v17, %v5306_v32  ;;  %v5577_v19 = vpack.c.bf16 %v5562_v52, %v5561_v16 }
 0x4df   :  { %v11187_v28 = vpop.f32.mrf.mxu0 }
 0x4e0   :  { %v14811_v47 = vadd.f32 %v4710_v37, %v4513_v7  ;;  %v11243_v27 = vpop.f32.mrf.mxu1 }
 0x4e1   :  { %v4460_v29 = vpop.f32.mrf.mxu0  ;;  %11405 = vmatmul.mubr.msk.bf16.gmra.mxu0 %vm1439_vm6, %v5319_v10  ;;  %v5308_v27 = vld [vmem:[#allocation2 + $0xc0] sm:$0xff] }
 0x4e2   :  { %v4715_v56 = vpop.f32.mrf.mxu1  ;;  %11461 = vmatmul.mubr.msk.bf16.gmra.mxu1 %vm1439_vm6, %v5574_v30  ;;  %11408 = vmatprep.mubr.msk.bf16.mxu0 %vm12204_vm2, %v16383_v58  ;;  %v5309_v30 = vld [vmem:[#allocation2 + $0xc8] sm:$0xff] }
 0x4e3   :  { %v11190_v3 = vpop.f32.mrf.mxu0  ;;  %11464 = vmatprep.mubr.msk.bf16.mxu1 %vm12204_vm2, %v16383_v58  ;;  %v5563_v56 = vld [vmem:[#allocation2 + $0xc1] sm:$0xff]  ;;  %v5323_v45 = vpack.c.bf16 %v5309_v30, %v5308_v27 }
 0x4e4   :  { %v11246_v18 = vpop.f32.mrf.mxu1  ;;  %v5564_v3 = vld [vmem:[#allocation2 + $0xc9] sm:$0xff] }
 0x4e5   :  { %v4463_v11 = vpop.f32.mrf.mxu0  ;;  %v5578_v23 = vpack.c.bf16 %v5564_v3, %v5563_v56 }
 0x4e6   :  { %v4515_v46 = vadd.f32 %v4463_v11, %v14678_v22  ;;  %v4718_v21 = vpop.f32.mrf.mxu1 }
 0x4e7   :  { %v11191_v48 = vpop.f32.mrf.mxu0 }
 0x4e8   :  { %v14820_v38 = vadd.f32 %v4718_v21, %v4515_v46  ;;  %v11247_v57 = vpop.f32.mrf.mxu1  ;;  %v5310_v21 = vld [vmem:[#allocation2 + $0xd0] sm:$0xff]  ;;  %v5311_v48 = vld [vmem:[#allocation2 + $0xd8] sm:$0xff] }
 0x4e9   :  { %v4468_v20 = vpop.f32.mrf.mxu0  ;;  %11409 = vmatmul.mubr.msk.bf16.gmra.mxu0 %vm1439_vm6, %v5320_v4  ;;  %v5565_v57 = vld [vmem:[#allocation2 + $0xd1] sm:$0xff] }
 0x4ea   :  { %v4516_v55 = vadd.f32 %v4468_v20, %v14693_v42  ;;  %v4723_v1 = vpop.f32.mrf.mxu1  ;;  %11465 = vmatmul.mubr.msk.bf16.gmra.mxu1 %vm1439_vm6, %v5575_v12  ;;  %11412 = vmatprep.mubr.msk.bf16.mxu0 %vm12204_vm2, %v16383_v58  ;;  %v5566_v12 = vld [vmem:[#allocation2 + $0xd9] sm:$0xff] }
 0x4eb   :  { %v11194_v54 = vpop.f32.mrf.mxu0  ;;  %11468 = vmatprep.mubr.msk.bf16.mxu1 %vm12204_vm2, %v16383_v58 }
 0x4ec   :  { %v14829_v22 = vadd.f32 %v4723_v1, %v4516_v55  ;;  %v11250_v34 = vpop.f32.mrf.mxu1  ;;  %v5324_v1 = vpack.c.bf16 %v5311_v48, %v5310_v21 }
 0x4ed   :  { %v4471_v5 = vpop.f32.mrf.mxu0  ;;  %v5579_v34 = vpack.c.bf16 %v5566_v12, %v5565_v57 }
 0x4ee   :  { %v4726_v50 = vpop.f32.mrf.mxu1 }
 0x4ef   :  { %v11195_v42 = vpop.f32.mrf.mxu0  ;;  %v5312_v50 = vld [vmem:[#allocation2 + $0xe0] sm:$0xff] }
 0x4f0   :  { %v11251_v15 = vpop.f32.mrf.mxu1 }
 0x4f1   :  { %v4476_v26 = vpop.f32.mrf.mxu0  ;;  %11413 = vmatmul.mubr.msk.bf16.gmra.mxu0 %vm1439_vm6, %v5321_v13  ;;  %v5567_v13 = vld [vmem:[#allocation2 + $0xe1] sm:$0xff] }
 0x4f2   :  { %v4518_v6 = vadd.f32 %v4476_v26, %v14708_v49  ;;  %v4731_v35 = vpop.f32.mrf.mxu1  ;;  %11469 = vmatmul.mubr.msk.bf16.gmra.mxu1 %vm1439_vm6, %v5576_v62  ;;  %11416 = vmatprep.mubr.msk.bf16.mxu0 %vm12204_vm2, %v16383_v58 }
 0x4f3   :  { %v11198_v44 = vpop.f32.mrf.mxu0  ;;  %11472 = vmatprep.mubr.msk.bf16.mxu1 %vm12204_vm2, %v16383_v58 }
 0x4f4   :  { %v14838_v8 = vadd.f32 %v4731_v35, %v4518_v6  ;;  %v11254_v60 = vpop.f32.mrf.mxu1  ;;  %v5325_v6 = vpack.c.bf16 %v5312_v50, %v5312_v50  ;;  %v5580_v44 = vpack.c.bf16 %v5567_v13, %v5567_v13 }
 0x4f5   :  { %v4479_v53 = vpop.f32.mrf.mxu0 }
 0x4f6   :  { %v4734_v14 = vpop.f32.mrf.mxu1 }
 0x4f7   :  { %v11199_v49 = vpop.f32.mrf.mxu0 }
 0x4f8   :  { %v11255_v39 = vpop.f32.mrf.mxu1 }
 0x4f9   :  { %v4484_v7 = vpop.f32.mrf.mxu0  ;;  %11417 = vmatmul.mubr.msk.bf16.gmra.mxu0 %vm1439_vm6, %v5322_v61 }
 0x4fa   :  { %v4739_v37 = vpop.f32.mrf.mxu1  ;;  %11473 = vmatmul.mubr.msk.bf16.gmra.mxu1 %vm1439_vm6, %v5577_v19  ;;  %11420 = vmatprep.mubr.msk.bf16.mxu0 %vm12204_vm2, %v16383_v58 }
 0x4fb   :  { %v11202_v28 = vpop.f32.mrf.mxu0  ;;  %11476 = vmatprep.mubr.msk.bf16.mxu1 %vm12204_vm2, %v16383_v58 }
 0x4fc   :  { %v11258_v10 = vpop.f32.mrf.mxu1 }
 0x4fd   :  { %v4487_v29 = vpop.f32.mrf.mxu0 }
 0x4fe   :  { %v4742_v18 = vpop.f32.mrf.mxu1 }
 0x4ff   :  { %v11203_v59 = vpop.f32.mrf.mxu0 }
 0x500   :  { %v11259_v11 = vpop.f32.mrf.mxu1 }
 0x501   :  { %v4492_v2 = vpop.f32.mrf.mxu0  ;;  %11421 = vmatmul.mubr.msk.bf16.gmra.mxu0 %vm1439_vm6, %v5323_v45 }
 0x502   :  { %v4747_v46 = vpop.f32.mrf.mxu1  ;;  %11477 = vmatmul.mubr.msk.bf16.gmra.mxu1 %vm1439_vm6, %v5578_v23  ;;  %11424 = vmatprep.mubr.msk.bf16.mxu0 %vm12204_vm2, %v16383_v58 }
 0x503   :  { %v11206_v4 = vpop.f32.mrf.mxu0  ;;  %11480 = vmatprep.mubr.msk.bf16.mxu1 %vm12204_vm2, %v16383_v58 }
 0x504   :  { %v11262_v20 = vpop.f32.mrf.mxu1 }
 0x505   :  { %v4495_v55 = vpop.f32.mrf.mxu0 }
 0x506   :  { %v4750_v54 = vpop.f32.mrf.mxu1 }
 0x507   :  { %v11207_v25 = vpop.f32.mrf.mxu0 }
 0x508   :  { %v11263_v51 = vpop.f32.mrf.mxu1 }
 0x509   :  { %v4906_v5 = vpop.f32.mrf.mxu0  ;;  %11425 = vmatmul.mubr.msk.bf16.gmra.mxu0 %vm1439_vm6, %v5324_v1 }
 0x50a   :  { %v5008_v9 = vadd.f32 %v4906_v5, %v14745_v24  ;;  %v5161_v31 = vpop.f32.mrf.mxu1  ;;  %11481 = vmatmul.mubr.msk.bf16.gmra.mxu1 %vm1439_vm6, %v5579_v34  ;;  %11428 = vmatprep.mubr.msk.bf16.mxu0 %vm12204_vm2, %v16383_v58 }
 0x50b   :  { %v11270_v42 = vpop.f32.mrf.mxu0  ;;  %11484 = vmatprep.mubr.msk.bf16.mxu1 %vm12204_vm2, %v16383_v58 }
 0x50c   :  { %v14859_v15 = vadd.f32 %v5161_v31, %v5008_v9  ;;  %v11326_v62 = vpop.f32.mrf.mxu1 }
 0x50d   :  { %v4909_v26 = vpop.f32.mrf.mxu0 }
 0x50e   :  { %v5164_v35 = vpop.f32.mrf.mxu1 }
 0x50f   :  { %v11271_v24 = vpop.f32.mrf.mxu0 }
 0x510   :  { %v11327_v60 = vpop.f32.mrf.mxu1 }
 0x511   :  { %v4914_v32 = vpop.f32.mrf.mxu0  ;;  %11429 = vmatmul.mubr.msk.bf16.gmra.mxu0 %vm1439_vm6, %v5325_v6 }
 0x512   :  { %v5010_v17 = vadd.f32 %v4914_v32, %v14754_v41  ;;  %v5169_v53 = vpop.f32.mrf.mxu1  ;;  %11485 = vmatmul.mubr.msk.bf16.gmra.mxu1 %vm1439_vm6, %v5580_v44  ;;  %11492 = vmatprep.mubr.msk.bf16.mxu0 %vm12204_vm2, %v16383_v58  ;;  %v12045_v32 = vld [vmem:[%s16243_s3 + $0x18] sm:$0xff]  }
 0x513   :  { %v11274_v16 = vpop.f32.mrf.mxu0  ;;  %11516 = vmatprep.mubr.msk.bf16.mxu1 %vm12204_vm2, %v16383_v58  ;;  %11489 = vmatpush3.bf16.msra.mxu0 %v12045_v32 }
 0x514   :  { %v14868_v52 = vadd.f32 %v5169_v53, %v5010_v17  ;;  %v11330_v14 = vpop.f32.mrf.mxu1  ;;  %11490 = vmatprep.subr.bf16.mxu0 %v16383_v58 }
 0x515   :  { %v4917_v49 = vpop.f32.mrf.mxu0 }
 0x516   :  { %v5011_v61 = vadd.f32 %v4917_v49, %v14757_v36  ;;  %v5172_v39 = vpop.f32.mrf.mxu1 }
 0x517   :  { %v11275_v19 = vpop.f32.mrf.mxu0 }
 0x518   :  { %v14871_v7 = vadd.f32 %v5172_v39, %v5011_v61  ;;  %v11331_v41 = vpop.f32.mrf.mxu1 }
 0x519   :  { %v4922_v37 = vpop.f32.mrf.mxu0 }
 0x51a   :  { %v5177_v28 = vpop.f32.mrf.mxu1 }
 0x51b   :  { %v11278_v10 = vpop.f32.mrf.mxu0 }
 0x51c   :  { %v11334_v27 = vpop.f32.mrf.mxu1 }
 0x51d   :  { %v4925_v30 = vpop.f32.mrf.mxu0 }
 0x51e   :  { %v5013_v29 = vadd.f32 %v4925_v30, %v14766_v40  ;;  %v5180_v56 = vpop.f32.mrf.mxu1 }
 0x51f   :  { %v11279_v3 = vpop.f32.mrf.mxu0 }
 0x520   :  { %v14874_v18 = vadd.f32 %v5180_v56, %v5013_v29  ;;  %v11335_v59 = vpop.f32.mrf.mxu1 }
 0x521   :  { %v4930_v45 = vpop.f32.mrf.mxu0 }
 0x522   :  { %v5185_v11 = vpop.f32.mrf.mxu1 }
 0x523   :  { %v11282_v36 = vpop.f32.mrf.mxu0 }
 0x524   :  { %v11338_v23 = vpop.f32.mrf.mxu1 }
 0x525   :  { %v4933_v2 = vpop.f32.mrf.mxu0 }
 0x526   :  { %v5015_v46 = vadd.f32 %v4933_v2, %v14775_v33  ;;  %v5188_v21 = vpop.f32.mrf.mxu1 }
 0x527   :  { %v11283_v48 = vpop.f32.mrf.mxu0 }
 0x528   :  { %v14877_v4 = vadd.f32 %v5188_v21, %v5015_v46  ;;  %v11339_v57 = vpop.f32.mrf.mxu1 }
 0x529   :  { %v4938_v12 = vpop.f32.mrf.mxu0 }
 0x52a   :  { %v5016_v40 = vadd.f32 %v4938_v12, %v14784_v0  ;;  %v5193_v20 = vpop.f32.mrf.mxu1 }
 0x52b   :  { %v11286_v55 = vpop.f32.mrf.mxu0 }
 0x52c   :  { %v14880_v1 = vadd.f32 %v5193_v20, %v5016_v40  ;;  %v11342_v54 = vpop.f32.mrf.mxu1 }
 0x52d   :  { %v4941_v34 = vpop.f32.mrf.mxu0 }
 0x52e   :  { %v5196_v25 = vpop.f32.mrf.mxu1 }
 0x52f   :  { %v11287_v51 = vpop.f32.mrf.mxu0 }
 0x530   :  { %v11343_v5 = vpop.f32.mrf.mxu1 }
 0x531   :  { %v4946_v9 = vpop.f32.mrf.mxu0 }
 0x532   :  { %v5201_v31 = vpop.f32.mrf.mxu1 }
 0x533   :  { %v11290_v33 = vpop.f32.mrf.mxu0 }
 0x534   :  { %v11346_v50 = vpop.f32.mrf.mxu1 }
 0x535   :  { %v4949_v42 = vpop.f32.mrf.mxu0 }
 0x536   :  { %v5204_v13 = vpop.f32.mrf.mxu1 }
 0x537   :  { %v11291_v62 = vpop.f32.mrf.mxu0 }
 0x538   :  { %v11347_v26 = vpop.f32.mrf.mxu1 }
 0x539   :  { %v4954_v6 = vpop.f32.mrf.mxu0 }
 0x53a   :  { %v5020_v0 = vadd.f32 %v4954_v6, %v14799_v43  ;;  %v5209_v35 = vpop.f32.mrf.mxu1 }
 0x53b   :  { %v11294_v44 = vpop.f32.mrf.mxu0 }
 0x53c   :  { %v14883_v24 = vadd.f32 %v5209_v35, %v5020_v0  ;;  %v11350_v60 = vpop.f32.mrf.mxu1 }
 0x53d   :  { %v4957_v17 = vpop.f32.mrf.mxu0 }
 0x53e   :  { %v5021_v53 = vadd.f32 %v4957_v17, %v14802_v63  ;;  %v5212_v16 = vpop.f32.mrf.mxu1 }
 0x53f   :  { %v11295_v14 = vpop.f32.mrf.mxu0 }
 0x540   :  { %v14890_v49 = vadd.f32 %v5212_v16, %v5021_v53  ;;  %v11351_v43 = vpop.f32.mrf.mxu1 }
 0x541   :  { %v4962_v61 = vpop.f32.mrf.mxu0 }
 0x542   :  { %v5217_v39 = vpop.f32.mrf.mxu1 }
 0x543   :  { %v11298_v19 = vpop.f32.mrf.mxu0 }
 0x544   :  { %v11354_v41 = vpop.f32.mrf.mxu1 }
 0x545   :  { %v4965_v37 = vpop.f32.mrf.mxu0 }
 0x546   :  { %v5023_v28 = vadd.f32 %v4965_v37, %v14811_v47  ;;  %v5220_v10 = vpop.f32.mrf.mxu1 }
 0x547   :  { %v11299_v27 = vpop.f32.mrf.mxu0 }
 0x548   :  { %v14893_v30 = vadd.f32 %v5220_v10, %v5023_v28  ;;  %v11355_v63 = vpop.f32.mrf.mxu1 }
 0x549   :  { %v4970_v29 = vpop.f32.mrf.mxu0 }
 0x54a   :  { %v5225_v56 = vpop.f32.mrf.mxu1 }
 0x54b   :  { %v11302_v3 = vpop.f32.mrf.mxu0 }
 0x54c   :  { %v11358_v59 = vpop.f32.mrf.mxu1 }
 0x54d   :  { %v4973_v45 = vpop.f32.mrf.mxu0 }
 0x54e   :  { %v5025_v11 = vadd.f32 %v4973_v45, %v14820_v38  ;;  %v5228_v36 = vpop.f32.mrf.mxu1 }
 0x54f   :  { %v11303_v23 = vpop.f32.mrf.mxu0 }
 0x550   :  { %v14896_v2 = vadd.f32 %v5228_v36, %v5025_v11  ;;  %v11359_v46 = vpop.f32.mrf.mxu1 }
 0x551   :  { %v4978_v21 = vpop.f32.mrf.mxu0 }
 0x552   :  { %v5026_v47 = vadd.f32 %v4978_v21, %v14829_v22  ;;  %v5233_v48 = vpop.f32.mrf.mxu1 }
 0x553   :  { %v11306_v57 = vpop.f32.mrf.mxu0 }
 0x554   :  { %v14899_v12 = vadd.f32 %v5233_v48, %v5026_v47  ;;  %v11362_v40 = vpop.f32.mrf.mxu1 }
 0x555   :  { %v4981_v20 = vpop.f32.mrf.mxu0 }
 0x556   :  { %v5236_v55 = vpop.f32.mrf.mxu1 }
 0x557   :  { %v11307_v54 = vpop.f32.mrf.mxu0 }
 0x558   :  { %v11363_v34 = vpop.f32.mrf.mxu1 }
 0x559   :  { %v4986_v25 = vpop.f32.mrf.mxu0 }
 0x55a   :  { %v5028_v38 = vadd.f32 %v4986_v25, %v14838_v8  ;;  %v5241_v51 = vpop.f32.mrf.mxu1 }
 0x55b   :  { %v11310_v5 = vpop.f32.mrf.mxu0 }
 0x55c   :  { %v14902_v9 = vadd.f32 %v5241_v51, %v5028_v38  ;;  %v11366_v31 = vpop.f32.mrf.mxu1 }
 0x55d   :  { %v4989_v33 = vpop.f32.mrf.mxu0 }
 0x55e   :  { %v5244_v50 = vpop.f32.mrf.mxu1 }
 0x55f   :  { %v11311_v22 = vpop.f32.mrf.mxu0 }
 0x560   :  { %v11367_v42 = vpop.f32.mrf.mxu1 }
 0x561   :  { %v4994_v13 = vpop.f32.mrf.mxu0 }
 0x562   :  { %v5249_v62 = vpop.f32.mrf.mxu1 }
 0x563   :  { %v11314_v26 = vpop.f32.mrf.mxu0 }
 0x564   :  { %v11370_v6 = vpop.f32.mrf.mxu1 }
 0x565   :  { %v4997_v0 = vpop.f32.mrf.mxu0 }
 0x566   :  { %v5252_v35 = vpop.f32.mrf.mxu1 }
 0x567   :  { %v11315_v44 = vpop.f32.mrf.mxu0 }
 0x568   :  { %v11371_v60 = vpop.f32.mrf.mxu1 }
 0x569   :  { %v5002_v32 = vpop.f32.mrf.mxu0 }
 0x56a   :  { %v5257_v17 = vpop.f32.mrf.mxu1 }
 0x56b   :  { %v11318_v8 = vpop.f32.mrf.mxu0 }
 0x56c   :  { %v11374_v53 = vpop.f32.mrf.mxu1 }
 0x56d   :  { %v5005_v16 = vpop.f32.mrf.mxu0 }
 0x56e   :  { %v5260_v14 = vpop.f32.mrf.mxu1 }
 0x56f   :  { %v11319_v43 = vpop.f32.mrf.mxu0 }
 0x570   :  { %v11375_v61 = vpop.f32.mrf.mxu1 }
 0x571   :  { %v5416_v39 = vpop.f32.mrf.mxu0 }
 0x572   :  { %v5518_v19 = vadd.f32 %v5416_v39, %v14859_v15  ;;  %v5671_v41 = vpop.f32.mrf.mxu1 }
 0x573   :  { %v11382_v37 = vpop.f32.mrf.mxu0 }
 0x574   :  { %v5773_v28 = vadd.f32 %v5671_v41, %v5518_v19  ;;  %v11438_v10 = vpop.f32.mrf.mxu1  ;;  %v12047_v37 = vld [vmem:[%s16243_s3 + $0x10] sm:$0xff]  }
 0x575   :  { %v5419_v27 = vpop.f32.mrf.mxu0  ;;  %11491 = vmatpush3.bf16.msra.mxu0 %v12047_v37 }
 0x576   :  { %5798 = vst.msk [vmem:[#allocation3] sm:$0xff] %vm1439_vm6, %v5773_v28  ;;  %v5674_v63 = vpop.f32.mrf.mxu1  ;;  %11536 = vmatprep.subr.bf16.mxu0 %v16383_v58 }
 0x577   :  { %v11383_v29 = vpop.f32.mrf.mxu0 }
 0x578   :  { %v11439_v56 = vpop.f32.mrf.mxu1 }
 0x579   :  { %v5424_v3 = vpop.f32.mrf.mxu0 }
 0x57a   :  { %v5520_v59 = vadd.f32 %v5424_v3, %v14868_v52  ;;  %v5679_v45 = vpop.f32.mrf.mxu1 }
 0x57b   :  { %v11386_v11 = vpop.f32.mrf.mxu0 }
 0x57c   :  { %v5775_v36 = vadd.f32 %v5679_v45, %v5520_v59  ;;  %v11442_v23 = vpop.f32.mrf.mxu1 }
 0x57d   :  { %v5835_v46 = vld [vmem:[#allocation3] sm:$0x1]  ;;  %v5838_v15 = vld [vmem:[#allocation3 + $0x2] sm:$0x1]  ;;  %v5840_v21 = vld [vmem:[#allocation3 + $0x4] sm:$0x1]  ;;  %v5427_v47 = vpop.f32.mrf.mxu0 }
 0x57e   :  { %5837 = vst.msk [vmem:[#allocation4 + $0xe] sm:$0x1] %vm5836_vm7, %v5835_v46  ;;  %5839 = vst.msk [vmem:[#allocation4 + $0xf] sm:$0x1] %vm5836_vm7, %v5838_v15  ;;  %v5842_v48 = vld [vmem:[#allocation3 + $0x6] sm:$0x1]  ;;  %v5521_v52 = vadd.f32 %v5427_v47, %v14871_v7  ;;  %v5682_v57 = vpop.f32.mrf.mxu1 }
 0x57f   :  { %5841 = vst.msk [vmem:[#allocation4 + $0x10] sm:$0x1] %vm5836_vm7, %v5840_v21  ;;  %5843 = vst.msk [vmem:[#allocation4 + $0x11] sm:$0x1] %vm5836_vm7, %v5842_v48  ;;  %v11387_v40 = vpop.f32.mrf.mxu0 }
 0x580   :  { %5800 = vst.msk [vmem:[#allocation3 + $0x10] sm:$0xff] %vm1439_vm6, %v5775_v36  ;;  %v5776_v20 = vadd.f32 %v5682_v57, %v5521_v52  ;;  %v11443_v55 = vpop.f32.mrf.mxu1 }
 0x581   :  { %v5432_v54 = vpop.f32.mrf.mxu0 }
 0x582   :  { %5801 = vst.msk [vmem:[#allocation3 + $0x18] sm:$0xff] %vm1439_vm6, %v5776_v20  ;;  %v5687_v34 = vpop.f32.mrf.mxu1 }
 0x583   :  { %v11390_v25 = vpop.f32.mrf.mxu0 }
 0x584   :  { %v11446_v38 = vpop.f32.mrf.mxu1 }
 0x585   :  { %v5435_v31 = vpop.f32.mrf.mxu0 }
 0x586   :  { %v5523_v7 = vadd.f32 %v5435_v31, %v14874_v18  ;;  %v5690_v33 = vpop.f32.mrf.mxu1 }
 0x587   :  { %v5844_v51 = vld [vmem:[#allocation3 + $0x14] sm:$0x1]  ;;  %v5846_v5 = vld [vmem:[#allocation3 + $0x16] sm:$0x1]  ;;  %v11391_v50 = vpop.f32.mrf.mxu0 }
 0x588   :  { %5845 = vst.msk [vmem:[#allocation4 + $0x14] sm:$0x1] %vm5836_vm7, %v5844_v51  ;;  %5847 = vst.msk [vmem:[#allocation4 + $0x15] sm:$0x1] %vm5836_vm7, %v5846_v5  ;;  %v5778_v22 = vadd.f32 %v5690_v33, %v5523_v7  ;;  %v11447_v42 = vpop.f32.mrf.mxu1 }
 0x589   :  { %v5848_v13 = vld [vmem:[#allocation3 + $0x18] sm:$0x1]  ;;  %v5850_v62 = vld [vmem:[#allocation3 + $0x1a] sm:$0x1]  ;;  %v5440_v26 = vpop.f32.mrf.mxu0 }
 0x58a   :  { %5849 = vst.msk [vmem:[#allocation4 + $0x16] sm:$0x1] %vm5836_vm7, %v5848_v13  ;;  %5851 = vst.msk [vmem:[#allocation4 + $0x17] sm:$0x1] %vm5836_vm7, %v5850_v62  ;;  %v5695_v6 = vpop.f32.mrf.mxu1 }
 0x58b   :  { %5803 = vst.msk [vmem:[#allocation3 + $0x28] sm:$0xff] %vm1439_vm6, %v5778_v22  ;;  %v11394_v0 = vpop.f32.mrf.mxu0 }
 0x58c   :  { %v11450_v35 = vpop.f32.mrf.mxu1 }
 0x58d   :  { %v5443_v44 = vpop.f32.mrf.mxu0 }
 0x58e   :  { %v5525_v60 = vadd.f32 %v5443_v44, %v14877_v4  ;;  %v5698_v18 = vpop.f32.mrf.mxu1  ;;  %v12046_v4 = vld [vmem:[%s16243_s3 + $0x8] sm:$0xff]  }
 0x58f   :  { %v11395_v32 = vpop.f32.mrf.mxu0  ;;  %11513 = vmatpush3.bf16.msra.mxu1 %v12046_v4 }
 0x590   :  { %v5780_v17 = vadd.f32 %v5698_v18, %v5525_v60  ;;  %v11451_v8 = vpop.f32.mrf.mxu1  ;;  %11514 = vmatprep.subr.bf16.mxu1 %v16383_v58 }
 0x591   :  { %v5448_v14 = vpop.f32.mrf.mxu0 }
 0x592   :  { %v5852_v53 = vld [vmem:[#allocation3 + $0x28] sm:$0x1]  ;;  %v5854_v16 = vld [vmem:[#allocation3 + $0x2a] sm:$0x1]  ;;  %v5856_v43 = vld [vmem:[#allocation3 + $0x2c] sm:$0x1]  ;;  %v5526_v39 = vadd.f32 %v5448_v14, %v14880_v1  ;;  %v5703_v19 = vpop.f32.mrf.mxu1 }
 0x593   :  { %5853 = vst.msk [vmem:[#allocation4 + $0x1a] sm:$0x1] %vm5836_vm7, %v5852_v53  ;;  %5855 = vst.msk [vmem:[#allocation4 + $0x1b] sm:$0x1] %vm5836_vm7, %v5854_v16  ;;  %v5858_v61 = vld [vmem:[#allocation3 + $0x2e] sm:$0x1]  ;;  %v11398_v41 = vpop.f32.mrf.mxu0 }
 0x594   :  { %5805 = vst.msk [vmem:[#allocation3 + $0x38] sm:$0xff] %vm1439_vm6, %v5780_v17  ;;  %v5781_v28 = vadd.f32 %v5703_v19, %v5526_v39  ;;  %v11454_v10 = vpop.f32.mrf.mxu1  ;;  %v12048_v1 = vld [vmem:[%s16243_s3] sm:$0xff]  }
 0x595   :  { %5857 = vst.msk [vmem:[#allocation4 + $0x1c] sm:$0x1] %vm5836_vm7, %v5856_v43  ;;  %5859 = vst.msk [vmem:[#allocation4 + $0x1d] sm:$0x1] %vm5836_vm7, %v5858_v61  ;;  %v5451_v27 = vpop.f32.mrf.mxu0  ;;  %11515 = vmatpush3.bf16.msra.mxu1 %v12048_v1  ;;  %v14960_v10 = vpop.permute.xlu1 %5913 }
 0x596   :  { %5806 = vst.msk [vmem:[#allocation3 + $0x40] sm:$0xff] %vm1439_vm6, %v5781_v28  ;;  %v5706_v63 = vpop.f32.mrf.mxu1  ;;  %11560 = vmatprep.subr.bf16.mxu1 %v16383_v58 }
 0x597   :  { %v11399_v29 = vpop.f32.mrf.mxu0 }
 0x598   :  { %v11455_v56 = vpop.f32.mrf.mxu1 }
 0x599   :  { %v5456_v45 = vpop.f32.mrf.mxu0 }
 0x59a   :  { %v5711_v11 = vpop.f32.mrf.mxu1 }
 0x59b   :  { %v5860_v3 = vld [vmem:[#allocation3 + $0x3c] sm:$0x1]  ;;  %v5862_v59 = vld [vmem:[#allocation3 + $0x3e] sm:$0x1]  ;;  %v11402_v36 = vpop.f32.mrf.mxu0 }
 0x59c   :  { %5861 = vst.msk [vmem:[#allocation4 + $0x20] sm:$0x1] %vm5836_vm7, %v5860_v3  ;;  %5863 = vst.msk [vmem:[#allocation4 + $0x21] sm:$0x1] %vm5836_vm7, %v5862_v59  ;;  %v11458_v23 = vpop.f32.mrf.mxu1  ;;  %v14964_v3 = vpop.permute.xlu0 %5918  ;;  %v14966_v59 = vld [vmem:[#allocation4 + $0xf] sm:$0xff]  ;;  %v14968_v36 = vld [vmem:[#allocation4 + $0x7] sm:$0xff] }
 0x59d   :  { %v5864_v46 = vld [vmem:[#allocation3 + $0x40] sm:$0x1]  ;;  %v5866_v15 = vld [vmem:[#allocation3 + $0x42] sm:$0x1]  ;;  %v5459_v21 = vpop.f32.mrf.mxu0 }
 0x59e   :  { %5865 = vst.msk [vmem:[#allocation4 + $0x22] sm:$0x1] %vm5836_vm7, %v5864_v46  ;;  %5867 = vst.msk [vmem:[#allocation4 + $0x23] sm:$0x1] %vm5836_vm7, %v5866_v15  ;;  %v5714_v47 = vpop.f32.mrf.mxu1  ;;  %v14972_v23 = vld [vmem:[#allocation4 + $0x17] sm:$0xff] }
 0x59f   :  { %v11403_v48 = vpop.f32.mrf.mxu0  ;;  %v5957_v47 = vmul.f32 %v14964_v3, %v14966_v59 }
 0x5a0   :  { %v11459_v52 = vpop.f32.mrf.mxu1 }
 0x5a1   :  { %v5464_v57 = vpop.f32.mrf.mxu0 }
 0x5a2   :  { %v5530_v40 = vadd.f32 %v5464_v57, %v14883_v24  ;;  %v5719_v20 = vpop.f32.mrf.mxu1 }
 0x5a3   :  { %v11406_v55 = vpop.f32.mrf.mxu0 }
 0x5a4   :  { %v5785_v54 = vadd.f32 %v5719_v20, %v5530_v40  ;;  %v11462_v34 = vpop.f32.mrf.mxu1  ;;  %v5956_v40 = vmul.f32 %v14960_v10, %v14968_v36 }
 0x5a5   :  { %v5467_v25 = vpop.f32.mrf.mxu0  ;;  %v14979_v57 = vld [vmem:[#allocation4 + $0x1f] sm:$0xff] }
 0x5a6   :  { %5810 = vst.msk [vmem:[#allocation3 + $0x60] sm:$0xff] %vm1439_vm6, %v5785_v54  ;;  %v5531_v38 = vadd.f32 %v5467_v25, %v14890_v49  ;;  %v5722_v51 = vpop.f32.mrf.mxu1  ;;  %v14985_v25 = vpop.permute.xlu0 %5928 }
 0x5a7   :  { %v11407_v5 = vpop.f32.mrf.mxu0 }
 0x5a8   :  { %v5786_v31 = vadd.f32 %v5722_v51, %v5531_v38  ;;  %v11463_v7 = vpop.f32.mrf.mxu1 }
 0x5a9   :  { %v5472_v33 = vpop.f32.mrf.mxu0 }
 0x5aa   :  { %5811 = vst.msk [vmem:[#allocation3 + $0x68] sm:$0xff] %vm1439_vm6, %v5786_v31  ;;  %v5727_v50 = vpop.f32.mrf.mxu1  ;;  %v5990_v31 = vmul.f32 %v5957_v47, %v5957_v47 }
 0x5ab   :  { %v11410_v22 = vpop.f32.mrf.mxu0  ;;  %v5989_v50 = vmul.f32 %v5956_v40, %v5956_v40 }
 0x5ac   :  { %v11466_v42 = vpop.f32.mrf.mxu1 }
 0x5ad   :  { %v5868_v24 = vld [vmem:[#allocation3 + $0x64] sm:$0x1]  ;;  %v5870_v13 = vld [vmem:[#allocation3 + $0x66] sm:$0x1]  ;;  %v5475_v62 = vpop.f32.mrf.mxu0  ;;  %v14994_v42 = vld [vmem:[#allocation4 + $0x27] sm:$0xff] }
 0x5ae   :  { %5869 = vst.msk [vmem:[#allocation4 + $0x32] sm:$0x1] %vm5836_vm7, %v5868_v24  ;;  %5871 = vst.msk [vmem:[#allocation4 + $0x33] sm:$0x1] %vm5836_vm7, %v5870_v13  ;;  %v5533_v26 = vadd.f32 %v5475_v62, %v14893_v30  ;;  %v5730_v49 = vpop.f32.mrf.mxu1  ;;  %v5966_v24 = vsel %vm1439_vm6, %v5957_v47, 0.0 }
 0x5af   :  { %v11411_v6 = vpop.f32.mrf.mxu0 }
 0x5b0   :  { %v5788_v0 = vadd.f32 %v5730_v49, %v5533_v26  ;;  %v11467_v35 = vpop.f32.mrf.mxu1  ;;  %v5965_v49 = vsel %vm1439_vm6, %v5956_v40, 0.0 }
 0x5b1   :  { %v5872_v44 = vld [vmem:[#allocation3 + $0x68] sm:$0x1]  ;;  %v5874_v60 = vld [vmem:[#allocation3 + $0x6a] sm:$0x1]  ;;  %v5480_v18 = vpop.f32.mrf.mxu0 }
 0x5b2   :  { %5873 = vst.msk [vmem:[#allocation4 + $0x34] sm:$0x1] %vm5836_vm7, %v5872_v44  ;;  %5875 = vst.msk [vmem:[#allocation4 + $0x35] sm:$0x1] %vm5836_vm7, %v5874_v60  ;;  %v5735_v32 = vpop.f32.mrf.mxu1  ;;  %v5999_v44 = vsel %vm1439_vm6, %v5990_v31, 0.0 }
 0x5b3   :  { %5813 = vst.msk [vmem:[#allocation3 + $0x78] sm:$0xff] %vm1439_vm6, %v5788_v0  ;;  %v11414_v17 = vpop.f32.mrf.mxu0  ;;  %v15004_v32 = vpop.permute.xlu0 %5938 }
 0x5b4   :  { %v11470_v8 = vpop.f32.mrf.mxu1 }
 0x5b5   :  { %v5483_v53 = vpop.f32.mrf.mxu0  ;;  %v5967_v8 = vadd.f32 %v5966_v24, %v5965_v49 }
 0x5b6   :  { %v5535_v16 = vadd.f32 %v5483_v53, %v14896_v2  ;;  %v5738_v30 = vpop.f32.mrf.mxu1  ;;  %v5998_v53 = vsel %vm1439_vm6, %v5989_v50, 0.0 }
 0x5b7   :  { %v11415_v14 = vpop.f32.mrf.mxu0 }
 0x5b8   :  { %v5790_v43 = vadd.f32 %v5738_v30, %v5535_v16  ;;  %v11471_v61 = vpop.f32.mrf.mxu1 }
 0x5b9   :  { %v5488_v41 = vpop.f32.mrf.mxu0  ;;  %v14997_v26 = vld [vmem:[#allocation4 + $0x2f] sm:$0xff] }
 0x5ba   :  { %v5876_v39 = vld [vmem:[#allocation3 + $0x78] sm:$0x1]  ;;  %v5878_v19 = vld [vmem:[#allocation3 + $0x7a] sm:$0x1]  ;;  %v5880_v4 = vld [vmem:[#allocation3 + $0x7c] sm:$0x1]  ;;  %v5536_v28 = vadd.f32 %v5488_v41, %v14899_v12  ;;  %v5743_v2 = vpop.f32.mrf.mxu1  ;;  %v14970_v12 = vpop.permute.xlu1 %5923  ;;  %v5961_v30 = vmul.f32 %v15004_v32, %v14997_v26 }
 0x5bb   :  { %5877 = vst.msk [vmem:[#allocation4 + $0x38] sm:$0x1] %vm5836_vm7, %v5876_v39  ;;  %5879 = vst.msk [vmem:[#allocation4 + $0x39] sm:$0x1] %vm5836_vm7, %v5878_v19  ;;  %v5882_v37 = vld [vmem:[#allocation3 + $0x7e] sm:$0x1]  ;;  %v11418_v1 = vpop.f32.mrf.mxu0  ;;  %v5958_v54 = vmul.f32 %v14970_v12, %v14972_v23 }
 0x5bc   :  { %5881 = vst.msk [vmem:[#allocation4 + $0x3a] sm:$0x1] %vm5836_vm7, %v5880_v4  ;;  %5883 = vst.msk [vmem:[#allocation4 + $0x3b] sm:$0x1] %vm5836_vm7, %v5882_v37  ;;  %v5791_v27 = vadd.f32 %v5743_v2, %v5536_v28  ;;  %v11474_v63 = vpop.f32.mrf.mxu1  ;;  %v6000_v28 = vadd.f32 %v5999_v44, %v5998_v53  ;;  %v5974_v40 = vsel %vm1439_vm6, %v5961_v30, 0.0 }
 0x5bd   :  { %5815 = vst.msk [vmem:[#allocation3 + $0x88] sm:$0xff] %vm1439_vm6, %v5790_v43  ;;  %v5491_v29 = vpop.f32.mrf.mxu0  ;;  %v5991_v13 = vmul.f32 %v5958_v54, %v5958_v54  ;;  %v5968_v0 = vsel %vm1439_vm6, %v5958_v54, 0.0 }
 0x5be   :  { %5816 = vst.msk [vmem:[#allocation3 + $0x90] sm:$0xff] %vm1439_vm6, %v5791_v27  ;;  %v5746_v56 = vpop.f32.mrf.mxu1  ;;  %v14992_v33 = vpop.permute.xlu1 %5933  ;;  %v5969_v37 = vadd.f32 %v5968_v0, %v5967_v8 }
 0x5bf   :  { %v11419_v45 = vpop.f32.mrf.mxu0  ;;  %v5960_v18 = vmul.f32 %v14992_v33, %v14994_v42  ;;  %v6001_v43 = vsel %vm1439_vm6, %v5991_v13, 0.0 }
 0x5c0   :  { %v11475_v11 = vpop.f32.mrf.mxu1  ;;  %v6002_v45 = vadd.f32 %v6001_v43, %v6000_v28 }
 0x5c1   :  { %v5496_v21 = vpop.f32.mrf.mxu0 }
 0x5c2   :  { %v5538_v48 = vadd.f32 %v5496_v21, %v14902_v9  ;;  %v5751_v52 = vpop.f32.mrf.mxu1  ;;  %v5959_v9 = vmul.f32 %v14985_v25, %v14979_v57  ;;  %v15013_v39 = vpop.permute.xlu1 %5943 }
 0x5c3   :  { %v11422_v20 = vpop.f32.mrf.mxu0 }
 0x5c4   :  { %v5884_v46 = vld [vmem:[#allocation3 + $0x8c] sm:$0x1]  ;;  %v5886_v15 = vld [vmem:[#allocation3 + $0x8e] sm:$0x1]  ;;  %v5793_v55 = vadd.f32 %v5751_v52, %v5538_v48  ;;  %v11478_v34 = vpop.f32.mrf.mxu1  ;;  %v5992_v35 = vmul.f32 %v5959_v9, %v5959_v9  ;;  %v5970_v14 = vsel %vm1439_vm6, %v5959_v9, 0.0  ;;  %v5972_v52 = vsel %vm1439_vm6, %v5960_v18, 0.0  ;;  %v15027_v9 = vpop.permute.xlu0 %5948 }
 0x5c5   :  { %5885 = vst.msk [vmem:[#allocation4 + $0x3e] sm:$0x1] %vm5836_vm7, %v5884_v46  ;;  %5887 = vst.msk [vmem:[#allocation4 + $0x3f] sm:$0x1] %vm5836_vm7, %v5886_v15  ;;  %v5888_v38 = vld [vmem:[#allocation3 + $0x90] sm:$0x1]  ;;  %v5499_v5 = vpop.f32.mrf.mxu0  ;;  %v5971_v56 = vadd.f32 %v5970_v14, %v5969_v37  ;;  %v5993_v46 = vmul.f32 %v5960_v18, %v5960_v18  ;;  %v5994_v15 = vmul.f32 %v5961_v30, %v5961_v30 }
 0x5c6   :  { %v5890_v51 = vld [vmem:[#allocation3 + $0x92] sm:$0x1]  ;;  %5889 = vst.msk [vmem:[#allocation4 + $0x40] sm:$0x1] %vm5836_vm7, %v5888_v38  ;;  %v5754_v7 = vpop.f32.mrf.mxu1  ;;  %v6003_v63 = vsel %vm1439_vm6, %v5992_v35, 0.0  ;;  %v15031_v13 = vpop.permute.xlu1 %5953 }
 0x5c7   :  { %5891 = vst.msk [vmem:[#allocation4 + $0x41] sm:$0x1] %vm5836_vm7, %v5890_v51  ;;  %v11423_v22 = vpop.f32.mrf.mxu0  ;;  %v6004_v47 = vadd.f32 %v6003_v63, %v6002_v45  ;;  %v5973_v54 = vadd.f32 %v5972_v52, %v5971_v56  ;;  %v6005_v38 = vsel %vm1439_vm6, %v5993_v46, 0.0  ;;  %v6007_v5 = vsel %vm1439_vm6, %v5994_v15, 0.0 }
 0x5c8   :  { %5818 = vst.msk [vmem:[#allocation3 + $0xa0] sm:$0xff] %vm1439_vm6, %v5793_v55  ;;  %v11479_v62 = vpop.f32.mrf.mxu1 }
 0x5c9   :  { %v5504_v6 = vpop.f32.mrf.mxu0  ;;  %v5975_v50 = vadd.f32 %v5974_v40, %v5973_v54  ;;  %v6006_v22 = vadd.f32 %v6005_v38, %v6004_v47 }
 0x5ca   :  { %v5759_v60 = vpop.f32.mrf.mxu1 }
 0x5cb   :  { %v11426_v16 = vpop.f32.mrf.mxu0  ;;  %v6008_v60 = vadd.f32 %v6007_v5, %v6006_v22 }
 0x5cc   :  { %v15006_v17 = vld [vmem:[#allocation4 + $0x37] sm:$0xff]  ;;  %v11482_v61 = vpop.f32.mrf.mxu1 }
 0x5cd   :  { %v5507_v2 = vpop.f32.mrf.mxu0  ;;  %v5962_v27 = vmul.f32 %v15013_v39, %v15006_v17 }
 0x5ce   :  { %v5762_v29 = vpop.f32.mrf.mxu1 }
 0x5cf   :  { %v5892_v19 = vld [vmem:[#allocation3 + $0xa0] sm:$0x1]  ;;  %v5894_v4 = vld [vmem:[#allocation3 + $0xa2] sm:$0x1]  ;;  %v5896_v41 = vld [vmem:[#allocation3 + $0xa4] sm:$0x1]  ;;  %v11427_v11 = vpop.f32.mrf.mxu0  ;;  %v5995_v20 = vmul.f32 %v5962_v27, %v5962_v27 }
 0x5d0   :  { %5893 = vst.msk [vmem:[#allocation4 + $0x44] sm:$0x1] %vm5836_vm7, %v5892_v19  ;;  %5895 = vst.msk [vmem:[#allocation4 + $0x45] sm:$0x1] %vm5836_vm7, %v5894_v4  ;;  %v5898_v1 = vld [vmem:[#allocation3 + $0xa6] sm:$0x1]  ;;  %v11483_v21 = vpop.f32.mrf.mxu1 }
 0x5d1   :  { %5897 = vst.msk [vmem:[#allocation4 + $0x46] sm:$0x1] %vm5836_vm7, %v5896_v41  ;;  %5899 = vst.msk [vmem:[#allocation4 + $0x47] sm:$0x1] %vm5836_vm7, %v5898_v1  ;;  %v5512_v48 = vpop.f32.mrf.mxu0  ;;  %v5976_v51 = vsel %vm1439_vm6, %v5962_v27, 0.0  ;;  %v6009_v6 = vsel %vm1439_vm6, %v5995_v20, 0.0 }
 0x5d2   :  { %v5767_v55 = vpop.f32.mrf.mxu1  ;;  %v5977_v44 = vadd.f32 %v5976_v51, %v5975_v50  ;;  %v6010_v43 = vadd.f32 %v6009_v6, %v6008_v60  ;;  %v9709_v50 = vld [vmem:[%s16242_s7 + $0x2] ss:$0 sm:$0xff] }
 0x5d3   :  { %v11430_v34 = vpop.f32.mrf.mxu0 }
 0x5d4   :  { %v11486_v31 = vpop.f32.mrf.mxu1 }
 0x5d5   :  { %v5515_v24 = vpop.f32.mrf.mxu0 }
 0x5d6   :  { %v5770_v0 = vpop.f32.mrf.mxu1 }
 0x5d7   :  { %v11431_v18 = vpop.f32.mrf.mxu0 }
 0x5d8   :  { %v15029_v7 = vld [vmem:[#allocation4 + $0x3f] sm:$0xff]  ;;  %v5908_v62 = vld [vmem:[#allocation4 + $0x47] sm:$0xff]  ;;  %v11487_v16 = vpop.f32.mrf.mxu1 }
 0x5d9   :  { %v5963_v49 = vmul.f32 %v15027_v9, %v15029_v7  ;;  %v5964_v35 = vmul.f32 %v15031_v13, %v5908_v62 }
 0x5db   :  { %v5978_v8 = vsel %vm1439_vm6, %v5963_v49, 0.0  ;;  %v5996_v53 = vmul.f32 %v5963_v49, %v5963_v49  ;;  %v5997_v14 = vmul.f32 %v5964_v35, %v5964_v35  ;;  %v5980_v61 = vsel %vm1439_vm6, %v5964_v35, 0.0 }
 0x5dc   :  { %v5979_v30 = vadd.f32 %v5978_v8, %v5977_v44 }
 0x5dd   :  { %v6011_v19 = vsel %vm1439_vm6, %v5996_v53, 0.0  ;;  %v6013_v37 = vsel %vm1439_vm6, %v5997_v14, 0.0 }
 0x5de   :  { %v5981_v4 = vadd.f32 %v5980_v61, %v5979_v30  ;;  %v6012_v41 = vadd.f32 %v6011_v19, %v6010_v43 }
 0x5e0   :  { %v5982_v28 = vrot.slane %v5981_v4, 4  ;;  %v6014_v2 = vadd.f32 %v6013_v37, %v6012_v41 }
 0x5e2   :  { %v5983_v1 = vadd.f32 %v5982_v28, %v5981_v4  ;;  %v6015_v27 = vrot.slane %v6014_v2, 4 }
 0x5e4   :  { %v5984_v63 = vrot.slane %v5983_v1, 2  ;;  %v6016_v29 = vadd.f32 %v6015_v27, %v6014_v2 }
 0x5e6   :  { %v5985_v56 = vadd.f32 %v5984_v63, %v5983_v1  ;;  %v6017_v45 = vrot.slane %v6016_v29, 2 }
 0x5e8   :  { %v5986_v11 = vrot.slane %v5985_v56, 1  ;;  %v6018_v46 = vadd.f32 %v6017_v45, %v6016_v29 }
 0x5ea   :  { %v5987_v15 = vadd.f32 %v5986_v11, %v5985_v56  ;;  %v6019_v21 = vrot.slane %v6018_v46, 1 }
 0x5ec   :  { %v5988_v47 = vmul.f32 0.03125, %v5987_v15  ;;  %v6020_v48 = vadd.f32 %v6019_v21, %v6018_v46 }
 0x5ee   :  { %v6021_v52 = vmul.f32 0.03125, %v6020_v48  ;;  %v6022_v40 = vmul.f32 %v5988_v47, %v5988_v47  ;;  %v6026_v54 = vsub.f32 %v14968_v36, %v5988_v47  ;;  %v6027_v34 = vsub.f32 %v14966_v59, %v5988_v47 }
 0x5ef   :  { %v6028_v38 = vsub.f32 %v14972_v23, %v5988_v47  ;;  %v6029_v51 = vsub.f32 %v14979_v57, %v5988_v47  ;;  %v6031_v5 = vsub.f32 %v14997_v26, %v5988_v47  ;;  %v6032_v22 = vsub.f32 %v15006_v17, %v5988_v47  ;;  %v9710_v57 = vld [vmem:[%s16242_s7 + $0x3] ss:$0 sm:$0xff] }
 0x5f0   :  { %v6023_v20 = vsub.f32 %v6021_v52, %v6022_v40  ;;  %v6033_v24 = vsub.f32 %v15029_v7, %v5988_v47  ;;  %v6034_v49 = vsub.f32 %v5908_v62, %v5988_v47  ;;  %v6030_v36 = vsub.f32 %v14994_v42, %v5988_v47 }
 0x5f2   :  { %v6024_v55 = vadd.f32 1e-05, %v6023_v20 }
 0x5f4   :  { %12089 = vrsqrt.f32 %v6024_v55 }
 0x601   :  { %v12090_v31 = vpop.eup %12089 }
 0x602   :  { %v6035_v6 = vmul.f32 %v12090_v31, %v6026_v54  ;;  %v6036_v59 = vmul.f32 %v12090_v31, %v6027_v34  ;;  %v6037_v0 = vmul.f32 %v12090_v31, %v6028_v38  ;;  %v6038_v23 = vmul.f32 %v12090_v31, %v6029_v51 }
 0x603   :  { %v6040_v26 = vmul.f32 %v12090_v31, %v6031_v5  ;;  %v6041_v35 = vmul.f32 %v12090_v31, %v6032_v22  ;;  %v6042_v44 = vmul.f32 %v12090_v31, %v6033_v24  ;;  %v6043_v60 = vmul.f32 %v12090_v31, %v6034_v49 }
 0x604   :  { %v6048_v18 = vmul.f32 %v9709_v50, %v6035_v6  ;;  %v6049_v8 = vmul.f32 %v9709_v50, %v6036_v59  ;;  %v6050_v17 = vmul.f32 %v9709_v50, %v6037_v0  ;;  %v6051_v53 = vmul.f32 %v9709_v50, %v6038_v23  ;;  %v12049_v6 = vld [vmem:[%s16243_s3 + $0x28] sm:$0xff]  }
 0x605   :  { %v6053_v7 = vmul.f32 %v9709_v50, %v6040_v26  ;;  %v6054_v62 = vmul.f32 %v9709_v50, %v6041_v35  ;;  %v6055_v16 = vmul.f32 %v9709_v50, %v6042_v44  ;;  %v6056_v42 = vmul.f32 %v9709_v50, %v6043_v60  ;;  %v12051_v60 = vld [vmem:[%s16243_s3 + $0x38] sm:$0xff]  }
 0x606   :  { %v6061_v30 = vadd.f32 %v9710_v57, %v6048_v18  ;;  %v6062_v14 = vadd.f32 %v9710_v57, %v6049_v8  ;;  %v6063_v43 = vadd.f32 %v9710_v57, %v6050_v17  ;;  %v6064_v61 = vadd.f32 %v9710_v57, %v6051_v53  ;;  %v12050_v18 = vld [vmem:[%s16243_s3 + $0x20] sm:$0xff]   ;;  %v12052_v53 = vld [vmem:[%s16243_s3 + $0x30] sm:$0xff]  }
 0x607   :  { %v6066_v19 = vadd.f32 %v9710_v57, %v6053_v7  ;;  %v6067_v4 = vadd.f32 %v9710_v57, %v6054_v62  ;;  %v6068_v41 = vadd.f32 %v9710_v57, %v6055_v16  ;;  %v6069_v37 = vadd.f32 %v9710_v57, %v6056_v42 }
 0x608   :  { %v6071_v28 = vmul.f32 %v6062_v14, %v14964_v3  ;;  %v6072_v2 = vmul.f32 %v6063_v43, %v14970_v12  ;;  %v6073_v1 = vmul.f32 %v6064_v61, %v14985_v25  ;;  %v6070_v27 = vmul.f32 %v6061_v30, %v14960_v10 }
 0x609   :  { %v6075_v63 = vmul.f32 %v6066_v19, %v15004_v32  ;;  %v6076_v29 = vmul.f32 %v6067_v4, %v15013_v39  ;;  %v6077_v56 = vmul.f32 %v6068_v41, %v15027_v9  ;;  %v6078_v45 = vmul.f32 %v6069_v37, %v15031_v13 }
 0x60a   :  { %6080 = vst.msk [vmem:[#allocation4 + $0xf] sm:$0xff] %vm1439_vm6, %v6071_v28  ;;  %6081 = vst.msk [vmem:[#allocation4 + $0x17] sm:$0xff] %vm1439_vm6, %v6072_v2  ;;  %v6039_v11 = vmul.f32 %v12090_v31, %v6030_v36 }
 0x60b   :  { %6082 = vst.msk [vmem:[#allocation4 + $0x1f] sm:$0xff] %vm1439_vm6, %v6073_v1  ;;  %6079 = vst.msk [vmem:[#allocation4 + $0x7] sm:$0xff] %vm1439_vm6, %v6070_v27 }
 0x60c   :  { %6087 = vst.msk [vmem:[#allocation4 + $0x47] sm:$0xff] %vm1439_vm6, %v6078_v45  ;;  %6084 = vst.msk [vmem:[#allocation4 + $0x2f] sm:$0xff] %vm1439_vm6, %v6075_v63  ;;  %v6052_v46 = vmul.f32 %v9709_v50, %v6039_v11 }
 0x60d   :  { %6085 = vst.msk [vmem:[#allocation4 + $0x37] sm:$0xff] %vm1439_vm6, %v6076_v29  ;;  %6086 = vst.msk [vmem:[#allocation4 + $0x3f] sm:$0xff] %vm1439_vm6, %v6077_v56 }
 0x60e   :  { %v6065_v15 = vadd.f32 %v9710_v57, %v6052_v46 }
 0x610   :  { %v6074_v21 = vmul.f32 %v6065_v15, %v14992_v33 }
 0x611   :  { %v15075_v48 = vld [vmem:[#allocation4 + $0xf] sm:$0xff]  ;;  %v15077_v52 = vld [vmem:[#allocation4 + $0x17] sm:$0xff] }
 0x612   :  { %v15073_v47 = vld [vmem:[#allocation4 + $0x7] sm:$0xff]  ;;  %v6098_v55 = vmax.f32 %v15075_v48, 0.0  ;;  %v15083_v54 = vld [vmem:[#allocation4 + $0x1f] sm:$0xff]  ;;  %v6099_v34 = vmax.f32 %v15077_v52, 0.0  ;;  %6083 = vst.msk [vmem:[#allocation4 + $0x27] sm:$0xff] %vm1439_vm6, %v6074_v21 }
 0x613   :  { %v15079_v40 = vld [vmem:[#allocation4 + $0x47] sm:$0xff]  ;;  %v6097_v20 = vmax.f32 %v15073_v47, 0.0  ;;  %v15087_v38 = vld [vmem:[#allocation4 + $0x2f] sm:$0xff]  ;;  %v16365_v5 = vmax.f32 %v15083_v54, 0.0 }
 0x614   :  { %v16360_v51 = vmax.f32 %v15079_v40, 0.0  ;;  %v16363_v31 = vmax.f32 %v15087_v38, 0.0  ;;  %v15092_v50 = vld [vmem:[#allocation4 + $0x37] sm:$0xff]  ;;  %v15094_v22 = vld [vmem:[#allocation4 + $0x3f] sm:$0xff]  ;;  %6107 = vst.msk [vmem:[#allocation4 + $0xf] sm:$0xff] %vm1439_vm6, %v6098_v55  ;;  %6108 = vst.msk [vmem:[#allocation4 + $0x17] sm:$0xff] %vm1439_vm6, %v6099_v34 }
 0x615   :  { %6106 = vst.msk [vmem:[#allocation4 + $0x7] sm:$0xff] %vm1439_vm6, %v6097_v20  ;;  %v16362_v24 = vmax.f32 %v15092_v50, 0.0  ;;  %v16361_v49 = vmax.f32 %v15094_v22, 0.0  ;;  %6109 = vst.msk [vmem:[#allocation4 + $0x1f] sm:$0xff] %vm1439_vm6, %v16365_v5  ;;  %v16655_v47 = vmax.f32 %v15094_v22, 0.0  ;;  %v16656_v48 = vmax.f32 %v15079_v40, 0.0 }
 0x616   :  { %6114 = vst.msk [vmem:[#allocation4 + $0x47] sm:$0xff] %vm1439_vm6, %v16360_v51  ;;  %6111 = vst.msk [vmem:[#allocation4 + $0x2f] sm:$0xff] %vm1439_vm6, %v16363_v31 }
 0x617   :  { %6112 = vst.msk [vmem:[#allocation4 + $0x37] sm:$0xff] %vm1439_vm6, %v16362_v24  ;;  %6113 = vst.msk [vmem:[#allocation4 + $0x3f] sm:$0xff] %vm1439_vm6, %v16361_v49 }
 0x619   :  { %v15122_v36 = vld [vmem:[#allocation4 + $0x27] sm:$0xff] }
 0x61a   :  { %v16364_v59 = vmax.f32 %v15122_v36, 0.0 }
 0x61b   :  { %v6135_v8 = vld [vmem:[#allocation4 + $0x11] sm:$0xff] }
 0x61c   :  { %v6133_v0 = vld [vmem:[#allocation4 + $0x1] sm:$0xff]  ;;  %v6134_v23 = vld [vmem:[#allocation4 + $0x9] sm:$0xff]  ;;  %6110 = vst.msk [vmem:[#allocation4 + $0x27] sm:$0xff] %vm1439_vm6, %v16364_v59  ;;  %v6136_v17 = vld [vmem:[#allocation4 + $0x19] sm:$0xff] }
 0x61d   :  { %v6115_v57 = vld [vmem:[#allocation4] sm:$0xff]  ;;  %v6142_v26 = vpack.c.bf16 %v6134_v23, %v6133_v0  ;;  %v15128_v35 = vld [vmem:[#allocation4 + $0x8] sm:$0xff]  ;;  %v15150_v7 = vld [vmem:[#allocation4 + $0x10] sm:$0xff]  ;;  %v6143_v16 = vpack.c.bf16 %v6136_v17, %v6135_v8 }
 0x61e   :  { %v6124_v44 = vpack.c.bf16 %v15128_v35, %v6115_v57  ;;  %v15152_v62 = vld [vmem:[#allocation4 + $0x18] sm:$0xff]  ;;  %v15177_v28 = vld [vmem:[#allocation4 + $0x30] sm:$0xff]  ;;  %v6141_v63 = vld [vmem:[#allocation4 + $0x41] sm:$0xff] }
 0x61f   :  { %11493 = vmatmul.mubr.msk.bf16.vlgmr.msra.gmra.mxu0 %vm1439_vm6, %v6142_v26  ;;  %v6125_v42 = vpack.c.bf16 %v15152_v62, %v15150_v7  ;;  %v6139_v41 = vld [vmem:[#allocation4 + $0x31] sm:$0xff]  ;;  %v6140_v37 = vld [vmem:[#allocation4 + $0x39] sm:$0xff]  ;;  %v6146_v56 = vpack.c.bf16 %v6141_v63, %v6141_v63  ;;  %v6350_v11 = vld [vmem:[#allocation4 + $0x2] sm:$0xff] }
 0x620   :  { %11517 = vmatmul.mubr.msk.bf16.vlgmr.msra.gmra.mxu1 %vm1439_vm6, %v6124_v44  ;;  %11537 = vmatpush3.bf16.msra.mxu0 %v12049_v6  ;;  %v15179_v2 = vld [vmem:[#allocation4 + $0x38] sm:$0xff]  ;;  %v6145_v1 = vpack.c.bf16 %v6140_v37, %v6139_v41  ;;  %v15189_v29 = vld [vmem:[#allocation4 + $0x40] sm:$0xff]  ;;  %v6351_v46 = vld [vmem:[#allocation4 + $0xa] sm:$0xff] }
 0x621   :  { %11496 = vmatprep.mubr.msk.bf16.mxu0 %vm12204_vm2, %v16383_v58  ;;  %11520 = vmatprep.mubr.msk.bf16.mxu1 %vm12204_vm2, %v16383_v58  ;;  %v6127_v27 = vpack.c.bf16 %v15179_v2, %v15177_v28  ;;  %v6128_v45 = vpack.c.bf16 %v15189_v29, %v15189_v29  ;;  %v6477_v15 = vld [vmem:[#allocation4 + $0x6] sm:$0xff]  ;;  %v15199_v21 = vld [vmem:[#allocation4 + $0xe] sm:$0xff]  ;;  %v6359_v0 = vpack.c.bf16 %v6351_v46, %v6350_v11  ;;  %v15221_v8 = vld [vmem:[#allocation4 + $0x16] sm:$0xff] }
 0x622   :  { %11538 = vmatprep.subr.bf16.mxu0 %v16383_v58  ;;  %11561 = vmatpush3.bf16.msra.mxu1 %v12051_v60  ;;  %v12053_v6 = vld [vmem:[%s16243_s3 + $0x48] sm:$0xff]   ;;  %v6486_v23 = vpack.c.bf16 %v15199_v21, %v6477_v15  ;;  %v12055_v57 = vld [vmem:[%s16243_s3 + $0x58] sm:$0xff]   ;;  %v12054_v26 = vld [vmem:[%s16243_s3 + $0x40] sm:$0xff]  }
 0x623   :  { %11562 = vmatprep.subr.bf16.mxu1 %v16383_v58  ;;  %v6137_v30 = vld [vmem:[#allocation4 + $0x21] sm:$0xff]  ;;  %v6138_v14 = vld [vmem:[#allocation4 + $0x29] sm:$0xff]  ;;  %v6352_v44 = vld [vmem:[#allocation4 + $0x12] sm:$0xff] }
 0x624   :  { %11539 = vmatpush3.bf16.msra.mxu0 %v12050_v18  ;;  %v15165_v43 = vld [vmem:[#allocation4 + $0x20] sm:$0xff]  ;;  %v15167_v61 = vld [vmem:[#allocation4 + $0x28] sm:$0xff]  ;;  %v6144_v19 = vpack.c.bf16 %v6138_v14, %v6137_v30  ;;  %v12056_v18 = vld [vmem:[%s16243_s3 + $0x50] sm:$0xff]  }
 0x625   :  { %11584 = vmatprep.subr.bf16.mxu0 %v16383_v58  ;;  %v6126_v4 = vpack.c.bf16 %v15167_v61, %v15165_v43  ;;  %v6353_v60 = vld [vmem:[#allocation4 + $0x1a] sm:$0xff]  ;;  %v6355_v30 = vld [vmem:[#allocation4 + $0x2a] sm:$0xff]  ;;  %v6356_v37 = vld [vmem:[#allocation4 + $0x32] sm:$0xff] }
 0x626   :  { %11563 = vmatpush3.bf16.msra.mxu1 %v12052_v53  ;;  %v15223_v17 = vld [vmem:[#allocation4 + $0x1e] sm:$0xff]  ;;  %v6360_v53 = vpack.c.bf16 %v6353_v60, %v6352_v44  ;;  %v15236_v14 = vld [vmem:[#allocation4 + $0x26] sm:$0xff]  ;;  %v6740_v44 = vpack.c.bf16 %v15150_v7, %v15128_v35 }
 0x627   :  { %11497 = vmatmul.mubr.msk.bf16.gmra.mxu0 %vm1439_vm6, %v6143_v16  ;;  %11608 = vmatprep.subr.bf16.mxu1 %v16383_v58  ;;  %v6487_v16 = vpack.c.bf16 %v15223_v17, %v15221_v8  ;;  %v15250_v63 = vld [vmem:[#allocation4 + $0x3e] sm:$0xff]  ;;  %v15260_v46 = vld [vmem:[#allocation4 + $0x46] sm:$0xff] }
 0x628   :  { %11521 = vmatmul.mubr.msk.bf16.gmra.mxu1 %vm1439_vm6, %v6125_v42  ;;  %11500 = vmatprep.mubr.msk.bf16.mxu0 %vm12204_vm2, %v16383_v58  ;;  %v6354_v42 = vld [vmem:[#allocation4 + $0x22] sm:$0xff]  ;;  %v6606_v35 = vld [vmem:[#allocation4 + $0x17] sm:$0xff] }
 0x629   :  { %11524 = vmatprep.mubr.msk.bf16.mxu1 %vm12204_vm2, %v16383_v58  ;;  %v6358_v11 = vld [vmem:[#allocation4 + $0x42] sm:$0xff] }
 0x62a   :  { %v6363_v15 = vpack.c.bf16 %v6358_v11, %v6358_v11  ;;  %v12059_v60 = vld [vmem:[%s16243_s3 + $0x78] sm:$0xff]  }
 0x62b   :  { %v6607_v7 = vld [vmem:[#allocation4 + $0x1f] sm:$0xff] }
 0x62f   :  { %11501 = vmatmul.mubr.msk.bf16.gmra.mxu0 %vm1439_vm6, %v6144_v19  ;;  %v15238_v19 = vld [vmem:[#allocation4 + $0x2e] sm:$0xff] }
 0x630   :  { %11525 = vmatmul.mubr.msk.bf16.gmra.mxu1 %vm1439_vm6, %v6126_v4  ;;  %11504 = vmatprep.mubr.msk.bf16.mxu0 %vm12204_vm2, %v16383_v58  ;;  %v6361_v4 = vpack.c.bf16 %v6355_v30, %v6354_v42  ;;  %v6488_v41 = vpack.c.bf16 %v15238_v19, %v15236_v14  ;;  %v6741_v42 = vpack.c.bf16 %v15165_v43, %v15152_v62  ;;  %v6608_v30 = vld [vmem:[#allocation4 + $0x27] sm:$0xff]  ;;  %v6610_v62 = vld [vmem:[#allocation4 + $0x37] sm:$0xff]  ;;  %v6611_v43 = vld [vmem:[#allocation4 + $0x3f] sm:$0xff] }
 0x631   :  { %11528 = vmatprep.mubr.msk.bf16.mxu1 %vm12204_vm2, %v16383_v58 }
 0x637   :  { %11505 = vmatmul.mubr.msk.bf16.gmra.mxu0 %vm1439_vm6, %v6145_v1  ;;  %v6357_v1 = vld [vmem:[#allocation4 + $0x3a] sm:$0xff] }
 0x638   :  { %11529 = vmatmul.mubr.msk.bf16.gmra.mxu1 %vm1439_vm6, %v6127_v27  ;;  %11508 = vmatprep.mubr.msk.bf16.mxu0 %vm12204_vm2, %v16383_v58  ;;  %v15248_v27 = vld [vmem:[#allocation4 + $0x36] sm:$0xff] }
 0x639   :  { %11532 = vmatprep.mubr.msk.bf16.mxu1 %vm12204_vm2, %v16383_v58 }
 0x63f   :  { %11509 = vmatmul.mubr.msk.bf16.gmra.mxu0 %vm1439_vm6, %v6146_v56  ;;  %v6362_v56 = vpack.c.bf16 %v6357_v1, %v6356_v37  ;;  %v6742_v37 = vpack.c.bf16 %v15177_v28, %v15167_v61  ;;  %v6616_v1 = vpack.c.bf16 %v6611_v43, %v6610_v62  ;;  %v6612_v61 = vld [vmem:[#allocation4 + $0x47] sm:$0xff]  ;;  %v6864_v62 = vld [vmem:[#allocation4 + $0x3c] sm:$0xff] }
 0x640   :  { %11533 = vmatmul.mubr.msk.bf16.gmra.mxu1 %vm1439_vm6, %v6128_v45  ;;  %11540 = vmatprep.mubr.msk.bf16.mxu0 %vm12204_vm2, %v16383_v58  ;;  %v6489_v45 = vpack.c.bf16 %v15250_v63, %v15248_v27  ;;  %v6739_v28 = vld [vmem:[#allocation4 + $0x48] sm:$0xff] }
 0x641   :  { %11564 = vmatprep.mubr.msk.bf16.mxu1 %vm12204_vm2, %v16383_v58  ;;  %v6744_v11 = vpack.c.bf16 %v6739_v28, %v6739_v28  ;;  %v6865_v43 = vld [vmem:[#allocation4 + $0x44] sm:$0xff] }
 0x647   :  { %11541 = vmatmul.mubr.msk.bf16.vlgmr.msra.gmra.mxu0 %vm1439_vm6, %v6359_v0  ;;  %v6604_v0 = vld [vmem:[#allocation4 + $0x7] sm:$0xff] }
 0x648   :  { %11565 = vmatmul.mubr.msk.bf16.vlgmr.msra.gmra.mxu1 %vm1439_vm6, %v6486_v23  ;;  %11585 = vmatpush3.bf16.msra.mxu0 %v12053_v6  ;;  %v6490_v6 = vpack.c.bf16 %v15260_v46, %v15260_v46  ;;  %v6605_v23 = vld [vmem:[#allocation4 + $0xf] sm:$0xff] }
 0x649   :  { %11544 = vmatprep.mubr.msk.bf16.mxu0 %vm12204_vm2, %v16383_v58  ;;  %11568 = vmatprep.mubr.msk.bf16.mxu1 %vm12204_vm2, %v16383_v58 }
 0x64a   :  { %11586 = vmatprep.subr.bf16.mxu0 %v16383_v58  ;;  %11609 = vmatpush3.bf16.msra.mxu1 %v12055_v57  ;;  %v12057_v57 = vld [vmem:[%s16243_s3 + $0x68] sm:$0xff]  }
 0x64b   :  { %11610 = vmatprep.subr.bf16.mxu1 %v16383_v58 }
 0x64c   :  { %11587 = vmatpush3.bf16.msra.mxu0 %v12054_v26  ;;  %v6613_v26 = vpack.c.bf16 %v6605_v23, %v6604_v0  ;;  %v12061_v0 = vld [vmem:[%s16243_s3 + $0x88] sm:$0xff]  }
 0x64d   :  { %11632 = vmatprep.subr.bf16.mxu0 %v16383_v58 }
 0x64e   :  { %11611 = vmatpush3.bf16.msra.mxu1 %v12056_v18  ;;  %v12058_v18 = vld [vmem:[%s16243_s3 + $0x60] sm:$0xff]  }
 0x64f   :  { %11545 = vmatmul.mubr.msk.bf16.gmra.mxu0 %vm1439_vm6, %v6360_v53  ;;  %11656 = vmatprep.subr.bf16.mxu1 %v16383_v58  ;;  %v12060_v53 = vld [vmem:[%s16243_s3 + $0x70] sm:$0xff]  }
 0x650   :  { %11569 = vmatmul.mubr.msk.bf16.gmra.mxu1 %vm1439_vm6, %v6487_v16  ;;  %11548 = vmatprep.mubr.msk.bf16.mxu0 %vm12204_vm2, %v16383_v58  ;;  %v6614_v16 = vpack.c.bf16 %v6607_v7, %v6606_v35  ;;  %v6988_v35 = vld [vmem:[#allocation4 + $0x25] sm:$0xff] }
 0x651   :  { %11572 = vmatprep.mubr.msk.bf16.mxu1 %vm12204_vm2, %v16383_v58 }
 0x657   :  { %11549 = vmatmul.mubr.msk.bf16.gmra.mxu0 %vm1439_vm6, %v6361_v4  ;;  %v6609_v4 = vld [vmem:[#allocation4 + $0x2f] sm:$0xff] }
 0x658   :  { %11573 = vmatmul.mubr.msk.bf16.gmra.mxu1 %vm1439_vm6, %v6488_v41  ;;  %11552 = vmatprep.mubr.msk.bf16.mxu0 %vm12204_vm2, %v16383_v58  ;;  %v6615_v41 = vpack.c.bf16 %v6609_v4, %v6608_v30  ;;  %v6989_v30 = vld [vmem:[#allocation4 + $0x2d] sm:$0xff]  ;;  %v6990_v4 = vld [vmem:[#allocation4 + $0x35] sm:$0xff] }
 0x659   :  { %11576 = vmatprep.mubr.msk.bf16.mxu1 %vm12204_vm2, %v16383_v58 }
 0x65f   :  { %11553 = vmatmul.mubr.msk.bf16.gmra.mxu0 %vm1439_vm6, %v6362_v56  ;;  %v6743_v56 = vpack.c.bf16 %v15189_v29, %v15179_v2  ;;  %v6858_v2 = vld [vmem:[#allocation4 + $0xc] sm:$0xff]  ;;  %v6859_v29 = vld [vmem:[#allocation4 + $0x14] sm:$0xff] }
 0x660   :  { %11577 = vmatmul.mubr.msk.bf16.gmra.mxu1 %vm1439_vm6, %v6489_v45  ;;  %11556 = vmatprep.mubr.msk.bf16.mxu0 %vm12204_vm2, %v16383_v58  ;;  %v6617_v45 = vpack.c.bf16 %v6612_v61, %v6612_v61  ;;  %v6867_v23 = vpack.c.bf16 %v6859_v29, %v6858_v2  ;;  %v6870_v61 = vpack.c.bf16 %v6865_v43, %v6864_v62 }
 0x661   :  { %11580 = vmatprep.mubr.msk.bf16.mxu1 %vm12204_vm2, %v16383_v58 }
 0x667   :  { %11557 = vmatmul.mubr.msk.bf16.gmra.mxu0 %vm1439_vm6, %v6363_v15  ;;  %v6985_v15 = vld [vmem:[#allocation4 + $0xd] sm:$0xff] }
 0x668   :  { %11581 = vmatmul.mubr.msk.bf16.gmra.mxu1 %vm1439_vm6, %v6490_v6  ;;  %11588 = vmatprep.mubr.msk.bf16.mxu0 %vm12204_vm2, %v16383_v58  ;;  %v6986_v6 = vld [vmem:[#allocation4 + $0x15] sm:$0xff] }
 0x669   :  { %11612 = vmatprep.mubr.msk.bf16.mxu1 %vm12204_vm2, %v16383_v58 }
 0x66f   :  { %11589 = vmatmul.mubr.msk.bf16.vlgmr.msra.gmra.mxu0 %vm1439_vm6, %v6613_v26  ;;  %v12062_v26 = vld [vmem:[%s16243_s3 + $0x80] sm:$0xff]  }
 0x670   :  { %11613 = vmatmul.mubr.msk.bf16.vlgmr.msra.gmra.mxu1 %vm1439_vm6, %v6740_v44  ;;  %11633 = vmatpush3.bf16.msra.mxu0 %v12057_v57  ;;  %v6994_v57 = vpack.c.bf16 %v6986_v6, %v6985_v15  ;;  %v6860_v44 = vld [vmem:[#allocation4 + $0x1c] sm:$0xff]  ;;  %v7121_v15 = vpack.c.bf16 %v15221_v8, %v15199_v21  ;;  %v7122_v6 = vpack.c.bf16 %v15236_v14, %v15223_v17  ;;  %v7120_v8 = vld [vmem:[#allocation4 + $0x4e] sm:$0xff] }
 0x671   :  { %11592 = vmatprep.mubr.msk.bf16.mxu0 %vm12204_vm2, %v16383_v58  ;;  %11616 = vmatprep.mubr.msk.bf16.mxu1 %vm12204_vm2, %v16383_v58  ;;  %v7124_v21 = vpack.c.bf16 %v15260_v46, %v15250_v63  ;;  %v7125_v17 = vpack.c.bf16 %v7120_v8, %v7120_v8 }
 0x672   :  { %11634 = vmatprep.subr.bf16.mxu0 %v16383_v58  ;;  %11657 = vmatpush3.bf16.msra.mxu1 %v12059_v60  ;;  %v6861_v60 = vld [vmem:[#allocation4 + $0x24] sm:$0xff] }
 0x673   :  { %11658 = vmatprep.subr.bf16.mxu1 %v16383_v58  ;;  %v6868_v7 = vpack.c.bf16 %v6861_v60, %v6860_v44 }
 0x674   :  { %11635 = vmatpush3.bf16.msra.mxu0 %v12058_v18  ;;  %v6987_v18 = vld [vmem:[#allocation4 + $0x1d] sm:$0xff] }
 0x675   :  { %11680 = vmatprep.subr.bf16.mxu0 %v16383_v58 }
 0x676   :  { %11659 = vmatpush3.bf16.msra.mxu1 %v12060_v53  ;;  %v6995_v53 = vpack.c.bf16 %v6988_v35, %v6987_v18 }
 0x677   :  { %11593 = vmatmul.mubr.msk.bf16.gmra.mxu0 %vm1439_vm6, %v6614_v16  ;;  %11704 = vmatprep.subr.bf16.mxu1 %v16383_v58  ;;  %v6862_v16 = vld [vmem:[#allocation4 + $0x2c] sm:$0xff] }
 0x678   :  { %11617 = vmatmul.mubr.msk.bf16.gmra.mxu1 %vm1439_vm6, %v6741_v42  ;;  %11596 = vmatprep.mubr.msk.bf16.mxu0 %vm12204_vm2, %v16383_v58  ;;  %v6863_v42 = vld [vmem:[#allocation4 + $0x34] sm:$0xff] }
 0x679   :  { %11620 = vmatprep.mubr.msk.bf16.mxu1 %vm12204_vm2, %v16383_v58 }
 0x67f   :  { %11597 = vmatmul.mubr.msk.bf16.gmra.mxu0 %vm1439_vm6, %v6615_v41  ;;  %v6869_v41 = vpack.c.bf16 %v6863_v42, %v6862_v16 }
 0x680   :  { %11621 = vmatmul.mubr.msk.bf16.gmra.mxu1 %vm1439_vm6, %v6742_v37  ;;  %11600 = vmatprep.mubr.msk.bf16.mxu0 %vm12204_vm2, %v16383_v58  ;;  %v6996_v37 = vpack.c.bf16 %v6990_v4, %v6989_v30 }
 0x681   :  { %11624 = vmatprep.mubr.msk.bf16.mxu1 %vm12204_vm2, %v16383_v58 }
 0x687   :  { %11601 = vmatmul.mubr.msk.bf16.gmra.mxu0 %vm1439_vm6, %v6616_v1  ;;  %v6991_v1 = vld [vmem:[#allocation4 + $0x3d] sm:$0xff] }
 0x688   :  { %11625 = vmatmul.mubr.msk.bf16.gmra.mxu1 %vm1439_vm6, %v6743_v56  ;;  %11604 = vmatprep.mubr.msk.bf16.mxu0 %vm12204_vm2, %v16383_v58  ;;  %v6992_v56 = vld [vmem:[#allocation4 + $0x45] sm:$0xff] }
 0x689   :  { %11628 = vmatprep.mubr.msk.bf16.mxu1 %vm12204_vm2, %v16383_v58  ;;  %v6997_v28 = vpack.c.bf16 %v6992_v56, %v6991_v1 }
 0x68f   :  { %11605 = vmatmul.mubr.msk.bf16.gmra.mxu0 %vm1439_vm6, %v6617_v45  ;;  %v6866_v45 = vld [vmem:[#allocation4 + $0x4c] sm:$0xff] }
 0x690   :  { %11629 = vmatmul.mubr.msk.bf16.gmra.mxu1 %vm1439_vm6, %v6744_v11  ;;  %11636 = vmatprep.mubr.msk.bf16.mxu0 %vm12204_vm2, %v16383_v58  ;;  %v6993_v11 = vld [vmem:[#allocation4 + $0x4d] sm:$0xff]  ;;  %v6871_v2 = vpack.c.bf16 %v6866_v45, %v6866_v45 }
 0x691   :  { %11660 = vmatprep.mubr.msk.bf16.mxu1 %vm12204_vm2, %v16383_v58  ;;  %v6998_v29 = vpack.c.bf16 %v6993_v11, %v6993_v11 }
 0x697   :  { %11637 = vmatmul.mubr.msk.bf16.vlgmr.msra.gmra.mxu0 %vm1439_vm6, %v6867_v23 }
 0x698   :  { %11661 = vmatmul.mubr.msk.bf16.vlgmr.msra.gmra.mxu1 %vm1439_vm6, %v6994_v57  ;;  %11681 = vmatpush3.bf16.msra.mxu0 %v12061_v0  ;;  %v7123_v0 = vpack.c.bf16 %v15248_v27, %v15238_v19 }
 0x699   :  { %11640 = vmatprep.mubr.msk.bf16.mxu0 %vm12204_vm2, %v16383_v58  ;;  %11664 = vmatprep.mubr.msk.bf16.mxu1 %vm12204_vm2, %v16383_v58 }
 0x69a   :  { %11682 = vmatprep.subr.bf16.mxu0 %v16383_v58 }
 0x69c   :  { %11683 = vmatpush3.bf16.msra.mxu0 %v12062_v26 }
 0x69d   :  { %11728 = vmatprep.subr.bf16.mxu0 %v16383_v58 }
 0x69f   :  { %11641 = vmatmul.mubr.msk.bf16.gmra.mxu0 %vm1439_vm6, %v6868_v7 }
 0x6a0   :  { %11665 = vmatmul.mubr.msk.bf16.gmra.mxu1 %vm1439_vm6, %v6995_v53  ;;  %11644 = vmatprep.mubr.msk.bf16.mxu0 %vm12204_vm2, %v16383_v58 }
 0x6a1   :  { %11668 = vmatprep.mubr.msk.bf16.mxu1 %vm12204_vm2, %v16383_v58 }
 0x6a7   :  { %11645 = vmatmul.mubr.msk.bf16.gmra.mxu0 %vm1439_vm6, %v6869_v41 }
 0x6a8   :  { %11669 = vmatmul.mubr.msk.bf16.gmra.mxu1 %vm1439_vm6, %v6996_v37  ;;  %11648 = vmatprep.mubr.msk.bf16.mxu0 %vm12204_vm2, %v16383_v58 }
 0x6a9   :  { %11672 = vmatprep.mubr.msk.bf16.mxu1 %vm12204_vm2, %v16383_v58 }
 0x6af   :  { %11649 = vmatmul.mubr.msk.bf16.gmra.mxu0 %vm1439_vm6, %v6870_v61 }
 0x6b0   :  { %11673 = vmatmul.mubr.msk.bf16.gmra.mxu1 %vm1439_vm6, %v6997_v28  ;;  %11652 = vmatprep.mubr.msk.bf16.mxu0 %vm12204_vm2, %v16383_v58 }
 0x6b1   :  { %11676 = vmatprep.mubr.msk.bf16.mxu1 %vm12204_vm2, %v16383_v58 }
 0x6b7   :  { %11653 = vmatmul.mubr.msk.bf16.gmra.mxu0 %vm1439_vm6, %v6871_v2 }
 0x6b8   :  { %11677 = vmatmul.mubr.msk.bf16.gmra.mxu1 %vm1439_vm6, %v6998_v29  ;;  %11684 = vmatprep.mubr.msk.bf16.mxu0 %vm12204_vm2, %v16383_v58 }
 0x6b9   :  { %11708 = vmatprep.mubr.msk.bf16.mxu1 %vm12204_vm2, %v16383_v58 }
 0x6bf   :  { %11685 = vmatmul.mubr.msk.bf16.vlgmr.msra.gmra.mxu0 %vm1439_vm6, %v7121_v15 }
 0x6c0   :  { %11688 = vmatprep.mubr.msk.bf16.mxu0 %vm12204_vm2, %v16383_v58 }
 0x6c7   :  { %11689 = vmatmul.mubr.msk.bf16.gmra.mxu0 %vm1439_vm6, %v7122_v6 }
 0x6c8   :  { %11692 = vmatprep.mubr.msk.bf16.mxu0 %vm12204_vm2, %v16383_v58 }
 0x6cf   :  { %11693 = vmatmul.mubr.msk.bf16.gmra.mxu0 %vm1439_vm6, %v7123_v0 }
 0x6d0   :  { %11696 = vmatprep.mubr.msk.bf16.mxu0 %vm12204_vm2, %v16383_v58 }
 0x6d7   :  { %11697 = vmatmul.mubr.msk.bf16.gmra.mxu0 %vm1439_vm6, %v7124_v21 }
 0x6d8   :  { %11700 = vmatprep.mubr.msk.bf16.mxu0 %vm12204_vm2, %v16383_v58 }
 0x6df   :  { %v6213_v14 = vpop.f32.mrf.mxu0  ;;  %11701 = vmatmul.mubr.msk.bf16.gmra.mxu0 %vm1439_vm6, %v7125_v17 }
 0x6e0   :  { %v6312_v23 = vpop.f32.mrf.mxu1  ;;  %11732 = vmatprep.mubr.msk.bf16.mxu0 %vm12204_vm2, %v16383_v58 }
 0x6e1   :  { %v6313_v19 = vadd.f32 %v6312_v23, %v6213_v14  ;;  %v11494_v27 = vpop.f32.mrf.mxu0 }
 0x6e2   :  { %v11518_v57 = vpop.f32.mrf.mxu1 }
 0x6e3   :  { %v6216_v26 = vpop.f32.mrf.mxu0 }
 0x6e4   :  { %v6315_v44 = vpop.f32.mrf.mxu1 }
 0x6e5   :  { %v6316_v63 = vadd.f32 %v6315_v44, %v6216_v26  ;;  %v11495_v46 = vpop.f32.mrf.mxu0 }
 0x6e6   :  { %v11519_v60 = vpop.f32.mrf.mxu1 }
 0x6e7   :  { %v6221_v18 = vpop.f32.mrf.mxu0 }
 0x6e8   :  { %v6320_v35 = vpop.f32.mrf.mxu1 }
 0x6e9   :  { %v6321_v7 = vadd.f32 %v6320_v35, %v6221_v18  ;;  %v11498_v53 = vpop.f32.mrf.mxu0 }
 0x6ea   :  { %v11522_v16 = vpop.f32.mrf.mxu1 }
 0x6eb   :  { %v6224_v42 = vpop.f32.mrf.mxu0 }
 0x6ec   :  { %v6323_v30 = vpop.f32.mrf.mxu1 }
 0x6ed   :  { %v6324_v4 = vadd.f32 %v6323_v30, %v6224_v42  ;;  %v11499_v41 = vpop.f32.mrf.mxu0 }
 0x6ee   :  { %v11523_v37 = vpop.f32.mrf.mxu1 }
 0x6ef   :  { %v6229_v62 = vpop.f32.mrf.mxu0 }
 0x6f0   :  { %v6328_v43 = vpop.f32.mrf.mxu1 }
 0x6f1   :  { %v6329_v1 = vadd.f32 %v6328_v43, %v6229_v62  ;;  %v11502_v56 = vpop.f32.mrf.mxu0 }
 0x6f2   :  { %v11526_v61 = vpop.f32.mrf.mxu1 }
 0x6f3   :  { %v6232_v28 = vpop.f32.mrf.mxu0 }
 0x6f4   :  { %v6331_v45 = vpop.f32.mrf.mxu1 }
 0x6f5   :  { %v6332_v11 = vadd.f32 %v6331_v45, %v6232_v28  ;;  %v11503_v2 = vpop.f32.mrf.mxu0 }
 0x6f6   :  { %v11527_v29 = vpop.f32.mrf.mxu1 }
 0x6f7   :  { %v6237_v15 = vpop.f32.mrf.mxu0 }
 0x6f8   :  { %v6336_v6 = vpop.f32.mrf.mxu1 }
 0x6f9   :  { %v6337_v0 = vadd.f32 %v6336_v6, %v6237_v15  ;;  %v11506_v21 = vpop.f32.mrf.mxu0 }
 0x6fa   :  { %v11530_v8 = vpop.f32.mrf.mxu1 }
 0x6fb   :  { %v6240_v17 = vpop.f32.mrf.mxu0 }
 0x6fc   :  { %v6339_v14 = vpop.f32.mrf.mxu1 }
 0x6fd   :  { %v6340_v23 = vadd.f32 %v6339_v14, %v6240_v17  ;;  %v11507_v27 = vpop.f32.mrf.mxu0 }
 0x6fe   :  { %v11531_v57 = vpop.f32.mrf.mxu1 }
 0x6ff   :  { %v6245_v26 = vpop.f32.mrf.mxu0 }
 0x700   :  { %v6344_v44 = vpop.f32.mrf.mxu1 }
 0x701   :  { %v6345_v46 = vadd.f32 %v6344_v44, %v6245_v26  ;;  %v11510_v60 = vpop.f32.mrf.mxu0 }
 0x702   :  { %v11534_v18 = vpop.f32.mrf.mxu1 }
 0x703   :  { %v6248_v35 = vpop.f32.mrf.mxu0 }
 0x704   :  { %v6347_v53 = vpop.f32.mrf.mxu1 }
 0x705   :  { %v11511_v16 = vpop.f32.mrf.mxu0 }
 0x706   :  { %v11535_v42 = vpop.f32.mrf.mxu1 }
 0x707   :  { %v6430_v30 = vpop.f32.mrf.mxu0 }
 0x708   :  { %v6468_v41 = vadd.f32 %v6430_v30, %v6313_v19  ;;  %v6557_v37 = vpop.f32.mrf.mxu1 }
 0x709   :  { %v11542_v62 = vpop.f32.mrf.mxu0 }
 0x70a   :  { %v6595_v43 = vadd.f32 %v6557_v37, %v6468_v41  ;;  %v11566_v56 = vpop.f32.mrf.mxu1 }
 0x70b   :  { %v6433_v61 = vpop.f32.mrf.mxu0 }
 0x70c   :  { %v6469_v28 = vadd.f32 %v6433_v61, %v6316_v63  ;;  %v6560_v45 = vpop.f32.mrf.mxu1 }
 0x70d   :  { %v11543_v2 = vpop.f32.mrf.mxu0 }
 0x70e   :  { %v6596_v29 = vadd.f32 %v6560_v45, %v6469_v28  ;;  %v11567_v15 = vpop.f32.mrf.mxu1 }
 0x70f   :  { %v6438_v6 = vpop.f32.mrf.mxu0 }
 0x710   :  { %v6470_v21 = vadd.f32 %v6438_v6, %v6321_v7  ;;  %v6565_v8 = vpop.f32.mrf.mxu1 }
 0x711   :  { %v11546_v17 = vpop.f32.mrf.mxu0 }
 0x712   :  { %v6597_v14 = vadd.f32 %v6565_v8, %v6470_v21  ;;  %v11570_v27 = vpop.f32.mrf.mxu1 }
 0x713   :  { %v6441_v57 = vpop.f32.mrf.mxu0 }
 0x714   :  { %v6471_v26 = vadd.f32 %v6441_v57, %v6324_v4  ;;  %v6568_v44 = vpop.f32.mrf.mxu1 }
 0x715   :  { %v11547_v19 = vpop.f32.mrf.mxu0 }
 0x716   :  { %v6598_v60 = vadd.f32 %v6568_v44, %v6471_v26  ;;  %v11571_v18 = vpop.f32.mrf.mxu1 }
 0x717   :  { %v6446_v35 = vpop.f32.mrf.mxu0 }
 0x718   :  { %v6472_v53 = vadd.f32 %v6446_v35, %v6329_v1  ;;  %v6573_v16 = vpop.f32.mrf.mxu1 }
 0x719   :  { %v11550_v63 = vpop.f32.mrf.mxu0 }
 0x71a   :  { %v6599_v42 = vadd.f32 %v6573_v16, %v6472_v53  ;;  %v11574_v30 = vpop.f32.mrf.mxu1 }
 0x71b   :  { %v6449_v41 = vpop.f32.mrf.mxu0 }
 0x71c   :  { %v6473_v37 = vadd.f32 %v6449_v41, %v6332_v11  ;;  %v6576_v62 = vpop.f32.mrf.mxu1 }
 0x71d   :  { %v11551_v7 = vpop.f32.mrf.mxu0 }
 0x71e   :  { %v6600_v56 = vadd.f32 %v6576_v62, %v6473_v37  ;;  %v11575_v61 = vpop.f32.mrf.mxu1 }
 0x71f   :  { %v6454_v28 = vpop.f32.mrf.mxu0 }
 0x720   :  { %v6474_v45 = vadd.f32 %v6454_v28, %v6337_v0  ;;  %v6581_v2 = vpop.f32.mrf.mxu1 }
 0x721   :  { %v11554_v4 = vpop.f32.mrf.mxu0 }
 0x722   :  { %v6601_v15 = vadd.f32 %v6581_v2, %v6474_v45  ;;  %v11578_v6 = vpop.f32.mrf.mxu1 }
 0x723   :  { %v6457_v21 = vpop.f32.mrf.mxu0 }
 0x724   :  { %v6475_v8 = vadd.f32 %v6457_v21, %v6340_v23  ;;  %v6584_v17 = vpop.f32.mrf.mxu1 }
 0x725   :  { %v11555_v1 = vpop.f32.mrf.mxu0 }
 0x726   :  { %v6602_v27 = vadd.f32 %v6584_v17, %v6475_v8  ;;  %v11579_v57 = vpop.f32.mrf.mxu1 }
 0x727   :  { %v6462_v26 = vpop.f32.mrf.mxu0 }
 0x728   :  { %v6476_v44 = vadd.f32 %v6462_v26, %v6345_v46  ;;  %v6589_v19 = vpop.f32.mrf.mxu1 }
 0x729   :  { %v11558_v11 = vpop.f32.mrf.mxu0 }
 0x72a   :  { %v6603_v18 = vadd.f32 %v6589_v19, %v6476_v44  ;;  %v11582_v35 = vpop.f32.mrf.mxu1 }
 0x72b   :  { %v6465_v53 = vpop.f32.mrf.mxu0 }
 0x72c   :  { %v6592_v16 = vpop.f32.mrf.mxu1 }
 0x72d   :  { %v11559_v63 = vpop.f32.mrf.mxu0 }
 0x72e   :  { %v11583_v0 = vpop.f32.mrf.mxu1 }
 0x72f   :  { %v6684_v30 = vpop.f32.mrf.mxu0 }
 0x730   :  { %v6722_v41 = vadd.f32 %v6684_v30, %v6595_v43  ;;  %v6811_v37 = vpop.f32.mrf.mxu1 }
 0x731   :  { %v11590_v62 = vpop.f32.mrf.mxu0 }
 0x732   :  { %v15385_v7 = vadd.f32 %v6811_v37, %v6722_v41  ;;  %v11614_v23 = vpop.f32.mrf.mxu1 }
 0x733   :  { %v6687_v61 = vpop.f32.mrf.mxu0 }
 0x734   :  { %v6723_v28 = vadd.f32 %v6687_v61, %v6596_v29  ;;  %v6814_v45 = vpop.f32.mrf.mxu1 }
 0x735   :  { %v11591_v2 = vpop.f32.mrf.mxu0 }
 0x736   :  { %v15387_v46 = vadd.f32 %v6814_v45, %v6723_v28  ;;  %v11615_v4 = vpop.f32.mrf.mxu1 }
 0x737   :  { %v6692_v6 = vpop.f32.mrf.mxu0 }
 0x738   :  { %v6724_v21 = vadd.f32 %v6692_v6, %v6597_v14  ;;  %v6819_v8 = vpop.f32.mrf.mxu1 }
 0x739   :  { %v11594_v17 = vpop.f32.mrf.mxu0 }
 0x73a   :  { %v15389_v1 = vadd.f32 %v6819_v8, %v6724_v21  ;;  %v11618_v57 = vpop.f32.mrf.mxu1 }
 0x73b   :  { %v6695_v43 = vpop.f32.mrf.mxu0 }
 0x73c   :  { %v6725_v26 = vadd.f32 %v6695_v43, %v6598_v60  ;;  %v6822_v44 = vpop.f32.mrf.mxu1 }
 0x73d   :  { %v11595_v19 = vpop.f32.mrf.mxu0 }
 0x73e   :  { %v15391_v11 = vadd.f32 %v6822_v44, %v6725_v26  ;;  %v11619_v35 = vpop.f32.mrf.mxu1 }
 0x73f   :  { %v6700_v29 = vpop.f32.mrf.mxu0 }
 0x740   :  { %v6726_v53 = vadd.f32 %v6700_v29, %v6599_v42  ;;  %v6827_v16 = vpop.f32.mrf.mxu1 }
 0x741   :  { %v11598_v63 = vpop.f32.mrf.mxu0 }
 0x742   :  { %v15393_v0 = vadd.f32 %v6827_v16, %v6726_v53  ;;  %v11622_v30 = vpop.f32.mrf.mxu1 }
 0x743   :  { %v6703_v14 = vpop.f32.mrf.mxu0 }
 0x744   :  { %v6727_v41 = vadd.f32 %v6703_v14, %v6600_v56  ;;  %v6830_v37 = vpop.f32.mrf.mxu1 }
 0x745   :  { %v11599_v62 = vpop.f32.mrf.mxu0 }
 0x746   :  { %v15395_v23 = vadd.f32 %v6830_v37, %v6727_v41  ;;  %v11623_v61 = vpop.f32.mrf.mxu1 }
 0x747   :  { %v6708_v60 = vpop.f32.mrf.mxu0 }
 0x748   :  { %v6728_v28 = vadd.f32 %v6708_v60, %v6601_v15  ;;  %v6835_v45 = vpop.f32.mrf.mxu1  ;;  %v12063_v15 = vld [vmem:[%s16244_s4 + $0x8] sm:$0xff]  }
 0x749   :  { %v11602_v2 = vpop.f32.mrf.mxu0  ;;  %11705 = vmatpush3.bf16.msra.mxu1 %v12063_v15 }
 0x74a   :  { %v15397_v4 = vadd.f32 %v6835_v45, %v6728_v28  ;;  %v11626_v6 = vpop.f32.mrf.mxu1  ;;  %11706 = vmatprep.subr.bf16.mxu1 %v16383_v58 }
 0x74b   :  { %v6711_v42 = vpop.f32.mrf.mxu0 }
 0x74c   :  { %v6729_v21 = vadd.f32 %v6711_v42, %v6602_v27  ;;  %v6838_v8 = vpop.f32.mrf.mxu1  ;;  %v12064_v27 = vld [vmem:[%s16244_s4] sm:$0xff]  }
 0x74d   :  { %v11603_v17 = vpop.f32.mrf.mxu0  ;;  %11707 = vmatpush3.bf16.msra.mxu1 %v12064_v27 }
 0x74e   :  { %v15399_v57 = vadd.f32 %v6838_v8, %v6729_v21  ;;  %v11627_v43 = vpop.f32.mrf.mxu1  ;;  %11752 = vmatprep.subr.bf16.mxu1 %v16383_v58 }
 0x74f   :  { %v6716_v56 = vpop.f32.mrf.mxu0 }
 0x750   :  { %v6730_v26 = vadd.f32 %v6716_v56, %v6603_v18  ;;  %v6843_v44 = vpop.f32.mrf.mxu1 }
 0x751   :  { %v11606_v19 = vpop.f32.mrf.mxu0 }
 0x752   :  { %v15401_v35 = vadd.f32 %v6843_v44, %v6730_v26  ;;  %v11630_v29 = vpop.f32.mrf.mxu1 }
 0x753   :  { %v6719_v53 = vpop.f32.mrf.mxu0 }
 0x754   :  { %v6846_v16 = vpop.f32.mrf.mxu1 }
 0x755   :  { %v11607_v63 = vpop.f32.mrf.mxu0 }
 0x756   :  { %v11631_v18 = vpop.f32.mrf.mxu1 }
 0x757   :  { %v6938_v30 = vpop.f32.mrf.mxu0 }
 0x758   :  { %v7065_v14 = vpop.f32.mrf.mxu1 }
 0x759   :  { %v11638_v41 = vpop.f32.mrf.mxu0 }
 0x75a   :  { %v11662_v37 = vpop.f32.mrf.mxu1 }
 0x75b   :  { %v6941_v62 = vpop.f32.mrf.mxu0 }
 0x75c   :  { %v7068_v61 = vpop.f32.mrf.mxu1 }
 0x75d   :  { %v11639_v60 = vpop.f32.mrf.mxu0 }
 0x75e   :  { %v11663_v28 = vpop.f32.mrf.mxu1 }
 0x75f   :  { %v6946_v45 = vpop.f32.mrf.mxu0 }
 0x760   :  { %v7073_v2 = vpop.f32.mrf.mxu1  ;;  %v6978_v59 = vadd.f32 %v6946_v45, %v15389_v1 }
 0x761   :  { %v11642_v6 = vpop.f32.mrf.mxu0 }
 0x762   :  { %v11666_v42 = vpop.f32.mrf.mxu1 }
 0x763   :  { %v6949_v21 = vpop.f32.mrf.mxu0 }
 0x764   :  { %v7076_v8 = vpop.f32.mrf.mxu1 }
 0x765   :  { %v11643_v17 = vpop.f32.mrf.mxu0 }
 0x766   :  { %v11667_v43 = vpop.f32.mrf.mxu1 }
 0x767   :  { %v6954_v56 = vpop.f32.mrf.mxu0 }
 0x768   :  { %v7081_v26 = vpop.f32.mrf.mxu1 }
 0x769   :  { %v11646_v44 = vpop.f32.mrf.mxu0 }
 0x76a   :  { %v11670_v19 = vpop.f32.mrf.mxu1  ;;  %v6976_v44 = vadd.f32 %v6938_v30, %v15385_v7  ;;  %v6979_v30 = vadd.f32 %v6949_v21, %v15391_v11 }
 0x76b   :  { %v6957_v29 = vpop.f32.mrf.mxu0 }
 0x76c   :  { %v15411_v15 = vpop.f32.mrf.mxu1  ;;  %v7103_v49 = vadd.f32 %v7065_v14, %v6976_v44  ;;  %v7105_v14 = vadd.f32 %v7073_v2, %v6978_v59  ;;  %v7106_v45 = vadd.f32 %v7076_v8, %v6979_v30  ;;  %v6981_v30 = vadd.f32 %v6957_v29, %v15395_v23 }
 0x76d   :  { %v11647_v53 = vpop.f32.mrf.mxu0 }
 0x76e   :  { %v11671_v27 = vpop.f32.mrf.mxu1 }
 0x76f   :  { %v15413_v16 = vpop.f32.mrf.mxu0 }
 0x770   :  { %v15415_v63 = vpop.f32.mrf.mxu1 }
 0x771   :  { %v11650_v18 = vpop.f32.mrf.mxu0 }
 0x772   :  { %v11674_v41 = vpop.f32.mrf.mxu1  ;;  %v6977_v18 = vadd.f32 %v6941_v62, %v15387_v46 }
 0x773   :  { %v15417_v37 = vpop.f32.mrf.mxu0 }
 0x774   :  { %v15419_v60 = vpop.f32.mrf.mxu1 }
 0x775   :  { %v11651_v28 = vpop.f32.mrf.mxu0 }
 0x776   :  { %v11675_v6 = vpop.f32.mrf.mxu1 }
 0x777   :  { %v15421_v42 = vpop.f32.mrf.mxu0  ;;  %v7104_v6 = vadd.f32 %v7068_v61, %v6977_v18 }
 0x778   :  { %v15423_v17 = vpop.f32.mrf.mxu1 }
 0x779   :  { %v11654_v43 = vpop.f32.mrf.mxu0 }
 0x77a   :  { %v11678_v19 = vpop.f32.mrf.mxu1 }
 0x77b   :  { %v6973_v53 = vpop.f32.mrf.mxu0 }
 0x77c   :  { %v7100_v27 = vpop.f32.mrf.mxu1  ;;  %v6980_v53 = vadd.f32 %v6954_v56, %v15393_v0 }
 0x77d   :  { %v11655_v51 = vpop.f32.mrf.mxu0 }
 0x77e   :  { %v11679_v41 = vpop.f32.mrf.mxu1 }
 0x77f   :  { %v7192_v24 = vpop.f32.mrf.mxu0 }
 0x780   :  { %v15427_v31 = vadd.f32 %v7192_v24, %v7103_v49 }
 0x781   :  { %v11686_v28 = vpop.f32.mrf.mxu0 }
 0x782   :  { %v7241_v43 = vmul.f32 %v15427_v31, %v14960_v10 }
 0x783   :  { %v7195_v5 = vpop.f32.mrf.mxu0 }
 0x784   :  { %v15432_v7 = vadd.f32 %v7195_v5, %v7104_v6  ;;  %v7274_v44 = vmul.f32 %v7241_v43, %v7241_v43  ;;  %v7250_v49 = vsel %vm1439_vm6, %v7241_v43, 0.0  ;;  %v7107_v43 = vadd.f32 %v7081_v26, %v6980_v53 }
 0x785   :  { %v11687_v51 = vpop.f32.mrf.mxu0  ;;  %v6982_v26 = vadd.f32 %v15413_v16, %v15397_v4 }
 0x786   :  { %v7242_v46 = vmul.f32 %v15432_v7, %v14964_v3  ;;  %v7283_v11 = vsel %vm1439_vm6, %v7274_v44, 0.0 }
 0x787   :  { %v7200_v24 = vpop.f32.mrf.mxu0 }
 0x788   :  { %v7251_v62 = vsel %vm1439_vm6, %v7242_v46, 0.0  ;;  %v7275_v1 = vmul.f32 %v7242_v46, %v7242_v46  ;;  %v15439_v61 = vadd.f32 %v7200_v24, %v7105_v14 }
 0x789   :  { %v7252_v19 = vadd.f32 %v7251_v62, %v7250_v49  ;;  %v11690_v5 = vpop.f32.mrf.mxu0 }
 0x78a   :  { %v7284_v59 = vsel %vm1439_vm6, %v7275_v1, 0.0  ;;  %v7243_v2 = vmul.f32 %v15439_v61, %v14970_v12  ;;  %v7108_v1 = vadd.f32 %v15411_v15, %v6981_v30  ;;  %v6983_v15 = vadd.f32 %v15417_v37, %v15399_v57 }
 0x78b   :  { %v7285_v21 = vadd.f32 %v7284_v59, %v7283_v11  ;;  %v7203_v27 = vpop.f32.mrf.mxu0 }
 0x78c   :  { %v7253_v18 = vsel %vm1439_vm6, %v7243_v2, 0.0  ;;  %v7276_v41 = vmul.f32 %v7243_v2, %v7243_v2  ;;  %v15447_v28 = vadd.f32 %v7203_v27, %v7106_v45 }
 0x78d   :  { %v7254_v6 = vadd.f32 %v7253_v18, %v7252_v19  ;;  %v11691_v8 = vpop.f32.mrf.mxu0 }
 0x78e   :  { %v7286_v0 = vsel %vm1439_vm6, %v7276_v41, 0.0  ;;  %v7244_v56 = vmul.f32 %v15447_v28, %v14985_v25 }
 0x78f   :  { %v7287_v51 = vadd.f32 %v7286_v0, %v7285_v21  ;;  %v7208_v14 = vpop.f32.mrf.mxu0  ;;  %v7109_v21 = vadd.f32 %v15415_v63, %v6982_v26  ;;  %v7110_v0 = vadd.f32 %v15419_v60, %v6983_v15  ;;  %v6984_v63 = vadd.f32 %v15421_v42, %v15401_v35 }
 0x790   :  { %v7255_v44 = vsel %vm1439_vm6, %v7244_v56, 0.0  ;;  %v7277_v46 = vmul.f32 %v7244_v56, %v7244_v56  ;;  %v15454_v24 = vadd.f32 %v7208_v14, %v7107_v43 }
 0x791   :  { %v7256_v49 = vadd.f32 %v7255_v44, %v7254_v6  ;;  %v11694_v62 = vpop.f32.mrf.mxu0 }
 0x792   :  { %v7288_v23 = vsel %vm1439_vm6, %v7277_v46, 0.0  ;;  %v7245_v29 = vmul.f32 %v15454_v24, %v14992_v33 }
 0x793   :  { %v7289_v45 = vadd.f32 %v7288_v23, %v7287_v51  ;;  %v7211_v19 = vpop.f32.mrf.mxu0 }
 0x794   :  { %v7257_v5 = vsel %vm1439_vm6, %v7245_v29, 0.0  ;;  %v7278_v53 = vmul.f32 %v7245_v29, %v7245_v29  ;;  %v15463_v11 = vadd.f32 %v7211_v19, %v7108_v1  ;;  %v7111_v1 = vadd.f32 %v15423_v17, %v6984_v63 }
 0x795   :  { %v7258_v59 = vadd.f32 %v7257_v5, %v7256_v49  ;;  %v11695_v2 = vpop.f32.mrf.mxu0 }
 0x796   :  { %v7290_v4 = vsel %vm1439_vm6, %v7278_v53, 0.0  ;;  %v7246_v16 = vmul.f32 %v15463_v11, %v15004_v32 }
 0x797   :  { %v7291_v27 = vadd.f32 %v7290_v4, %v7289_v45  ;;  %v7216_v18 = vpop.f32.mrf.mxu0 }
 0x798   :  { %v7259_v41 = vsel %vm1439_vm6, %v7246_v16, 0.0  ;;  %v7279_v6 = vmul.f32 %v7246_v16, %v7246_v16  ;;  %v15472_v8 = vadd.f32 %v7216_v18, %v7109_v21 }
 0x799   :  { %v7260_v43 = vadd.f32 %v7259_v41, %v7258_v59  ;;  %v11698_v30 = vpop.f32.mrf.mxu0 }
 0x79a   :  { %v7292_v57 = vsel %vm1439_vm6, %v7279_v6, 0.0  ;;  %v7247_v37 = vmul.f32 %v15472_v8, %v15013_v39 }
 0x79b   :  { %v7293_v56 = vadd.f32 %v7292_v57, %v7291_v27  ;;  %v7219_v51 = vpop.f32.mrf.mxu0 }
 0x79c   :  { %v7261_v14 = vsel %vm1439_vm6, %v7247_v37, 0.0  ;;  %v7280_v44 = vmul.f32 %v7247_v37, %v7247_v37  ;;  %v15481_v46 = vadd.f32 %v7219_v51, %v7110_v0 }
 0x79d   :  { %v7262_v49 = vadd.f32 %v7261_v14, %v7260_v43  ;;  %v11699_v62 = vpop.f32.mrf.mxu0 }
 0x79e   :  { %v7294_v60 = vsel %vm1439_vm6, %v7280_v44, 0.0  ;;  %v7248_v35 = vmul.f32 %v15481_v46, %v15027_v9 }
 0x79f   :  { %v7295_v42 = vadd.f32 %v7294_v60, %v7293_v56  ;;  %v7224_v26 = vpop.f32.mrf.mxu0 }
 0x7a0   :  { %v7263_v23 = vsel %vm1439_vm6, %v7248_v35, 0.0  ;;  %v7281_v29 = vmul.f32 %v7248_v35, %v7248_v35  ;;  %v7238_v45 = vadd.f32 %v7224_v26, %v7111_v1 }
 0x7a1   :  { %v7264_v19 = vadd.f32 %v7263_v23, %v7262_v49  ;;  %v11702_v5 = vpop.f32.mrf.mxu0 }
 0x7a2   :  { %v7296_v53 = vsel %vm1439_vm6, %v7281_v29, 0.0  ;;  %v7249_v59 = vmul.f32 %v7238_v45, %v15031_v13 }
 0x7a3   :  { %v7297_v2 = vadd.f32 %v7296_v53, %v7295_v42  ;;  %v7227_v21 = vpop.f32.mrf.mxu0 }
 0x7a4   :  { %v7265_v17 = vsel %vm1439_vm6, %v7249_v59, 0.0  ;;  %v7282_v15 = vmul.f32 %v7249_v59, %v7249_v59 }
 0x7a5   :  { %v7266_v4 = vadd.f32 %v7265_v17, %v7264_v19  ;;  %v11703_v16 = vpop.f32.mrf.mxu0 }
 0x7a6   :  { %v7298_v27 = vsel %vm1439_vm6, %v7282_v15, 0.0 }
 0x7a7   :  { %v7267_v18 = vrot.slane %v7266_v4, 4  ;;  %v7299_v41 = vadd.f32 %v7298_v27, %v7297_v2 }
 0x7a9   :  { %v7268_v6 = vadd.f32 %v7267_v18, %v7266_v4  ;;  %v7300_v43 = vrot.slane %v7299_v41, 4 }
 0x7ab   :  { %v7269_v30 = vrot.slane %v7268_v6, 2  ;;  %v7301_v0 = vadd.f32 %v7300_v43, %v7299_v41 }
 0x7ad   :  { %v7270_v63 = vadd.f32 %v7269_v30, %v7268_v6  ;;  %v7302_v57 = vrot.slane %v7301_v0, 2 }
 0x7af   :  { %v7271_v37 = vrot.slane %v7270_v63, 1  ;;  %v7303_v56 = vadd.f32 %v7302_v57, %v7301_v0 }
 0x7b1   :  { %v7272_v51 = vadd.f32 %v7271_v37, %v7270_v63  ;;  %v7304_v14 = vrot.slane %v7303_v56, 1 }
 0x7b3   :  { %v7273_v44 = vmul.f32 0.03125, %v7272_v51  ;;  %v7305_v49 = vadd.f32 %v7304_v14, %v7303_v56 }
 0x7b5   :  { %v7306_v62 = vmul.f32 0.03125, %v7305_v49  ;;  %v7307_v1 = vmul.f32 %v7273_v44, %v7273_v44  ;;  %v7319_v60 = vsub.f32 %v7238_v45, %v7273_v44  ;;  %v7311_v35 = vsub.f32 %v15427_v31, %v7273_v44  ;;  %v9806_v31 = vld [vmem:[%s16242_s7 + $0x4] ss:$0 sm:$0xff] }
 0x7b6   :  { %v7312_v42 = vsub.f32 %v15432_v7, %v7273_v44  ;;  %v7313_v26 = vsub.f32 %v15439_v61, %v7273_v44  ;;  %v7314_v23 = vsub.f32 %v15447_v28, %v7273_v44  ;;  %v7315_v29 = vsub.f32 %v15454_v24, %v7273_v44  ;;  %v9807_v24 = vld [vmem:[%s16242_s7 + $0x5] ss:$0 sm:$0xff] }
 0x7b7   :  { %v7308_v19 = vsub.f32 %v7306_v62, %v7307_v1  ;;  %v7316_v5 = vsub.f32 %v15463_v11, %v7273_v44  ;;  %v7317_v53 = vsub.f32 %v15472_v8, %v7273_v44  ;;  %v7318_v59 = vsub.f32 %v15481_v46, %v7273_v44 }
 0x7b9   :  { %v7309_v2 = vadd.f32 1e-05, %v7308_v19 }
 0x7bb   :  { %12091 = vrsqrt.f32 %v7309_v2 }
 0x7c8   :  { %v12092_v45 = vpop.eup %12091 }
 0x7c9   :  { %v7328_v7 = vmul.f32 %v12092_v45, %v7319_v60  ;;  %v7320_v61 = vmul.f32 %v12092_v45, %v7311_v35  ;;  %v7321_v21 = vmul.f32 %v12092_v45, %v7312_v42  ;;  %v7322_v28 = vmul.f32 %v12092_v45, %v7313_v26 }
 0x7ca   :  { %v7323_v11 = vmul.f32 %v12092_v45, %v7314_v23  ;;  %v7324_v17 = vmul.f32 %v12092_v45, %v7315_v29  ;;  %v7325_v8 = vmul.f32 %v12092_v45, %v7316_v5  ;;  %v7326_v15 = vmul.f32 %v12092_v45, %v7317_v53 }
 0x7cb   :  { %v7333_v46 = vmul.f32 %v9806_v31, %v7320_v61  ;;  %v7334_v4 = vmul.f32 %v9806_v31, %v7321_v21  ;;  %v7335_v16 = vmul.f32 %v9806_v31, %v7322_v28  ;;  %v7327_v6 = vmul.f32 %v12092_v45, %v7318_v59  ;;  %v12065_v21 = vld [vmem:[%s16243_s3 + $0xa8] sm:$0xff]   ;;  %v12068_v28 = vld [vmem:[%s16243_s3 + $0x90] sm:$0xff]  }
 0x7cc   :  { %v7336_v27 = vmul.f32 %v9806_v31, %v7323_v11  ;;  %v7337_v18 = vmul.f32 %v9806_v31, %v7324_v17  ;;  %v7338_v41 = vmul.f32 %v9806_v31, %v7325_v8  ;;  %v7339_v56 = vmul.f32 %v9806_v31, %v7326_v15  ;;  %11729 = vmatpush3.bf16.msra.mxu0 %v12065_v21 }
 0x7cd   :  { %v7346_v43 = vadd.f32 %v9807_v24, %v7333_v46  ;;  %v7347_v30 = vadd.f32 %v9807_v24, %v7334_v4  ;;  %v7348_v0 = vadd.f32 %v9807_v24, %v7335_v16  ;;  %v7340_v60 = vmul.f32 %v9806_v31, %v7327_v6  ;;  %11730 = vmatprep.subr.bf16.mxu0 %v16383_v58 }
 0x7ce   :  { %v7349_v63 = vadd.f32 %v9807_v24, %v7336_v27  ;;  %v7350_v57 = vadd.f32 %v9807_v24, %v7337_v18  ;;  %v7351_v37 = vadd.f32 %v9807_v24, %v7338_v41  ;;  %v7352_v42 = vadd.f32 %v9807_v24, %v7339_v56 }
 0x7cf   :  { %v7355_v51 = vmax.f32 %v7346_v43, 0.0  ;;  %v7356_v14 = vmax.f32 %v7347_v30, 0.0  ;;  %v7357_v44 = vmax.f32 %v7348_v0, 0.0  ;;  %v7353_v29 = vadd.f32 %v9807_v24, %v7340_v60 }
 0x7d0   :  { %v7358_v49 = vmax.f32 %v7349_v63, 0.0  ;;  %v7359_v62 = vmax.f32 %v7350_v57, 0.0  ;;  %v7360_v1 = vmax.f32 %v7351_v37, 0.0  ;;  %v7361_v19 = vmax.f32 %v7352_v42, 0.0 }
 0x7d1   :  { %v7364_v35 = vpack.c.bf16 %v7356_v14, %v7355_v51  ;;  %v7362_v5 = vmax.f32 %v7353_v29, 0.0  ;;  %v7341_v59 = vmul.f32 %v9806_v31, %v7328_v7  ;;  %v12067_v31 = vld [vmem:[%s16243_s3 + $0x98] sm:$0xff]   ;;  %v12066_v7 = vld [vmem:[%s16243_s3 + $0xa0] sm:$0xff]  }
 0x7d2   :  { %v7365_v26 = vpack.c.bf16 %v7358_v49, %v7357_v44  ;;  %v7366_v23 = vpack.c.bf16 %v7360_v1, %v7359_v62  ;;  %11731 = vmatpush3.bf16.msra.mxu0 %v12066_v7 }
 0x7d3   :  { %11709 = vmatmul.mubr.msk.bf16.vlgmr.msra.gmra.mxu1 %vm1439_vm6, %v7364_v35  ;;  %v7367_v53 = vpack.c.bf16 %v7362_v5, %v7361_v19  ;;  %v7354_v2 = vadd.f32 %v9807_v24, %v7341_v59  ;;  %11776 = vmatprep.subr.bf16.mxu0 %v16383_v58 }
 0x7d4   :  { %11712 = vmatprep.mubr.msk.bf16.mxu1 %vm12204_vm2, %v16383_v58  ;;  %11753 = vmatpush3.bf16.msra.mxu1 %v12067_v31 }
 0x7d5   :  { %v7363_v45 = vmax.f32 %v7354_v2, 0.0  ;;  %11754 = vmatprep.subr.bf16.mxu1 %v16383_v58 }
 0x7d7   :  { %v7368_v61 = vpack.c.bf16 %v7363_v45, %v7363_v45 }
 0x7d8   :  { %11755 = vmatpush3.bf16.msra.mxu1 %v12068_v28 }
 0x7d9   :  { %11800 = vmatprep.subr.bf16.mxu1 %v16383_v58 }
 0x7db   :  { %11713 = vmatmul.mubr.msk.bf16.gmra.mxu1 %vm1439_vm6, %v7365_v26 }
 0x7dc   :  { %11716 = vmatprep.mubr.msk.bf16.mxu1 %vm12204_vm2, %v16383_v58 }
 0x7e3   :  { %11717 = vmatmul.mubr.msk.bf16.gmra.mxu1 %vm1439_vm6, %v7366_v23 }
 0x7e4   :  { %11720 = vmatprep.mubr.msk.bf16.mxu1 %vm12204_vm2, %v16383_v58 }
 0x7eb   :  { %11721 = vmatmul.mubr.msk.bf16.gmra.mxu1 %vm1439_vm6, %v7367_v53 }
 0x7ec   :  { %11724 = vmatprep.mubr.msk.bf16.mxu1 %vm12204_vm2, %v16383_v58 }
 0x7f3   :  { %11725 = vmatmul.mubr.msk.bf16.gmra.mxu1 %vm1439_vm6, %v7368_v61 }
 0x7f4   :  { %11756 = vmatprep.mubr.msk.bf16.mxu1 %vm12204_vm2, %v16383_v58 }
 0x893   :  { %v15537_v24 = vpop.f32.mrf.mxu1 }
 0x894   :  { %v7474_v18 = vmul.f32 %v15537_v24, %v14960_v10 }
 0x895   :  { %v11710_v11 = vpop.f32.mrf.mxu1 }
 0x896   :  { %v7507_v63 = vmul.f32 %v7474_v18, %v7474_v18  ;;  %v7483_v51 = vsel %vm1439_vm6, %v7474_v18, 0.0 }
 0x897   :  { %v15539_v17 = vpop.f32.mrf.mxu1 }
 0x898   :  { %v7475_v16 = vmul.f32 %v15539_v17, %v14964_v3  ;;  %v7516_v42 = vsel %vm1439_vm6, %v7507_v63, 0.0 }
 0x899   :  { %v11711_v8 = vpop.f32.mrf.mxu1 }
 0x89a   :  { %v7508_v43 = vmul.f32 %v7475_v16, %v7475_v16  ;;  %v7484_v57 = vsel %vm1439_vm6, %v7475_v16, 0.0 }
 0x89b   :  { %v15541_v15 = vpop.f32.mrf.mxu1  ;;  %v7485_v60 = vadd.f32 %v7484_v57, %v7483_v51 }
 0x89c   :  { %v7476_v41 = vmul.f32 %v15541_v15, %v14970_v12  ;;  %v7517_v44 = vsel %vm1439_vm6, %v7508_v43, 0.0 }
 0x89d   :  { %v11714_v46 = vpop.f32.mrf.mxu1  ;;  %v7518_v19 = vadd.f32 %v7517_v44, %v7516_v42 }
 0x89e   :  { %v7509_v37 = vmul.f32 %v7476_v41, %v7476_v41  ;;  %v7486_v49 = vsel %vm1439_vm6, %v7476_v41, 0.0 }
 0x89f   :  { %v15543_v4 = vpop.f32.mrf.mxu1  ;;  %v7487_v5 = vadd.f32 %v7486_v49, %v7485_v60 }
 0x8a0   :  { %v7477_v30 = vmul.f32 %v15543_v4, %v14985_v25  ;;  %v7519_v26 = vsel %vm1439_vm6, %v7509_v37, 0.0 }
 0x8a1   :  { %v11715_v27 = vpop.f32.mrf.mxu1  ;;  %v7520_v21 = vadd.f32 %v7519_v26, %v7518_v19 }
 0x8a2   :  { %v7510_v62 = vmul.f32 %v7477_v30, %v7477_v30  ;;  %v7488_v23 = vsel %vm1439_vm6, %v7477_v30, 0.0 }
 0x8a3   :  { %v15551_v6 = vpop.f32.mrf.mxu1  ;;  %v7489_v31 = vadd.f32 %v7488_v23, %v7487_v5 }
 0x8a4   :  { %v7478_v56 = vmul.f32 %v15551_v6, %v14992_v33  ;;  %v7521_v59 = vsel %vm1439_vm6, %v7510_v62, 0.0 }
 0x8a5   :  { %v11718_v0 = vpop.f32.mrf.mxu1  ;;  %v7522_v46 = vadd.f32 %v7521_v59, %v7520_v21 }
 0x8a6   :  { %v7511_v29 = vmul.f32 %v7478_v56, %v7478_v56  ;;  %v7490_v2 = vsel %vm1439_vm6, %v7478_v56, 0.0 }
 0x8a7   :  { %v15559_v14 = vpop.f32.mrf.mxu1  ;;  %v7491_v16 = vadd.f32 %v7490_v2, %v7489_v31 }
 0x8a8   :  { %v7479_v1 = vmul.f32 %v15559_v14, %v15004_v32  ;;  %v7523_v28 = vsel %vm1439_vm6, %v7511_v29, 0.0 }
 0x8a9   :  { %v11719_v35 = vpop.f32.mrf.mxu1  ;;  %v7524_v30 = vadd.f32 %v7523_v28, %v7522_v46 }
 0x8aa   :  { %v7512_v45 = vmul.f32 %v7479_v1, %v7479_v1  ;;  %v7492_v11 = vsel %vm1439_vm6, %v7479_v1, 0.0 }
 0x8ab   :  { %v15568_v53 = vpop.f32.mrf.mxu1  ;;  %v7493_v0 = vadd.f32 %v7492_v11, %v7491_v16 }
 0x8ac   :  { %v7480_v61 = vmul.f32 %v15568_v53, %v15013_v39  ;;  %v7525_v18 = vsel %vm1439_vm6, %v7512_v45, 0.0 }
 0x8ad   :  { %v11722_v7 = vpop.f32.mrf.mxu1  ;;  %v7526_v51 = vadd.f32 %v7525_v18, %v7524_v30 }
 0x8ae   :  { %v7513_v8 = vmul.f32 %v7480_v61, %v7480_v61  ;;  %v7494_v41 = vsel %vm1439_vm6, %v7480_v61, 0.0 }
 0x8af   :  { %v15576_v27 = vpop.f32.mrf.mxu1  ;;  %v7495_v44 = vadd.f32 %v7494_v41, %v7493_v0 }
 0x8b0   :  { %v7481_v43 = vmul.f32 %v15576_v27, %v15027_v9  ;;  %v7527_v57 = vsel %vm1439_vm6, %v7513_v8, 0.0 }
 0x8b1   :  { %v11723_v63 = vpop.f32.mrf.mxu1  ;;  %v7528_v60 = vadd.f32 %v7527_v57, %v7526_v51 }
 0x8b2   :  { %v7496_v37 = vsel %vm1439_vm6, %v7481_v43, 0.0  ;;  %v7514_v56 = vmul.f32 %v7481_v43, %v7481_v43 }
 0x8b3   :  { %v7466_v49 = vpop.f32.mrf.mxu1  ;;  %v7497_v35 = vadd.f32 %v7496_v37, %v7495_v44 }
 0x8b4   :  { %v7529_v62 = vsel %vm1439_vm6, %v7514_v56, 0.0  ;;  %v7482_v1 = vmul.f32 %v7466_v49, %v15031_v13 }
 0x8b5   :  { %v11726_v42 = vpop.f32.mrf.mxu1  ;;  %v7530_v29 = vadd.f32 %v7529_v62, %v7528_v60 }
 0x8b6   :  { %v7498_v26 = vsel %vm1439_vm6, %v7482_v1, 0.0  ;;  %v7515_v23 = vmul.f32 %v7482_v1, %v7482_v1 }
 0x8b7   :  { %v7499_v19 = vadd.f32 %v7498_v26, %v7497_v35  ;;  %v7469_v5 = vpop.f32.mrf.mxu1  ;;  %v9815_v35 = vld [vmem:[%s16242_s7 + $0x6] ss:$0 sm:$0xff] }
 0x8b8   :  { %v7531_v59 = vsel %vm1439_vm6, %v7515_v23, 0.0 }
 0x8b9   :  { %v7500_v2 = vrot.slane %v7499_v19, 4  ;;  %v7532_v45 = vadd.f32 %v7531_v59, %v7530_v29  ;;  %v11727_v61 = vpop.f32.mrf.mxu1 }
 0x8bb   :  { %v7501_v21 = vadd.f32 %v7500_v2, %v7499_v19  ;;  %v7533_v31 = vrot.slane %v7532_v45, 4 }
 0x8bd   :  { %v7502_v7 = vrot.slane %v7501_v21, 2  ;;  %v7534_v28 = vadd.f32 %v7533_v31, %v7532_v45 }
 0x8bf   :  { %v7503_v11 = vadd.f32 %v7502_v7, %v7501_v21  ;;  %v7535_v8 = vrot.slane %v7534_v28, 2 }
 0x8c1   :  { %v7504_v46 = vrot.slane %v7503_v11, 1  ;;  %v7536_v16 = vadd.f32 %v7535_v8, %v7534_v28 }
 0x8c3   :  { %v7505_v18 = vadd.f32 %v7504_v46, %v7503_v11  ;;  %v7537_v41 = vrot.slane %v7536_v16, 1 }
 0x8c5   :  { %v7506_v43 = vmul.f32 0.03125, %v7505_v18  ;;  %v7538_v30 = vadd.f32 %v7537_v41, %v7536_v16 }
 0x8c7   :  { %v7539_v0 = vmul.f32 0.03125, %v7538_v30  ;;  %v7540_v63 = vmul.f32 %v7506_v43, %v7506_v43  ;;  %v7544_v56 = vsub.f32 %v15537_v24, %v7506_v43  ;;  %v7545_v51 = vsub.f32 %v15539_v17, %v7506_v43 }
 0x8c8   :  { %v7546_v44 = vsub.f32 %v15541_v15, %v7506_v43  ;;  %v7547_v62 = vsub.f32 %v15543_v4, %v7506_v43  ;;  %v7548_v1 = vsub.f32 %v15551_v6, %v7506_v43  ;;  %v7549_v42 = vsub.f32 %v15559_v14, %v7506_v43  ;;  %v9816_v4 = vld [vmem:[%s16242_s7 + $0x7] ss:$0 sm:$0xff] }
 0x8c9   :  { %v7541_v57 = vsub.f32 %v7539_v0, %v7540_v63  ;;  %v7550_v26 = vsub.f32 %v15568_v53, %v7506_v43  ;;  %v7551_v23 = vsub.f32 %v15576_v27, %v7506_v43  ;;  %v7552_v24 = vsub.f32 %v7466_v49, %v7506_v43 }
 0x8cb   :  { %v7542_v37 = vadd.f32 1e-05, %v7541_v57 }
 0x8cd   :  { %12093 = vrsqrt.f32 %v7542_v37 }
 0x8da   :  { %v12094_v60 = vpop.eup %12093 }
 0x8db   :  { %v7553_v29 = vmul.f32 %v12094_v60, %v7544_v56  ;;  %v7554_v17 = vmul.f32 %v12094_v60, %v7545_v51  ;;  %v7555_v19 = vmul.f32 %v12094_v60, %v7546_v44  ;;  %v7556_v15 = vmul.f32 %v12094_v60, %v7547_v62 }
 0x8dc   :  { %v7557_v6 = vmul.f32 %v12094_v60, %v7548_v1  ;;  %v7558_v5 = vmul.f32 %v12094_v60, %v7549_v42  ;;  %v7559_v59 = vmul.f32 %v12094_v60, %v7550_v26  ;;  %v7560_v2 = vmul.f32 %v12094_v60, %v7551_v23 }
 0x8dd   :  { %v7561_v45 = vmul.f32 %v12094_v60, %v7552_v24  ;;  %v7566_v61 = vmul.f32 %v9815_v35, %v7553_v29  ;;  %v7567_v14 = vmul.f32 %v9815_v35, %v7554_v17  ;;  %v7568_v21 = vmul.f32 %v9815_v35, %v7555_v19 }
 0x8de   :  { %v7569_v53 = vmul.f32 %v9815_v35, %v7556_v15  ;;  %v7570_v31 = vmul.f32 %v9815_v35, %v7557_v6  ;;  %v7571_v27 = vmul.f32 %v9815_v35, %v7558_v5  ;;  %v7572_v49 = vmul.f32 %v9815_v35, %v7559_v59 }
 0x8df   :  { %v7573_v7 = vmul.f32 %v9815_v35, %v7560_v2  ;;  %v7574_v28 = vmul.f32 %v9815_v35, %v7561_v45  ;;  %v7579_v11 = vadd.f32 %v9816_v4, %v7566_v61  ;;  %v7580_v8 = vadd.f32 %v9816_v4, %v7567_v14 }
 0x8e0   :  { %v7581_v46 = vadd.f32 %v9816_v4, %v7568_v21  ;;  %v7582_v16 = vadd.f32 %v9816_v4, %v7569_v53  ;;  %v7583_v18 = vadd.f32 %v9816_v4, %v7570_v31  ;;  %v7584_v41 = vadd.f32 %v9816_v4, %v7571_v27 }
 0x8e1   :  { %v7585_v43 = vadd.f32 %v9816_v4, %v7572_v49  ;;  %v7586_v30 = vadd.f32 %v9816_v4, %v7573_v7  ;;  %v7587_v0 = vadd.f32 %v9816_v4, %v7574_v28  ;;  %v7588_v63 = vmul.f32 %v7579_v11, %v14960_v10  ;;  %v12069_v49 = vld [vmem:[%s16243_s3 + $0xb8] sm:$0xff]  }
 0x8e2   :  { %v7589_v57 = vmul.f32 %v7580_v8, %v14964_v3  ;;  %v7590_v37 = vmul.f32 %v7581_v46, %v14970_v12  ;;  %v7591_v56 = vmul.f32 %v7582_v16, %v14985_v25  ;;  %v7592_v51 = vmul.f32 %v7583_v18, %v14992_v33  ;;  %v12071_v18 = vld [vmem:[%s16243_s3 + $0xc8] sm:$0xff]  }
 0x8e3   :  { %v7593_v44 = vmul.f32 %v7584_v41, %v15004_v32  ;;  %v7594_v62 = vmul.f32 %v7585_v43, %v15013_v39  ;;  %v7595_v1 = vmul.f32 %v7586_v30, %v15027_v9  ;;  %v7596_v60 = vmul.f32 %v7587_v0, %v15031_v13  ;;  %v12070_v41 = vld [vmem:[%s16243_s3 + $0xb0] sm:$0xff]   ;;  %v12072_v0 = vld [vmem:[%s16243_s3 + $0xc0] sm:$0xff]  }
 0x8e4   :  { %v7597_v35 = vadd.f32 %v7588_v63, %v6097_v20  ;;  %v7598_v42 = vadd.f32 %v7589_v57, %v6098_v55  ;;  %v7599_v26 = vadd.f32 %v7590_v37, %v6099_v34  ;;  %v16651_v23 = vmax.f32 %v15083_v54, 0.0 }
 0x8e5   :  { %v16652_v29 = vmax.f32 %v15122_v36, 0.0  ;;  %v16653_v19 = vmax.f32 %v15087_v38, 0.0  ;;  %v16654_v4 = vmax.f32 %v15092_v50, 0.0  ;;  %v7604_v20 = vadd.f32 %v7595_v1, %v16655_v47 }
 0x8e6   :  { %v7600_v24 = vadd.f32 %v7591_v56, %v16651_v23  ;;  %v7605_v55 = vadd.f32 %v7596_v60, %v16656_v48  ;;  %7606 = vst.msk [vmem:[#allocation4 + $0x7] sm:$0xff] %vm1439_vm6, %v7597_v35  ;;  %7607 = vst.msk [vmem:[#allocation4 + $0xf] sm:$0xff] %vm1439_vm6, %v7598_v42 }
 0x8e7   :  { %v7601_v17 = vadd.f32 %v7592_v51, %v16652_v29  ;;  %v7602_v15 = vadd.f32 %v7593_v44, %v16653_v19  ;;  %v7603_v6 = vadd.f32 %v7594_v62, %v16654_v4  ;;  %7608 = vst.msk [vmem:[#allocation4 + $0x17] sm:$0xff] %vm1439_vm6, %v7599_v26  ;;  %7613 = vst.msk [vmem:[#allocation4 + $0x3f] sm:$0xff] %vm1439_vm6, %v7604_v20 }
 0x8e8   :  { %7609 = vst.msk [vmem:[#allocation4 + $0x1f] sm:$0xff] %vm1439_vm6, %v7600_v24  ;;  %7614 = vst.msk [vmem:[#allocation4 + $0x47] sm:$0xff] %vm1439_vm6, %v7605_v55 }
 0x8e9   :  { %7610 = vst.msk [vmem:[#allocation4 + $0x27] sm:$0xff] %vm1439_vm6, %v7601_v17  ;;  %7611 = vst.msk [vmem:[#allocation4 + $0x2f] sm:$0xff] %vm1439_vm6, %v7602_v15 }
 0x8ea   :  { %7612 = vst.msk [vmem:[#allocation4 + $0x37] sm:$0xff] %vm1439_vm6, %v7603_v6 }
 0x8ed   :  { %v15638_v52 = vld [vmem:[#allocation4 + $0x7] sm:$0xff]  ;;  %v15640_v40 = vld [vmem:[#allocation4 + $0xf] sm:$0xff] }
 0x8ee   :  { %v15642_v54 = vld [vmem:[#allocation4 + $0x17] sm:$0xff]  ;;  %v7624_v34 = vmax.f32 %v15638_v52, 0.0  ;;  %v7625_v38 = vmax.f32 %v15640_v40, 0.0  ;;  %v15658_v14 = vld [vmem:[#allocation4 + $0x3f] sm:$0xff] }
 0x8ef   :  { %v15646_v50 = vld [vmem:[#allocation4 + $0x1f] sm:$0xff]  ;;  %v7626_v22 = vmax.f32 %v15642_v54, 0.0  ;;  %v15660_v21 = vld [vmem:[#allocation4 + $0x47] sm:$0xff]  ;;  %v16367_v31 = vmax.f32 %v15658_v14, 0.0  ;;  %v16661_v52 = vmax.f32 %v15658_v14, 0.0 }
 0x8f0   :  { %v15649_v36 = vld [vmem:[#allocation4 + $0x27] sm:$0xff]  ;;  %v15651_v5 = vld [vmem:[#allocation4 + $0x2f] sm:$0xff]  ;;  %v16371_v59 = vmax.f32 %v15646_v50, 0.0  ;;  %7633 = vst.msk [vmem:[#allocation4 + $0x7] sm:$0xff] %vm1439_vm6, %v7624_v34  ;;  %7634 = vst.msk [vmem:[#allocation4 + $0xf] sm:$0xff] %vm1439_vm6, %v7625_v38  ;;  %v16366_v27 = vmax.f32 %v15660_v21, 0.0 }
 0x8f1   :  { %v16370_v2 = vmax.f32 %v15649_v36, 0.0  ;;  %v16369_v45 = vmax.f32 %v15651_v5, 0.0  ;;  %v15656_v61 = vld [vmem:[#allocation4 + $0x37] sm:$0xff]  ;;  %7635 = vst.msk [vmem:[#allocation4 + $0x17] sm:$0xff] %vm1439_vm6, %v7626_v22  ;;  %7640 = vst.msk [vmem:[#allocation4 + $0x3f] sm:$0xff] %vm1439_vm6, %v16367_v31  ;;  %v16662_v40 = vmax.f32 %v15660_v21, 0.0 }
 0x8f2   :  { %v16368_v53 = vmax.f32 %v15656_v61, 0.0  ;;  %7636 = vst.msk [vmem:[#allocation4 + $0x1f] sm:$0xff] %vm1439_vm6, %v16371_v59  ;;  %7641 = vst.msk [vmem:[#allocation4 + $0x47] sm:$0xff] %vm1439_vm6, %v16366_v27 }
 0x8f3   :  { %7637 = vst.msk [vmem:[#allocation4 + $0x27] sm:$0xff] %vm1439_vm6, %v16370_v2  ;;  %7638 = vst.msk [vmem:[#allocation4 + $0x2f] sm:$0xff] %vm1439_vm6, %v16369_v45 }
 0x8f4   :  { %7639 = vst.msk [vmem:[#allocation4 + $0x37] sm:$0xff] %vm1439_vm6, %v16368_v53 }
 0x8f7   :  { %v7661_v7 = vld [vmem:[#allocation4 + $0x1] sm:$0xff]  ;;  %v7662_v28 = vld [vmem:[#allocation4 + $0x9] sm:$0xff] }
 0x8f8   :  { %v7642_v11 = vld [vmem:[#allocation4] sm:$0xff]  ;;  %v7670_v8 = vpack.c.bf16 %v7662_v28, %v7661_v7  ;;  %v15695_v46 = vld [vmem:[#allocation4 + $0x8] sm:$0xff]  ;;  %v7663_v43 = vld [vmem:[#allocation4 + $0x11] sm:$0xff] }
 0x8f9   :  { %v7651_v16 = vpack.c.bf16 %v15695_v46, %v7642_v11  ;;  %v7664_v30 = vld [vmem:[#allocation4 + $0x19] sm:$0xff]  ;;  %v15714_v63 = vld [vmem:[#allocation4 + $0x10] sm:$0xff]  ;;  %v7669_v19 = vld [vmem:[#allocation4 + $0x41] sm:$0xff] }
 0x8fa   :  { %11733 = vmatmul.mubr.msk.bf16.vlgmr.msra.gmra.mxu0 %vm1439_vm6, %v7670_v8  ;;  %v15716_v57 = vld [vmem:[#allocation4 + $0x18] sm:$0xff]  ;;  %v7671_v37 = vpack.c.bf16 %v7664_v30, %v7663_v43  ;;  %v7665_v51 = vld [vmem:[#allocation4 + $0x21] sm:$0xff]  ;;  %v7666_v44 = vld [vmem:[#allocation4 + $0x29] sm:$0xff]  ;;  %v7674_v4 = vpack.c.bf16 %v7669_v19, %v7669_v19 }
 0x8fb   :  { %11757 = vmatmul.mubr.msk.bf16.vlgmr.msra.gmra.mxu1 %vm1439_vm6, %v7651_v16  ;;  %11777 = vmatpush3.bf16.msra.mxu0 %v12069_v49  ;;  %v7652_v56 = vpack.c.bf16 %v15716_v57, %v15714_v63  ;;  %v15729_v62 = vld [vmem:[#allocation4 + $0x20] sm:$0xff]  ;;  %v15731_v1 = vld [vmem:[#allocation4 + $0x28] sm:$0xff]  ;;  %v7672_v60 = vpack.c.bf16 %v7666_v44, %v7665_v51  ;;  %v7667_v42 = vld [vmem:[#allocation4 + $0x31] sm:$0xff] }
 0x8fc   :  { %11736 = vmatprep.mubr.msk.bf16.mxu0 %vm12204_vm2, %v16383_v58  ;;  %11760 = vmatprep.mubr.msk.bf16.mxu1 %vm12204_vm2, %v16383_v58  ;;  %v7653_v35 = vpack.c.bf16 %v15731_v1, %v15729_v62  ;;  %v7668_v26 = vld [vmem:[#allocation4 + $0x39] sm:$0xff]  ;;  %v15741_v23 = vld [vmem:[#allocation4 + $0x30] sm:$0xff]  ;;  %v7878_v47 = vld [vmem:[#allocation4 + $0x2] sm:$0xff] }
 0x8fd   :  { %11778 = vmatprep.subr.bf16.mxu0 %v16383_v58  ;;  %11801 = vmatpush3.bf16.msra.mxu1 %v12071_v18  ;;  %v15743_v24 = vld [vmem:[#allocation4 + $0x38] sm:$0xff]  ;;  %v7673_v29 = vpack.c.bf16 %v7668_v26, %v7667_v42  ;;  %v15753_v15 = vld [vmem:[#allocation4 + $0x40] sm:$0xff]  ;;  %v7879_v20 = vld [vmem:[#allocation4 + $0xa] sm:$0xff] }
 0x8fe   :  { %11802 = vmatprep.subr.bf16.mxu1 %v16383_v58  ;;  %v7654_v17 = vpack.c.bf16 %v15743_v24, %v15741_v23  ;;  %v7655_v6 = vpack.c.bf16 %v15753_v15, %v15753_v15  ;;  %v8005_v48 = vld [vmem:[#allocation4 + $0x6] sm:$0xff]  ;;  %v15763_v55 = vld [vmem:[#allocation4 + $0xe] sm:$0xff]  ;;  %v7887_v7 = vpack.c.bf16 %v7879_v20, %v7878_v47  ;;  %v12074_v8 = vld [vmem:[%s16243_s3 + $0xd0] sm:$0xff]  }
 0x8ff   :  { %11779 = vmatpush3.bf16.msra.mxu0 %v12070_v41  ;;  %v12073_v49 = vld [vmem:[%s16243_s3 + $0xd8] sm:$0xff]   ;;  %v8014_v28 = vpack.c.bf16 %v15763_v55, %v8005_v48  ;;  %v12075_v11 = vld [vmem:[%s16243_s3 + $0xe8] sm:$0xff]   ;;  %v12076_v41 = vld [vmem:[%s16243_s3 + $0xe0] sm:$0xff]  }
 0x900   :  { %11824 = vmatprep.subr.bf16.mxu0 %v16383_v58  ;;  %v7880_v16 = vld [vmem:[#allocation4 + $0x12] sm:$0xff]  ;;  %v7881_v18 = vld [vmem:[#allocation4 + $0x1a] sm:$0xff]  ;;  %v7883_v51 = vld [vmem:[#allocation4 + $0x2a] sm:$0xff] }
 0x901   :  { %11803 = vmatpush3.bf16.msra.mxu1 %v12072_v0  ;;  %v15785_v43 = vld [vmem:[#allocation4 + $0x16] sm:$0xff]  ;;  %v15787_v30 = vld [vmem:[#allocation4 + $0x1e] sm:$0xff]  ;;  %v7888_v0 = vpack.c.bf16 %v7881_v18, %v7880_v16  ;;  %v15800_v44 = vld [vmem:[#allocation4 + $0x26] sm:$0xff]  ;;  %v8268_v16 = vpack.c.bf16 %v15714_v63, %v15695_v46 }
 0x902   :  { %11737 = vmatmul.mubr.msk.bf16.gmra.mxu0 %vm1439_vm6, %v7671_v37  ;;  %11848 = vmatprep.subr.bf16.mxu1 %v16383_v58  ;;  %v8015_v37 = vpack.c.bf16 %v15787_v30, %v15785_v43  ;;  %v7884_v26 = vld [vmem:[#allocation4 + $0x32] sm:$0xff]  ;;  %v15814_v19 = vld [vmem:[#allocation4 + $0x3e] sm:$0xff]  ;;  %v15824_v20 = vld [vmem:[#allocation4 + $0x46] sm:$0xff] }
 0x903   :  { %11761 = vmatmul.mubr.msk.bf16.gmra.mxu1 %vm1439_vm6, %v7652_v56  ;;  %11740 = vmatprep.mubr.msk.bf16.mxu0 %vm12204_vm2, %v16383_v58  ;;  %v7882_v56 = vld [vmem:[#allocation4 + $0x22] sm:$0xff]  ;;  %v12079_v18 = vld [vmem:[%s16243_s3 + $0x108] sm:$0xff]  }
 0x904   :  { %11764 = vmatprep.mubr.msk.bf16.mxu1 %vm12204_vm2, %v16383_v58  ;;  %v7886_v47 = vld [vmem:[#allocation4 + $0x42] sm:$0xff]  ;;  %v8134_v46 = vld [vmem:[#allocation4 + $0x17] sm:$0xff] }
 0x905   :  { %v7891_v48 = vpack.c.bf16 %v7886_v47, %v7886_v47  ;;  %v8135_v63 = vld [vmem:[#allocation4 + $0x1f] sm:$0xff] }
 0x90a   :  { %11741 = vmatmul.mubr.msk.bf16.gmra.mxu0 %vm1439_vm6, %v7672_v60  ;;  %v15802_v60 = vld [vmem:[#allocation4 + $0x2e] sm:$0xff] }
 0x90b   :  { %11765 = vmatmul.mubr.msk.bf16.gmra.mxu1 %vm1439_vm6, %v7653_v35  ;;  %11744 = vmatprep.mubr.msk.bf16.mxu0 %vm12204_vm2, %v16383_v58  ;;  %v7889_v35 = vpack.c.bf16 %v7883_v51, %v7882_v56  ;;  %v8016_v42 = vpack.c.bf16 %v15802_v60, %v15800_v44  ;;  %v8269_v56 = vpack.c.bf16 %v15729_v62, %v15716_v57  ;;  %v8136_v51 = vld [vmem:[#allocation4 + $0x27] sm:$0xff]  ;;  %v8138_v57 = vld [vmem:[#allocation4 + $0x37] sm:$0xff]  ;;  %v8139_v62 = vld [vmem:[#allocation4 + $0x3f] sm:$0xff] }
 0x90c   :  { %11768 = vmatprep.mubr.msk.bf16.mxu1 %vm12204_vm2, %v16383_v58 }
 0x912   :  { %11745 = vmatmul.mubr.msk.bf16.gmra.mxu0 %vm1439_vm6, %v7673_v29  ;;  %v7885_v29 = vld [vmem:[#allocation4 + $0x3a] sm:$0xff] }
 0x913   :  { %11769 = vmatmul.mubr.msk.bf16.gmra.mxu1 %vm1439_vm6, %v7654_v17  ;;  %11748 = vmatprep.mubr.msk.bf16.mxu0 %vm12204_vm2, %v16383_v58  ;;  %v15812_v17 = vld [vmem:[#allocation4 + $0x36] sm:$0xff] }
 0x914   :  { %11772 = vmatprep.mubr.msk.bf16.mxu1 %vm12204_vm2, %v16383_v58 }
 0x91a   :  { %11749 = vmatmul.mubr.msk.bf16.gmra.mxu0 %vm1439_vm6, %v7674_v4  ;;  %v7890_v4 = vpack.c.bf16 %v7885_v29, %v7884_v26  ;;  %v8270_v26 = vpack.c.bf16 %v15741_v23, %v15731_v1  ;;  %v8144_v29 = vpack.c.bf16 %v8139_v62, %v8138_v57  ;;  %v8140_v1 = vld [vmem:[#allocation4 + $0x47] sm:$0xff]  ;;  %v8392_v57 = vld [vmem:[#allocation4 + $0x3c] sm:$0xff] }
 0x91b   :  { %11773 = vmatmul.mubr.msk.bf16.gmra.mxu1 %vm1439_vm6, %v7655_v6  ;;  %11780 = vmatprep.mubr.msk.bf16.mxu0 %vm12204_vm2, %v16383_v58  ;;  %v8017_v6 = vpack.c.bf16 %v15814_v19, %v15812_v17  ;;  %v8267_v23 = vld [vmem:[#allocation4 + $0x48] sm:$0xff] }
 0x91c   :  { %11804 = vmatprep.mubr.msk.bf16.mxu1 %vm12204_vm2, %v16383_v58  ;;  %v8272_v47 = vpack.c.bf16 %v8267_v23, %v8267_v23  ;;  %v8393_v62 = vld [vmem:[#allocation4 + $0x44] sm:$0xff] }
 0x922   :  { %11781 = vmatmul.mubr.msk.bf16.vlgmr.msra.gmra.mxu0 %vm1439_vm6, %v7887_v7  ;;  %v8132_v7 = vld [vmem:[#allocation4 + $0x7] sm:$0xff] }
 0x923   :  { %11805 = vmatmul.mubr.msk.bf16.vlgmr.msra.gmra.mxu1 %vm1439_vm6, %v8014_v28  ;;  %11825 = vmatpush3.bf16.msra.mxu0 %v12073_v49  ;;  %v8018_v49 = vpack.c.bf16 %v15824_v20, %v15824_v20  ;;  %v8133_v28 = vld [vmem:[#allocation4 + $0xf] sm:$0xff] }
 0x924   :  { %11784 = vmatprep.mubr.msk.bf16.mxu0 %vm12204_vm2, %v16383_v58  ;;  %11808 = vmatprep.mubr.msk.bf16.mxu1 %vm12204_vm2, %v16383_v58 }
 0x925   :  { %11826 = vmatprep.subr.bf16.mxu0 %v16383_v58  ;;  %11849 = vmatpush3.bf16.msra.mxu1 %v12075_v11  ;;  %v12077_v11 = vld [vmem:[%s16243_s3 + $0xf8] sm:$0xff]  }
 0x926   :  { %11850 = vmatprep.subr.bf16.mxu1 %v16383_v58 }
 0x927   :  { %11827 = vmatpush3.bf16.msra.mxu0 %v12074_v8  ;;  %v8141_v8 = vpack.c.bf16 %v8133_v28, %v8132_v7  ;;  %v12081_v7 = vld [vmem:[%s16243_s3 + $0x118] sm:$0xff]  }
 0x928   :  { %11872 = vmatprep.subr.bf16.mxu0 %v16383_v58 }
 0x929   :  { %11851 = vmatpush3.bf16.msra.mxu1 %v12076_v41  ;;  %v12078_v41 = vld [vmem:[%s16243_s3 + $0xf0] sm:$0xff]  }
 0x92a   :  { %11785 = vmatmul.mubr.msk.bf16.gmra.mxu0 %vm1439_vm6, %v7888_v0  ;;  %11896 = vmatprep.subr.bf16.mxu1 %v16383_v58  ;;  %v12080_v0 = vld [vmem:[%s16243_s3 + $0x100] sm:$0xff]  }
 0x92b   :  { %11809 = vmatmul.mubr.msk.bf16.gmra.mxu1 %vm1439_vm6, %v8015_v37  ;;  %11788 = vmatprep.mubr.msk.bf16.mxu0 %vm12204_vm2, %v16383_v58  ;;  %v8142_v37 = vpack.c.bf16 %v8135_v63, %v8134_v46  ;;  %v8516_v46 = vld [vmem:[#allocation4 + $0x25] sm:$0xff] }
 0x92c   :  { %11812 = vmatprep.mubr.msk.bf16.mxu1 %vm12204_vm2, %v16383_v58 }
 0x932   :  { %11789 = vmatmul.mubr.msk.bf16.gmra.mxu0 %vm1439_vm6, %v7889_v35  ;;  %v8137_v35 = vld [vmem:[#allocation4 + $0x2f] sm:$0xff] }
 0x933   :  { %11813 = vmatmul.mubr.msk.bf16.gmra.mxu1 %vm1439_vm6, %v8016_v42  ;;  %11792 = vmatprep.mubr.msk.bf16.mxu0 %vm12204_vm2, %v16383_v58  ;;  %v8143_v42 = vpack.c.bf16 %v8137_v35, %v8136_v51  ;;  %v8517_v51 = vld [vmem:[#allocation4 + $0x2d] sm:$0xff]  ;;  %v8518_v35 = vld [vmem:[#allocation4 + $0x35] sm:$0xff] }
 0x934   :  { %11816 = vmatprep.mubr.msk.bf16.mxu1 %vm12204_vm2, %v16383_v58 }
 0x93a   :  { %11793 = vmatmul.mubr.msk.bf16.gmra.mxu0 %vm1439_vm6, %v7890_v4  ;;  %v8271_v4 = vpack.c.bf16 %v15753_v15, %v15743_v24  ;;  %v8386_v24 = vld [vmem:[#allocation4 + $0xc] sm:$0xff]  ;;  %v8387_v15 = vld [vmem:[#allocation4 + $0x14] sm:$0xff] }
 0x93b   :  { %11817 = vmatmul.mubr.msk.bf16.gmra.mxu1 %vm1439_vm6, %v8017_v6  ;;  %11796 = vmatprep.mubr.msk.bf16.mxu0 %vm12204_vm2, %v16383_v58  ;;  %v8145_v6 = vpack.c.bf16 %v8140_v1, %v8140_v1  ;;  %v8395_v28 = vpack.c.bf16 %v8387_v15, %v8386_v24  ;;  %v8398_v1 = vpack.c.bf16 %v8393_v62, %v8392_v57 }
 0x93c   :  { %11820 = vmatprep.mubr.msk.bf16.mxu1 %vm12204_vm2, %v16383_v58 }
 0x942   :  { %11797 = vmatmul.mubr.msk.bf16.gmra.mxu0 %vm1439_vm6, %v7891_v48  ;;  %v8513_v48 = vld [vmem:[#allocation4 + $0xd] sm:$0xff] }
 0x943   :  { %11821 = vmatmul.mubr.msk.bf16.gmra.mxu1 %vm1439_vm6, %v8018_v49  ;;  %11828 = vmatprep.mubr.msk.bf16.mxu0 %vm12204_vm2, %v16383_v58  ;;  %v8514_v49 = vld [vmem:[#allocation4 + $0x15] sm:$0xff] }
 0x944   :  { %11852 = vmatprep.mubr.msk.bf16.mxu1 %vm12204_vm2, %v16383_v58 }
 0x94a   :  { %11829 = vmatmul.mubr.msk.bf16.vlgmr.msra.gmra.mxu0 %vm1439_vm6, %v8141_v8  ;;  %v12082_v8 = vld [vmem:[%s16243_s3 + $0x110] sm:$0xff]  }
 0x94b   :  { %11853 = vmatmul.mubr.msk.bf16.vlgmr.msra.gmra.mxu1 %vm1439_vm6, %v8268_v16  ;;  %11873 = vmatpush3.bf16.msra.mxu0 %v12077_v11  ;;  %v8522_v11 = vpack.c.bf16 %v8514_v49, %v8513_v48  ;;  %v8388_v16 = vld [vmem:[#allocation4 + $0x1c] sm:$0xff]  ;;  %v8649_v48 = vpack.c.bf16 %v15785_v43, %v15763_v55  ;;  %v8650_v49 = vpack.c.bf16 %v15800_v44, %v15787_v30  ;;  %v8648_v43 = vld [vmem:[#allocation4 + $0x4e] sm:$0xff] }
 0x94c   :  { %11832 = vmatprep.mubr.msk.bf16.mxu0 %vm12204_vm2, %v16383_v58  ;;  %11856 = vmatprep.mubr.msk.bf16.mxu1 %vm12204_vm2, %v16383_v58  ;;  %v8652_v55 = vpack.c.bf16 %v15824_v20, %v15814_v19  ;;  %v8653_v30 = vpack.c.bf16 %v8648_v43, %v8648_v43 }
 0x94d   :  { %11874 = vmatprep.subr.bf16.mxu0 %v16383_v58  ;;  %11897 = vmatpush3.bf16.msra.mxu1 %v12079_v18  ;;  %v8389_v18 = vld [vmem:[#allocation4 + $0x24] sm:$0xff] }
 0x94e   :  { %11898 = vmatprep.subr.bf16.mxu1 %v16383_v58  ;;  %v8396_v63 = vpack.c.bf16 %v8389_v18, %v8388_v16 }
 0x94f   :  { %11875 = vmatpush3.bf16.msra.mxu0 %v12078_v41  ;;  %v8515_v41 = vld [vmem:[#allocation4 + $0x1d] sm:$0xff] }
 0x950   :  { %11920 = vmatprep.subr.bf16.mxu0 %v16383_v58 }
 0x951   :  { %11899 = vmatpush3.bf16.msra.mxu1 %v12080_v0  ;;  %v8523_v0 = vpack.c.bf16 %v8516_v46, %v8515_v41 }
 0x952   :  { %11833 = vmatmul.mubr.msk.bf16.gmra.mxu0 %vm1439_vm6, %v8142_v37  ;;  %11944 = vmatprep.subr.bf16.mxu1 %v16383_v58  ;;  %v8390_v37 = vld [vmem:[#allocation4 + $0x2c] sm:$0xff] }
 0x953   :  { %11857 = vmatmul.mubr.msk.bf16.gmra.mxu1 %vm1439_vm6, %v8269_v56  ;;  %11836 = vmatprep.mubr.msk.bf16.mxu0 %vm12204_vm2, %v16383_v58  ;;  %v8391_v56 = vld [vmem:[#allocation4 + $0x34] sm:$0xff] }
 0x954   :  { %11860 = vmatprep.mubr.msk.bf16.mxu1 %vm12204_vm2, %v16383_v58 }
 0x95a   :  { %11837 = vmatmul.mubr.msk.bf16.gmra.mxu0 %vm1439_vm6, %v8143_v42  ;;  %v8397_v42 = vpack.c.bf16 %v8391_v56, %v8390_v37 }
 0x95b   :  { %11861 = vmatmul.mubr.msk.bf16.gmra.mxu1 %vm1439_vm6, %v8270_v26  ;;  %11840 = vmatprep.mubr.msk.bf16.mxu0 %vm12204_vm2, %v16383_v58  ;;  %v8524_v26 = vpack.c.bf16 %v8518_v35, %v8517_v51 }
 0x95c   :  { %11864 = vmatprep.mubr.msk.bf16.mxu1 %vm12204_vm2, %v16383_v58 }
 0x962   :  { %11841 = vmatmul.mubr.msk.bf16.gmra.mxu0 %vm1439_vm6, %v8144_v29  ;;  %v8519_v29 = vld [vmem:[#allocation4 + $0x3d] sm:$0xff] }
 0x963   :  { %11865 = vmatmul.mubr.msk.bf16.gmra.mxu1 %vm1439_vm6, %v8271_v4  ;;  %11844 = vmatprep.mubr.msk.bf16.mxu0 %vm12204_vm2, %v16383_v58  ;;  %v8520_v4 = vld [vmem:[#allocation4 + $0x45] sm:$0xff] }
 0x964   :  { %11868 = vmatprep.mubr.msk.bf16.mxu1 %vm12204_vm2, %v16383_v58  ;;  %v8525_v23 = vpack.c.bf16 %v8520_v4, %v8519_v29 }
 0x96a   :  { %11845 = vmatmul.mubr.msk.bf16.gmra.mxu0 %vm1439_vm6, %v8145_v6  ;;  %v8394_v6 = vld [vmem:[#allocation4 + $0x4c] sm:$0xff] }
 0x96b   :  { %11869 = vmatmul.mubr.msk.bf16.gmra.mxu1 %vm1439_vm6, %v8272_v47  ;;  %11876 = vmatprep.mubr.msk.bf16.mxu0 %vm12204_vm2, %v16383_v58  ;;  %v8521_v47 = vld [vmem:[#allocation4 + $0x4d] sm:$0xff]  ;;  %v8399_v24 = vpack.c.bf16 %v8394_v6, %v8394_v6 }
 0x96c   :  { %11900 = vmatprep.mubr.msk.bf16.mxu1 %vm12204_vm2, %v16383_v58  ;;  %v8526_v15 = vpack.c.bf16 %v8521_v47, %v8521_v47 }
 0x972   :  { %11877 = vmatmul.mubr.msk.bf16.vlgmr.msra.gmra.mxu0 %vm1439_vm6, %v8395_v28 }
 0x973   :  { %11901 = vmatmul.mubr.msk.bf16.vlgmr.msra.gmra.mxu1 %vm1439_vm6, %v8522_v11  ;;  %11921 = vmatpush3.bf16.msra.mxu0 %v12081_v7  ;;  %v8651_v7 = vpack.c.bf16 %v15812_v17, %v15802_v60 }
 0x974   :  { %11880 = vmatprep.mubr.msk.bf16.mxu0 %vm12204_vm2, %v16383_v58  ;;  %11904 = vmatprep.mubr.msk.bf16.mxu1 %vm12204_vm2, %v16383_v58 }
 0x975   :  { %11922 = vmatprep.subr.bf16.mxu0 %v16383_v58 }
 0x977   :  { %11923 = vmatpush3.bf16.msra.mxu0 %v12082_v8 }
 0x97a   :  { %11881 = vmatmul.mubr.msk.bf16.gmra.mxu0 %vm1439_vm6, %v8396_v63 }
 0x97b   :  { %11905 = vmatmul.mubr.msk.bf16.gmra.mxu1 %vm1439_vm6, %v8523_v0  ;;  %11884 = vmatprep.mubr.msk.bf16.mxu0 %vm12204_vm2, %v16383_v58 }
 0x97c   :  { %11908 = vmatprep.mubr.msk.bf16.mxu1 %vm12204_vm2, %v16383_v58 }
 0x982   :  { %11885 = vmatmul.mubr.msk.bf16.gmra.mxu0 %vm1439_vm6, %v8397_v42 }
 0x983   :  { %11909 = vmatmul.mubr.msk.bf16.gmra.mxu1 %vm1439_vm6, %v8524_v26  ;;  %11888 = vmatprep.mubr.msk.bf16.mxu0 %vm12204_vm2, %v16383_v58 }
 0x984   :  { %11912 = vmatprep.mubr.msk.bf16.mxu1 %vm12204_vm2, %v16383_v58 }
 0x98a   :  { %11889 = vmatmul.mubr.msk.bf16.gmra.mxu0 %vm1439_vm6, %v8398_v1 }
 0x98b   :  { %11913 = vmatmul.mubr.msk.bf16.gmra.mxu1 %vm1439_vm6, %v8525_v23  ;;  %11892 = vmatprep.mubr.msk.bf16.mxu0 %vm12204_vm2, %v16383_v58 }
 0x98c   :  { %11916 = vmatprep.mubr.msk.bf16.mxu1 %vm12204_vm2, %v16383_v58 }
 0x992   :  { %11893 = vmatmul.mubr.msk.bf16.gmra.mxu0 %vm1439_vm6, %v8399_v24 }
 0x993   :  { %11917 = vmatmul.mubr.msk.bf16.gmra.mxu1 %vm1439_vm6, %v8526_v15  ;;  %11924 = vmatprep.mubr.msk.bf16.mxu0 %vm12204_vm2, %v16383_v58 }
 0x994   :  { %11948 = vmatprep.mubr.msk.bf16.mxu1 %vm12204_vm2, %v16383_v58 }
 0x99a   :  { %11925 = vmatmul.mubr.msk.bf16.vlgmr.msra.gmra.mxu0 %vm1439_vm6, %v8649_v48 }
 0x99b   :  { %11928 = vmatprep.mubr.msk.bf16.mxu0 %vm12204_vm2, %v16383_v58 }
 0x9a2   :  { %11929 = vmatmul.mubr.msk.bf16.gmra.mxu0 %vm1439_vm6, %v8650_v49 }
 0x9a3   :  { %11932 = vmatprep.mubr.msk.bf16.mxu0 %vm12204_vm2, %v16383_v58 }
 0x9aa   :  { %11933 = vmatmul.mubr.msk.bf16.gmra.mxu0 %vm1439_vm6, %v8651_v7 }
 0x9ab   :  { %11936 = vmatprep.mubr.msk.bf16.mxu0 %vm12204_vm2, %v16383_v58 }
 0x9b2   :  { %11937 = vmatmul.mubr.msk.bf16.gmra.mxu0 %vm1439_vm6, %v8652_v55 }
 0x9b3   :  { %11940 = vmatprep.mubr.msk.bf16.mxu0 %vm12204_vm2, %v16383_v58 }
 0x9ba   :  { %v7741_v44 = vpop.f32.mrf.mxu0  ;;  %11941 = vmatmul.mubr.msk.bf16.gmra.mxu0 %vm1439_vm6, %v8653_v30 }
 0x9bb   :  { %v7840_v28 = vpop.f32.mrf.mxu1 }
 0x9bc   :  { %v7841_v60 = vadd.f32 %v7840_v28, %v7741_v44  ;;  %v11734_v17 = vpop.f32.mrf.mxu0 }
 0x9bd   :  { %v11758_v11 = vpop.f32.mrf.mxu1 }
 0x9be   :  { %v7744_v8 = vpop.f32.mrf.mxu0 }
 0x9bf   :  { %v7843_v16 = vpop.f32.mrf.mxu1 }
 0x9c0   :  { %v7844_v18 = vadd.f32 %v7843_v16, %v7744_v8  ;;  %v11735_v41 = vpop.f32.mrf.mxu0 }
 0x9c1   :  { %v11759_v46 = vpop.f32.mrf.mxu1 }
 0x9c2   :  { %v7749_v19 = vpop.f32.mrf.mxu0 }
 0x9c3   :  { %v7848_v20 = vpop.f32.mrf.mxu1 }
 0x9c4   :  { %v7849_v63 = vadd.f32 %v7848_v20, %v7749_v19  ;;  %v11738_v0 = vpop.f32.mrf.mxu0 }
 0x9c5   :  { %v11762_v37 = vpop.f32.mrf.mxu1 }
 0x9c6   :  { %v7752_v56 = vpop.f32.mrf.mxu0 }
 0x9c7   :  { %v7851_v51 = vpop.f32.mrf.mxu1 }
 0x9c8   :  { %v7852_v35 = vadd.f32 %v7851_v51, %v7752_v56  ;;  %v11739_v42 = vpop.f32.mrf.mxu0 }
 0x9c9   :  { %v11763_v26 = vpop.f32.mrf.mxu1 }
 0x9ca   :  { %v7757_v57 = vpop.f32.mrf.mxu0 }
 0x9cb   :  { %v7856_v62 = vpop.f32.mrf.mxu1 }
 0x9cc   :  { %v7857_v29 = vadd.f32 %v7856_v62, %v7757_v57  ;;  %v11742_v4 = vpop.f32.mrf.mxu0 }
 0x9cd   :  { %v11766_v1 = vpop.f32.mrf.mxu1 }
 0x9ce   :  { %v7760_v23 = vpop.f32.mrf.mxu0 }
 0x9cf   :  { %v7859_v6 = vpop.f32.mrf.mxu1 }
 0x9d0   :  { %v7860_v47 = vadd.f32 %v7859_v6, %v7760_v23  ;;  %v11743_v24 = vpop.f32.mrf.mxu0 }
 0x9d1   :  { %v11767_v15 = vpop.f32.mrf.mxu1 }
 0x9d2   :  { %v7765_v48 = vpop.f32.mrf.mxu0 }
 0x9d3   :  { %v7864_v49 = vpop.f32.mrf.mxu1 }
 0x9d4   :  { %v7865_v7 = vadd.f32 %v7864_v49, %v7765_v48  ;;  %v11746_v55 = vpop.f32.mrf.mxu0 }
 0x9d5   :  { %v11770_v43 = vpop.f32.mrf.mxu1 }
 0x9d6   :  { %v7768_v30 = vpop.f32.mrf.mxu0 }
 0x9d7   :  { %v7867_v44 = vpop.f32.mrf.mxu1 }
 0x9d8   :  { %v7868_v28 = vadd.f32 %v7867_v44, %v7768_v30  ;;  %v11747_v17 = vpop.f32.mrf.mxu0 }
 0x9d9   :  { %v11771_v11 = vpop.f32.mrf.mxu1 }
 0x9da   :  { %v7773_v8 = vpop.f32.mrf.mxu0 }
 0x9db   :  { %v7872_v16 = vpop.f32.mrf.mxu1 }
 0x9dc   :  { %v7873_v41 = vadd.f32 %v7872_v16, %v7773_v8  ;;  %v11750_v46 = vpop.f32.mrf.mxu0 }
 0x9dd   :  { %v11774_v19 = vpop.f32.mrf.mxu1 }
 0x9de   :  { %v7776_v20 = vpop.f32.mrf.mxu0 }
 0x9df   :  { %v7875_v0 = vpop.f32.mrf.mxu1 }
 0x9e0   :  { %v11751_v37 = vpop.f32.mrf.mxu0 }
 0x9e1   :  { %v11775_v56 = vpop.f32.mrf.mxu1 }
 0x9e2   :  { %v7958_v51 = vpop.f32.mrf.mxu0 }
 0x9e3   :  { %v7996_v42 = vadd.f32 %v7958_v51, %v7841_v60  ;;  %v8085_v26 = vpop.f32.mrf.mxu1 }
 0x9e4   :  { %v11782_v57 = vpop.f32.mrf.mxu0 }
 0x9e5   :  { %v8123_v62 = vadd.f32 %v8085_v26, %v7996_v42  ;;  %v11806_v4 = vpop.f32.mrf.mxu1 }
 0x9e6   :  { %v7961_v1 = vpop.f32.mrf.mxu0 }
 0x9e7   :  { %v7997_v23 = vadd.f32 %v7961_v1, %v7844_v18  ;;  %v8088_v6 = vpop.f32.mrf.mxu1 }
 0x9e8   :  { %v11783_v24 = vpop.f32.mrf.mxu0 }
 0x9e9   :  { %v8124_v15 = vadd.f32 %v8088_v6, %v7997_v23  ;;  %v11807_v48 = vpop.f32.mrf.mxu1 }
 0x9ea   :  { %v7966_v49 = vpop.f32.mrf.mxu0 }
 0x9eb   :  { %v7998_v55 = vadd.f32 %v7966_v49, %v7849_v63  ;;  %v8093_v43 = vpop.f32.mrf.mxu1 }
 0x9ec   :  { %v11786_v30 = vpop.f32.mrf.mxu0 }
 0x9ed   :  { %v8125_v44 = vadd.f32 %v8093_v43, %v7998_v55  ;;  %v11810_v17 = vpop.f32.mrf.mxu1 }
 0x9ee   :  { %v7969_v11 = vpop.f32.mrf.mxu0 }
 0x9ef   :  { %v7999_v8 = vadd.f32 %v7969_v11, %v7852_v35  ;;  %v8096_v16 = vpop.f32.mrf.mxu1 }
 0x9f0   :  { %v11787_v60 = vpop.f32.mrf.mxu0 }
 0x9f1   :  { %v8126_v46 = vadd.f32 %v8096_v16, %v7999_v8  ;;  %v11811_v19 = vpop.f32.mrf.mxu1 }
 0x9f2   :  { %v7974_v20 = vpop.f32.mrf.mxu0 }
 0x9f3   :  { %v8000_v0 = vadd.f32 %v7974_v20, %v7857_v29  ;;  %v8101_v37 = vpop.f32.mrf.mxu1 }
 0x9f4   :  { %v11790_v18 = vpop.f32.mrf.mxu0 }
 0x9f5   :  { %v8127_v56 = vadd.f32 %v8101_v37, %v8000_v0  ;;  %v11814_v51 = vpop.f32.mrf.mxu1 }
 0x9f6   :  { %v7977_v42 = vpop.f32.mrf.mxu0 }
 0x9f7   :  { %v8001_v26 = vadd.f32 %v7977_v42, %v7860_v47  ;;  %v8104_v57 = vpop.f32.mrf.mxu1 }
 0x9f8   :  { %v11791_v63 = vpop.f32.mrf.mxu0 }
 0x9f9   :  { %v8128_v4 = vadd.f32 %v8104_v57, %v8001_v26  ;;  %v11815_v1 = vpop.f32.mrf.mxu1 }
 0x9fa   :  { %v7982_v23 = vpop.f32.mrf.mxu0 }
 0x9fb   :  { %v8002_v6 = vadd.f32 %v7982_v23, %v7865_v7  ;;  %v8109_v24 = vpop.f32.mrf.mxu1 }
 0x9fc   :  { %v11794_v35 = vpop.f32.mrf.mxu0 }
 0x9fd   :  { %v8129_v48 = vadd.f32 %v8109_v24, %v8002_v6  ;;  %v11818_v49 = vpop.f32.mrf.mxu1 }
 0x9fe   :  { %v7985_v55 = vpop.f32.mrf.mxu0 }
 0x9ff   :  { %v8003_v43 = vadd.f32 %v7985_v55, %v7868_v28  ;;  %v8112_v30 = vpop.f32.mrf.mxu1 }
 0xa00   :  { %v11795_v29 = vpop.f32.mrf.mxu0 }
 0xa01   :  { %v8130_v17 = vadd.f32 %v8112_v30, %v8003_v43  ;;  %v11819_v11 = vpop.f32.mrf.mxu1 }
 0xa02   :  { %v7990_v8 = vpop.f32.mrf.mxu0 }
 0xa03   :  { %v8004_v16 = vadd.f32 %v7990_v8, %v7873_v41  ;;  %v8117_v60 = vpop.f32.mrf.mxu1 }
 0xa04   :  { %v11798_v47 = vpop.f32.mrf.mxu0 }
 0xa05   :  { %v8131_v19 = vadd.f32 %v8117_v60, %v8004_v16  ;;  %v11822_v20 = vpop.f32.mrf.mxu1 }
 0xa06   :  { %v7993_v0 = vpop.f32.mrf.mxu0 }
 0xa07   :  { %v8120_v37 = vpop.f32.mrf.mxu1 }
 0xa08   :  { %v11799_v18 = vpop.f32.mrf.mxu0 }
 0xa09   :  { %v11823_v7 = vpop.f32.mrf.mxu1 }
 0xa0a   :  { %v8212_v51 = vpop.f32.mrf.mxu0 }
 0xa0b   :  { %v8250_v42 = vadd.f32 %v8212_v51, %v8123_v62  ;;  %v8339_v26 = vpop.f32.mrf.mxu1 }
 0xa0c   :  { %v11830_v57 = vpop.f32.mrf.mxu0 }
 0xa0d   :  { %v15946_v63 = vadd.f32 %v8339_v26, %v8250_v42  ;;  %v11854_v28 = vpop.f32.mrf.mxu1 }
 0xa0e   :  { %v8215_v1 = vpop.f32.mrf.mxu0 }
 0xa0f   :  { %v8251_v23 = vadd.f32 %v8215_v1, %v8124_v15  ;;  %v8342_v6 = vpop.f32.mrf.mxu1 }
 0xa10   :  { %v11831_v24 = vpop.f32.mrf.mxu0 }
 0xa11   :  { %v15948_v41 = vadd.f32 %v8342_v6, %v8251_v23  ;;  %v11855_v35 = vpop.f32.mrf.mxu1 }
 0xa12   :  { %v8220_v49 = vpop.f32.mrf.mxu0 }
 0xa13   :  { %v8252_v55 = vadd.f32 %v8220_v49, %v8125_v44  ;;  %v8347_v43 = vpop.f32.mrf.mxu1 }
 0xa14   :  { %v11834_v30 = vpop.f32.mrf.mxu0 }
 0xa15   :  { %v15950_v29 = vadd.f32 %v8347_v43, %v8252_v55  ;;  %v11858_v11 = vpop.f32.mrf.mxu1 }
 0xa16   :  { %v8223_v62 = vpop.f32.mrf.mxu0 }
 0xa17   :  { %v8253_v8 = vadd.f32 %v8223_v62, %v8126_v46  ;;  %v8350_v16 = vpop.f32.mrf.mxu1 }
 0xa18   :  { %v11835_v60 = vpop.f32.mrf.mxu0 }
 0xa19   :  { %v15952_v47 = vadd.f32 %v8350_v16, %v8253_v8  ;;  %v11859_v20 = vpop.f32.mrf.mxu1 }
 0xa1a   :  { %v8228_v15 = vpop.f32.mrf.mxu0 }
 0xa1b   :  { %v8254_v0 = vadd.f32 %v8228_v15, %v8127_v56  ;;  %v8355_v37 = vpop.f32.mrf.mxu1 }
 0xa1c   :  { %v11838_v18 = vpop.f32.mrf.mxu0 }
 0xa1d   :  { %v15954_v7 = vadd.f32 %v8355_v37, %v8254_v0  ;;  %v11862_v51 = vpop.f32.mrf.mxu1 }
 0xa1e   :  { %v8231_v44 = vpop.f32.mrf.mxu0 }
 0xa1f   :  { %v8255_v42 = vadd.f32 %v8231_v44, %v8128_v4  ;;  %v8358_v26 = vpop.f32.mrf.mxu1 }
 0xa20   :  { %v11839_v57 = vpop.f32.mrf.mxu0 }
 0xa21   :  { %v15956_v28 = vadd.f32 %v8358_v26, %v8255_v42  ;;  %v11863_v1 = vpop.f32.mrf.mxu1 }
 0xa22   :  { %v8236_v46 = vpop.f32.mrf.mxu0 }
 0xa23   :  { %v8256_v23 = vadd.f32 %v8236_v46, %v8129_v48  ;;  %v8363_v6 = vpop.f32.mrf.mxu1  ;;  %v12083_v48 = vld [vmem:[%s16244_s4 + $0x18] sm:$0xff]  }
 0xa24   :  { %v11842_v24 = vpop.f32.mrf.mxu0  ;;  %11945 = vmatpush3.bf16.msra.mxu1 %v12083_v48 }
 0xa25   :  { %v15958_v35 = vadd.f32 %v8363_v6, %v8256_v23  ;;  %v11866_v49 = vpop.f32.mrf.mxu1  ;;  %11946 = vmatprep.subr.bf16.mxu1 %v16383_v58 }
 0xa26   :  { %v8239_v56 = vpop.f32.mrf.mxu0 }
 0xa27   :  { %v8257_v55 = vadd.f32 %v8239_v56, %v8130_v17  ;;  %v8366_v43 = vpop.f32.mrf.mxu1  ;;  %v12084_v17 = vld [vmem:[%s16244_s4 + $0x10] sm:$0xff]  }
 0xa28   :  { %v11843_v30 = vpop.f32.mrf.mxu0  ;;  %11947 = vmatpush3.bf16.msra.mxu1 %v12084_v17 }
 0xa29   :  { %v15960_v11 = vadd.f32 %v8366_v43, %v8257_v55  ;;  %v11867_v62 = vpop.f32.mrf.mxu1 }
 0xa2a   :  { %v8244_v4 = vpop.f32.mrf.mxu0 }
 0xa2b   :  { %v8258_v8 = vadd.f32 %v8244_v4, %v8131_v19  ;;  %v8371_v16 = vpop.f32.mrf.mxu1 }
 0xa2c   :  { %v11846_v60 = vpop.f32.mrf.mxu0 }
 0xa2d   :  { %v15965_v20 = vadd.f32 %v8371_v16, %v8258_v8  ;;  %v11870_v15 = vpop.f32.mrf.mxu1 }
 0xa2e   :  { %v8247_v0 = vpop.f32.mrf.mxu0 }
 0xa2f   :  { %v8374_v37 = vpop.f32.mrf.mxu1 }
 0xa30   :  { %v11847_v18 = vpop.f32.mrf.mxu0 }
 0xa31   :  { %v11871_v19 = vpop.f32.mrf.mxu1 }
 0xa32   :  { %v8466_v51 = vpop.f32.mrf.mxu0 }
 0xa33   :  { %v8593_v44 = vpop.f32.mrf.mxu1 }
 0xa34   :  { %v11878_v42 = vpop.f32.mrf.mxu0 }
 0xa35   :  { %v11902_v26 = vpop.f32.mrf.mxu1 }
 0xa36   :  { %v8469_v57 = vpop.f32.mrf.mxu0 }
 0xa37   :  { %v8596_v1 = vpop.f32.mrf.mxu1 }
 0xa38   :  { %v11879_v46 = vpop.f32.mrf.mxu0 }
 0xa39   :  { %v11903_v23 = vpop.f32.mrf.mxu1 }
 0xa3a   :  { %v8474_v6 = vpop.f32.mrf.mxu0 }
 0xa3b   :  { %v8601_v24 = vpop.f32.mrf.mxu1  ;;  %v8506_v2 = vadd.f32 %v8474_v6, %v15950_v29 }
 0xa3c   :  { %v11882_v49 = vpop.f32.mrf.mxu0 }
 0xa3d   :  { %v11906_v56 = vpop.f32.mrf.mxu1 }
 0xa3e   :  { %v8477_v55 = vpop.f32.mrf.mxu0 }
 0xa3f   :  { %v8604_v43 = vpop.f32.mrf.mxu1 }
 0xa40   :  { %v11883_v30 = vpop.f32.mrf.mxu0 }
 0xa41   :  { %v11907_v62 = vpop.f32.mrf.mxu1 }
 0xa42   :  { %v8482_v4 = vpop.f32.mrf.mxu0 }
 0xa43   :  { %v8609_v8 = vpop.f32.mrf.mxu1 }
 0xa44   :  { %v11886_v16 = vpop.f32.mrf.mxu0 }
 0xa45   :  { %v11910_v60 = vpop.f32.mrf.mxu1  ;;  %v8504_v16 = vadd.f32 %v8466_v51, %v15946_v63  ;;  %v8507_v51 = vadd.f32 %v8477_v55, %v15952_v47 }
 0xa46   :  { %v8485_v48 = vpop.f32.mrf.mxu0 }
 0xa47   :  { %v15971_v15 = vpop.f32.mrf.mxu1  ;;  %v8631_v31 = vadd.f32 %v8593_v44, %v8504_v16  ;;  %v8633_v44 = vadd.f32 %v8601_v24, %v8506_v2  ;;  %v8634_v6 = vadd.f32 %v8604_v43, %v8507_v51  ;;  %v8509_v51 = vadd.f32 %v8485_v48, %v15956_v28 }
 0xa48   :  { %v11887_v0 = vpop.f32.mrf.mxu0 }
 0xa49   :  { %v11911_v17 = vpop.f32.mrf.mxu1 }
 0xa4a   :  { %v15973_v37 = vpop.f32.mrf.mxu0 }
 0xa4b   :  { %v15975_v18 = vpop.f32.mrf.mxu1 }
 0xa4c   :  { %v11890_v19 = vpop.f32.mrf.mxu0 }
 0xa4d   :  { %v11914_v42 = vpop.f32.mrf.mxu1  ;;  %v8505_v19 = vadd.f32 %v8469_v57, %v15948_v41 }
 0xa4e   :  { %v15977_v26 = vpop.f32.mrf.mxu0 }
 0xa4f   :  { %v15979_v46 = vpop.f32.mrf.mxu1 }
 0xa50   :  { %v11891_v23 = vpop.f32.mrf.mxu0 }
 0xa51   :  { %v11915_v49 = vpop.f32.mrf.mxu1 }
 0xa52   :  { %v15981_v56 = vpop.f32.mrf.mxu0  ;;  %v8632_v49 = vadd.f32 %v8596_v1, %v8505_v19 }
 0xa53   :  { %v15983_v30 = vpop.f32.mrf.mxu1 }
 0xa54   :  { %v11894_v62 = vpop.f32.mrf.mxu0 }
 0xa55   :  { %v11918_v60 = vpop.f32.mrf.mxu1 }
 0xa56   :  { %v8501_v0 = vpop.f32.mrf.mxu0 }
 0xa57   :  { %v8628_v17 = vpop.f32.mrf.mxu1  ;;  %v8508_v0 = vadd.f32 %v8482_v4, %v15954_v7 }
 0xa58   :  { %v11895_v27 = vpop.f32.mrf.mxu0 }
 0xa59   :  { %v11919_v42 = vpop.f32.mrf.mxu1 }
 0xa5a   :  { %v8720_v53 = vpop.f32.mrf.mxu0 }
 0xa5b   :  { %v15987_v45 = vadd.f32 %v8720_v53, %v8631_v31 }
 0xa5c   :  { %v11926_v23 = vpop.f32.mrf.mxu0 }
 0xa5d   :  { %v8769_v62 = vmul.f32 %v15987_v45, %v14960_v10 }
 0xa5e   :  { %v8723_v59 = vpop.f32.mrf.mxu0 }
 0xa5f   :  { %v15992_v63 = vadd.f32 %v8723_v59, %v8632_v49  ;;  %v8802_v16 = vmul.f32 %v8769_v62, %v8769_v62  ;;  %v8778_v31 = vsel %vm1439_vm6, %v8769_v62, 0.0  ;;  %v8635_v62 = vadd.f32 %v8609_v8, %v8508_v0 }
 0xa60   :  { %v11927_v27 = vpop.f32.mrf.mxu0  ;;  %v8510_v8 = vadd.f32 %v15973_v37, %v15958_v35 }
 0xa61   :  { %v8770_v41 = vmul.f32 %v15992_v63, %v14964_v3  ;;  %v8811_v47 = vsel %vm1439_vm6, %v8802_v16, 0.0 }
 0xa62   :  { %v8728_v53 = vpop.f32.mrf.mxu0 }
 0xa63   :  { %v8779_v57 = vsel %vm1439_vm6, %v8770_v41, 0.0  ;;  %v8803_v29 = vmul.f32 %v8770_v41, %v8770_v41  ;;  %v15999_v1 = vadd.f32 %v8728_v53, %v8633_v44 }
 0xa64   :  { %v8780_v60 = vadd.f32 %v8779_v57, %v8778_v31  ;;  %v11930_v59 = vpop.f32.mrf.mxu0 }
 0xa65   :  { %v8812_v2 = vsel %vm1439_vm6, %v8803_v29, 0.0  ;;  %v8771_v24 = vmul.f32 %v15999_v1, %v14970_v12  ;;  %v8636_v29 = vadd.f32 %v15971_v15, %v8509_v51  ;;  %v8511_v15 = vadd.f32 %v15977_v26, %v15960_v11 }
 0xa66   :  { %v8813_v55 = vadd.f32 %v8812_v2, %v8811_v47  ;;  %v8731_v17 = vpop.f32.mrf.mxu0 }
 0xa67   :  { %v8781_v19 = vsel %vm1439_vm6, %v8771_v24, 0.0  ;;  %v8804_v42 = vmul.f32 %v8771_v24, %v8771_v24  ;;  %v16007_v23 = vadd.f32 %v8731_v17, %v8634_v6 }
 0xa68   :  { %v8782_v49 = vadd.f32 %v8781_v19, %v8780_v60  ;;  %v11931_v43 = vpop.f32.mrf.mxu0 }
 0xa69   :  { %v8814_v7 = vsel %vm1439_vm6, %v8804_v42, 0.0  ;;  %v8772_v4 = vmul.f32 %v16007_v23, %v14985_v25 }
 0xa6a   :  { %v8815_v27 = vadd.f32 %v8814_v7, %v8813_v55  ;;  %v8736_v44 = vpop.f32.mrf.mxu0  ;;  %v8637_v55 = vadd.f32 %v15975_v18, %v8510_v8  ;;  %v8638_v7 = vadd.f32 %v15979_v46, %v8511_v15  ;;  %v8512_v18 = vadd.f32 %v15981_v56, %v15965_v20 }
 0xa6b   :  { %v8783_v16 = vsel %vm1439_vm6, %v8772_v4, 0.0  ;;  %v8805_v41 = vmul.f32 %v8772_v4, %v8772_v4  ;;  %v16014_v53 = vadd.f32 %v8736_v44, %v8635_v62 }
 0xa6c   :  { %v8784_v31 = vadd.f32 %v8783_v16, %v8782_v49  ;;  %v11934_v57 = vpop.f32.mrf.mxu0 }
 0xa6d   :  { %v8816_v28 = vsel %vm1439_vm6, %v8805_v41, 0.0  ;;  %v8773_v48 = vmul.f32 %v16014_v53, %v14992_v33 }
 0xa6e   :  { %v8817_v6 = vadd.f32 %v8816_v28, %v8815_v27  ;;  %v8739_v60 = vpop.f32.mrf.mxu0 }
 0xa6f   :  { %v8785_v59 = vsel %vm1439_vm6, %v8773_v48, 0.0  ;;  %v8806_v0 = vmul.f32 %v8773_v48, %v8773_v48  ;;  %v16023_v47 = vadd.f32 %v8739_v60, %v8636_v29  ;;  %v8639_v29 = vadd.f32 %v15983_v30, %v8512_v18 }
 0xa70   :  { %v8786_v2 = vadd.f32 %v8785_v59, %v8784_v31  ;;  %v11935_v24 = vpop.f32.mrf.mxu0 }
 0xa71   :  { %v8818_v35 = vsel %vm1439_vm6, %v8806_v0, 0.0  ;;  %v8774_v37 = vmul.f32 %v16023_v47, %v15004_v32 }
 0xa72   :  { %v8819_v17 = vadd.f32 %v8818_v35, %v8817_v6  ;;  %v8744_v19 = vpop.f32.mrf.mxu0 }
 0xa73   :  { %v8787_v42 = vsel %vm1439_vm6, %v8774_v37, 0.0  ;;  %v8807_v49 = vmul.f32 %v8774_v37, %v8774_v37  ;;  %v16032_v43 = vadd.f32 %v8744_v19, %v8637_v55 }
 0xa74   :  { %v8788_v62 = vadd.f32 %v8787_v42, %v8786_v2  ;;  %v11938_v51 = vpop.f32.mrf.mxu0 }
 0xa75   :  { %v8820_v11 = vsel %vm1439_vm6, %v8807_v49, 0.0  ;;  %v8775_v26 = vmul.f32 %v16032_v43, %v15013_v39 }
 0xa76   :  { %v8821_v4 = vadd.f32 %v8820_v11, %v8819_v17  ;;  %v8747_v27 = vpop.f32.mrf.mxu0 }
 0xa77   :  { %v8789_v44 = vsel %vm1439_vm6, %v8775_v26, 0.0  ;;  %v8808_v16 = vmul.f32 %v8775_v26, %v8775_v26  ;;  %v16041_v41 = vadd.f32 %v8747_v27, %v8638_v7 }
 0xa78   :  { %v8790_v31 = vadd.f32 %v8789_v44, %v8788_v62  ;;  %v11939_v57 = vpop.f32.mrf.mxu0 }
 0xa79   :  { %v8822_v46 = vsel %vm1439_vm6, %v8808_v16, 0.0  ;;  %v8776_v20 = vmul.f32 %v16041_v41, %v15027_v9 }
 0xa7a   :  { %v8823_v56 = vadd.f32 %v8822_v46, %v8821_v4  ;;  %v8752_v8 = vpop.f32.mrf.mxu0 }
 0xa7b   :  { %v8791_v28 = vsel %vm1439_vm6, %v8776_v20, 0.0  ;;  %v8809_v48 = vmul.f32 %v8776_v20, %v8776_v20  ;;  %v8766_v6 = vadd.f32 %v8752_v8, %v8639_v29 }
 0xa7c   :  { %v8792_v60 = vadd.f32 %v8791_v28, %v8790_v31  ;;  %v11942_v59 = vpop.f32.mrf.mxu0 }
 0xa7d   :  { %v8824_v0 = vsel %vm1439_vm6, %v8809_v48, 0.0  ;;  %v8777_v2 = vmul.f32 %v8766_v6, %v15031_v13 }
 0xa7e   :  { %v8825_v24 = vadd.f32 %v8824_v0, %v8823_v56  ;;  %v8755_v55 = vpop.f32.mrf.mxu0 }
 0xa7f   :  { %v8793_v30 = vsel %vm1439_vm6, %v8777_v2, 0.0  ;;  %v8810_v15 = vmul.f32 %v8777_v2, %v8777_v2 }
 0xa80   :  { %v8794_v35 = vadd.f32 %v8793_v30, %v8792_v60  ;;  %v11943_v37 = vpop.f32.mrf.mxu0 }
 0xa81   :  { %v8826_v17 = vsel %vm1439_vm6, %v8810_v15, 0.0 }
 0xa82   :  { %v8795_v19 = vrot.slane %v8794_v35, 4  ;;  %v8827_v42 = vadd.f32 %v8826_v17, %v8825_v24 }
 0xa84   :  { %v8796_v49 = vadd.f32 %v8795_v19, %v8794_v35  ;;  %v8828_v62 = vrot.slane %v8827_v42, 4 }
 0xa86   :  { %v8797_v51 = vrot.slane %v8796_v49, 2  ;;  %v8829_v7 = vadd.f32 %v8828_v62, %v8827_v42 }
 0xa88   :  { %v8798_v18 = vadd.f32 %v8797_v51, %v8796_v49  ;;  %v8830_v11 = vrot.slane %v8829_v7, 2 }
 0xa8a   :  { %v8799_v26 = vrot.slane %v8798_v18, 1  ;;  %v8831_v4 = vadd.f32 %v8830_v11, %v8829_v7 }
 0xa8c   :  { %v8800_v27 = vadd.f32 %v8799_v26, %v8798_v18  ;;  %v8832_v44 = vrot.slane %v8831_v4, 1 }
 0xa8e   :  { %v8801_v16 = vmul.f32 0.03125, %v8800_v27  ;;  %v8833_v31 = vadd.f32 %v8832_v44, %v8831_v4 }
 0xa90   :  { %v8834_v57 = vmul.f32 0.03125, %v8833_v31  ;;  %v8835_v29 = vmul.f32 %v8801_v16, %v8801_v16  ;;  %v8847_v46 = vsub.f32 %v8766_v6, %v8801_v16  ;;  %v8839_v20 = vsub.f32 %v15987_v45, %v8801_v16  ;;  %v9916_v45 = vld [vmem:[%s16242_s7 + $0x8] ss:$0 sm:$0xff] }
 0xa91   :  { %v8840_v56 = vsub.f32 %v15992_v63, %v8801_v16  ;;  %v8841_v8 = vsub.f32 %v15999_v1, %v8801_v16  ;;  %v8842_v28 = vsub.f32 %v16007_v23, %v8801_v16  ;;  %v8843_v48 = vsub.f32 %v16014_v53, %v8801_v16  ;;  %v9917_v53 = vld [vmem:[%s16242_s7 + $0x9] ss:$0 sm:$0xff] }
 0xa92   :  { %v8836_v60 = vsub.f32 %v8834_v57, %v8835_v29  ;;  %v8844_v59 = vsub.f32 %v16023_v47, %v8801_v16  ;;  %v8845_v0 = vsub.f32 %v16032_v43, %v8801_v16  ;;  %v8846_v2 = vsub.f32 %v16041_v41, %v8801_v16 }
 0xa94   :  { %v8837_v24 = vadd.f32 1e-05, %v8836_v60 }
 0xa96   :  { %12095 = vrsqrt.f32 %v8837_v24 }
 0xaa3   :  { %v12096_v6 = vpop.eup %12095 }
 0xaa4   :  { %v8856_v63 = vmul.f32 %v12096_v6, %v8847_v46  ;;  %v8848_v1 = vmul.f32 %v12096_v6, %v8839_v20  ;;  %v8849_v55 = vmul.f32 %v12096_v6, %v8840_v56  ;;  %v8850_v23 = vmul.f32 %v12096_v6, %v8841_v8 }
 0xaa5   :  { %v8851_v47 = vmul.f32 %v12096_v6, %v8842_v28  ;;  %v8852_v30 = vmul.f32 %v12096_v6, %v8843_v48  ;;  %v8853_v43 = vmul.f32 %v12096_v6, %v8844_v59  ;;  %v8854_v15 = vmul.f32 %v12096_v6, %v8845_v0 }
 0xaa6   :  { %v8861_v41 = vmul.f32 %v9916_v45, %v8848_v1  ;;  %v8862_v35 = vmul.f32 %v9916_v45, %v8849_v55  ;;  %v8863_v37 = vmul.f32 %v9916_v45, %v8850_v23  ;;  %v8855_v49 = vmul.f32 %v12096_v6, %v8846_v2  ;;  %v12085_v55 = vld [vmem:[%s16245_s5 + $0x8] sm:$0xff]   ;;  %v12086_v23 = vld [vmem:[%s16245_s5] sm:$0xff]  }
 0xaa7   :  { %v8864_v17 = vmul.f32 %v9916_v45, %v8851_v47  ;;  %v8865_v19 = vmul.f32 %v9916_v45, %v8852_v30  ;;  %v8866_v42 = vmul.f32 %v9916_v45, %v8853_v43  ;;  %v8867_v4 = vmul.f32 %v9916_v45, %v8854_v15  ;;  %11968 = vmatprep.subr.bf16.mxu0 %v12085_v55 }
 0xaa8   :  { %v8874_v62 = vadd.f32 %v9917_v53, %v8861_v41  ;;  %v8875_v51 = vadd.f32 %v9917_v53, %v8862_v35  ;;  %v8876_v7 = vadd.f32 %v9917_v53, %v8863_v37  ;;  %v8868_v46 = vmul.f32 %v9916_v45, %v8855_v49  ;;  %11969 = vmatpush3.bf16.msra.mxu0 %v12085_v55 }
 0xaa9   :  { %v8877_v18 = vadd.f32 %v9917_v53, %v8864_v17  ;;  %v8878_v11 = vadd.f32 %v9917_v53, %v8865_v19  ;;  %v8879_v26 = vadd.f32 %v9917_v53, %v8866_v42  ;;  %v8880_v56 = vadd.f32 %v9917_v53, %v8867_v4  ;;  %11970 = vmatprep.subr.bf16.mxu0 %v12086_v23 }
 0xaaa   :  { %v8883_v27 = vmax.f32 %v8874_v62, 0.0  ;;  %v8884_v44 = vmax.f32 %v8875_v51, 0.0  ;;  %v8885_v16 = vmax.f32 %v8876_v7, 0.0  ;;  %v8881_v48 = vadd.f32 %v9917_v53, %v8868_v46 }
 0xaab   :  { %v8886_v31 = vmax.f32 %v8877_v18, 0.0  ;;  %v8887_v57 = vmax.f32 %v8878_v11, 0.0  ;;  %v8888_v29 = vmax.f32 %v8879_v26, 0.0  ;;  %v8889_v60 = vmax.f32 %v8880_v56, 0.0 }
 0xaac   :  { %v8892_v20 = vpack.c.bf16 %v8884_v44, %v8883_v27  ;;  %v8890_v59 = vmax.f32 %v8881_v48, 0.0  ;;  %v8869_v2 = vmul.f32 %v9916_v45, %v8856_v63  ;;  %11971 = vmatpush3.bf16.msra.mxu0 %v12086_v23 }
 0xaad   :  { %v8893_v8 = vpack.c.bf16 %v8886_v31, %v8885_v16  ;;  %v8894_v28 = vpack.c.bf16 %v8888_v29, %v8887_v57 }
 0xaae   :  { %11949 = vmatmul.mubr.msk.bf16.vlgmr.msra.gmra.mxu1 %vm1439_vm6, %v8892_v20  ;;  %v8895_v0 = vpack.c.bf16 %v8890_v59, %v8889_v60  ;;  %v8882_v24 = vadd.f32 %v9917_v53, %v8869_v2 }
 0xaaf   :  { %11952 = vmatprep.mubr.msk.bf16.mxu1 %vm12204_vm2, %v16383_v58 }
 0xab0   :  { %v8891_v6 = vmax.f32 %v8882_v24, 0.0 }
 0xab2   :  { %v8896_v1 = vpack.c.bf16 %v8891_v6, %v8891_v6 }
 0xab6   :  { %11953 = vmatmul.mubr.msk.bf16.gmra.mxu1 %vm1439_vm6, %v8893_v8 }
 0xab7   :  { %11956 = vmatprep.mubr.msk.bf16.mxu1 %vm12204_vm2, %v16383_v58 }
 0xabe   :  { %11957 = vmatmul.mubr.msk.bf16.gmra.mxu1 %vm1439_vm6, %v8894_v28 }
 0xabf   :  { %11960 = vmatprep.mubr.msk.bf16.mxu1 %vm12204_vm2, %v16383_v58 }
 0xac6   :  { %11961 = vmatmul.mubr.msk.bf16.gmra.mxu1 %vm1439_vm6, %v8895_v0 }
 0xac7   :  { %11964 = vmatprep.mubr.msk.bf16.mxu1 %vm12204_vm2, %v16383_v58 }
 0xace   :  { %11965 = vmatmul.mubr.msk.bf16.gmra.mxu1 %vm1439_vm6, %v8896_v1 }
 0xb6e   :  { %v16085_v45 = vpop.f32.mrf.mxu1 }
 0xb6f   :  { %v9003_v35 = vmul.f32 %v16085_v45, %v14960_v10 }
 0xb70   :  { %v11950_v63 = vpop.f32.mrf.mxu1 }
 0xb71   :  { %v9036_v62 = vmul.f32 %v9003_v35, %v9003_v35  ;;  %v9012_v11 = vsel %vm1439_vm6, %v9003_v35, 0.0 }
 0xb72   :  { %v16087_v58 = vpop.f32.mrf.mxu1 }
 0xb73   :  { %v9004_v15 = vmul.f32 %v16087_v58, %v14964_v3  ;;  %v9045_v29 = vsel %vm1439_vm6, %v9036_v62, 0.0 }
 0xb74   :  { %v11951_v53 = vpop.f32.mrf.mxu1 }
 0xb75   :  { %v9037_v19 = vmul.f32 %v9004_v15, %v9004_v15  ;;  %v9013_v51 = vsel %vm1439_vm6, %v9004_v15, 0.0 }
 0xb76   :  { %v16089_v47 = vpop.f32.mrf.mxu1  ;;  %v9014_v31 = vadd.f32 %v9013_v51, %v9012_v11 }
 0xb77   :  { %v9005_v37 = vmul.f32 %v16089_v47, %v14970_v12  ;;  %v9046_v4 = vsel %vm1439_vm6, %v9037_v19, 0.0 }
 0xb78   :  { %v11954_v30 = vpop.f32.mrf.mxu1  ;;  %v9047_v8 = vadd.f32 %v9046_v4, %v9045_v29 }
 0xb79   :  { %v9038_v7 = vmul.f32 %v9005_v37, %v9005_v37  ;;  %v9015_v27 = vsel %vm1439_vm6, %v9005_v37, 0.0 }
 0xb7a   :  { %v16091_v43 = vpop.f32.mrf.mxu1  ;;  %v9016_v28 = vadd.f32 %v9015_v27, %v9014_v31 }
 0xb7b   :  { %v9006_v42 = vmul.f32 %v16091_v43, %v14985_v25  ;;  %v9048_v46 = vsel %vm1439_vm6, %v9038_v7, 0.0 }
 0xb7c   :  { %v11955_v41 = vpop.f32.mrf.mxu1  ;;  %v9049_v24 = vadd.f32 %v9048_v46, %v9047_v8 }
 0xb7d   :  { %v9039_v44 = vmul.f32 %v9006_v42, %v9006_v42  ;;  %v9017_v20 = vsel %vm1439_vm6, %v9006_v42, 0.0 }
 0xb7e   :  { %v16099_v17 = vpop.f32.mrf.mxu1  ;;  %v9018_v6 = vadd.f32 %v9017_v20, %v9016_v28 }
 0xb7f   :  { %v9007_v18 = vmul.f32 %v16099_v17, %v14992_v33  ;;  %v9050_v60 = vsel %vm1439_vm6, %v9039_v44, 0.0 }
 0xb80   :  { %v11958_v49 = vpop.f32.mrf.mxu1  ;;  %v9051_v53 = vadd.f32 %v9050_v60, %v9049_v24 }
 0xb81   :  { %v9040_v56 = vmul.f32 %v9007_v18, %v9007_v18  ;;  %v9019_v59 = vsel %vm1439_vm6, %v9007_v18, 0.0 }
 0xb82   :  { %v16107_v26 = vpop.f32.mrf.mxu1  ;;  %v9020_v30 = vadd.f32 %v9019_v59, %v9018_v6 }
 0xb83   :  { %v9008_v16 = vmul.f32 %v16107_v26, %v15004_v32  ;;  %v9052_v55 = vsel %vm1439_vm6, %v9040_v56, 0.0 }
 0xb84   :  { %v11959_v57 = vpop.f32.mrf.mxu1  ;;  %v9053_v19 = vadd.f32 %v9052_v55, %v9051_v53 }
 0xb85   :  { %v9041_v0 = vmul.f32 %v9008_v16, %v9008_v16  ;;  %v9021_v23 = vsel %vm1439_vm6, %v9008_v16, 0.0 }
 0xb86   :  { %v16116_v48 = vpop.f32.mrf.mxu1  ;;  %v9022_v42 = vadd.f32 %v9021_v23, %v9020_v30 }
 0xb87   :  { %v9009_v2 = vmul.f32 %v16116_v48, %v15013_v39  ;;  %v9054_v41 = vsel %vm1439_vm6, %v9041_v0, 0.0 }
 0xb88   :  { %v11962_v1 = vpop.f32.mrf.mxu1  ;;  %v9055_v18 = vadd.f32 %v9054_v41, %v9053_v19 }
 0xb89   :  { %v9042_v63 = vmul.f32 %v9009_v2, %v9009_v2  ;;  %v9023_v35 = vsel %vm1439_vm6, %v9009_v2, 0.0 }
 0xb8a   :  { %v16124_v15 = vpop.f32.mrf.mxu1  ;;  %v9024_v11 = vadd.f32 %v9023_v35, %v9022_v42 }
 0xb8b   :  { %v9010_v37 = vmul.f32 %v16124_v15, %v15027_v9  ;;  %v9056_v62 = vsel %vm1439_vm6, %v9042_v63, 0.0 }
 0xb8c   :  { %v11963_v49 = vpop.f32.mrf.mxu1  ;;  %v9057_v16 = vadd.f32 %v9056_v62, %v9055_v18 }
 0xb8d   :  { %v9025_v51 = vsel %vm1439_vm6, %v9010_v37, 0.0  ;;  %v9043_v7 = vmul.f32 %v9010_v37, %v9010_v37 }
 0xb8e   :  { %v8995_v4 = vpop.f32.mrf.mxu1  ;;  %v9026_v31 = vadd.f32 %v9025_v51, %v9024_v11 }
 0xb8f   :  { %v9058_v27 = vsel %vm1439_vm6, %v9043_v7, 0.0  ;;  %v9011_v44 = vmul.f32 %v8995_v4, %v15031_v13 }
 0xb90   :  { %v11966_v57 = vpop.f32.mrf.mxu1  ;;  %v9059_v20 = vadd.f32 %v9058_v27, %v9057_v16  ;;  %v9929_v16 = vld [vmem:[%s16242_s7 + $0xa] ss:$0 sm:$0xff] }
 0xb91   :  { %v9027_v29 = vsel %vm1439_vm6, %v9011_v44, 0.0  ;;  %v9044_v46 = vmul.f32 %v9011_v44, %v9011_v44 }
 0xb92   :  { %v9028_v56 = vadd.f32 %v9027_v29, %v9026_v31  ;;  %v8998_v8 = vpop.f32.mrf.mxu1 }
 0xb93   :  { %v9060_v28 = vsel %vm1439_vm6, %v9044_v46, 0.0 }
 0xb94   :  { %v9029_v60 = vrot.slane %v9028_v56, 4  ;;  %v9061_v59 = vadd.f32 %v9060_v28, %v9059_v20  ;;  %v11967_v0 = vpop.f32.mrf.mxu1 }
 0xb96   :  { %v9030_v2 = vadd.f32 %v9029_v60, %v9028_v56  ;;  %v9062_v24 = vrot.slane %v9061_v59, 4 }
 0xb98   :  { %v9031_v6 = vrot.slane %v9030_v2, 2  ;;  %v9063_v1 = vadd.f32 %v9062_v24, %v9061_v59 }
 0xb9a   :  { %v9032_v55 = vadd.f32 %v9031_v6, %v9030_v2  ;;  %v9064_v23 = vrot.slane %v9063_v1, 2 }
 0xb9c   :  { %v9033_v63 = vrot.slane %v9032_v55, 1  ;;  %v9065_v53 = vadd.f32 %v9064_v23, %v9063_v1 }
 0xb9e   :  { %v9034_v30 = vadd.f32 %v9033_v63, %v9032_v55  ;;  %v9066_v41 = vrot.slane %v9065_v53, 1 }
 0xba0   :  { %v9035_v35 = vmul.f32 0.03125, %v9034_v30  ;;  %v9067_v37 = vadd.f32 %v9066_v41, %v9065_v53 }
 0xba2   :  { %v9068_v19 = vmul.f32 0.03125, %v9067_v37  ;;  %v9069_v42 = vmul.f32 %v9035_v35, %v9035_v35  ;;  %v9073_v51 = vsub.f32 %v16085_v45, %v9035_v35  ;;  %v9074_v7 = vsub.f32 %v16087_v58, %v9035_v35 }
 0xba3   :  { %v9075_v18 = vsub.f32 %v16089_v47, %v9035_v35  ;;  %v9076_v11 = vsub.f32 %v16091_v43, %v9035_v35  ;;  %v9077_v27 = vsub.f32 %v16099_v17, %v9035_v35  ;;  %v9078_v31 = vsub.f32 %v16107_v26, %v9035_v35  ;;  %v9930_v43 = vld [vmem:[%s16242_s7 + $0xb] ss:$0 sm:$0xff] }
 0xba4   :  { %v9070_v49 = vsub.f32 %v9068_v19, %v9069_v42  ;;  %v9079_v57 = vsub.f32 %v16116_v48, %v9035_v35  ;;  %v9080_v29 = vsub.f32 %v16124_v15, %v9035_v35  ;;  %v9081_v45 = vsub.f32 %v8995_v4, %v9035_v35 }
 0xba6   :  { %v9071_v62 = vadd.f32 1e-05, %v9070_v49 }
 0xba8   :  { %12097 = vrsqrt.f32 %v9071_v62 }
 0xbb5   :  { %v12098_v44 = vpop.eup %12097 }
 0xbb6   :  { %v9082_v46 = vmul.f32 %v12098_v44, %v9073_v51  ;;  %v9083_v58 = vmul.f32 %v12098_v44, %v9074_v7  ;;  %v9084_v20 = vmul.f32 %v12098_v44, %v9075_v18  ;;  %v9085_v47 = vmul.f32 %v12098_v44, %v9076_v11 }
 0xbb7   :  { %v9086_v17 = vmul.f32 %v12098_v44, %v9077_v27  ;;  %v9087_v56 = vmul.f32 %v12098_v44, %v9078_v31  ;;  %v9088_v8 = vmul.f32 %v12098_v44, %v9079_v57  ;;  %v9089_v28 = vmul.f32 %v12098_v44, %v9080_v29 }
 0xbb8   :  { %v9090_v60 = vmul.f32 %v12098_v44, %v9081_v45  ;;  %v9095_v59 = vmul.f32 %v9929_v16, %v9082_v46  ;;  %v9096_v26 = vmul.f32 %v9929_v16, %v9083_v58  ;;  %v9097_v0 = vmul.f32 %v9929_v16, %v9084_v20  ;;  %v9931_v20 = vld [vmem:[%s16246_s6] ss:$0 sm:$0xff] }
 0xbb9   :  { %v9098_v48 = vmul.f32 %v9929_v16, %v9085_v47  ;;  %v9099_v2 = vmul.f32 %v9929_v16, %v9086_v17  ;;  %v9100_v15 = vmul.f32 %v9929_v16, %v9087_v56  ;;  %v9101_v4 = vmul.f32 %v9929_v16, %v9088_v8 }
 0xbba   :  { %v9102_v24 = vmul.f32 %v9929_v16, %v9089_v28  ;;  %v9103_v6 = vmul.f32 %v9929_v16, %v9090_v60  ;;  %v9108_v1 = vadd.f32 %v9930_v43, %v9095_v59  ;;  %v9109_v55 = vadd.f32 %v9930_v43, %v9096_v26 }
 0xbbb   :  { %v9110_v23 = vadd.f32 %v9930_v43, %v9097_v0  ;;  %v9111_v63 = vadd.f32 %v9930_v43, %v9098_v48  ;;  %v9112_v53 = vadd.f32 %v9930_v43, %v9099_v2  ;;  %v9113_v30 = vadd.f32 %v9930_v43, %v9100_v15 }
 0xbbc   :  { %v9114_v41 = vadd.f32 %v9930_v43, %v9101_v4  ;;  %v9115_v35 = vadd.f32 %v9930_v43, %v9102_v24  ;;  %v9116_v37 = vadd.f32 %v9930_v43, %v9103_v6  ;;  %v9117_v19 = vmul.f32 %v9108_v1, %v14960_v10 }
 0xbbd   :  { %v9118_v42 = vmul.f32 %v9109_v55, %v14964_v3  ;;  %v9119_v49 = vmul.f32 %v9110_v23, %v14970_v12  ;;  %v9120_v62 = vmul.f32 %v9111_v63, %v14985_v25  ;;  %v9121_v51 = vmul.f32 %v9112_v53, %v14992_v33 }
 0xbbe   :  { %v9122_v7 = vmul.f32 %v9113_v30, %v15004_v32  ;;  %v9123_v18 = vmul.f32 %v9114_v41, %v15013_v39  ;;  %v9124_v11 = vmul.f32 %v9115_v35, %v15027_v9  ;;  %v9125_v27 = vmul.f32 %v9116_v37, %v15031_v13 }
 0xbbf   :  { %v9126_v44 = vadd.f32 %v9117_v19, %v7624_v34  ;;  %v9127_v10 = vadd.f32 %v9118_v42, %v7625_v38  ;;  %v9128_v3 = vadd.f32 %v9119_v49, %v7626_v22  ;;  %v16657_v12 = vmax.f32 %v15646_v50, 0.0 }
 0xbc0   :  { %v16658_v33 = vmax.f32 %v15649_v36, 0.0  ;;  %v16659_v39 = vmax.f32 %v15651_v5, 0.0  ;;  %v16660_v13 = vmax.f32 %v15656_v61, 0.0  ;;  %v9133_v34 = vadd.f32 %v9124_v11, %v16661_v52 }
 0xbc1   :  { %v9129_v25 = vadd.f32 %v9120_v62, %v16657_v12  ;;  %v9134_v38 = vadd.f32 %v9125_v27, %v16662_v40  ;;  %9135 = vst.msk [vmem:[#allocation4 + $0x7] sm:$0xff] %vm1439_vm6, %v9126_v44  ;;  %9136 = vst.msk [vmem:[#allocation4 + $0xf] sm:$0xff] %vm1439_vm6, %v9127_v10  ;;  %v9245_v37 = vlaneseq }
 0xbc2   :  { %v9130_v32 = vadd.f32 %v9121_v51, %v16658_v33  ;;  %v9131_v9 = vadd.f32 %v9122_v7, %v16659_v39  ;;  %v9132_v16 = vadd.f32 %v9123_v18, %v16660_v13  ;;  %9137 = vst.msk [vmem:[#allocation4 + $0x17] sm:$0xff] %vm1439_vm6, %v9128_v3  ;;  %9142 = vst.msk [vmem:[#allocation4 + $0x3f] sm:$0xff] %vm1439_vm6, %v9133_v34 }
 0xbc3   :  { %9138 = vst.msk [vmem:[#allocation4 + $0x1f] sm:$0xff] %vm1439_vm6, %v9129_v25  ;;  %9143 = vst.msk [vmem:[#allocation4 + $0x47] sm:$0xff] %vm1439_vm6, %v9134_v38  ;;  %v9246_v62 = vand.u32 127, %v9245_v37 }
 0xbc4   :  { %9139 = vst.msk [vmem:[#allocation4 + $0x27] sm:$0xff] %vm1439_vm6, %v9130_v32  ;;  %9140 = vst.msk [vmem:[#allocation4 + $0x2f] sm:$0xff] %vm1439_vm6, %v9131_v9 }
 0xbc5   :  { %9141 = vst.msk [vmem:[#allocation4 + $0x37] sm:$0xff] %vm1439_vm6, %v9132_v16  ;;  %vm9303_vm10 = vcmp.lt.s32.totalorder %v9246_v62, 8 }
 0xbc8   :  { %v9144_v54 = vld [vmem:[#allocation4 + $0xe] sm:$0xf] }
 0xbc9   :  { %v9147_v50 = vld [vmem:[#allocation4 + $0x14] sm:$0xf]  ;;  %v9149_v22 = vld [vmem:[#allocation4 + $0x1a] sm:$0xf]  ;;  %9146 = vst.msk [vmem:[#allocation5] sm:$0xf] %vm9145_vm9, %v9144_v54 }
 0xbca   :  { %9148 = vst.msk [vmem:[#allocation5 + $0x4] sm:$0xf] %vm9145_vm9, %v9147_v50  ;;  %9150 = vst.msk [vmem:[#allocation5 + $0x8] sm:$0xf] %vm9145_vm9, %v9149_v22  ;;  %v9151_v36 = vld [vmem:[#allocation4 + $0x20] sm:$0xf] }
 0xbcb   :  { %v9153_v5 = vld [vmem:[#allocation4 + $0x32] sm:$0xf]  ;;  %9152 = vst.msk [vmem:[#allocation5 + $0xc] sm:$0xf] %vm9145_vm9, %v9151_v36  ;;  %v9159_v21 = vld [vmem:[#allocation4 + $0x44] sm:$0xf] }
 0xbcc   :  { %v9155_v61 = vld [vmem:[#allocation4 + $0x38] sm:$0xf]  ;;  %9154 = vst.msk [vmem:[#allocation5 + $0x10] sm:$0xf] %vm9145_vm9, %v9153_v5  ;;  %v9157_v14 = vld [vmem:[#allocation4 + $0x3e] sm:$0xf] }
 0xbcd   :  { %9156 = vst.msk [vmem:[#allocation5 + $0x14] sm:$0xf] %vm9145_vm9, %v9155_v61  ;;  %9158 = vst.msk [vmem:[#allocation5 + $0x18] sm:$0xf] %vm9145_vm9, %v9157_v14 }
 0xbce   :  { %9160 = vst.msk [vmem:[#allocation5 + $0x1c] sm:$0xf] %vm9145_vm9, %v9159_v21 }
 0xbd1   :  { %v9161_v31 = vld [vmem:[#allocation5] sm:$0xff] }
 0xbd2   :  { %v9162_v57 = vld [vmem:[#allocation5 + $0x8] sm:$0xff] }
 0xbd3   :  { %v9165_v45 = vpack.c.bf16 %v9162_v57, %v9161_v31 }
 0xbd4   :  { %v9163_v29 = vld [vmem:[#allocation5 + $0x10] sm:$0xff] }
 0xbd5   :  { %v9164_v46 = vld [vmem:[#allocation5 + $0x18] sm:$0xff]  ;;  %11972 = vmatprep.mubr.msk.bf16.mxu0 %vm1439_vm6, %v9165_v45 }
 0xbd6   :  { %v9166_v58 = vpack.c.bf16 %v9164_v46, %v9163_v29 }
 0xbd8   :  { %11973 = vmatmul.mubr.msk.bf16.vlgmr.msra.gmra.mxu0 %vm1439_vm6, %v9166_v58 }
 0xc98   :  { %v11974_v47 = vpop.f32.mrf.mxu0 }
 0xc99   :  { %v9239_v43 = vadd.f32 %v11974_v47, %v9931_v20 }
 0xc9a   :  { %v9230_v17 = vpop.f32.mrf.mxu0 }
 0xc9b   :  { %v9253_v56 = vmin.f32 %v9239_v43, 20.0  ;;  %v16199_v8 = vadd.f32 %v9931_v20, %v9230_v17  ;;  %vm9249_vm11 = vcmp.gt.f32.partialorder %v9239_v43, 20.0 }
 0xc9c   :  { %v11975_v28 = vpop.f32.mrf.mxu0 }
 0xc9d   :  { %v9259_v60 = vmul.f32 1.442695, %v9253_v56  ;;  %v9251_v59 = vmin.f32 %v16199_v8, 20.0  ;;  %v16202_v26 = vadd.f32 %v11975_v28, %v9931_v20  ;;  %vm9247_vm14 = vcmp.gt.f32.partialorder %v16199_v8, 20.0 }
 0xc9e   :  { %v9233_v0 = vpop.f32.mrf.mxu0 }
 0xc9f   :  { %12099 = vpow2.f32 %v9259_v60  ;;  %v9255_v48 = vmul.f32 1.442695, %v9251_v59  ;;  %v9254_v2 = vmin.f32 %v16202_v26, 20.0  ;;  %v16205_v15 = vadd.f32 %v9931_v20, %v9233_v0 }
 0xca0   :  { %vm9250_vm1 = vcmp.gt.f32.partialorder %v16202_v26, 20.0 }
 0xca1   :  { %12101 = vpow2.f32 %v9255_v48  ;;  %v9261_v4 = vmul.f32 1.442695, %v9254_v2  ;;  %v9252_v24 = vmin.f32 %v16205_v15, 20.0  ;;  %vm9248_vm3 = vcmp.gt.f32.partialorder %v16205_v15, 20.0 }
 0xca3   :  { %12103 = vpow2.f32 %v9261_v4  ;;  %v9257_v6 = vmul.f32 1.442695, %v9252_v24 }
 0xca5   :  { %12105 = vpow2.f32 %v9257_v6 }
 0xcac   :  { %v12100_v1 = vpop.eup %12099 }
 0xcad   :  { %v9281_v55 = vadd.f32 1.0, %v12100_v1  ;;  %v9284_v19 = vmul.f32 -0.5, %v12100_v1  ;;  %v9287_v7 = vand.u32 2147483647, %v12100_v1 }
 0xcae   :  { %v12102_v23 = vpop.eup %12101 }
 0xcaf   :  { %12107 = vlog2.f32 %v9281_v55  ;;  %v9263_v63 = vadd.f32 1.0, %v12102_v23  ;;  %v9266_v42 = vmul.f32 -0.5, %v12102_v23  ;;  %v9285_v51 = vadd.f32 1.0, %v9284_v19 }
 0xcb0   :  { %v12104_v53 = vpop.eup %12103  ;;  %v9269_v27 = vand.u32 2147483647, %v12102_v23  ;;  %vm9288_vm12 = vcmp.lt.f32.partialorder %v9287_v7, 0.0004427343 }
 0xcb1   :  { %12109 = vlog2.f32 %v9263_v63  ;;  %v9290_v30 = vadd.f32 1.0, %v12104_v53  ;;  %v9293_v49 = vmul.f32 -0.5, %v12104_v53  ;;  %v9267_v18 = vadd.f32 1.0, %v9266_v42 }
 0xcb2   :  { %v12106_v41 = vpop.eup %12105  ;;  %v9286_v12 = vmul.f32 %v12100_v1, %v9285_v51  ;;  %v9296_v33 = vand.u32 2147483647, %v12104_v53  ;;  %vm9270_vm15 = vcmp.lt.f32.partialorder %v9269_v27, 0.0004427343 }
 0xcb3   :  { %12111 = vlog2.f32 %v9290_v30  ;;  %v9272_v35 = vadd.f32 1.0, %v12106_v41  ;;  %v9294_v44 = vadd.f32 1.0, %v9293_v49  ;;  %v9275_v10 = vmul.f32 -0.5, %v12106_v41 }
 0xcb4   :  { %v9268_v9 = vmul.f32 %v12102_v23, %v9267_v18  ;;  %v9278_v50 = vand.u32 2147483647, %v12106_v41  ;;  %vm9297_vm0 = vcmp.lt.f32.partialorder %v9296_v33, 0.0004427343 }
 0xcb5   :  { %12113 = vlog2.f32 %v9272_v35  ;;  %v9295_v52 = vmul.f32 %v12104_v53, %v9294_v44  ;;  %v9276_v34 = vadd.f32 1.0, %v9275_v10 }
 0xcb6   :  { %vm9279_vm2 = vcmp.lt.f32.partialorder %v9278_v50, 0.0004427343 }
 0xcb7   :  { %v9277_v31 = vmul.f32 %v12106_v41, %v9276_v34 }
 0xcbc   :  { %v12108_v11 = vpop.eup %12107 }
 0xcbd   :  { %v9283_v3 = vmul.f32 0.6931472, %v12108_v11 }
 0xcbe   :  { %v12110_v25 = vpop.eup %12109 }
 0xcbf   :  { %v9289_v32 = vsel %vm9288_vm12, %v9286_v12, %v9283_v3  ;;  %v9265_v39 = vmul.f32 0.6931472, %v12110_v25 }
 0xcc0   :  { %v12112_v13 = vpop.eup %12111  ;;  %v9301_v16 = vsel %vm9249_vm11, %v9239_v43, %v9289_v32 }
 0xcc1   :  { %v9306_v40 = vsel %vm9303_vm10, %v9239_v43, %v9301_v16  ;;  %v9271_v38 = vsel %vm9270_vm15, %v9268_v9, %v9265_v39  ;;  %v9292_v54 = vmul.f32 0.6931472, %v12112_v13 }
 0xcc2   :  { %9311 = vst.msk [vmem:[%s16247_s10 + $0x10] sm:$0xff] %vm9308_vm13, %v9306_v40  ;;  %v9299_v22 = vsel %vm9247_vm14, %v16199_v8, %v9271_v38  ;;  %v12114_v36 = vpop.eup %12113 }
 0xcc3   :  { %v9304_v5 = vsel %vm9303_vm10, %v16199_v8, %v9299_v22  ;;  %v9298_v61 = vsel %vm9297_vm0, %v9295_v52, %v9292_v54  ;;  %v9274_v21 = vmul.f32 0.6931472, %v12114_v36 }
 0xcc4   :  { %9309 = vst.msk [vmem:[%s16247_s10] sm:$0xff] %vm9308_vm13, %v9304_v5  ;;  %v9302_v14 = vsel %vm9250_vm1, %v16202_v26, %v9298_v61 }
 0xcc5   :  { %v9307_v57 = vsel %vm9303_vm10, %v16202_v26, %v9302_v14  ;;  %v9280_v29 = vsel %vm9279_vm2, %v9277_v31, %v9274_v21 }
 0xcc6   :  { %9312 = vst.msk [vmem:[%s16247_s10 + $0x18] sm:$0xff] %vm9308_vm13, %v9307_v57  ;;  %v9300_v45 = vsel %vm9248_vm3, %v16205_v15, %v9280_v29 }
 0xcc7   :  { %v9305_v46 = vsel %vm9303_vm10, %v16205_v15, %v9300_v45 }
 0xcc8   :  { %9310 = vst.msk [vmem:[%s16247_s10 + $0x8] sm:$0xff] %vm9308_vm13, %v9305_v46 }

</bundles_post_ra>
